<compile_context>
chip_gen: v7x
topology: tpu7x:2x2x1
jax: 0.10.0
libtpu: 0.0.40
codegen_flags: <defaults>
</compile_context>

<pallas_src>
import jax
import jax.numpy as jnp
from jax.experimental import pallas as pl
from jax.experimental.pallas import tpu as pltpu


# ----------------------------------- constants ------------------------------------

LSTM_HIDDEN = 50
LSTM_HIDDEN_PAD = 128         # pad H 50 -> 128 so every gate slice is a full vreg
LSTM_LAYERS = 3
ENC_DIMS = [800, 500, 200, 50, 20]
DEC_DIMS = [200, 500, 800]

N_ENC = len(ENC_DIMS)
N_DEC = len(DEC_DIMS) + 1     # + final Linear(800 -> input_dim)

# PyTorch gate chunk order is (i, f, g, o); we pack as [i, f, o, g] so the three
# sigmoid gates are contiguous (one sigmoid call) and tanh(g) is the last slot.
GATE_SLOT = (0, 1, 3, 2)      # torch chunk idx -> packed slot


# ------------------------------- fused forward kernel ------------------------------
# Ref order (all whole-array, grid=()):
#   inputs : x, (enc_w, enc_b)*5, wih0, whh0, b0, (wstk, b)*2,
#            dec_w*4 (HBM/ANY), dec_b*4, cls_w, cls_b, h0_pad, c0_pad
#   outputs: out, h_n_pad, c_n_pad
#   scratch: seq (T,Hp) VMEM, dec_w VMEM buffers *4, DMA sem (4,)


def _fused_forward_kernel(*refs):
    it = iter(refs)
    x_ref = next(it)
    enc = [(next(it), next(it)) for _ in range(N_ENC)]
    wih0_ref, whh0_ref, b0_ref = next(it), next(it), next(it)
    upper = [(next(it), next(it)) for _ in range(LSTM_LAYERS - 1)]     # (wstk, b)
    dec_w_hbm = [next(it) for _ in range(N_DEC)]
    dec_b = [next(it) for _ in range(N_DEC)]
    cls_w_ref, cls_b_ref = next(it), next(it)
    h0_ref, c0_ref = next(it), next(it)
    out_ref, hn_ref, cn_ref = next(it), next(it), next(it)
    seq_ref = next(it)
    dec_w_vmem = [next(it) for _ in range(N_DEC)]
    dma_sem = next(it)

    hp = LSTM_HIDDEN_PAD
    seq_len = x_ref.shape[0]

    # ---- kick off decoder-weight DMA (HBM -> VMEM scratch); overlaps enc+LSTM ----
    dec_copies = [
        pltpu.make_async_copy(dec_w_hbm[i], dec_w_vmem[i], dma_sem.at[i])
        for i in range(N_DEC)
    ]
    for cp in dec_copies:
        cp.start()

    # ---- encoder MLP: (Linear + ReLU) x 5, bf16 weights, f32 accumulation ----
    feat = x_ref[...]
    for w_ref, b_ref in enc:
        feat = jnp.maximum(
            jnp.dot(feat.astype(jnp.bfloat16), w_ref[...],
                    preferred_element_type=jnp.float32) + b_ref[...],
            0.0)

    # ---- LSTM cell (gate layout [i, f, o, g], all slices vreg-aligned) ----
    def cell(gates, c_prev):
        sig = jax.nn.sigmoid(gates[:, :3 * hp])          # one EUP launch for i,f,o
        g_g = jnp.tanh(gates[:, 3 * hp:])                # one EUP launch for g
        i_g = sig[:, 0 * hp:1 * hp]
        f_g = sig[:, 1 * hp:2 * hp]
        o_g = sig[:, 2 * hp:3 * hp]
        c_new = f_g * c_prev + i_g * g_g
        h_new = o_g * jnp.tanh(c_new)
        return h_new, c_new

    # ---- layer 0: input sequence fully available -> hoist x @ W_ih once ----
    xw0 = (jnp.dot(feat, wih0_ref[...], preferred_element_type=jnp.float32)
           + b0_ref[...])                                # (T, 4*Hp)
    whh0 = whh0_ref[...]                                 # (Hp, 4*Hp), loop-invariant
    h = h0_ref[0]
    c = c0_ref[0]
    below = []                                           # per-step h of layer below
    for t in range(seq_len):                             # static unroll
        gates = xw0[t:t + 1, :] + jnp.dot(h, whh0,
                                          preferred_element_type=jnp.float32)
        h, c = cell(gates, c)
        below.append(h)
    hn_ref[0] = h.astype(hn_ref.dtype)
    cn_ref[0] = c.astype(cn_ref.dtype)

    # ---- layers 1..2: per-step folded projection (no whole-sequence barrier) ----
    for li in range(1, LSTM_LAYERS):
        wstk_ref, b_ref = upper[li - 1]
        wstk = wstk_ref[...]                             # (2*Hp, 4*Hp) = [W_ih; W_hh]
        b = b_ref[...]
        h = h0_ref[li]
        c = c0_ref[li]
        cur = []
        last = li == LSTM_LAYERS - 1
        for t in range(seq_len):                         # static unroll
            xh = jnp.concatenate([below[t], h], axis=1)  # (1, 2*Hp)
            gates = jnp.dot(xh, wstk, preferred_element_type=jnp.float32) + b
            h, c = cell(gates, c)
            if last:
                seq_ref[pl.ds(t, 1), :] = h              # dense sublane store
            else:
                cur.append(h)
        hn_ref[li] = h.astype(hn_ref.dtype)
        cn_ref[li] = c.astype(cn_ref.dtype)
        below = cur

    # ---- decoder weights must be resident now ----
    for cp in dec_copies:
        cp.wait()

    # ---- decoder MLP (ReLU on all but last) + classifier, bf16 weights ----
    out = seq_ref[...]                                   # (T, Hp); dec W0 is H-padded
    for idx in range(N_DEC):
        out = (jnp.dot(out.astype(jnp.bfloat16), dec_w_vmem[idx][...],
                       preferred_element_type=jnp.float32) + dec_b[idx][...])
        if idx < N_DEC - 1:
            out = jnp.maximum(out, 0.0)
    out = (jnp.dot(out.astype(jnp.bfloat16), cls_w_ref[...],
                   preferred_element_type=jnp.float32) + cls_b_ref[...])
    out_ref[...] = out.astype(out_ref.dtype)


# ------------------------------ parameter preparation -------------------------------


def _fuse_lstm_layer_weights(w_ih, w_hh, b_ih, b_hh, in_pad):
    """PyTorch (4H,in)/(4H,H)/(4H,) -> fused, H-padded (in_pad,4Hp)/(Hp,4Hp)/(1,4Hp).

    Packed gate order [i, f, o, g]; b = b_ih + b_hh pre-summed.  Padded rows/columns
    are zero so padded h/c lanes remain exactly zero through the recurrence.
    """
    H, HP = LSTM_HIDDEN, LSTM_HIDDEN_PAD
    in_dim = w_ih.shape[1]
    wih = w_ih.reshape(4, H, in_dim)
    whh = w_hh.reshape(4, H, H)
    b = (b_ih + b_hh).reshape(4, H)

    wih_f = jnp.zeros((in_pad, 4 * HP), jnp.float32)
    whh_f = jnp.zeros((HP, 4 * HP), jnp.float32)
    b_f = jnp.zeros((1, 4 * HP), jnp.float32)
    for g in range(4):
        s = GATE_SLOT[g]
        wih_f = wih_f.at[:in_dim, s * HP:s * HP + H].set(wih[g].T)
        whh_f = whh_f.at[:H, s * HP:s * HP + H].set(whh[g].T)
        b_f = b_f.at[0, s * HP:s * HP + H].set(b[g])
    return wih_f, whh_f, b_f


def init_params(key, input_dim, output_dim):
    """Deterministic synthetic parameters in kernel-ready layout (prepped ONCE)."""
    def lin_init(k, fan_in, fan_out, w_dtype=jnp.float32):
        k1, k2 = jax.random.split(k)
        lim = 1.0 / jnp.sqrt(jnp.float32(fan_in))
        w = jax.random.uniform(k1, (fan_in, fan_out), jnp.float32, -lim, lim)
        b = jax.random.uniform(k2, (1, fan_out), jnp.float32, -lim, lim)
        return w.astype(w_dtype), b                      # weight bf16, bias f32

    keys = iter(jax.random.split(key, 64))
    params = {}

    # Encoder: bf16 weights (MXU-native, half the HBM bytes), f32 biases.
    enc = []
    d_in = input_dim
    for d_out in ENC_DIMS:
        enc.append(lin_init(next(keys), d_in, d_out, jnp.bfloat16))
        d_in = d_out
    params["encoder"] = enc

    # LSTM: draw in PyTorch layout, fuse/pad once.  Layer 0 keeps (W_ih, W_hh, b)
    # separate (input projection is hoisted); layers 1-2 store vstack(W_ih, W_hh).
    lim = 1.0 / jnp.sqrt(jnp.float32(LSTM_HIDDEN))
    in_sz = ENC_DIMS[-1]
    lstm_upper = []
    for layer in range(LSTM_LAYERS):
        w_ih = jax.random.uniform(next(keys), (4 * LSTM_HIDDEN, in_sz),
                                  jnp.float32, -lim, lim)
        w_hh = jax.random.uniform(next(keys), (4 * LSTM_HIDDEN, LSTM_HIDDEN),
                                  jnp.float32, -lim, lim)
        b_ih = jax.random.uniform(next(keys), (4 * LSTM_HIDDEN,),
                                  jnp.float32, -lim, lim)
        b_hh = jax.random.uniform(next(keys), (4 * LSTM_HIDDEN,),
                                  jnp.float32, -lim, lim)
        in_pad = in_sz if layer == 0 else LSTM_HIDDEN_PAD
        wih_f, whh_f, b_f = _fuse_lstm_layer_weights(w_ih, w_hh, b_ih, b_hh, in_pad)
        if layer == 0:
            params["lstm0"] = (wih_f, whh_f, b_f)
        else:
            lstm_upper.append((jnp.concatenate([wih_f, whh_f], axis=0), b_f))
        in_sz = LSTM_HIDDEN
    params["lstm_upper"] = lstm_upper

    # Decoder: bf16 weights; first weight zero-padded (50 -> 128 rows) so it consumes
    # the H-padded LSTM sequence directly (padded lanes are exactly zero).
    dec = []
    d_in = LSTM_HIDDEN
    for idx, d_out in enumerate(DEC_DIMS + [input_dim]):
        w, b = lin_init(next(keys), d_in, d_out, jnp.bfloat16)
        if idx == 0:
            w = jnp.zeros((LSTM_HIDDEN_PAD, d_out),
                          jnp.bfloat16).at[:LSTM_HIDDEN].set(w)
        dec.append((w, b))
        d_in = d_out
    params["decoder"] = dec

    params["classify"] = lin_init(next(keys), input_dim, output_dim, jnp.bfloat16)
    return params


# ------------------------------------- forward --------------------------------------

_VMEM_SPEC = pl.BlockSpec(memory_space=pltpu.MemorySpace.VMEM)
_ANY_SPEC = pl.BlockSpec(memory_space=pl.ANY)


@jax.jit
def lstm_mvp_forward(params, x, h):
    """Mirrors LSTM_MVP.forward: returns (output (1, N, output_dim), (h_n, c_n))."""
    h0_all, c0_all = h                                   # each (L, 1, H)
    n = x.shape[0]
    feat = x.reshape(n, -1)                              # torch.flatten(x, 1)
    output_dim = params["classify"][1].shape[1]

    L, H, HP = LSTM_LAYERS, LSTM_HIDDEN, LSTM_HIDDEN_PAD
    h0p = jnp.zeros((L, 1, HP), jnp.float32).at[:, :, :H].set(h0_all)
    c0p = jnp.zeros((L, 1, HP), jnp.float32).at[:, :, :H].set(c0_all)

    args, specs = [feat], [_VMEM_SPEC]
    for w, b in params["encoder"]:
        args += [w, b]
        specs += [_VMEM_SPEC, _VMEM_SPEC]
    wih0, whh0, b0 = params["lstm0"]
    args += [wih0, whh0, b0]
    specs += [_VMEM_SPEC] * 3
    for wstk, b in params["lstm_upper"]:
        args += [wstk, b]
        specs += [_VMEM_SPEC, _VMEM_SPEC]
    dec_ws = [w for w, _ in params["decoder"]]
    dec_bs = [b for _, b in params["decoder"]]
    args += dec_ws
    specs += [_ANY_SPEC] * N_DEC                         # decoder weights stay in HBM;
    args += dec_bs                                       # kernel DMAs them async
    specs += [_VMEM_SPEC] * N_DEC
    args += [params["classify"][0], params["classify"][1], h0p, c0p]
    specs += [_VMEM_SPEC] * 4

    scratch = [pltpu.VMEM((n, HP), jnp.float32)]         # final-layer h sequence
    scratch += [pltpu.VMEM(w.shape, w.dtype) for w in dec_ws]
    scratch += [pltpu.SemaphoreType.DMA((N_DEC,))]

    out, hn_p, cn_p = pl.pallas_call(
        _fused_forward_kernel,
        out_shape=(
            jax.ShapeDtypeStruct((n, output_dim), jnp.float32),
            jax.ShapeDtypeStruct((L, 1, HP), jnp.float32),
            jax.ShapeDtypeStruct((L, 1, HP), jnp.float32),
        ),
        in_specs=specs,
        out_specs=(_VMEM_SPEC, _VMEM_SPEC, _VMEM_SPEC),
        scratch_shapes=scratch,
        # grid=() / whole-array blocks: ~3 MB of weights + tiny activations live in
        # VMEM for the whole forward; decoder-weight DMA overlapped in-kernel.
    )(*args)

    out = out[None]                                      # unsqueeze(0): (1, N, out)
    h_n = hn_p[:, :, :H]                                 # drop padded lanes (all zero)
    c_n = cn_p[:, :, :H]
    return out, (h_n, c_n)


def init_hidden():
    z = jnp.zeros((LSTM_LAYERS, 1, LSTM_HIDDEN), jnp.float32)
    return (z, z)


if __name__ == "__main__":
    key = jax.random.PRNGKey(0)
    k_params, k_x = jax.random.split(key)

    input_dim = 64        # = 4 * 4 * 4 after flatten
    output_dim = 10

    params = init_params(k_params, input_dim, output_dim)
    x = jax.random.normal(k_x, (8, 4, 4, 4), jnp.float32)   # NCHW-like; seq_len = 8
    h = init_hidden()

    out, (h_n, c_n) = lstm_mvp_forward(params, x, h)
    jax.block_until_ready((out, h_n, c_n))

    assert out.shape == (1, 8, output_dim)
    assert h_n.shape == (LSTM_LAYERS, 1, LSTM_HIDDEN)
    assert c_n.shape == (LSTM_LAYERS, 1, LSTM_HIDDEN)
    print("KERNEL_OK")
</pallas_src>

<mosaic_0001>
module attributes {stable_mosaic.version = 11 : i64} {
  func.func @_fused_forward_kernel(%arg0: memref<8x64xf32, #tpu.memory_space<vmem>>, %arg1: memref<64x800xbf16, #tpu.memory_space<vmem>>, %arg2: memref<1x800xf32, #tpu.memory_space<vmem>>, %arg3: memref<800x500xbf16, #tpu.memory_space<vmem>>, %arg4: memref<1x500xf32, #tpu.memory_space<vmem>>, %arg5: memref<500x200xbf16, #tpu.memory_space<vmem>>, %arg6: memref<1x200xf32, #tpu.memory_space<vmem>>, %arg7: memref<200x50xbf16, #tpu.memory_space<vmem>>, %arg8: memref<1x50xf32, #tpu.memory_space<vmem>>, %arg9: memref<50x20xbf16, #tpu.memory_space<vmem>>, %arg10: memref<1x20xf32, #tpu.memory_space<vmem>>, %arg11: memref<20x512xf32, #tpu.memory_space<vmem>>, %arg12: memref<128x512xf32, #tpu.memory_space<vmem>>, %arg13: memref<1x512xf32, #tpu.memory_space<vmem>>, %arg14: memref<256x512xf32, #tpu.memory_space<vmem>>, %arg15: memref<1x512xf32, #tpu.memory_space<vmem>>, %arg16: memref<256x512xf32, #tpu.memory_space<vmem>>, %arg17: memref<1x512xf32, #tpu.memory_space<vmem>>, %arg18: memref<128x200xbf16, #tpu.memory_space<any>>, %arg19: memref<200x500xbf16, #tpu.memory_space<any>>, %arg20: memref<500x800xbf16, #tpu.memory_space<any>>, %arg21: memref<800x64xbf16, #tpu.memory_space<any>>, %arg22: memref<1x200xf32, #tpu.memory_space<vmem>>, %arg23: memref<1x500xf32, #tpu.memory_space<vmem>>, %arg24: memref<1x800xf32, #tpu.memory_space<vmem>>, %arg25: memref<1x64xf32, #tpu.memory_space<vmem>>, %arg26: memref<64x10xbf16, #tpu.memory_space<vmem>>, %arg27: memref<1x10xf32, #tpu.memory_space<vmem>>, %arg28: memref<3x1x128xf32, #tpu.memory_space<vmem>>, %arg29: memref<3x1x128xf32, #tpu.memory_space<vmem>>, %arg30: memref<8x10xf32, #tpu.memory_space<vmem>>, %arg31: memref<3x1x128xf32, #tpu.memory_space<vmem>>, %arg32: memref<3x1x128xf32, #tpu.memory_space<vmem>>, %arg33: memref<8x128xf32, #tpu.memory_space<vmem>>, %arg34: memref<128x200xbf16, #tpu.memory_space<vmem>>, %arg35: memref<200x500xbf16, #tpu.memory_space<vmem>>, %arg36: memref<500x800xbf16, #tpu.memory_space<vmem>>, %arg37: memref<800x64xbf16, #tpu.memory_space<vmem>>, %arg38: memref<4x!tpu.dma_semaphore, #tpu.memory_space<semaphore_mem>>) attributes {dimension_semantics = [], scalar_prefetch = 0 : i64, scratch_operands = 6 : i64, tpu.core_type = #tpu.core_type<tc>} {
    %c0_i32 = arith.constant 0 : i32
    %0 = tpu.memref_slice %arg38[%c0_i32] : memref<4x!tpu.dma_semaphore, #tpu.memory_space<semaphore_mem>> -> memref<1x!tpu.dma_semaphore, #tpu.memory_space<semaphore_mem>>
    %1 = tpu.memref_squeeze %0 : memref<1x!tpu.dma_semaphore, #tpu.memory_space<semaphore_mem>> -> memref<!tpu.dma_semaphore, #tpu.memory_space<semaphore_mem>>
    tpu.enqueue_dma source(%arg18 : memref<128x200xbf16, #tpu.memory_space<any>>) target(%arg34 : memref<128x200xbf16, #tpu.memory_space<vmem>>) target_semaphore(%1 : memref<!tpu.dma_semaphore, #tpu.memory_space<semaphore_mem>>)
    %c1_i32 = arith.constant 1 : i32
    %2 = tpu.memref_slice %arg38[%c1_i32] : memref<4x!tpu.dma_semaphore, #tpu.memory_space<semaphore_mem>> -> memref<1x!tpu.dma_semaphore, #tpu.memory_space<semaphore_mem>>
    %3 = tpu.memref_squeeze %2 : memref<1x!tpu.dma_semaphore, #tpu.memory_space<semaphore_mem>> -> memref<!tpu.dma_semaphore, #tpu.memory_space<semaphore_mem>>
    tpu.enqueue_dma source(%arg19 : memref<200x500xbf16, #tpu.memory_space<any>>) target(%arg35 : memref<200x500xbf16, #tpu.memory_space<vmem>>) target_semaphore(%3 : memref<!tpu.dma_semaphore, #tpu.memory_space<semaphore_mem>>)
    %c2_i32 = arith.constant 2 : i32
    %4 = tpu.memref_slice %arg38[%c2_i32] : memref<4x!tpu.dma_semaphore, #tpu.memory_space<semaphore_mem>> -> memref<1x!tpu.dma_semaphore, #tpu.memory_space<semaphore_mem>>
    %5 = tpu.memref_squeeze %4 : memref<1x!tpu.dma_semaphore, #tpu.memory_space<semaphore_mem>> -> memref<!tpu.dma_semaphore, #tpu.memory_space<semaphore_mem>>
    tpu.enqueue_dma source(%arg20 : memref<500x800xbf16, #tpu.memory_space<any>>) target(%arg36 : memref<500x800xbf16, #tpu.memory_space<vmem>>) target_semaphore(%5 : memref<!tpu.dma_semaphore, #tpu.memory_space<semaphore_mem>>)
    %c3_i32 = arith.constant 3 : i32
    %6 = tpu.memref_slice %arg38[%c3_i32] : memref<4x!tpu.dma_semaphore, #tpu.memory_space<semaphore_mem>> -> memref<1x!tpu.dma_semaphore, #tpu.memory_space<semaphore_mem>>
    %7 = tpu.memref_squeeze %6 : memref<1x!tpu.dma_semaphore, #tpu.memory_space<semaphore_mem>> -> memref<!tpu.dma_semaphore, #tpu.memory_space<semaphore_mem>>
    tpu.enqueue_dma source(%arg21 : memref<800x64xbf16, #tpu.memory_space<any>>) target(%arg37 : memref<800x64xbf16, #tpu.memory_space<vmem>>) target_semaphore(%7 : memref<!tpu.dma_semaphore, #tpu.memory_space<semaphore_mem>>)
    %c0 = arith.constant 0 : index
    %c0_0 = arith.constant 0 : index
    %8 = vector.load %arg0[%c0, %c0_0] : memref<8x64xf32, #tpu.memory_space<vmem>>, vector<8x64xf32>
    %9 = arith.truncf %8 : vector<8x64xf32> to vector<8x64xbf16>
    %c0_1 = arith.constant 0 : index
    %c0_2 = arith.constant 0 : index
    %10 = vector.load %arg1[%c0_1, %c0_2] : memref<64x800xbf16, #tpu.memory_space<vmem>>, vector<64x800xbf16>
    %cst = arith.constant dense<0.000000e+00> : vector<8x800xf32>
    %11 = tpu.matmul %9, %10, %cst {dimension_numbers = #tpu.dot_dimension_numbers<[1], [0], [0], [1], [0, 0, 1, 1], [], []>} : vector<8x64xbf16>, vector<64x800xbf16>, vector<8x800xf32> -> vector<8x800xf32>
    %c0_3 = arith.constant 0 : index
    %c0_4 = arith.constant 0 : index
    %12 = vector.load %arg2[%c0_3, %c0_4] : memref<1x800xf32, #tpu.memory_space<vmem>>, vector<1x800xf32>
    %13 = vector.broadcast %12 : vector<1x800xf32> to vector<8x800xf32>
    %14 = arith.addf %11, %13 : vector<8x800xf32>
    %cst_5 = arith.constant 0.000000e+00 : f32
    %15 = vector.broadcast %cst_5 : f32 to vector<8x800xf32>
    %16 = arith.maximumf %14, %15 : vector<8x800xf32>
    %17 = arith.truncf %16 : vector<8x800xf32> to vector<8x800xbf16>
    %c0_6 = arith.constant 0 : index
    %c0_7 = arith.constant 0 : index
    %18 = vector.load %arg3[%c0_6, %c0_7] : memref<800x500xbf16, #tpu.memory_space<vmem>>, vector<800x500xbf16>
    %cst_8 = arith.constant dense<0.000000e+00> : vector<8x500xf32>
    %19 = tpu.matmul %17, %18, %cst_8 {dimension_numbers = #tpu.dot_dimension_numbers<[1], [0], [0], [1], [0, 0, 1, 1], [], []>} : vector<8x800xbf16>, vector<800x500xbf16>, vector<8x500xf32> -> vector<8x500xf32>
    %c0_9 = arith.constant 0 : index
    %c0_10 = arith.constant 0 : index
    %20 = vector.load %arg4[%c0_9, %c0_10] : memref<1x500xf32, #tpu.memory_space<vmem>>, vector<1x500xf32>
    %21 = vector.broadcast %20 : vector<1x500xf32> to vector<8x500xf32>
    %22 = arith.addf %19, %21 : vector<8x500xf32>
    %cst_11 = arith.constant 0.000000e+00 : f32
    %23 = vector.broadcast %cst_11 : f32 to vector<8x500xf32>
    %24 = arith.maximumf %22, %23 : vector<8x500xf32>
    %25 = arith.truncf %24 : vector<8x500xf32> to vector<8x500xbf16>
    %c0_12 = arith.constant 0 : index
    %c0_13 = arith.constant 0 : index
    %26 = vector.load %arg5[%c0_12, %c0_13] : memref<500x200xbf16, #tpu.memory_space<vmem>>, vector<500x200xbf16>
    %cst_14 = arith.constant dense<0.000000e+00> : vector<8x200xf32>
    %27 = tpu.matmul %25, %26, %cst_14 {dimension_numbers = #tpu.dot_dimension_numbers<[1], [0], [0], [1], [0, 0, 1, 1], [], []>} : vector<8x500xbf16>, vector<500x200xbf16>, vector<8x200xf32> -> vector<8x200xf32>
    %c0_15 = arith.constant 0 : index
    %c0_16 = arith.constant 0 : index
    %28 = vector.load %arg6[%c0_15, %c0_16] : memref<1x200xf32, #tpu.memory_space<vmem>>, vector<1x200xf32>
    %29 = vector.broadcast %28 : vector<1x200xf32> to vector<8x200xf32>
    %30 = arith.addf %27, %29 : vector<8x200xf32>
    %cst_17 = arith.constant 0.000000e+00 : f32
    %31 = vector.broadcast %cst_17 : f32 to vector<8x200xf32>
    %32 = arith.maximumf %30, %31 : vector<8x200xf32>
    %33 = arith.truncf %32 : vector<8x200xf32> to vector<8x200xbf16>
    %c0_18 = arith.constant 0 : index
    %c0_19 = arith.constant 0 : index
    %34 = vector.load %arg7[%c0_18, %c0_19] : memref<200x50xbf16, #tpu.memory_space<vmem>>, vector<200x50xbf16>
    %cst_20 = arith.constant dense<0.000000e+00> : vector<8x50xf32>
    %35 = tpu.matmul %33, %34, %cst_20 {dimension_numbers = #tpu.dot_dimension_numbers<[1], [0], [0], [1], [0, 0, 1, 1], [], []>} : vector<8x200xbf16>, vector<200x50xbf16>, vector<8x50xf32> -> vector<8x50xf32>
    %c0_21 = arith.constant 0 : index
    %c0_22 = arith.constant 0 : index
    %36 = vector.load %arg8[%c0_21, %c0_22] : memref<1x50xf32, #tpu.memory_space<vmem>>, vector<1x50xf32>
    %37 = vector.broadcast %36 : vector<1x50xf32> to vector<8x50xf32>
    %38 = arith.addf %35, %37 : vector<8x50xf32>
    %cst_23 = arith.constant 0.000000e+00 : f32
    %39 = vector.broadcast %cst_23 : f32 to vector<8x50xf32>
    %40 = arith.maximumf %38, %39 : vector<8x50xf32>
    %41 = arith.truncf %40 : vector<8x50xf32> to vector<8x50xbf16>
    %c0_24 = arith.constant 0 : index
    %c0_25 = arith.constant 0 : index
    %42 = vector.load %arg9[%c0_24, %c0_25] : memref<50x20xbf16, #tpu.memory_space<vmem>>, vector<50x20xbf16>
    %cst_26 = arith.constant dense<0.000000e+00> : vector<8x20xf32>
    %43 = tpu.matmul %41, %42, %cst_26 {dimension_numbers = #tpu.dot_dimension_numbers<[1], [0], [0], [1], [0, 0, 1, 1], [], []>} : vector<8x50xbf16>, vector<50x20xbf16>, vector<8x20xf32> -> vector<8x20xf32>
    %c0_27 = arith.constant 0 : index
    %c0_28 = arith.constant 0 : index
    %44 = vector.load %arg10[%c0_27, %c0_28] : memref<1x20xf32, #tpu.memory_space<vmem>>, vector<1x20xf32>
    %45 = vector.broadcast %44 : vector<1x20xf32> to vector<8x20xf32>
    %46 = arith.addf %43, %45 : vector<8x20xf32>
    %cst_29 = arith.constant 0.000000e+00 : f32
    %47 = vector.broadcast %cst_29 : f32 to vector<8x20xf32>
    %48 = arith.maximumf %46, %47 : vector<8x20xf32>
    %c0_30 = arith.constant 0 : index
    %c0_31 = arith.constant 0 : index
    %49 = vector.load %arg11[%c0_30, %c0_31] : memref<20x512xf32, #tpu.memory_space<vmem>>, vector<20x512xf32>
    %cst_32 = arith.constant dense<0.000000e+00> : vector<8x512xf32>
    %50 = tpu.matmul %48, %49, %cst_32 {dimension_numbers = #tpu.dot_dimension_numbers<[1], [0], [0], [1], [0, 0, 1, 1], [], []>} : vector<8x20xf32>, vector<20x512xf32>, vector<8x512xf32> -> vector<8x512xf32>
    %c0_33 = arith.constant 0 : index
    %c0_34 = arith.constant 0 : index
    %51 = vector.load %arg13[%c0_33, %c0_34] : memref<1x512xf32, #tpu.memory_space<vmem>>, vector<1x512xf32>
    %52 = vector.broadcast %51 : vector<1x512xf32> to vector<8x512xf32>
    %53 = arith.addf %50, %52 : vector<8x512xf32>
    %c0_35 = arith.constant 0 : index
    %c0_36 = arith.constant 0 : index
    %54 = vector.load %arg12[%c0_35, %c0_36] : memref<128x512xf32, #tpu.memory_space<vmem>>, vector<128x512xf32>
    %c0_37 = arith.constant 0 : index
    %c0_38 = arith.constant 0 : index
    %c0_39 = arith.constant 0 : index
    %55 = vector.load %arg28[%c0_37, %c0_38, %c0_39] : memref<3x1x128xf32, #tpu.memory_space<vmem>>, vector<1x1x128xf32>
    %56 = vector.shape_cast %55 : vector<1x1x128xf32> to vector<1x128xf32>
    %c0_40 = arith.constant 0 : index
    %c0_41 = arith.constant 0 : index
    %c0_42 = arith.constant 0 : index
    %57 = vector.load %arg29[%c0_40, %c0_41, %c0_42] : memref<3x1x128xf32, #tpu.memory_space<vmem>>, vector<1x1x128xf32>
    %58 = vector.shape_cast %57 : vector<1x1x128xf32> to vector<1x128xf32>
    %59 = vector.extract_strided_slice %53 {offsets = [0, 0], sizes = [1, 512], strides = [1, 1]} : vector<8x512xf32> to vector<1x512xf32>
    %cst_43 = arith.constant dense<0.000000e+00> : vector<1x512xf32>
    %60 = tpu.matmul %56, %54, %cst_43 {dimension_numbers = #tpu.dot_dimension_numbers<[1], [0], [0], [1], [0, 0, 1, 1], [], []>} : vector<1x128xf32>, vector<128x512xf32>, vector<1x512xf32> -> vector<1x512xf32>
    %61 = arith.addf %59, %60 : vector<1x512xf32>
    %62 = vector.extract_strided_slice %61 {offsets = [0, 0], sizes = [1, 384], strides = [1, 1]} : vector<1x512xf32> to vector<1x384xf32>
    %63 = arith.negf %62 : vector<1x384xf32>
    %64 = math.exp %63 : vector<1x384xf32>
    %cst_44 = arith.constant 1.000000e+00 : f32
    %65 = vector.broadcast %cst_44 : f32 to vector<1x384xf32>
    %66 = arith.addf %65, %64 : vector<1x384xf32>
    %67 = arith.divf %65, %66 : vector<1x384xf32>
    %68 = vector.extract_strided_slice %61 {offsets = [0, 384], sizes = [1, 128], strides = [1, 1]} : vector<1x512xf32> to vector<1x128xf32>
    %69 = math.tanh %68 : vector<1x128xf32>
    %70 = vector.extract_strided_slice %67 {offsets = [0, 0], sizes = [1, 128], strides = [1, 1]} : vector<1x384xf32> to vector<1x128xf32>
    %71 = vector.extract_strided_slice %67 {offsets = [0, 128], sizes = [1, 128], strides = [1, 1]} : vector<1x384xf32> to vector<1x128xf32>
    %72 = vector.extract_strided_slice %67 {offsets = [0, 256], sizes = [1, 128], strides = [1, 1]} : vector<1x384xf32> to vector<1x128xf32>
    %73 = arith.mulf %71, %58 : vector<1x128xf32>
    %74 = arith.mulf %70, %69 : vector<1x128xf32>
    %75 = arith.addf %73, %74 : vector<1x128xf32>
    %76 = math.tanh %75 : vector<1x128xf32>
    %77 = arith.mulf %72, %76 : vector<1x128xf32>
    %78 = vector.extract_strided_slice %53 {offsets = [1, 0], sizes = [1, 512], strides = [1, 1]} : vector<8x512xf32> to vector<1x512xf32>
    %cst_45 = arith.constant dense<0.000000e+00> : vector<1x512xf32>
    %79 = tpu.matmul %77, %54, %cst_45 {dimension_numbers = #tpu.dot_dimension_numbers<[1], [0], [0], [1], [0, 0, 1, 1], [], []>} : vector<1x128xf32>, vector<128x512xf32>, vector<1x512xf32> -> vector<1x512xf32>
    %80 = arith.addf %78, %79 : vector<1x512xf32>
    %81 = vector.extract_strided_slice %80 {offsets = [0, 0], sizes = [1, 384], strides = [1, 1]} : vector<1x512xf32> to vector<1x384xf32>
    %82 = arith.negf %81 : vector<1x384xf32>
    %83 = math.exp %82 : vector<1x384xf32>
    %cst_46 = arith.constant 1.000000e+00 : f32
    %84 = vector.broadcast %cst_46 : f32 to vector<1x384xf32>
    %85 = arith.addf %84, %83 : vector<1x384xf32>
    %86 = arith.divf %84, %85 : vector<1x384xf32>
    %87 = vector.extract_strided_slice %80 {offsets = [0, 384], sizes = [1, 128], strides = [1, 1]} : vector<1x512xf32> to vector<1x128xf32>
    %88 = math.tanh %87 : vector<1x128xf32>
    %89 = vector.extract_strided_slice %86 {offsets = [0, 0], sizes = [1, 128], strides = [1, 1]} : vector<1x384xf32> to vector<1x128xf32>
    %90 = vector.extract_strided_slice %86 {offsets = [0, 128], sizes = [1, 128], strides = [1, 1]} : vector<1x384xf32> to vector<1x128xf32>
    %91 = vector.extract_strided_slice %86 {offsets = [0, 256], sizes = [1, 128], strides = [1, 1]} : vector<1x384xf32> to vector<1x128xf32>
    %92 = arith.mulf %90, %75 : vector<1x128xf32>
    %93 = arith.mulf %89, %88 : vector<1x128xf32>
    %94 = arith.addf %92, %93 : vector<1x128xf32>
    %95 = math.tanh %94 : vector<1x128xf32>
    %96 = arith.mulf %91, %95 : vector<1x128xf32>
    %97 = vector.extract_strided_slice %53 {offsets = [2, 0], sizes = [1, 512], strides = [1, 1]} : vector<8x512xf32> to vector<1x512xf32>
    %cst_47 = arith.constant dense<0.000000e+00> : vector<1x512xf32>
    %98 = tpu.matmul %96, %54, %cst_47 {dimension_numbers = #tpu.dot_dimension_numbers<[1], [0], [0], [1], [0, 0, 1, 1], [], []>} : vector<1x128xf32>, vector<128x512xf32>, vector<1x512xf32> -> vector<1x512xf32>
    %99 = arith.addf %97, %98 : vector<1x512xf32>
    %100 = vector.extract_strided_slice %99 {offsets = [0, 0], sizes = [1, 384], strides = [1, 1]} : vector<1x512xf32> to vector<1x384xf32>
    %101 = arith.negf %100 : vector<1x384xf32>
    %102 = math.exp %101 : vector<1x384xf32>
    %cst_48 = arith.constant 1.000000e+00 : f32
    %103 = vector.broadcast %cst_48 : f32 to vector<1x384xf32>
    %104 = arith.addf %103, %102 : vector<1x384xf32>
    %105 = arith.divf %103, %104 : vector<1x384xf32>
    %106 = vector.extract_strided_slice %99 {offsets = [0, 384], sizes = [1, 128], strides = [1, 1]} : vector<1x512xf32> to vector<1x128xf32>
    %107 = math.tanh %106 : vector<1x128xf32>
    %108 = vector.extract_strided_slice %105 {offsets = [0, 0], sizes = [1, 128], strides = [1, 1]} : vector<1x384xf32> to vector<1x128xf32>
    %109 = vector.extract_strided_slice %105 {offsets = [0, 128], sizes = [1, 128], strides = [1, 1]} : vector<1x384xf32> to vector<1x128xf32>
    %110 = vector.extract_strided_slice %105 {offsets = [0, 256], sizes = [1, 128], strides = [1, 1]} : vector<1x384xf32> to vector<1x128xf32>
    %111 = arith.mulf %109, %94 : vector<1x128xf32>
    %112 = arith.mulf %108, %107 : vector<1x128xf32>
    %113 = arith.addf %111, %112 : vector<1x128xf32>
    %114 = math.tanh %113 : vector<1x128xf32>
    %115 = arith.mulf %110, %114 : vector<1x128xf32>
    %116 = vector.extract_strided_slice %53 {offsets = [3, 0], sizes = [1, 512], strides = [1, 1]} : vector<8x512xf32> to vector<1x512xf32>
    %cst_49 = arith.constant dense<0.000000e+00> : vector<1x512xf32>
    %117 = tpu.matmul %115, %54, %cst_49 {dimension_numbers = #tpu.dot_dimension_numbers<[1], [0], [0], [1], [0, 0, 1, 1], [], []>} : vector<1x128xf32>, vector<128x512xf32>, vector<1x512xf32> -> vector<1x512xf32>
    %118 = arith.addf %116, %117 : vector<1x512xf32>
    %119 = vector.extract_strided_slice %118 {offsets = [0, 0], sizes = [1, 384], strides = [1, 1]} : vector<1x512xf32> to vector<1x384xf32>
    %120 = arith.negf %119 : vector<1x384xf32>
    %121 = math.exp %120 : vector<1x384xf32>
    %cst_50 = arith.constant 1.000000e+00 : f32
    %122 = vector.broadcast %cst_50 : f32 to vector<1x384xf32>
    %123 = arith.addf %122, %121 : vector<1x384xf32>
    %124 = arith.divf %122, %123 : vector<1x384xf32>
    %125 = vector.extract_strided_slice %118 {offsets = [0, 384], sizes = [1, 128], strides = [1, 1]} : vector<1x512xf32> to vector<1x128xf32>
    %126 = math.tanh %125 : vector<1x128xf32>
    %127 = vector.extract_strided_slice %124 {offsets = [0, 0], sizes = [1, 128], strides = [1, 1]} : vector<1x384xf32> to vector<1x128xf32>
    %128 = vector.extract_strided_slice %124 {offsets = [0, 128], sizes = [1, 128], strides = [1, 1]} : vector<1x384xf32> to vector<1x128xf32>
    %129 = vector.extract_strided_slice %124 {offsets = [0, 256], sizes = [1, 128], strides = [1, 1]} : vector<1x384xf32> to vector<1x128xf32>
    %130 = arith.mulf %128, %113 : vector<1x128xf32>
    %131 = arith.mulf %127, %126 : vector<1x128xf32>
    %132 = arith.addf %130, %131 : vector<1x128xf32>
    %133 = math.tanh %132 : vector<1x128xf32>
    %134 = arith.mulf %129, %133 : vector<1x128xf32>
    %135 = vector.extract_strided_slice %53 {offsets = [4, 0], sizes = [1, 512], strides = [1, 1]} : vector<8x512xf32> to vector<1x512xf32>
    %cst_51 = arith.constant dense<0.000000e+00> : vector<1x512xf32>
    %136 = tpu.matmul %134, %54, %cst_51 {dimension_numbers = #tpu.dot_dimension_numbers<[1], [0], [0], [1], [0, 0, 1, 1], [], []>} : vector<1x128xf32>, vector<128x512xf32>, vector<1x512xf32> -> vector<1x512xf32>
    %137 = arith.addf %135, %136 : vector<1x512xf32>
    %138 = vector.extract_strided_slice %137 {offsets = [0, 0], sizes = [1, 384], strides = [1, 1]} : vector<1x512xf32> to vector<1x384xf32>
    %139 = arith.negf %138 : vector<1x384xf32>
    %140 = math.exp %139 : vector<1x384xf32>
    %cst_52 = arith.constant 1.000000e+00 : f32
    %141 = vector.broadcast %cst_52 : f32 to vector<1x384xf32>
    %142 = arith.addf %141, %140 : vector<1x384xf32>
    %143 = arith.divf %141, %142 : vector<1x384xf32>
    %144 = vector.extract_strided_slice %137 {offsets = [0, 384], sizes = [1, 128], strides = [1, 1]} : vector<1x512xf32> to vector<1x128xf32>
    %145 = math.tanh %144 : vector<1x128xf32>
    %146 = vector.extract_strided_slice %143 {offsets = [0, 0], sizes = [1, 128], strides = [1, 1]} : vector<1x384xf32> to vector<1x128xf32>
    %147 = vector.extract_strided_slice %143 {offsets = [0, 128], sizes = [1, 128], strides = [1, 1]} : vector<1x384xf32> to vector<1x128xf32>
    %148 = vector.extract_strided_slice %143 {offsets = [0, 256], sizes = [1, 128], strides = [1, 1]} : vector<1x384xf32> to vector<1x128xf32>
    %149 = arith.mulf %147, %132 : vector<1x128xf32>
    %150 = arith.mulf %146, %145 : vector<1x128xf32>
    %151 = arith.addf %149, %150 : vector<1x128xf32>
    %152 = math.tanh %151 : vector<1x128xf32>
    %153 = arith.mulf %148, %152 : vector<1x128xf32>
    %154 = vector.extract_strided_slice %53 {offsets = [5, 0], sizes = [1, 512], strides = [1, 1]} : vector<8x512xf32> to vector<1x512xf32>
    %cst_53 = arith.constant dense<0.000000e+00> : vector<1x512xf32>
    %155 = tpu.matmul %153, %54, %cst_53 {dimension_numbers = #tpu.dot_dimension_numbers<[1], [0], [0], [1], [0, 0, 1, 1], [], []>} : vector<1x128xf32>, vector<128x512xf32>, vector<1x512xf32> -> vector<1x512xf32>
    %156 = arith.addf %154, %155 : vector<1x512xf32>
    %157 = vector.extract_strided_slice %156 {offsets = [0, 0], sizes = [1, 384], strides = [1, 1]} : vector<1x512xf32> to vector<1x384xf32>
    %158 = arith.negf %157 : vector<1x384xf32>
    %159 = math.exp %158 : vector<1x384xf32>
    %cst_54 = arith.constant 1.000000e+00 : f32
    %160 = vector.broadcast %cst_54 : f32 to vector<1x384xf32>
    %161 = arith.addf %160, %159 : vector<1x384xf32>
    %162 = arith.divf %160, %161 : vector<1x384xf32>
    %163 = vector.extract_strided_slice %156 {offsets = [0, 384], sizes = [1, 128], strides = [1, 1]} : vector<1x512xf32> to vector<1x128xf32>
    %164 = math.tanh %163 : vector<1x128xf32>
    %165 = vector.extract_strided_slice %162 {offsets = [0, 0], sizes = [1, 128], strides = [1, 1]} : vector<1x384xf32> to vector<1x128xf32>
    %166 = vector.extract_strided_slice %162 {offsets = [0, 128], sizes = [1, 128], strides = [1, 1]} : vector<1x384xf32> to vector<1x128xf32>
    %167 = vector.extract_strided_slice %162 {offsets = [0, 256], sizes = [1, 128], strides = [1, 1]} : vector<1x384xf32> to vector<1x128xf32>
    %168 = arith.mulf %166, %151 : vector<1x128xf32>
    %169 = arith.mulf %165, %164 : vector<1x128xf32>
    %170 = arith.addf %168, %169 : vector<1x128xf32>
    %171 = math.tanh %170 : vector<1x128xf32>
    %172 = arith.mulf %167, %171 : vector<1x128xf32>
    %173 = vector.extract_strided_slice %53 {offsets = [6, 0], sizes = [1, 512], strides = [1, 1]} : vector<8x512xf32> to vector<1x512xf32>
    %cst_55 = arith.constant dense<0.000000e+00> : vector<1x512xf32>
    %174 = tpu.matmul %172, %54, %cst_55 {dimension_numbers = #tpu.dot_dimension_numbers<[1], [0], [0], [1], [0, 0, 1, 1], [], []>} : vector<1x128xf32>, vector<128x512xf32>, vector<1x512xf32> -> vector<1x512xf32>
    %175 = arith.addf %173, %174 : vector<1x512xf32>
    %176 = vector.extract_strided_slice %175 {offsets = [0, 0], sizes = [1, 384], strides = [1, 1]} : vector<1x512xf32> to vector<1x384xf32>
    %177 = arith.negf %176 : vector<1x384xf32>
    %178 = math.exp %177 : vector<1x384xf32>
    %cst_56 = arith.constant 1.000000e+00 : f32
    %179 = vector.broadcast %cst_56 : f32 to vector<1x384xf32>
    %180 = arith.addf %179, %178 : vector<1x384xf32>
    %181 = arith.divf %179, %180 : vector<1x384xf32>
    %182 = vector.extract_strided_slice %175 {offsets = [0, 384], sizes = [1, 128], strides = [1, 1]} : vector<1x512xf32> to vector<1x128xf32>
    %183 = math.tanh %182 : vector<1x128xf32>
    %184 = vector.extract_strided_slice %181 {offsets = [0, 0], sizes = [1, 128], strides = [1, 1]} : vector<1x384xf32> to vector<1x128xf32>
    %185 = vector.extract_strided_slice %181 {offsets = [0, 128], sizes = [1, 128], strides = [1, 1]} : vector<1x384xf32> to vector<1x128xf32>
    %186 = vector.extract_strided_slice %181 {offsets = [0, 256], sizes = [1, 128], strides = [1, 1]} : vector<1x384xf32> to vector<1x128xf32>
    %187 = arith.mulf %185, %170 : vector<1x128xf32>
    %188 = arith.mulf %184, %183 : vector<1x128xf32>
    %189 = arith.addf %187, %188 : vector<1x128xf32>
    %190 = math.tanh %189 : vector<1x128xf32>
    %191 = arith.mulf %186, %190 : vector<1x128xf32>
    %192 = vector.extract_strided_slice %53 {offsets = [7, 0], sizes = [1, 512], strides = [1, 1]} : vector<8x512xf32> to vector<1x512xf32>
    %cst_57 = arith.constant dense<0.000000e+00> : vector<1x512xf32>
    %193 = tpu.matmul %191, %54, %cst_57 {dimension_numbers = #tpu.dot_dimension_numbers<[1], [0], [0], [1], [0, 0, 1, 1], [], []>} : vector<1x128xf32>, vector<128x512xf32>, vector<1x512xf32> -> vector<1x512xf32>
    %194 = arith.addf %192, %193 : vector<1x512xf32>
    %195 = vector.extract_strided_slice %194 {offsets = [0, 0], sizes = [1, 384], strides = [1, 1]} : vector<1x512xf32> to vector<1x384xf32>
    %196 = arith.negf %195 : vector<1x384xf32>
    %197 = math.exp %196 : vector<1x384xf32>
    %cst_58 = arith.constant 1.000000e+00 : f32
    %198 = vector.broadcast %cst_58 : f32 to vector<1x384xf32>
    %199 = arith.addf %198, %197 : vector<1x384xf32>
    %200 = arith.divf %198, %199 : vector<1x384xf32>
    %201 = vector.extract_strided_slice %194 {offsets = [0, 384], sizes = [1, 128], strides = [1, 1]} : vector<1x512xf32> to vector<1x128xf32>
    %202 = math.tanh %201 : vector<1x128xf32>
    %203 = vector.extract_strided_slice %200 {offsets = [0, 0], sizes = [1, 128], strides = [1, 1]} : vector<1x384xf32> to vector<1x128xf32>
    %204 = vector.extract_strided_slice %200 {offsets = [0, 128], sizes = [1, 128], strides = [1, 1]} : vector<1x384xf32> to vector<1x128xf32>
    %205 = vector.extract_strided_slice %200 {offsets = [0, 256], sizes = [1, 128], strides = [1, 1]} : vector<1x384xf32> to vector<1x128xf32>
    %206 = arith.mulf %204, %189 : vector<1x128xf32>
    %207 = arith.mulf %203, %202 : vector<1x128xf32>
    %208 = arith.addf %206, %207 : vector<1x128xf32>
    %209 = math.tanh %208 : vector<1x128xf32>
    %210 = arith.mulf %205, %209 : vector<1x128xf32>
    %c0_59 = arith.constant 0 : index
    %c0_60 = arith.constant 0 : index
    %c0_61 = arith.constant 0 : index
    %211 = vector.load %arg31[%c0_59, %c0_60, %c0_61] : memref<3x1x128xf32, #tpu.memory_space<vmem>>, vector<1x1x128xf32>
    %212 = vector.shape_cast %211 : vector<1x1x128xf32> to vector<1x128xf32>
    %213 = vector.shape_cast %210 : vector<1x128xf32> to vector<1x1x128xf32>
    tpu.vector_store %arg31[%c0_59, %c0_60, %c0_61], %213 {strides = array<i32>} : memref<3x1x128xf32, #tpu.memory_space<vmem>>, vector<1x1x128xf32>,
    %c0_62 = arith.constant 0 : index
    %c0_63 = arith.constant 0 : index
    %c0_64 = arith.constant 0 : index
    %214 = vector.load %arg32[%c0_62, %c0_63, %c0_64] : memref<3x1x128xf32, #tpu.memory_space<vmem>>, vector<1x1x128xf32>
    %215 = vector.shape_cast %214 : vector<1x1x128xf32> to vector<1x128xf32>
    %216 = vector.shape_cast %208 : vector<1x128xf32> to vector<1x1x128xf32>
    tpu.vector_store %arg32[%c0_62, %c0_63, %c0_64], %216 {strides = array<i32>} : memref<3x1x128xf32, #tpu.memory_space<vmem>>, vector<1x1x128xf32>,
    %c0_65 = arith.constant 0 : index
    %c0_66 = arith.constant 0 : index
    %217 = vector.load %arg14[%c0_65, %c0_66] : memref<256x512xf32, #tpu.memory_space<vmem>>, vector<256x512xf32>
    %c0_67 = arith.constant 0 : index
    %c0_68 = arith.constant 0 : index
    %218 = vector.load %arg15[%c0_67, %c0_68] : memref<1x512xf32, #tpu.memory_space<vmem>>, vector<1x512xf32>
    %c1 = arith.constant 1 : index
    %c0_69 = arith.constant 0 : index
    %c0_70 = arith.constant 0 : index
    %219 = vector.load %arg28[%c1, %c0_69, %c0_70] : memref<3x1x128xf32, #tpu.memory_space<vmem>>, vector<1x1x128xf32>
    %220 = vector.shape_cast %219 : vector<1x1x128xf32> to vector<1x128xf32>
    %c1_71 = arith.constant 1 : index
    %c0_72 = arith.constant 0 : index
    %c0_73 = arith.constant 0 : index
    %221 = vector.load %arg29[%c1_71, %c0_72, %c0_73] : memref<3x1x128xf32, #tpu.memory_space<vmem>>, vector<1x1x128xf32>
    %222 = vector.shape_cast %221 : vector<1x1x128xf32> to vector<1x128xf32>
    %223 = tpu.concatenate %77, %220 in 1 : vector<1x128xf32>, vector<1x128xf32> -> vector<1x256xf32>
    %cst_74 = arith.constant dense<0.000000e+00> : vector<1x512xf32>
    %224 = tpu.matmul %223, %217, %cst_74 {dimension_numbers = #tpu.dot_dimension_numbers<[1], [0], [0], [1], [0, 0, 1, 1], [], []>} : vector<1x256xf32>, vector<256x512xf32>, vector<1x512xf32> -> vector<1x512xf32>
    %225 = arith.addf %224, %218 : vector<1x512xf32>
    %226 = vector.extract_strided_slice %225 {offsets = [0, 0], sizes = [1, 384], strides = [1, 1]} : vector<1x512xf32> to vector<1x384xf32>
    %227 = arith.negf %226 : vector<1x384xf32>
    %228 = math.exp %227 : vector<1x384xf32>
    %cst_75 = arith.constant 1.000000e+00 : f32
    %229 = vector.broadcast %cst_75 : f32 to vector<1x384xf32>
    %230 = arith.addf %229, %228 : vector<1x384xf32>
    %231 = arith.divf %229, %230 : vector<1x384xf32>
    %232 = vector.extract_strided_slice %225 {offsets = [0, 384], sizes = [1, 128], strides = [1, 1]} : vector<1x512xf32> to vector<1x128xf32>
    %233 = math.tanh %232 : vector<1x128xf32>
    %234 = vector.extract_strided_slice %231 {offsets = [0, 0], sizes = [1, 128], strides = [1, 1]} : vector<1x384xf32> to vector<1x128xf32>
    %235 = vector.extract_strided_slice %231 {offsets = [0, 128], sizes = [1, 128], strides = [1, 1]} : vector<1x384xf32> to vector<1x128xf32>
    %236 = vector.extract_strided_slice %231 {offsets = [0, 256], sizes = [1, 128], strides = [1, 1]} : vector<1x384xf32> to vector<1x128xf32>
    %237 = arith.mulf %235, %222 : vector<1x128xf32>
    %238 = arith.mulf %234, %233 : vector<1x128xf32>
    %239 = arith.addf %237, %238 : vector<1x128xf32>
    %240 = math.tanh %239 : vector<1x128xf32>
    %241 = arith.mulf %236, %240 : vector<1x128xf32>
    %242 = tpu.concatenate %96, %241 in 1 : vector<1x128xf32>, vector<1x128xf32> -> vector<1x256xf32>
    %cst_76 = arith.constant dense<0.000000e+00> : vector<1x512xf32>
    %243 = tpu.matmul %242, %217, %cst_76 {dimension_numbers = #tpu.dot_dimension_numbers<[1], [0], [0], [1], [0, 0, 1, 1], [], []>} : vector<1x256xf32>, vector<256x512xf32>, vector<1x512xf32> -> vector<1x512xf32>
    %244 = arith.addf %243, %218 : vector<1x512xf32>
    %245 = vector.extract_strided_slice %244 {offsets = [0, 0], sizes = [1, 384], strides = [1, 1]} : vector<1x512xf32> to vector<1x384xf32>
    %246 = arith.negf %245 : vector<1x384xf32>
    %247 = math.exp %246 : vector<1x384xf32>
    %cst_77 = arith.constant 1.000000e+00 : f32
    %248 = vector.broadcast %cst_77 : f32 to vector<1x384xf32>
    %249 = arith.addf %248, %247 : vector<1x384xf32>
    %250 = arith.divf %248, %249 : vector<1x384xf32>
    %251 = vector.extract_strided_slice %244 {offsets = [0, 384], sizes = [1, 128], strides = [1, 1]} : vector<1x512xf32> to vector<1x128xf32>
    %252 = math.tanh %251 : vector<1x128xf32>
    %253 = vector.extract_strided_slice %250 {offsets = [0, 0], sizes = [1, 128], strides = [1, 1]} : vector<1x384xf32> to vector<1x128xf32>
    %254 = vector.extract_strided_slice %250 {offsets = [0, 128], sizes = [1, 128], strides = [1, 1]} : vector<1x384xf32> to vector<1x128xf32>
    %255 = vector.extract_strided_slice %250 {offsets = [0, 256], sizes = [1, 128], strides = [1, 1]} : vector<1x384xf32> to vector<1x128xf32>
    %256 = arith.mulf %254, %239 : vector<1x128xf32>
    %257 = arith.mulf %253, %252 : vector<1x128xf32>
    %258 = arith.addf %256, %257 : vector<1x128xf32>
    %259 = math.tanh %258 : vector<1x128xf32>
    %260 = arith.mulf %255, %259 : vector<1x128xf32>
    %261 = tpu.concatenate %115, %260 in 1 : vector<1x128xf32>, vector<1x128xf32> -> vector<1x256xf32>
    %cst_78 = arith.constant dense<0.000000e+00> : vector<1x512xf32>
    %262 = tpu.matmul %261, %217, %cst_78 {dimension_numbers = #tpu.dot_dimension_numbers<[1], [0], [0], [1], [0, 0, 1, 1], [], []>} : vector<1x256xf32>, vector<256x512xf32>, vector<1x512xf32> -> vector<1x512xf32>
    %263 = arith.addf %262, %218 : vector<1x512xf32>
    %264 = vector.extract_strided_slice %263 {offsets = [0, 0], sizes = [1, 384], strides = [1, 1]} : vector<1x512xf32> to vector<1x384xf32>
    %265 = arith.negf %264 : vector<1x384xf32>
    %266 = math.exp %265 : vector<1x384xf32>
    %cst_79 = arith.constant 1.000000e+00 : f32
    %267 = vector.broadcast %cst_79 : f32 to vector<1x384xf32>
    %268 = arith.addf %267, %266 : vector<1x384xf32>
    %269 = arith.divf %267, %268 : vector<1x384xf32>
    %270 = vector.extract_strided_slice %263 {offsets = [0, 384], sizes = [1, 128], strides = [1, 1]} : vector<1x512xf32> to vector<1x128xf32>
    %271 = math.tanh %270 : vector<1x128xf32>
    %272 = vector.extract_strided_slice %269 {offsets = [0, 0], sizes = [1, 128], strides = [1, 1]} : vector<1x384xf32> to vector<1x128xf32>
    %273 = vector.extract_strided_slice %269 {offsets = [0, 128], sizes = [1, 128], strides = [1, 1]} : vector<1x384xf32> to vector<1x128xf32>
    %274 = vector.extract_strided_slice %269 {offsets = [0, 256], sizes = [1, 128], strides = [1, 1]} : vector<1x384xf32> to vector<1x128xf32>
    %275 = arith.mulf %273, %258 : vector<1x128xf32>
    %276 = arith.mulf %272, %271 : vector<1x128xf32>
    %277 = arith.addf %275, %276 : vector<1x128xf32>
    %278 = math.tanh %277 : vector<1x128xf32>
    %279 = arith.mulf %274, %278 : vector<1x128xf32>
    %280 = tpu.concatenate %134, %279 in 1 : vector<1x128xf32>, vector<1x128xf32> -> vector<1x256xf32>
    %cst_80 = arith.constant dense<0.000000e+00> : vector<1x512xf32>
    %281 = tpu.matmul %280, %217, %cst_80 {dimension_numbers = #tpu.dot_dimension_numbers<[1], [0], [0], [1], [0, 0, 1, 1], [], []>} : vector<1x256xf32>, vector<256x512xf32>, vector<1x512xf32> -> vector<1x512xf32>
    %282 = arith.addf %281, %218 : vector<1x512xf32>
    %283 = vector.extract_strided_slice %282 {offsets = [0, 0], sizes = [1, 384], strides = [1, 1]} : vector<1x512xf32> to vector<1x384xf32>
    %284 = arith.negf %283 : vector<1x384xf32>
    %285 = math.exp %284 : vector<1x384xf32>
    %cst_81 = arith.constant 1.000000e+00 : f32
    %286 = vector.broadcast %cst_81 : f32 to vector<1x384xf32>
    %287 = arith.addf %286, %285 : vector<1x384xf32>
    %288 = arith.divf %286, %287 : vector<1x384xf32>
    %289 = vector.extract_strided_slice %282 {offsets = [0, 384], sizes = [1, 128], strides = [1, 1]} : vector<1x512xf32> to vector<1x128xf32>
    %290 = math.tanh %289 : vector<1x128xf32>
    %291 = vector.extract_strided_slice %288 {offsets = [0, 0], sizes = [1, 128], strides = [1, 1]} : vector<1x384xf32> to vector<1x128xf32>
    %292 = vector.extract_strided_slice %288 {offsets = [0, 128], sizes = [1, 128], strides = [1, 1]} : vector<1x384xf32> to vector<1x128xf32>
    %293 = vector.extract_strided_slice %288 {offsets = [0, 256], sizes = [1, 128], strides = [1, 1]} : vector<1x384xf32> to vector<1x128xf32>
    %294 = arith.mulf %292, %277 : vector<1x128xf32>
    %295 = arith.mulf %291, %290 : vector<1x128xf32>
    %296 = arith.addf %294, %295 : vector<1x128xf32>
    %297 = math.tanh %296 : vector<1x128xf32>
    %298 = arith.mulf %293, %297 : vector<1x128xf32>
    %299 = tpu.concatenate %153, %298 in 1 : vector<1x128xf32>, vector<1x128xf32> -> vector<1x256xf32>
    %cst_82 = arith.constant dense<0.000000e+00> : vector<1x512xf32>
    %300 = tpu.matmul %299, %217, %cst_82 {dimension_numbers = #tpu.dot_dimension_numbers<[1], [0], [0], [1], [0, 0, 1, 1], [], []>} : vector<1x256xf32>, vector<256x512xf32>, vector<1x512xf32> -> vector<1x512xf32>
    %301 = arith.addf %300, %218 : vector<1x512xf32>
    %302 = vector.extract_strided_slice %301 {offsets = [0, 0], sizes = [1, 384], strides = [1, 1]} : vector<1x512xf32> to vector<1x384xf32>
    %303 = arith.negf %302 : vector<1x384xf32>
    %304 = math.exp %303 : vector<1x384xf32>
    %cst_83 = arith.constant 1.000000e+00 : f32
    %305 = vector.broadcast %cst_83 : f32 to vector<1x384xf32>
    %306 = arith.addf %305, %304 : vector<1x384xf32>
    %307 = arith.divf %305, %306 : vector<1x384xf32>
    %308 = vector.extract_strided_slice %301 {offsets = [0, 384], sizes = [1, 128], strides = [1, 1]} : vector<1x512xf32> to vector<1x128xf32>
    %309 = math.tanh %308 : vector<1x128xf32>
    %310 = vector.extract_strided_slice %307 {offsets = [0, 0], sizes = [1, 128], strides = [1, 1]} : vector<1x384xf32> to vector<1x128xf32>
    %311 = vector.extract_strided_slice %307 {offsets = [0, 128], sizes = [1, 128], strides = [1, 1]} : vector<1x384xf32> to vector<1x128xf32>
    %312 = vector.extract_strided_slice %307 {offsets = [0, 256], sizes = [1, 128], strides = [1, 1]} : vector<1x384xf32> to vector<1x128xf32>
    %313 = arith.mulf %311, %296 : vector<1x128xf32>
    %314 = arith.mulf %310, %309 : vector<1x128xf32>
    %315 = arith.addf %313, %314 : vector<1x128xf32>
    %316 = math.tanh %315 : vector<1x128xf32>
    %317 = arith.mulf %312, %316 : vector<1x128xf32>
    %318 = tpu.concatenate %172, %317 in 1 : vector<1x128xf32>, vector<1x128xf32> -> vector<1x256xf32>
    %cst_84 = arith.constant dense<0.000000e+00> : vector<1x512xf32>
    %319 = tpu.matmul %318, %217, %cst_84 {dimension_numbers = #tpu.dot_dimension_numbers<[1], [0], [0], [1], [0, 0, 1, 1], [], []>} : vector<1x256xf32>, vector<256x512xf32>, vector<1x512xf32> -> vector<1x512xf32>
    %320 = arith.addf %319, %218 : vector<1x512xf32>
    %321 = vector.extract_strided_slice %320 {offsets = [0, 0], sizes = [1, 384], strides = [1, 1]} : vector<1x512xf32> to vector<1x384xf32>
    %322 = arith.negf %321 : vector<1x384xf32>
    %323 = math.exp %322 : vector<1x384xf32>
    %cst_85 = arith.constant 1.000000e+00 : f32
    %324 = vector.broadcast %cst_85 : f32 to vector<1x384xf32>
    %325 = arith.addf %324, %323 : vector<1x384xf32>
    %326 = arith.divf %324, %325 : vector<1x384xf32>
    %327 = vector.extract_strided_slice %320 {offsets = [0, 384], sizes = [1, 128], strides = [1, 1]} : vector<1x512xf32> to vector<1x128xf32>
    %328 = math.tanh %327 : vector<1x128xf32>
    %329 = vector.extract_strided_slice %326 {offsets = [0, 0], sizes = [1, 128], strides = [1, 1]} : vector<1x384xf32> to vector<1x128xf32>
    %330 = vector.extract_strided_slice %326 {offsets = [0, 128], sizes = [1, 128], strides = [1, 1]} : vector<1x384xf32> to vector<1x128xf32>
    %331 = vector.extract_strided_slice %326 {offsets = [0, 256], sizes = [1, 128], strides = [1, 1]} : vector<1x384xf32> to vector<1x128xf32>
    %332 = arith.mulf %330, %315 : vector<1x128xf32>
    %333 = arith.mulf %329, %328 : vector<1x128xf32>
    %334 = arith.addf %332, %333 : vector<1x128xf32>
    %335 = math.tanh %334 : vector<1x128xf32>
    %336 = arith.mulf %331, %335 : vector<1x128xf32>
    %337 = tpu.concatenate %191, %336 in 1 : vector<1x128xf32>, vector<1x128xf32> -> vector<1x256xf32>
    %cst_86 = arith.constant dense<0.000000e+00> : vector<1x512xf32>
    %338 = tpu.matmul %337, %217, %cst_86 {dimension_numbers = #tpu.dot_dimension_numbers<[1], [0], [0], [1], [0, 0, 1, 1], [], []>} : vector<1x256xf32>, vector<256x512xf32>, vector<1x512xf32> -> vector<1x512xf32>
    %339 = arith.addf %338, %218 : vector<1x512xf32>
    %340 = vector.extract_strided_slice %339 {offsets = [0, 0], sizes = [1, 384], strides = [1, 1]} : vector<1x512xf32> to vector<1x384xf32>
    %341 = arith.negf %340 : vector<1x384xf32>
    %342 = math.exp %341 : vector<1x384xf32>
    %cst_87 = arith.constant 1.000000e+00 : f32
    %343 = vector.broadcast %cst_87 : f32 to vector<1x384xf32>
    %344 = arith.addf %343, %342 : vector<1x384xf32>
    %345 = arith.divf %343, %344 : vector<1x384xf32>
    %346 = vector.extract_strided_slice %339 {offsets = [0, 384], sizes = [1, 128], strides = [1, 1]} : vector<1x512xf32> to vector<1x128xf32>
    %347 = math.tanh %346 : vector<1x128xf32>
    %348 = vector.extract_strided_slice %345 {offsets = [0, 0], sizes = [1, 128], strides = [1, 1]} : vector<1x384xf32> to vector<1x128xf32>
    %349 = vector.extract_strided_slice %345 {offsets = [0, 128], sizes = [1, 128], strides = [1, 1]} : vector<1x384xf32> to vector<1x128xf32>
    %350 = vector.extract_strided_slice %345 {offsets = [0, 256], sizes = [1, 128], strides = [1, 1]} : vector<1x384xf32> to vector<1x128xf32>
    %351 = arith.mulf %349, %334 : vector<1x128xf32>
    %352 = arith.mulf %348, %347 : vector<1x128xf32>
    %353 = arith.addf %351, %352 : vector<1x128xf32>
    %354 = math.tanh %353 : vector<1x128xf32>
    %355 = arith.mulf %350, %354 : vector<1x128xf32>
    %356 = tpu.concatenate %210, %355 in 1 : vector<1x128xf32>, vector<1x128xf32> -> vector<1x256xf32>
    %cst_88 = arith.constant dense<0.000000e+00> : vector<1x512xf32>
    %357 = tpu.matmul %356, %217, %cst_88 {dimension_numbers = #tpu.dot_dimension_numbers<[1], [0], [0], [1], [0, 0, 1, 1], [], []>} : vector<1x256xf32>, vector<256x512xf32>, vector<1x512xf32> -> vector<1x512xf32>
    %358 = arith.addf %357, %218 : vector<1x512xf32>
    %359 = vector.extract_strided_slice %358 {offsets = [0, 0], sizes = [1, 384], strides = [1, 1]} : vector<1x512xf32> to vector<1x384xf32>
    %360 = arith.negf %359 : vector<1x384xf32>
    %361 = math.exp %360 : vector<1x384xf32>
    %cst_89 = arith.constant 1.000000e+00 : f32
    %362 = vector.broadcast %cst_89 : f32 to vector<1x384xf32>
    %363 = arith.addf %362, %361 : vector<1x384xf32>
    %364 = arith.divf %362, %363 : vector<1x384xf32>
    %365 = vector.extract_strided_slice %358 {offsets = [0, 384], sizes = [1, 128], strides = [1, 1]} : vector<1x512xf32> to vector<1x128xf32>
    %366 = math.tanh %365 : vector<1x128xf32>
    %367 = vector.extract_strided_slice %364 {offsets = [0, 0], sizes = [1, 128], strides = [1, 1]} : vector<1x384xf32> to vector<1x128xf32>
    %368 = vector.extract_strided_slice %364 {offsets = [0, 128], sizes = [1, 128], strides = [1, 1]} : vector<1x384xf32> to vector<1x128xf32>
    %369 = vector.extract_strided_slice %364 {offsets = [0, 256], sizes = [1, 128], strides = [1, 1]} : vector<1x384xf32> to vector<1x128xf32>
    %370 = arith.mulf %368, %353 : vector<1x128xf32>
    %371 = arith.mulf %367, %366 : vector<1x128xf32>
    %372 = arith.addf %370, %371 : vector<1x128xf32>
    %373 = math.tanh %372 : vector<1x128xf32>
    %374 = arith.mulf %369, %373 : vector<1x128xf32>
    %c1_90 = arith.constant 1 : index
    %c0_91 = arith.constant 0 : index
    %c0_92 = arith.constant 0 : index
    %375 = vector.load %arg31[%c1_90, %c0_91, %c0_92] : memref<3x1x128xf32, #tpu.memory_space<vmem>>, vector<1x1x128xf32>
    %376 = vector.shape_cast %375 : vector<1x1x128xf32> to vector<1x128xf32>
    %377 = vector.shape_cast %374 : vector<1x128xf32> to vector<1x1x128xf32>
    tpu.vector_store %arg31[%c1_90, %c0_91, %c0_92], %377 {strides = array<i32>} : memref<3x1x128xf32, #tpu.memory_space<vmem>>, vector<1x1x128xf32>,
    %c1_93 = arith.constant 1 : index
    %c0_94 = arith.constant 0 : index
    %c0_95 = arith.constant 0 : index
    %378 = vector.load %arg32[%c1_93, %c0_94, %c0_95] : memref<3x1x128xf32, #tpu.memory_space<vmem>>, vector<1x1x128xf32>
    %379 = vector.shape_cast %378 : vector<1x1x128xf32> to vector<1x128xf32>
    %380 = vector.shape_cast %372 : vector<1x128xf32> to vector<1x1x128xf32>
    tpu.vector_store %arg32[%c1_93, %c0_94, %c0_95], %380 {strides = array<i32>} : memref<3x1x128xf32, #tpu.memory_space<vmem>>, vector<1x1x128xf32>,
    %c0_96 = arith.constant 0 : index
    %c0_97 = arith.constant 0 : index
    %381 = vector.load %arg16[%c0_96, %c0_97] : memref<256x512xf32, #tpu.memory_space<vmem>>, vector<256x512xf32>
    %c0_98 = arith.constant 0 : index
    %c0_99 = arith.constant 0 : index
    %382 = vector.load %arg17[%c0_98, %c0_99] : memref<1x512xf32, #tpu.memory_space<vmem>>, vector<1x512xf32>
    %c2 = arith.constant 2 : index
    %c0_100 = arith.constant 0 : index
    %c0_101 = arith.constant 0 : index
    %383 = vector.load %arg28[%c2, %c0_100, %c0_101] : memref<3x1x128xf32, #tpu.memory_space<vmem>>, vector<1x1x128xf32>
    %384 = vector.shape_cast %383 : vector<1x1x128xf32> to vector<1x128xf32>
    %c2_102 = arith.constant 2 : index
    %c0_103 = arith.constant 0 : index
    %c0_104 = arith.constant 0 : index
    %385 = vector.load %arg29[%c2_102, %c0_103, %c0_104] : memref<3x1x128xf32, #tpu.memory_space<vmem>>, vector<1x1x128xf32>
    %386 = vector.shape_cast %385 : vector<1x1x128xf32> to vector<1x128xf32>
    %387 = tpu.concatenate %241, %384 in 1 : vector<1x128xf32>, vector<1x128xf32> -> vector<1x256xf32>
    %cst_105 = arith.constant dense<0.000000e+00> : vector<1x512xf32>
    %388 = tpu.matmul %387, %381, %cst_105 {dimension_numbers = #tpu.dot_dimension_numbers<[1], [0], [0], [1], [0, 0, 1, 1], [], []>} : vector<1x256xf32>, vector<256x512xf32>, vector<1x512xf32> -> vector<1x512xf32>
    %389 = arith.addf %388, %382 : vector<1x512xf32>
    %390 = vector.extract_strided_slice %389 {offsets = [0, 0], sizes = [1, 384], strides = [1, 1]} : vector<1x512xf32> to vector<1x384xf32>
    %391 = arith.negf %390 : vector<1x384xf32>
    %392 = math.exp %391 : vector<1x384xf32>
    %cst_106 = arith.constant 1.000000e+00 : f32
    %393 = vector.broadcast %cst_106 : f32 to vector<1x384xf32>
    %394 = arith.addf %393, %392 : vector<1x384xf32>
    %395 = arith.divf %393, %394 : vector<1x384xf32>
    %396 = vector.extract_strided_slice %389 {offsets = [0, 384], sizes = [1, 128], strides = [1, 1]} : vector<1x512xf32> to vector<1x128xf32>
    %397 = math.tanh %396 : vector<1x128xf32>
    %398 = vector.extract_strided_slice %395 {offsets = [0, 0], sizes = [1, 128], strides = [1, 1]} : vector<1x384xf32> to vector<1x128xf32>
    %399 = vector.extract_strided_slice %395 {offsets = [0, 128], sizes = [1, 128], strides = [1, 1]} : vector<1x384xf32> to vector<1x128xf32>
    %400 = vector.extract_strided_slice %395 {offsets = [0, 256], sizes = [1, 128], strides = [1, 1]} : vector<1x384xf32> to vector<1x128xf32>
    %401 = arith.mulf %399, %386 : vector<1x128xf32>
    %402 = arith.mulf %398, %397 : vector<1x128xf32>
    %403 = arith.addf %401, %402 : vector<1x128xf32>
    %404 = math.tanh %403 : vector<1x128xf32>
    %405 = arith.mulf %400, %404 : vector<1x128xf32>
    %c0_107 = arith.constant 0 : index
    %c0_108 = arith.constant 0 : index
    %406 = vector.load %arg33[%c0_107, %c0_108] : memref<8x128xf32, #tpu.memory_space<vmem>>, vector<1x128xf32>
    tpu.vector_store %arg33[%c0_107, %c0_108], %405 {strides = array<i32>} : memref<8x128xf32, #tpu.memory_space<vmem>>, vector<1x128xf32>,
    %407 = tpu.concatenate %260, %405 in 1 : vector<1x128xf32>, vector<1x128xf32> -> vector<1x256xf32>
    %cst_109 = arith.constant dense<0.000000e+00> : vector<1x512xf32>
    %408 = tpu.matmul %407, %381, %cst_109 {dimension_numbers = #tpu.dot_dimension_numbers<[1], [0], [0], [1], [0, 0, 1, 1], [], []>} : vector<1x256xf32>, vector<256x512xf32>, vector<1x512xf32> -> vector<1x512xf32>
    %409 = arith.addf %408, %382 : vector<1x512xf32>
    %410 = vector.extract_strided_slice %409 {offsets = [0, 0], sizes = [1, 384], strides = [1, 1]} : vector<1x512xf32> to vector<1x384xf32>
    %411 = arith.negf %410 : vector<1x384xf32>
    %412 = math.exp %411 : vector<1x384xf32>
    %cst_110 = arith.constant 1.000000e+00 : f32
    %413 = vector.broadcast %cst_110 : f32 to vector<1x384xf32>
    %414 = arith.addf %413, %412 : vector<1x384xf32>
    %415 = arith.divf %413, %414 : vector<1x384xf32>
    %416 = vector.extract_strided_slice %409 {offsets = [0, 384], sizes = [1, 128], strides = [1, 1]} : vector<1x512xf32> to vector<1x128xf32>
    %417 = math.tanh %416 : vector<1x128xf32>
    %418 = vector.extract_strided_slice %415 {offsets = [0, 0], sizes = [1, 128], strides = [1, 1]} : vector<1x384xf32> to vector<1x128xf32>
    %419 = vector.extract_strided_slice %415 {offsets = [0, 128], sizes = [1, 128], strides = [1, 1]} : vector<1x384xf32> to vector<1x128xf32>
    %420 = vector.extract_strided_slice %415 {offsets = [0, 256], sizes = [1, 128], strides = [1, 1]} : vector<1x384xf32> to vector<1x128xf32>
    %421 = arith.mulf %419, %403 : vector<1x128xf32>
    %422 = arith.mulf %418, %417 : vector<1x128xf32>
    %423 = arith.addf %421, %422 : vector<1x128xf32>
    %424 = math.tanh %423 : vector<1x128xf32>
    %425 = arith.mulf %420, %424 : vector<1x128xf32>
    %c1_111 = arith.constant 1 : index
    %c0_112 = arith.constant 0 : index
    %426 = vector.load %arg33[%c1_111, %c0_112] : memref<8x128xf32, #tpu.memory_space<vmem>>, vector<1x128xf32>
    tpu.vector_store %arg33[%c1_111, %c0_112], %425 {strides = array<i32>} : memref<8x128xf32, #tpu.memory_space<vmem>>, vector<1x128xf32>,
    %427 = tpu.concatenate %279, %425 in 1 : vector<1x128xf32>, vector<1x128xf32> -> vector<1x256xf32>
    %cst_113 = arith.constant dense<0.000000e+00> : vector<1x512xf32>
    %428 = tpu.matmul %427, %381, %cst_113 {dimension_numbers = #tpu.dot_dimension_numbers<[1], [0], [0], [1], [0, 0, 1, 1], [], []>} : vector<1x256xf32>, vector<256x512xf32>, vector<1x512xf32> -> vector<1x512xf32>
    %429 = arith.addf %428, %382 : vector<1x512xf32>
    %430 = vector.extract_strided_slice %429 {offsets = [0, 0], sizes = [1, 384], strides = [1, 1]} : vector<1x512xf32> to vector<1x384xf32>
    %431 = arith.negf %430 : vector<1x384xf32>
    %432 = math.exp %431 : vector<1x384xf32>
    %cst_114 = arith.constant 1.000000e+00 : f32
    %433 = vector.broadcast %cst_114 : f32 to vector<1x384xf32>
    %434 = arith.addf %433, %432 : vector<1x384xf32>
    %435 = arith.divf %433, %434 : vector<1x384xf32>
    %436 = vector.extract_strided_slice %429 {offsets = [0, 384], sizes = [1, 128], strides = [1, 1]} : vector<1x512xf32> to vector<1x128xf32>
    %437 = math.tanh %436 : vector<1x128xf32>
    %438 = vector.extract_strided_slice %435 {offsets = [0, 0], sizes = [1, 128], strides = [1, 1]} : vector<1x384xf32> to vector<1x128xf32>
    %439 = vector.extract_strided_slice %435 {offsets = [0, 128], sizes = [1, 128], strides = [1, 1]} : vector<1x384xf32> to vector<1x128xf32>
    %440 = vector.extract_strided_slice %435 {offsets = [0, 256], sizes = [1, 128], strides = [1, 1]} : vector<1x384xf32> to vector<1x128xf32>
    %441 = arith.mulf %439, %423 : vector<1x128xf32>
    %442 = arith.mulf %438, %437 : vector<1x128xf32>
    %443 = arith.addf %441, %442 : vector<1x128xf32>
    %444 = math.tanh %443 : vector<1x128xf32>
    %445 = arith.mulf %440, %444 : vector<1x128xf32>
    %c2_115 = arith.constant 2 : index
    %c0_116 = arith.constant 0 : index
    %446 = vector.load %arg33[%c2_115, %c0_116] : memref<8x128xf32, #tpu.memory_space<vmem>>, vector<1x128xf32>
    tpu.vector_store %arg33[%c2_115, %c0_116], %445 {strides = array<i32>} : memref<8x128xf32, #tpu.memory_space<vmem>>, vector<1x128xf32>,
    %447 = tpu.concatenate %298, %445 in 1 : vector<1x128xf32>, vector<1x128xf32> -> vector<1x256xf32>
    %cst_117 = arith.constant dense<0.000000e+00> : vector<1x512xf32>
    %448 = tpu.matmul %447, %381, %cst_117 {dimension_numbers = #tpu.dot_dimension_numbers<[1], [0], [0], [1], [0, 0, 1, 1], [], []>} : vector<1x256xf32>, vector<256x512xf32>, vector<1x512xf32> -> vector<1x512xf32>
    %449 = arith.addf %448, %382 : vector<1x512xf32>
    %450 = vector.extract_strided_slice %449 {offsets = [0, 0], sizes = [1, 384], strides = [1, 1]} : vector<1x512xf32> to vector<1x384xf32>
    %451 = arith.negf %450 : vector<1x384xf32>
    %452 = math.exp %451 : vector<1x384xf32>
    %cst_118 = arith.constant 1.000000e+00 : f32
    %453 = vector.broadcast %cst_118 : f32 to vector<1x384xf32>
    %454 = arith.addf %453, %452 : vector<1x384xf32>
    %455 = arith.divf %453, %454 : vector<1x384xf32>
    %456 = vector.extract_strided_slice %449 {offsets = [0, 384], sizes = [1, 128], strides = [1, 1]} : vector<1x512xf32> to vector<1x128xf32>
    %457 = math.tanh %456 : vector<1x128xf32>
    %458 = vector.extract_strided_slice %455 {offsets = [0, 0], sizes = [1, 128], strides = [1, 1]} : vector<1x384xf32> to vector<1x128xf32>
    %459 = vector.extract_strided_slice %455 {offsets = [0, 128], sizes = [1, 128], strides = [1, 1]} : vector<1x384xf32> to vector<1x128xf32>
    %460 = vector.extract_strided_slice %455 {offsets = [0, 256], sizes = [1, 128], strides = [1, 1]} : vector<1x384xf32> to vector<1x128xf32>
    %461 = arith.mulf %459, %443 : vector<1x128xf32>
    %462 = arith.mulf %458, %457 : vector<1x128xf32>
    %463 = arith.addf %461, %462 : vector<1x128xf32>
    %464 = math.tanh %463 : vector<1x128xf32>
    %465 = arith.mulf %460, %464 : vector<1x128xf32>
    %c3 = arith.constant 3 : index
    %c0_119 = arith.constant 0 : index
    %466 = vector.load %arg33[%c3, %c0_119] : memref<8x128xf32, #tpu.memory_space<vmem>>, vector<1x128xf32>
    tpu.vector_store %arg33[%c3, %c0_119], %465 {strides = array<i32>} : memref<8x128xf32, #tpu.memory_space<vmem>>, vector<1x128xf32>,
    %467 = tpu.concatenate %317, %465 in 1 : vector<1x128xf32>, vector<1x128xf32> -> vector<1x256xf32>
    %cst_120 = arith.constant dense<0.000000e+00> : vector<1x512xf32>
    %468 = tpu.matmul %467, %381, %cst_120 {dimension_numbers = #tpu.dot_dimension_numbers<[1], [0], [0], [1], [0, 0, 1, 1], [], []>} : vector<1x256xf32>, vector<256x512xf32>, vector<1x512xf32> -> vector<1x512xf32>
    %469 = arith.addf %468, %382 : vector<1x512xf32>
    %470 = vector.extract_strided_slice %469 {offsets = [0, 0], sizes = [1, 384], strides = [1, 1]} : vector<1x512xf32> to vector<1x384xf32>
    %471 = arith.negf %470 : vector<1x384xf32>
    %472 = math.exp %471 : vector<1x384xf32>
    %cst_121 = arith.constant 1.000000e+00 : f32
    %473 = vector.broadcast %cst_121 : f32 to vector<1x384xf32>
    %474 = arith.addf %473, %472 : vector<1x384xf32>
    %475 = arith.divf %473, %474 : vector<1x384xf32>
    %476 = vector.extract_strided_slice %469 {offsets = [0, 384], sizes = [1, 128], strides = [1, 1]} : vector<1x512xf32> to vector<1x128xf32>
    %477 = math.tanh %476 : vector<1x128xf32>
    %478 = vector.extract_strided_slice %475 {offsets = [0, 0], sizes = [1, 128], strides = [1, 1]} : vector<1x384xf32> to vector<1x128xf32>
    %479 = vector.extract_strided_slice %475 {offsets = [0, 128], sizes = [1, 128], strides = [1, 1]} : vector<1x384xf32> to vector<1x128xf32>
    %480 = vector.extract_strided_slice %475 {offsets = [0, 256], sizes = [1, 128], strides = [1, 1]} : vector<1x384xf32> to vector<1x128xf32>
    %481 = arith.mulf %479, %463 : vector<1x128xf32>
    %482 = arith.mulf %478, %477 : vector<1x128xf32>
    %483 = arith.addf %481, %482 : vector<1x128xf32>
    %484 = math.tanh %483 : vector<1x128xf32>
    %485 = arith.mulf %480, %484 : vector<1x128xf32>
    %c4 = arith.constant 4 : index
    %c0_122 = arith.constant 0 : index
    %486 = vector.load %arg33[%c4, %c0_122] : memref<8x128xf32, #tpu.memory_space<vmem>>, vector<1x128xf32>
    tpu.vector_store %arg33[%c4, %c0_122], %485 {strides = array<i32>} : memref<8x128xf32, #tpu.memory_space<vmem>>, vector<1x128xf32>,
    %487 = tpu.concatenate %336, %485 in 1 : vector<1x128xf32>, vector<1x128xf32> -> vector<1x256xf32>
    %cst_123 = arith.constant dense<0.000000e+00> : vector<1x512xf32>
    %488 = tpu.matmul %487, %381, %cst_123 {dimension_numbers = #tpu.dot_dimension_numbers<[1], [0], [0], [1], [0, 0, 1, 1], [], []>} : vector<1x256xf32>, vector<256x512xf32>, vector<1x512xf32> -> vector<1x512xf32>
    %489 = arith.addf %488, %382 : vector<1x512xf32>
    %490 = vector.extract_strided_slice %489 {offsets = [0, 0], sizes = [1, 384], strides = [1, 1]} : vector<1x512xf32> to vector<1x384xf32>
    %491 = arith.negf %490 : vector<1x384xf32>
    %492 = math.exp %491 : vector<1x384xf32>
    %cst_124 = arith.constant 1.000000e+00 : f32
    %493 = vector.broadcast %cst_124 : f32 to vector<1x384xf32>
    %494 = arith.addf %493, %492 : vector<1x384xf32>
    %495 = arith.divf %493, %494 : vector<1x384xf32>
    %496 = vector.extract_strided_slice %489 {offsets = [0, 384], sizes = [1, 128], strides = [1, 1]} : vector<1x512xf32> to vector<1x128xf32>
    %497 = math.tanh %496 : vector<1x128xf32>
    %498 = vector.extract_strided_slice %495 {offsets = [0, 0], sizes = [1, 128], strides = [1, 1]} : vector<1x384xf32> to vector<1x128xf32>
    %499 = vector.extract_strided_slice %495 {offsets = [0, 128], sizes = [1, 128], strides = [1, 1]} : vector<1x384xf32> to vector<1x128xf32>
    %500 = vector.extract_strided_slice %495 {offsets = [0, 256], sizes = [1, 128], strides = [1, 1]} : vector<1x384xf32> to vector<1x128xf32>
    %501 = arith.mulf %499, %483 : vector<1x128xf32>
    %502 = arith.mulf %498, %497 : vector<1x128xf32>
    %503 = arith.addf %501, %502 : vector<1x128xf32>
    %504 = math.tanh %503 : vector<1x128xf32>
    %505 = arith.mulf %500, %504 : vector<1x128xf32>
    %c5 = arith.constant 5 : index
    %c0_125 = arith.constant 0 : index
    %506 = vector.load %arg33[%c5, %c0_125] : memref<8x128xf32, #tpu.memory_space<vmem>>, vector<1x128xf32>
    tpu.vector_store %arg33[%c5, %c0_125], %505 {strides = array<i32>} : memref<8x128xf32, #tpu.memory_space<vmem>>, vector<1x128xf32>,
    %507 = tpu.concatenate %355, %505 in 1 : vector<1x128xf32>, vector<1x128xf32> -> vector<1x256xf32>
    %cst_126 = arith.constant dense<0.000000e+00> : vector<1x512xf32>
    %508 = tpu.matmul %507, %381, %cst_126 {dimension_numbers = #tpu.dot_dimension_numbers<[1], [0], [0], [1], [0, 0, 1, 1], [], []>} : vector<1x256xf32>, vector<256x512xf32>, vector<1x512xf32> -> vector<1x512xf32>
    %509 = arith.addf %508, %382 : vector<1x512xf32>
    %510 = vector.extract_strided_slice %509 {offsets = [0, 0], sizes = [1, 384], strides = [1, 1]} : vector<1x512xf32> to vector<1x384xf32>
    %511 = arith.negf %510 : vector<1x384xf32>
    %512 = math.exp %511 : vector<1x384xf32>
    %cst_127 = arith.constant 1.000000e+00 : f32
    %513 = vector.broadcast %cst_127 : f32 to vector<1x384xf32>
    %514 = arith.addf %513, %512 : vector<1x384xf32>
    %515 = arith.divf %513, %514 : vector<1x384xf32>
    %516 = vector.extract_strided_slice %509 {offsets = [0, 384], sizes = [1, 128], strides = [1, 1]} : vector<1x512xf32> to vector<1x128xf32>
    %517 = math.tanh %516 : vector<1x128xf32>
    %518 = vector.extract_strided_slice %515 {offsets = [0, 0], sizes = [1, 128], strides = [1, 1]} : vector<1x384xf32> to vector<1x128xf32>
    %519 = vector.extract_strided_slice %515 {offsets = [0, 128], sizes = [1, 128], strides = [1, 1]} : vector<1x384xf32> to vector<1x128xf32>
    %520 = vector.extract_strided_slice %515 {offsets = [0, 256], sizes = [1, 128], strides = [1, 1]} : vector<1x384xf32> to vector<1x128xf32>
    %521 = arith.mulf %519, %503 : vector<1x128xf32>
    %522 = arith.mulf %518, %517 : vector<1x128xf32>
    %523 = arith.addf %521, %522 : vector<1x128xf32>
    %524 = math.tanh %523 : vector<1x128xf32>
    %525 = arith.mulf %520, %524 : vector<1x128xf32>
    %c6 = arith.constant 6 : index
    %c0_128 = arith.constant 0 : index
    %526 = vector.load %arg33[%c6, %c0_128] : memref<8x128xf32, #tpu.memory_space<vmem>>, vector<1x128xf32>
    tpu.vector_store %arg33[%c6, %c0_128], %525 {strides = array<i32>} : memref<8x128xf32, #tpu.memory_space<vmem>>, vector<1x128xf32>,
    %527 = tpu.concatenate %374, %525 in 1 : vector<1x128xf32>, vector<1x128xf32> -> vector<1x256xf32>
    %cst_129 = arith.constant dense<0.000000e+00> : vector<1x512xf32>
    %528 = tpu.matmul %527, %381, %cst_129 {dimension_numbers = #tpu.dot_dimension_numbers<[1], [0], [0], [1], [0, 0, 1, 1], [], []>} : vector<1x256xf32>, vector<256x512xf32>, vector<1x512xf32> -> vector<1x512xf32>
    %529 = arith.addf %528, %382 : vector<1x512xf32>
    %530 = vector.extract_strided_slice %529 {offsets = [0, 0], sizes = [1, 384], strides = [1, 1]} : vector<1x512xf32> to vector<1x384xf32>
    %531 = arith.negf %530 : vector<1x384xf32>
    %532 = math.exp %531 : vector<1x384xf32>
    %cst_130 = arith.constant 1.000000e+00 : f32
    %533 = vector.broadcast %cst_130 : f32 to vector<1x384xf32>
    %534 = arith.addf %533, %532 : vector<1x384xf32>
    %535 = arith.divf %533, %534 : vector<1x384xf32>
    %536 = vector.extract_strided_slice %529 {offsets = [0, 384], sizes = [1, 128], strides = [1, 1]} : vector<1x512xf32> to vector<1x128xf32>
    %537 = math.tanh %536 : vector<1x128xf32>
    %538 = vector.extract_strided_slice %535 {offsets = [0, 0], sizes = [1, 128], strides = [1, 1]} : vector<1x384xf32> to vector<1x128xf32>
    %539 = vector.extract_strided_slice %535 {offsets = [0, 128], sizes = [1, 128], strides = [1, 1]} : vector<1x384xf32> to vector<1x128xf32>
    %540 = vector.extract_strided_slice %535 {offsets = [0, 256], sizes = [1, 128], strides = [1, 1]} : vector<1x384xf32> to vector<1x128xf32>
    %541 = arith.mulf %539, %523 : vector<1x128xf32>
    %542 = arith.mulf %538, %537 : vector<1x128xf32>
    %543 = arith.addf %541, %542 : vector<1x128xf32>
    %544 = math.tanh %543 : vector<1x128xf32>
    %545 = arith.mulf %540, %544 : vector<1x128xf32>
    %c7 = arith.constant 7 : index
    %c0_131 = arith.constant 0 : index
    %546 = vector.load %arg33[%c7, %c0_131] : memref<8x128xf32, #tpu.memory_space<vmem>>, vector<1x128xf32>
    tpu.vector_store %arg33[%c7, %c0_131], %545 {strides = array<i32>} : memref<8x128xf32, #tpu.memory_space<vmem>>, vector<1x128xf32>,
    %c2_132 = arith.constant 2 : index
    %c0_133 = arith.constant 0 : index
    %c0_134 = arith.constant 0 : index
    %547 = vector.load %arg31[%c2_132, %c0_133, %c0_134] : memref<3x1x128xf32, #tpu.memory_space<vmem>>, vector<1x1x128xf32>
    %548 = vector.shape_cast %547 : vector<1x1x128xf32> to vector<1x128xf32>
    %549 = vector.shape_cast %545 : vector<1x128xf32> to vector<1x1x128xf32>
    tpu.vector_store %arg31[%c2_132, %c0_133, %c0_134], %549 {strides = array<i32>} : memref<3x1x128xf32, #tpu.memory_space<vmem>>, vector<1x1x128xf32>,
    %c2_135 = arith.constant 2 : index
    %c0_136 = arith.constant 0 : index
    %c0_137 = arith.constant 0 : index
    %550 = vector.load %arg32[%c2_135, %c0_136, %c0_137] : memref<3x1x128xf32, #tpu.memory_space<vmem>>, vector<1x1x128xf32>
    %551 = vector.shape_cast %550 : vector<1x1x128xf32> to vector<1x128xf32>
    %552 = vector.shape_cast %543 : vector<1x128xf32> to vector<1x1x128xf32>
    tpu.vector_store %arg32[%c2_135, %c0_136, %c0_137], %552 {strides = array<i32>} : memref<3x1x128xf32, #tpu.memory_space<vmem>>, vector<1x1x128xf32>,
    %c0_i32_138 = arith.constant 0 : i32
    %553 = tpu.memref_slice %arg38[%c0_i32_138] : memref<4x!tpu.dma_semaphore, #tpu.memory_space<semaphore_mem>> -> memref<1x!tpu.dma_semaphore, #tpu.memory_space<semaphore_mem>>
    %554 = tpu.memref_squeeze %553 : memref<1x!tpu.dma_semaphore, #tpu.memory_space<semaphore_mem>> -> memref<!tpu.dma_semaphore, #tpu.memory_space<semaphore_mem>>
    tpu.wait_dma2 semaphore(%554 : memref<!tpu.dma_semaphore, #tpu.memory_space<semaphore_mem>>) src(%arg18 : memref<128x200xbf16, #tpu.memory_space<any>>) dst(%arg34 : memref<128x200xbf16, #tpu.memory_space<vmem>>)
    %c1_i32_139 = arith.constant 1 : i32
    %555 = tpu.memref_slice %arg38[%c1_i32_139] : memref<4x!tpu.dma_semaphore, #tpu.memory_space<semaphore_mem>> -> memref<1x!tpu.dma_semaphore, #tpu.memory_space<semaphore_mem>>
    %556 = tpu.memref_squeeze %555 : memref<1x!tpu.dma_semaphore, #tpu.memory_space<semaphore_mem>> -> memref<!tpu.dma_semaphore, #tpu.memory_space<semaphore_mem>>
    tpu.wait_dma2 semaphore(%556 : memref<!tpu.dma_semaphore, #tpu.memory_space<semaphore_mem>>) src(%arg19 : memref<200x500xbf16, #tpu.memory_space<any>>) dst(%arg35 : memref<200x500xbf16, #tpu.memory_space<vmem>>)
    %c2_i32_140 = arith.constant 2 : i32
    %557 = tpu.memref_slice %arg38[%c2_i32_140] : memref<4x!tpu.dma_semaphore, #tpu.memory_space<semaphore_mem>> -> memref<1x!tpu.dma_semaphore, #tpu.memory_space<semaphore_mem>>
    %558 = tpu.memref_squeeze %557 : memref<1x!tpu.dma_semaphore, #tpu.memory_space<semaphore_mem>> -> memref<!tpu.dma_semaphore, #tpu.memory_space<semaphore_mem>>
    tpu.wait_dma2 semaphore(%558 : memref<!tpu.dma_semaphore, #tpu.memory_space<semaphore_mem>>) src(%arg20 : memref<500x800xbf16, #tpu.memory_space<any>>) dst(%arg36 : memref<500x800xbf16, #tpu.memory_space<vmem>>)
    %c3_i32_141 = arith.constant 3 : i32
    %559 = tpu.memref_slice %arg38[%c3_i32_141] : memref<4x!tpu.dma_semaphore, #tpu.memory_space<semaphore_mem>> -> memref<1x!tpu.dma_semaphore, #tpu.memory_space<semaphore_mem>>
    %560 = tpu.memref_squeeze %559 : memref<1x!tpu.dma_semaphore, #tpu.memory_space<semaphore_mem>> -> memref<!tpu.dma_semaphore, #tpu.memory_space<semaphore_mem>>
    tpu.wait_dma2 semaphore(%560 : memref<!tpu.dma_semaphore, #tpu.memory_space<semaphore_mem>>) src(%arg21 : memref<800x64xbf16, #tpu.memory_space<any>>) dst(%arg37 : memref<800x64xbf16, #tpu.memory_space<vmem>>)
    %c0_142 = arith.constant 0 : index
    %c0_143 = arith.constant 0 : index
    %561 = vector.load %arg33[%c0_142, %c0_143] : memref<8x128xf32, #tpu.memory_space<vmem>>, vector<8x128xf32>
    %562 = arith.truncf %561 : vector<8x128xf32> to vector<8x128xbf16>
    %c0_144 = arith.constant 0 : index
    %c0_145 = arith.constant 0 : index
    %563 = vector.load %arg34[%c0_144, %c0_145] : memref<128x200xbf16, #tpu.memory_space<vmem>>, vector<128x200xbf16>
    %cst_146 = arith.constant dense<0.000000e+00> : vector<8x200xf32>
    %564 = tpu.matmul %562, %563, %cst_146 {dimension_numbers = #tpu.dot_dimension_numbers<[1], [0], [0], [1], [0, 0, 1, 1], [], []>} : vector<8x128xbf16>, vector<128x200xbf16>, vector<8x200xf32> -> vector<8x200xf32>
    %c0_147 = arith.constant 0 : index
    %c0_148 = arith.constant 0 : index
    %565 = vector.load %arg22[%c0_147, %c0_148] : memref<1x200xf32, #tpu.memory_space<vmem>>, vector<1x200xf32>
    %566 = vector.broadcast %565 : vector<1x200xf32> to vector<8x200xf32>
    %567 = arith.addf %564, %566 : vector<8x200xf32>
    %cst_149 = arith.constant 0.000000e+00 : f32
    %568 = vector.broadcast %cst_149 : f32 to vector<8x200xf32>
    %569 = arith.maximumf %567, %568 : vector<8x200xf32>
    %570 = arith.truncf %569 : vector<8x200xf32> to vector<8x200xbf16>
    %c0_150 = arith.constant 0 : index
    %c0_151 = arith.constant 0 : index
    %571 = vector.load %arg35[%c0_150, %c0_151] : memref<200x500xbf16, #tpu.memory_space<vmem>>, vector<200x500xbf16>
    %cst_152 = arith.constant dense<0.000000e+00> : vector<8x500xf32>
    %572 = tpu.matmul %570, %571, %cst_152 {dimension_numbers = #tpu.dot_dimension_numbers<[1], [0], [0], [1], [0, 0, 1, 1], [], []>} : vector<8x200xbf16>, vector<200x500xbf16>, vector<8x500xf32> -> vector<8x500xf32>
    %c0_153 = arith.constant 0 : index
    %c0_154 = arith.constant 0 : index
    %573 = vector.load %arg23[%c0_153, %c0_154] : memref<1x500xf32, #tpu.memory_space<vmem>>, vector<1x500xf32>
    %574 = vector.broadcast %573 : vector<1x500xf32> to vector<8x500xf32>
    %575 = arith.addf %572, %574 : vector<8x500xf32>
    %cst_155 = arith.constant 0.000000e+00 : f32
    %576 = vector.broadcast %cst_155 : f32 to vector<8x500xf32>
    %577 = arith.maximumf %575, %576 : vector<8x500xf32>
    %578 = arith.truncf %577 : vector<8x500xf32> to vector<8x500xbf16>
    %c0_156 = arith.constant 0 : index
    %c0_157 = arith.constant 0 : index
    %579 = vector.load %arg36[%c0_156, %c0_157] : memref<500x800xbf16, #tpu.memory_space<vmem>>, vector<500x800xbf16>
    %cst_158 = arith.constant dense<0.000000e+00> : vector<8x800xf32>
    %580 = tpu.matmul %578, %579, %cst_158 {dimension_numbers = #tpu.dot_dimension_numbers<[1], [0], [0], [1], [0, 0, 1, 1], [], []>} : vector<8x500xbf16>, vector<500x800xbf16>, vector<8x800xf32> -> vector<8x800xf32>
    %c0_159 = arith.constant 0 : index
    %c0_160 = arith.constant 0 : index
    %581 = vector.load %arg24[%c0_159, %c0_160] : memref<1x800xf32, #tpu.memory_space<vmem>>, vector<1x800xf32>
    %582 = vector.broadcast %581 : vector<1x800xf32> to vector<8x800xf32>
    %583 = arith.addf %580, %582 : vector<8x800xf32>
    %cst_161 = arith.constant 0.000000e+00 : f32
    %584 = vector.broadcast %cst_161 : f32 to vector<8x800xf32>
    %585 = arith.maximumf %583, %584 : vector<8x800xf32>
    %586 = arith.truncf %585 : vector<8x800xf32> to vector<8x800xbf16>
    %c0_162 = arith.constant 0 : index
    %c0_163 = arith.constant 0 : index
    %587 = vector.load %arg37[%c0_162, %c0_163] : memref<800x64xbf16, #tpu.memory_space<vmem>>, vector<800x64xbf16>
    %cst_164 = arith.constant dense<0.000000e+00> : vector<8x64xf32>
    %588 = tpu.matmul %586, %587, %cst_164 {dimension_numbers = #tpu.dot_dimension_numbers<[1], [0], [0], [1], [0, 0, 1, 1], [], []>} : vector<8x800xbf16>, vector<800x64xbf16>, vector<8x64xf32> -> vector<8x64xf32>
    %c0_165 = arith.constant 0 : index
    %c0_166 = arith.constant 0 : index
    %589 = vector.load %arg25[%c0_165, %c0_166] : memref<1x64xf32, #tpu.memory_space<vmem>>, vector<1x64xf32>
    %590 = vector.broadcast %589 : vector<1x64xf32> to vector<8x64xf32>
    %591 = arith.addf %588, %590 : vector<8x64xf32>
    %592 = arith.truncf %591 : vector<8x64xf32> to vector<8x64xbf16>
    %c0_167 = arith.constant 0 : index
    %c0_168 = arith.constant 0 : index
    %593 = vector.load %arg26[%c0_167, %c0_168] : memref<64x10xbf16, #tpu.memory_space<vmem>>, vector<64x10xbf16>
    %cst_169 = arith.constant dense<0.000000e+00> : vector<8x10xf32>
    %594 = tpu.matmul %592, %593, %cst_169 {dimension_numbers = #tpu.dot_dimension_numbers<[1], [0], [0], [1], [0, 0, 1, 1], [], []>} : vector<8x64xbf16>, vector<64x10xbf16>, vector<8x10xf32> -> vector<8x10xf32>
    %c0_170 = arith.constant 0 : index
    %c0_171 = arith.constant 0 : index
    %595 = vector.load %arg27[%c0_170, %c0_171] : memref<1x10xf32, #tpu.memory_space<vmem>>, vector<1x10xf32>
    %596 = vector.broadcast %595 : vector<1x10xf32> to vector<8x10xf32>
    %597 = arith.addf %594, %596 : vector<8x10xf32>
    %c0_172 = arith.constant 0 : index
    %c0_173 = arith.constant 0 : index
    %598 = vector.load %arg30[%c0_172, %c0_173] : memref<8x10xf32, #tpu.memory_space<vmem>>, vector<8x10xf32>
    tpu.vector_store %arg30[%c0_172, %c0_173], %597 {strides = array<i32>} : memref<8x10xf32, #tpu.memory_space<vmem>>, vector<8x10xf32>,
    return
  }
}

</mosaic_0001>

<bundles_post_ra>
// kernel: lstm_mvp_forward.1
= control target key start
LH: loop header
LB: loop body
LE: loop exit
PB: predicated region body
PF: predicated region fallthrough
CT: control target
= control target key end

     0   :  { %s16526_s6 = smov 1   ;;  %s16527_s10 = smov 2   ;;  %s19947_s0 = inlined_call_operand.smem [shape: u32[33], index: -1, kind: input, shape index: {}] }
   0x1   :  { %s16593_s5 = sld [smem:[%s19947_s0]]   ;;  %s16528_s14 = smov 3  }
   0x2   :  { %s16598_s9 = sld [smem:[%s19947_s0 + %s16526_s6]]   ;;  %s16529_s18 = smov 4  }
   0x3   :  { %s16603_s13 = sld [smem:[%s19947_s0 + %s16527_s10]]   ;;  %s16530_s22 = smov 5  }
   0x4   :  { %s16608_s17 = sld [smem:[%s19947_s0 + %s16528_s14]]   ;;  %s16531_s26 = smov 6  }
   0x5   :  { %s16613_s21 = sld [smem:[%s19947_s0 + %s16529_s18]]   ;;  %s16532_s30 = smov 7  }
   0x6   :  { %s16618_s25 = sld [smem:[%s19947_s0 + %s16530_s22]]   ;;  %s16533_s4 = smov 8  }
   0x7   :  { %20114 = sst [smem:[#allocation56_spill]] %s16593_s5  ;;  %s16534_s10 = smov 9  }
   0x8   :  { %s16623_s29 = sld [smem:[%s19947_s0 + %s16531_s26]]   ;;  %s16535_s15 = smov 10  }
   0x9   :  { %20115 = sst [smem:[#allocation57_spill]] %s16603_s13  ;;  %s16536_s20 = smov 11  }
   0xa   :  { %20116 = sst [smem:[#allocation58_spill]] %s16608_s17  ;;  %s16537_s26 = smov 12  }
   0xb   :  { %20117 = sst [smem:[#allocation59_spill]] %s16613_s21  ;;  %s16538_s1 = smov 13  }
   0xc   :  { %20118 = sst [smem:[#allocation60_spill]] %s16618_s25  ;;  %s16539_s7 = smov 14  }
   0xd   :  { %s16628_s3 = sld [smem:[%s19947_s0 + %s16532_s30]]   ;;  %s16541_s22 = smov 16  }
   0xe   :  { %s16633_s8 = sld [smem:[%s19947_s0 + %s16533_s4]]   ;;  %s16542_s28 = smov 17  }
   0xf   :  { %s16638_s14 = sld [smem:[%s19947_s0 + %s16534_s10]]  }
  0x10   :  { %s16643_s19 = sld [smem:[%s19947_s0 + %s16535_s15]]   ;;  %s16540_s15 = smov 15  }
  0x11   :  { %s16648_s24 = sld [smem:[%s19947_s0 + %s16536_s20]]  }
  0x12   :  { %s16653_s30 = sld [smem:[%s19947_s0 + %s16537_s26]]  }
  0x13   :  { %20119 = sst [smem:[#allocation61_spill]] %s16628_s3 }
  0x14   :  { %s16658_s6 = sld [smem:[%s19947_s0 + %s16538_s1]]  }
  0x15   :  { %20120 = sst [smem:[#allocation62_spill]] %s16638_s14 }
  0x16   :  { %s16663_s12 = sld [smem:[%s19947_s0 + %s16539_s7]]   ;;  %s16543_s7 = smov 18  }
  0x17   :  { %s16668_s20 = sld [smem:[%s19947_s0 + %s16540_s15]]   ;;  %s16544_s15 = smov 19  }
  0x18   :  { %s16673_s27 = sld [smem:[%s19947_s0 + %s16541_s22]]   ;;  %s16545_s22 = smov 20  }
  0x19   :  { %s16678_s4 = sld [smem:[%s19947_s0 + %s16542_s28]]   ;;  %s16546_s28 = smov 21  }
  0x1a   :  { %s16688_s14 = sld [smem:[%s19947_s0 + %s16544_s15]]   ;;  %s16548_s15 = smov 23  }
  0x1b   :  { %s16698_s21 = sld [smem:[%s19947_s0 + %s16546_s28]]   ;;  %s16550_s28 = smov 25  }
  0x1c   :  { %20121 = sst [smem:[#allocation63_spill]] %s16663_s12 }
  0x1d   :  { %s16683_s12 = sld [smem:[%s19947_s0 + %s16543_s7]]   ;;  %s16547_s7 = smov 22  }
  0x1e   :  { %20122 = sst [smem:[#allocation64_spill]] %s16673_s27 }
  0x1f   :  { %s16693_s27 = sld [smem:[%s19947_s0 + %s16545_s22]]   ;;  %s16549_s22 = smov 24  }
  0x20   :  { %20124 = sst [smem:[#allocation66_spill]] %s16688_s14 }
  0x21   :  { %20126 = sst [smem:[#allocation68_spill]] %s16698_s21 }
  0x22   :  { %s16703_s3 = sld [smem:[%s19947_s0 + %s16547_s7]]   ;;  %s16551_s7 = smov 26  }
  0x23   :  { %20123 = sst [smem:[#allocation65_spill]] %s16683_s12 }
  0x24   :  { %s16708_s25 = sld [smem:[%s19947_s0 + %s16548_s15]]   ;;  %s16552_s15 = smov 27  }
  0x25   :  { %20125 = sst [smem:[#allocation67_spill]] %s16693_s27 }
  0x26   :  { %s16713_s13 = sld [smem:[%s19947_s0 + %s16549_s22]]   ;;  %s16553_s22 = smov 28  }
  0x27   :  { %s16718_s17 = sld [smem:[%s19947_s0 + %s16550_s28]]   ;;  %s16554_s28 = smov 29  }
  0x28   :  { %s16723_s5 = sld [smem:[%s19947_s0 + %s16551_s7]]   ;;  %s16555_s7 = smov 30  }
  0x29   :  { %s16728_s21 = sld [smem:[%s19947_s0 + %s16552_s15]]   ;;  %s16556_s15 = smov 31  }
  0x2a   :  { %s16733_s14 = sld [smem:[%s19947_s0 + %s16553_s22]]   ;;  %s16557_s22 = smov 32  }
  0x2b   :  { %s16738_s27 = sld [smem:[%s19947_s0 + %s16554_s28]]  }
  0x2c   :  { %s16748_s12 = sld [smem:[%s19947_s0 + %s16556_s15]]  }
  0x2e   :  { %20127 = sst [smem:[#allocation69_spill]] %s16723_s5 }
  0x2f   :  { %s16743_s5 = sld [smem:[%s19947_s0 + %s16555_s7]]  }
  0x30   :  { %20128 = sst [smem:[#allocation70_spill]] %s16733_s14 }
  0x31   :  { %s16753_s14 = sld [smem:[%s19947_s0 + %s16557_s22]]  }
  0x32   :  { %71 = vsyncpa [#allocation9], 0 }
  0x33   :  { %72 = vsyncpa [#allocation12], 0 }
  0x34   :  { %73 = vsyncpa [#allocation15], 0 }
  0x35   :  { %74 = vsyncpa [#allocation18], 0 }
  0x36   :  { %75 = vsyncpa [#allocation21], 0 }
  0x37   :  { %76 = vsyncpa [#allocation24], 0 }
  0x38   :  { %77 = vsyncpa [#allocation27], 0 }
  0x39   :  { %78 = vsyncpa [#allocation30], 0 }
  0x3a   :  { %79 = vsyncpa [#allocation10], 0 }
  0x3b   :  { %80 = vsyncpa [#allocation33], 0  ;;  %s16558_s28 = smov [#allocation11]   ;;  %s16559_s2 = smov [#allocation14]  }
  0x3c   :  { %s109_s1 = sshll.u32 %s16558_s28, 4  ;;  %s133_s7 = sshll.u32 %s16559_s2, 4  ;;  %s110_s1 = int_to_ptr.vmem [resolvable:$true] %s109_s1  ;;  %s134_s7 = int_to_ptr.vmem [resolvable:$true] %s133_s7 }
  0x3d   :  { %s16102_s0 = scalar_lea.hbm %s16623_s29, 32 }
  0x3e   :  { %p16103_p0 = scmp.ne.s32.totalorder %s16623_s29, %s16102_s0  ;;  %p16106_p1 = scmp.lt.u32.totalorder %s16102_s0, %s16623_s29 }
  0x40   :  { %p16108_p2 = pnand %p16106_p1, %p16103_p0 }
  0x42   :  { %16111 = shalt.err (!%p16108_p2)
}
  0x43   :  { %s16112_s10 = scalar_lea.vmem %s110_s1, 32  ;;  %p16117_p4 = scmp.lt.s32.totalorder %s110_s1, %s110_s1 }
  0x44   :  { %p16113_p3 = scmp.ne.s32.totalorder %s110_s1, %s16112_s10  ;;  %p16118_p5 = scmp.lt.s32.totalorder %s16112_s10, %s16112_s10 }
  0x46   :  { %p16119_p6 = por %p16118_p5, %p16117_p4 }
  0x48   :  { %p16120_p7 = pnand %p16119_p6, %p16113_p3 }
  0x4a   :  { %16123 = shalt.err (!%p16120_p7)
}
  0x4b   :  { %112 = dma.hbm_to_vmem [thread:$0]  %s16623_s29, 32, %s110_s1, [#allocation12]  }
  0x4c   :  { %s16124_s11 = scalar_lea.hbm %s16643_s19, 16 }
  0x4d   :  { %p16125_p8 = scmp.ne.s32.totalorder %s16643_s19, %s16124_s11  ;;  %p16128_p9 = scmp.lt.u32.totalorder %s16124_s11, %s16643_s19 }
  0x4f   :  { %p16130_p10 = pnand %p16128_p9, %p16125_p8 }
  0x51   :  { %16133 = shalt.err (!%p16130_p10)
}
  0x52   :  { %s16134_s15 = scalar_lea.vmem %s134_s7, 16  ;;  %s16138_s16 = scalar_lea.vmem %s134_s7, 32 }
  0x53   :  { %p16135_p11 = scmp.ne.s32.totalorder %s134_s7, %s16134_s15  ;;  %p16139_p12 = scmp.lt.s32.totalorder %s134_s7, %s134_s7 }
  0x54   :  { %p16140_p13 = scmp.lt.s32.totalorder %s16138_s16, %s16134_s15 }
  0x56   :  { %p16141_p0 = por %p16140_p13, %p16139_p12 }
  0x58   :  { %p16142_p1 = pnand %p16141_p0, %p16135_p11 }
  0x5a   :  { %16145 = shalt.err (!%p16142_p1)
}
  0x5b   :  { %136 = dma.hbm_to_vmem [thread:$0]  %s16643_s19, 16, %s134_s7, [#allocation15]  }
  0x5c   :  { %s16560_s18 = smov [#allocation17]   ;;  %s16561_s22 = smov [#allocation20]  }
  0x5d   :  { %s154_s29 = sshll.u32 %s16560_s18, 4  ;;  %s179_s23 = sshll.u32 %s16561_s22, 4  ;;  %s155_s29 = int_to_ptr.vmem [resolvable:$true] %s154_s29  ;;  %s180_s23 = int_to_ptr.vmem [resolvable:$true] %s179_s23 }
  0x5e   :  { %s16146_s26 = scalar_lea.hbm %s16653_s30, 8192 }
  0x5f   :  { %p16147_p2 = scmp.ne.s32.totalorder %s16653_s30, %s16146_s26  ;;  %p16150_p3 = scmp.lt.u32.totalorder %s16146_s26, %s16653_s30 }
  0x61   :  { %p16152_p4 = pnand %p16150_p3, %p16147_p2 }
  0x63   :  { %16155 = shalt.err (!%p16152_p4)
}
  0x64   :  { %s16156_s28 = scalar_lea.vmem %s155_s29, 8192  ;;  %p16161_p6 = scmp.lt.s32.totalorder %s155_s29, %s155_s29 }
  0x65   :  { %p16157_p5 = scmp.ne.s32.totalorder %s155_s29, %s16156_s28  ;;  %p16162_p7 = scmp.lt.s32.totalorder %s16156_s28, %s16156_s28 }
  0x67   :  { %p16163_p8 = por %p16162_p7, %p16161_p6 }
  0x69   :  { %p16164_p9 = pnand %p16163_p8, %p16157_p5 }
  0x6b   :  { %16167 = shalt.err (!%p16164_p9)
}
  0x6c   :  { %s16562_s1 = smov 512   ;;  %s16563_s19 = smov 32  }
  0x6d   :  { %160 = dma.hbm_to_vmem [thread:$0]  %s16653_s30, 8192, %s155_s29, [#allocation18], %s16562_s1, %s16562_s1, %s16563_s19  }
  0x6e   :  { %s16168_s2 = scalar_lea.hbm %s16668_s20, 64 }
  0x6f   :  { %p16169_p10 = scmp.ne.s32.totalorder %s16668_s20, %s16168_s2  ;;  %p16172_p11 = scmp.lt.u32.totalorder %s16168_s2, %s16668_s20 }
  0x71   :  { %p16174_p12 = pnand %p16172_p11, %p16169_p10 }
  0x73   :  { %16177 = shalt.err (!%p16174_p12)
}
  0x74   :  { %s16178_s7 = scalar_lea.vmem %s180_s23, 64  ;;  %p16183_p0 = scmp.lt.s32.totalorder %s180_s23, %s180_s23 }
  0x75   :  { %p16179_p13 = scmp.ne.s32.totalorder %s180_s23, %s16178_s7  ;;  %p16184_p1 = scmp.lt.s32.totalorder %s16178_s7, %s16178_s7 }
  0x77   :  { %p16185_p2 = por %p16184_p1, %p16183_p0 }
  0x79   :  { %p16186_p3 = pnand %p16185_p2, %p16179_p13 }
  0x7b   :  { %16189 = shalt.err (!%p16186_p3)
}
  0x7c   :  { %182 = dma.hbm_to_vmem [thread:$0]  %s16668_s20, 64, %s180_s23, [#allocation21]  }
  0x7d   :  { %s16564_s0 = smov [#allocation23]   ;;  %s16565_s30 = smov [#allocation26]  }
  0x7e   :  { %s201_s10 = sshll.u32 %s16564_s0, 4  ;;  %s221_s11 = sshll.u32 %s16565_s30, 4  ;;  %s202_s10 = int_to_ptr.vmem [resolvable:$true] %s201_s10  ;;  %s222_s11 = int_to_ptr.vmem [resolvable:$true] %s221_s11 }
  0x7f   :  { %s16190_s15 = scalar_lea.hbm %s16703_s3, 32 }
  0x80   :  { %p16191_p4 = scmp.ne.s32.totalorder %s16703_s3, %s16190_s15  ;;  %p16194_p5 = scmp.lt.u32.totalorder %s16190_s15, %s16703_s3 }
  0x82   :  { %p16196_p6 = pnand %p16194_p5, %p16191_p4 }
  0x84   :  { %16199 = shalt.err (!%p16196_p6)
}
  0x85   :  { %s16200_s16 = scalar_lea.vmem %s202_s10, 32  ;;  %p16205_p8 = scmp.lt.s32.totalorder %s202_s10, %s202_s10 }
  0x86   :  { %p16201_p7 = scmp.ne.s32.totalorder %s202_s10, %s16200_s16  ;;  %p16206_p9 = scmp.lt.s32.totalorder %s16200_s16, %s16200_s16 }
  0x88   :  { %p16207_p10 = por %p16206_p9, %p16205_p8 }
  0x8a   :  { %p16208_p11 = pnand %p16207_p10, %p16201_p7 }
  0x8c   :  { %16211 = shalt.err (!%p16208_p11)
}
  0x8d   :  { %204 = dma.hbm_to_vmem [thread:$0]  %s16703_s3, 32, %s202_s10, [#allocation24]  }
  0x8e   :  { %s16212_s20 = scalar_lea.hbm %s16713_s13, 112 }
  0x8f   :  { %p16213_p12 = scmp.ne.s32.totalorder %s16713_s13, %s16212_s20  ;;  %p16216_p13 = scmp.lt.u32.totalorder %s16212_s20, %s16713_s13 }
  0x91   :  { %p16218_p0 = pnand %p16216_p13, %p16213_p12 }
  0x93   :  { %16221 = shalt.err (!%p16218_p0)
}
  0x94   :  { %s16222_s18 = scalar_lea.vmem %s222_s11, 112  ;;  %s16226_s29 = scalar_lea.vmem %s222_s11, 128 }
  0x95   :  { %p16223_p1 = scmp.ne.s32.totalorder %s222_s11, %s16222_s18  ;;  %p16227_p2 = scmp.lt.s32.totalorder %s222_s11, %s222_s11 }
  0x96   :  { %p16228_p3 = scmp.lt.s32.totalorder %s16226_s29, %s16222_s18 }
  0x98   :  { %p16229_p4 = por %p16228_p3, %p16227_p2 }
  0x9a   :  { %p16230_p5 = pnand %p16229_p4, %p16223_p1 }
  0x9c   :  { %16233 = shalt.err (!%p16230_p5)
}
  0x9d   :  { %224 = dma.hbm_to_vmem [thread:$0]  %s16713_s13, 112, %s222_s11, [#allocation27]  }
  0x9e   :  { %s16566_s22 = smov [#allocation8]   ;;  %s16234_s23 = scalar_lea.hbm %s16598_s9, 3584 }
  0x9f   :  { %s88_s3 = sshll.u32 %s16566_s22, 4  ;;  %p16235_p6 = scmp.ne.s32.totalorder %s16598_s9, %s16234_s23  ;;  %s89_s3 = int_to_ptr.vmem [resolvable:$true] %s88_s3 }
  0xa0   :  { %p16238_p7 = scmp.lt.u32.totalorder %s16234_s23, %s16598_s9 }
  0xa2   :  { %p16240_p8 = pnand %p16238_p7, %p16235_p6 }
  0xa4   :  { %16243 = shalt.err (!%p16240_p8)
}
  0xa5   :  { %s16244_s26 = scalar_lea.vmem %s89_s3, 3584  ;;  %p16249_p10 = scmp.lt.s32.totalorder %s89_s3, %s89_s3 }
  0xa6   :  { %p16245_p9 = scmp.ne.s32.totalorder %s89_s3, %s16244_s26  ;;  %p16250_p11 = scmp.lt.s32.totalorder %s16244_s26, %s16244_s26 }
  0xa8   :  { %p16251_p12 = por %p16250_p11, %p16249_p10 }
  0xaa   :  { %p16252_p13 = pnand %p16251_p12, %p16245_p9 }
  0xac   :  { %16255 = shalt.err (!%p16252_p13)
}
  0xad   :  { %s16567_s28 = smov 448   ;;  %s16568_s13 = smov 28  }
  0xae   :  { %94 = dma.hbm_to_vmem [thread:$0]  %s16598_s9, 3584, %s89_s3, [#allocation9], %s16567_s28, %s16567_s28, %s16568_s13  }
  0xaf   :  { %s16569_s2 = smov [#allocation13]   ;;  %s16570_s0 = smov [#allocation16]  }
  0xb0   :  { %s121_s7 = sshll.u32 %s16569_s2, 4  ;;  %s142_s10 = sshll.u32 %s16570_s0, 4  ;;  %s122_s7 = int_to_ptr.vmem [resolvable:$true] %s121_s7  ;;  %s143_s10 = int_to_ptr.vmem [resolvable:$true] %s142_s10 }
  0xb1   :  { %s16256_s30 = scalar_lea.hbm %s16633_s8, 16 }
  0xb2   :  { %p16257_p0 = scmp.ne.s32.totalorder %s16633_s8, %s16256_s30  ;;  %p16260_p1 = scmp.lt.u32.totalorder %s16256_s30, %s16633_s8 }
  0xb4   :  { %p16262_p2 = pnand %p16260_p1, %p16257_p0 }
  0xb6   :  { %16265 = shalt.err (!%p16262_p2)
}
  0xb7   :  { %s16266_s11 = scalar_lea.vmem %s122_s7, 16  ;;  %s16270_s15 = scalar_lea.vmem %s122_s7, 32 }
  0xb8   :  { %p16267_p3 = scmp.ne.s32.totalorder %s122_s7, %s16266_s11  ;;  %p16271_p4 = scmp.lt.s32.totalorder %s122_s7, %s122_s7 }
  0xb9   :  { %p16272_p5 = scmp.lt.s32.totalorder %s16270_s15, %s16266_s11 }
  0xbb   :  { %p16273_p6 = por %p16272_p5, %p16271_p4 }
  0xbd   :  { %p16274_p7 = pnand %p16273_p6, %p16267_p3 }
  0xbf   :  { %16277 = shalt.err (!%p16274_p7)
}
  0xc0   :  { %124 = dma.hbm_to_vmem [thread:$0]  %s16633_s8, 16, %s122_s7, [#allocation12]  }
  0xc1   :  { %s16278_s9 = scalar_lea.hbm %s16648_s24, 1536 }
  0xc2   :  { %p16279_p8 = scmp.ne.s32.totalorder %s16648_s24, %s16278_s9  ;;  %p16282_p9 = scmp.lt.u32.totalorder %s16278_s9, %s16648_s24 }
  0xc4   :  { %p16284_p10 = pnand %p16282_p9, %p16279_p8 }
  0xc6   :  { %16287 = shalt.err (!%p16284_p10)
}
  0xc7   :  { %s16288_s16 = scalar_lea.vmem %s143_s10, 1536  ;;  %p16293_p12 = scmp.lt.s32.totalorder %s143_s10, %s143_s10 }
  0xc8   :  { %p16289_p11 = scmp.ne.s32.totalorder %s143_s10, %s16288_s16  ;;  %p16294_p13 = scmp.lt.s32.totalorder %s16288_s16, %s16288_s16 }
  0xca   :  { %p16295_p0 = por %p16294_p13, %p16293_p12 }
  0xcc   :  { %p16296_p1 = pnand %p16295_p0, %p16289_p11 }
  0xce   :  { %16299 = shalt.err (!%p16296_p1)
}
  0xcf   :  { %148 = dma.hbm_to_vmem [thread:$0]  %s16648_s24, 1536, %s143_s10, [#allocation15], %s16562_s1, %s16562_s1, %s16563_s19  }
  0xd0   :  { %s16571_s8 = smov [#allocation19]   ;;  %s16572_s18 = smov [#allocation22]  }
  0xd1   :  { %s167_s20 = sshll.u32 %s16571_s8, 4  ;;  %s191_s29 = sshll.u32 %s16572_s18, 4  ;;  %s168_s20 = int_to_ptr.vmem [resolvable:$true] %s167_s20  ;;  %s192_s29 = int_to_ptr.vmem [resolvable:$true] %s191_s29 }
  0xd2   :  { %s16300_s22 = scalar_lea.hbm %s16658_s6, 64 }
  0xd3   :  { %p16301_p2 = scmp.ne.s32.totalorder %s16658_s6, %s16300_s22  ;;  %p16304_p3 = scmp.lt.u32.totalorder %s16300_s22, %s16658_s6 }
  0xd5   :  { %p16306_p4 = pnand %p16304_p3, %p16301_p2 }
  0xd7   :  { %16309 = shalt.err (!%p16306_p4)
}
  0xd8   :  { %s16310_s3 = scalar_lea.vmem %s168_s20, 64  ;;  %p16315_p6 = scmp.lt.s32.totalorder %s168_s20, %s168_s20 }
  0xd9   :  { %p16311_p5 = scmp.ne.s32.totalorder %s168_s20, %s16310_s3  ;;  %p16316_p7 = scmp.lt.s32.totalorder %s16310_s3, %s16310_s3 }
  0xdb   :  { %p16317_p8 = por %p16316_p7, %p16315_p6 }
  0xdd   :  { %p16318_p9 = pnand %p16317_p8, %p16311_p5 }
  0xdf   :  { %16321 = shalt.err (!%p16318_p9)
}
  0xe0   :  { %170 = dma.hbm_to_vmem [thread:$0]  %s16658_s6, 64, %s168_s20, [#allocation18]  }
  0xe1   :  { %s16322_s24 = scalar_lea.hbm %s16678_s4, 64 }
  0xe2   :  { %p16323_p10 = scmp.ne.s32.totalorder %s16678_s4, %s16322_s24  ;;  %p16326_p11 = scmp.lt.u32.totalorder %s16322_s24, %s16678_s4 }
  0xe4   :  { %p16328_p12 = pnand %p16326_p11, %p16323_p10 }
  0xe6   :  { %16331 = shalt.err (!%p16328_p12)
}
  0xe7   :  { %s16332_s1 = scalar_lea.vmem %s192_s29, 64  ;;  %p16337_p0 = scmp.lt.s32.totalorder %s192_s29, %s192_s29 }
  0xe8   :  { %p16333_p13 = scmp.ne.s32.totalorder %s192_s29, %s16332_s1  ;;  %p16338_p1 = scmp.lt.s32.totalorder %s16332_s1, %s16332_s1 }
  0xea   :  { %p16339_p2 = por %p16338_p1, %p16337_p0 }
  0xec   :  { %p16340_p3 = pnand %p16339_p2, %p16333_p13 }
  0xee   :  { %16343 = shalt.err (!%p16340_p3)
}
  0xef   :  { %194 = dma.hbm_to_vmem [thread:$0]  %s16678_s4, 64, %s192_s29, [#allocation21]  }
  0xf0   :  { %s16573_s19 = smov [#allocation25]   ;;  %s16574_s23 = smov [#allocation28]  }
  0xf1   :  { %s211_s6 = sshll.u32 %s16573_s19, 4  ;;  %s231_s26 = sshll.u32 %s16574_s23, 4  ;;  %s212_s6 = int_to_ptr.vmem [resolvable:$true] %s211_s6  ;;  %s232_s26 = int_to_ptr.vmem [resolvable:$true] %s231_s26 }
  0xf2   :  { %s16344_s28 = scalar_lea.hbm %s16708_s25, 64 }
  0xf3   :  { %p16345_p4 = scmp.ne.s32.totalorder %s16708_s25, %s16344_s28  ;;  %p16348_p5 = scmp.lt.u32.totalorder %s16344_s28, %s16708_s25 }
  0xf5   :  { %p16350_p6 = pnand %p16348_p5, %p16345_p4 }
  0xf7   :  { %16353 = shalt.err (!%p16350_p6)
}
  0xf8   :  { %s16354_s13 = scalar_lea.vmem %s212_s6, 64  ;;  %p16359_p8 = scmp.lt.s32.totalorder %s212_s6, %s212_s6 }
  0xf9   :  { %p16355_p7 = scmp.ne.s32.totalorder %s212_s6, %s16354_s13  ;;  %p16360_p9 = scmp.lt.s32.totalorder %s16354_s13, %s16354_s13 }
  0xfb   :  { %p16361_p10 = por %p16360_p9, %p16359_p8 }
  0xfd   :  { %p16362_p11 = pnand %p16361_p10, %p16355_p7 }
  0xff   :  { %16365 = shalt.err (!%p16362_p11)
}
 0x100   :  { %214 = dma.hbm_to_vmem [thread:$0]  %s16708_s25, 64, %s212_s6, [#allocation24]  }
 0x101   :  { %s16366_s4 = scalar_lea.hbm %s16718_s17, 16 }
 0x102   :  { %p16367_p12 = scmp.ne.s32.totalorder %s16718_s17, %s16366_s4  ;;  %p16370_p13 = scmp.lt.u32.totalorder %s16366_s4, %s16718_s17 }
 0x104   :  { %p16372_p0 = pnand %p16370_p13, %p16367_p12 }
 0x106   :  { %16375 = shalt.err (!%p16372_p0)
}
 0x107   :  { %s16376_s2 = scalar_lea.vmem %s232_s26, 16  ;;  %s16380_s7 = scalar_lea.vmem %s232_s26, 32 }
 0x108   :  { %p16377_p1 = scmp.ne.s32.totalorder %s232_s26, %s16376_s2  ;;  %p16381_p2 = scmp.lt.s32.totalorder %s232_s26, %s232_s26 }
 0x109   :  { %p16382_p3 = scmp.lt.s32.totalorder %s16380_s7, %s16376_s2 }
 0x10b   :  { %p16383_p4 = por %p16382_p3, %p16381_p2 }
 0x10d   :  { %p16384_p5 = pnand %p16383_p4, %p16377_p1 }
 0x10f   :  { %16387 = shalt.err (!%p16384_p5)
}
 0x110   :  { %234 = dma.hbm_to_vmem [thread:$0]  %s16718_s17, 16, %s232_s26, [#allocation27]  }
 0x111   :  { %s16575_s25 = smov [#allocation29]   ;;  %s16388_s10 = scalar_lea.hbm %s16728_s21, 16 }
 0x112   :  { %s243_s0 = sshll.u32 %s16575_s25, 4  ;;  %p16389_p6 = scmp.ne.s32.totalorder %s16728_s21, %s16388_s10  ;;  %s244_s0 = int_to_ptr.vmem [resolvable:$true] %s243_s0 }
 0x113   :  { %p16392_p7 = scmp.lt.u32.totalorder %s16388_s10, %s16728_s21 }
 0x115   :  { %p16394_p8 = pnand %p16392_p7, %p16389_p6 }
 0x117   :  { %16397 = shalt.err (!%p16394_p8)
}
 0x118   :  { %s16398_s30 = scalar_lea.vmem %s244_s0, 16  ;;  %s16402_s11 = scalar_lea.vmem %s244_s0, 32 }
 0x119   :  { %p16399_p9 = scmp.ne.s32.totalorder %s244_s0, %s16398_s30  ;;  %p16403_p10 = scmp.lt.s32.totalorder %s244_s0, %s244_s0 }
 0x11a   :  { %p16404_p11 = scmp.lt.s32.totalorder %s16402_s11, %s16398_s30 }
 0x11c   :  { %p16405_p12 = por %p16404_p11, %p16403_p10 }
 0x11e   :  { %p16406_p13 = pnand %p16405_p12, %p16399_p9 }
 0x120   :  { %16409 = shalt.err (!%p16406_p13)
}
 0x121   :  { %246 = dma.hbm_to_vmem [thread:$0]  %s16728_s21, 16, %s244_s0, [#allocation30]  }
 0x122   :  { %16498 = dma.done.wait [#allocation9], 3584  }
 0x123   :  { %16499 = vsyncadd [#allocation9], 4294963712 }
 0x124   :  { %16500 = dma.done.wait [#allocation12], 48  }
 0x125   :  { %16501 = vsyncadd [#allocation12], 4294967248 }
 0x126   :  { %16502 = dma.done.wait [#allocation15], 1552  }
 0x127   :  { %16503 = vsyncadd [#allocation15], 4294965744 }
 0x128   :  { %16504 = dma.done.wait [#allocation18], 8256  }
 0x129   :  { %16505 = vsyncadd [#allocation18], 4294959040 }
 0x12a   :  { %16506 = dma.done.wait [#allocation21], 128  }
 0x12b   :  { %16507 = vsyncadd [#allocation21], 4294967168 }
 0x12c   :  { %16508 = dma.done.wait [#allocation24], 96  }
 0x12d   :  { %16509 = vsyncadd [#allocation24], 4294967200 }
 0x12e   :  { %16510 = dma.done.wait [#allocation27], 128  }
 0x12f   :  { %16511 = vsyncadd [#allocation27], 4294967168 }
 0x130   :  { %16512 = dma.done.wait [#allocation30], 16  }
 0x131   :  { %16513 = vsyncadd [#allocation30], 4294967280  ;;  %s20129_s17 = sld [smem:[#allocation65_spill]] }
 0x137   :  { %v311_v0 = vld [vmem:[%s20129_s17] sm:$0xf]  ;;  %v313_v1 = vld [vmem:[%s20129_s17 + $0x8] sm:$0xf]  ;;  %v315_v2 = vld [vmem:[%s20129_s17 + $0x4] sm:$0xf] }
 0x138   :  { %312 = vst [vmem:[#allocation3] sm:$0xf] %v311_v0  ;;  %314 = vst [vmem:[#allocation3 + $0x4] sm:$0xf] %v313_v1  ;;  %v317_v3 = vld [vmem:[%s20129_s17 + $0xc] sm:$0xf] }
 0x139   :  { %316 = vst [vmem:[#allocation3 + $0x8] sm:$0xf] %v315_v2  ;;  %v319_v4 = vld [vmem:[%s20129_s17 + $0x10] sm:$0xf]  ;;  %v321_v5 = vld [vmem:[%s20129_s17 + $0x18] sm:$0xf] }
 0x13a   :  { %318 = vst [vmem:[#allocation3 + $0xc] sm:$0xf] %v317_v3  ;;  %320 = vst [vmem:[#allocation3 + $0x10] sm:$0xf] %v319_v4  ;;  %v323_v6 = vld [vmem:[%s20129_s17 + $0x14] sm:$0xf] }
 0x13b   :  { %322 = vst [vmem:[#allocation3 + $0x14] sm:$0xf] %v321_v5  ;;  %v325_v7 = vld [vmem:[%s20129_s17 + $0x1c] sm:$0xf]  ;;  %v327_v8 = vld [vmem:[%s20129_s17 + $0x20] sm:$0xf] }
 0x13c   :  { %324 = vst [vmem:[#allocation3 + $0x18] sm:$0xf] %v323_v6  ;;  %326 = vst [vmem:[#allocation3 + $0x1c] sm:$0xf] %v325_v7  ;;  %v329_v9 = vld [vmem:[%s20129_s17 + $0x28] sm:$0xf] }
 0x13d   :  { %328 = vst [vmem:[#allocation3 + $0x20] sm:$0xf] %v327_v8  ;;  %v331_v10 = vld [vmem:[%s20129_s17 + $0x24] sm:$0xf]  ;;  %v333_v11 = vld [vmem:[%s20129_s17 + $0x2c] sm:$0xf] }
 0x13e   :  { %330 = vst [vmem:[#allocation3 + $0x24] sm:$0xf] %v329_v9  ;;  %332 = vst [vmem:[#allocation3 + $0x28] sm:$0xf] %v331_v10  ;;  %v335_v12 = vld [vmem:[%s20129_s17 + $0x30] sm:$0xf] }
 0x13f   :  { %334 = vst [vmem:[#allocation3 + $0x2c] sm:$0xf] %v333_v11  ;;  %v337_v13 = vld [vmem:[%s20129_s17 + $0x38] sm:$0xf]  ;;  %v339_v14 = vld [vmem:[%s20129_s17 + $0x34] sm:$0xf] }
 0x140   :  { %336 = vst [vmem:[#allocation3 + $0x30] sm:$0xf] %v335_v12  ;;  %338 = vst [vmem:[#allocation3 + $0x34] sm:$0xf] %v337_v13  ;;  %v341_v15 = vld [vmem:[%s20129_s17 + $0x3c] sm:$0xf] }
 0x141   :  { %340 = vst [vmem:[#allocation3 + $0x38] sm:$0xf] %v339_v14  ;;  %v343_v16 = vld [vmem:[%s20129_s17 + $0x40] sm:$0xf]  ;;  %v345_v17 = vld [vmem:[%s20129_s17 + $0x48] sm:$0xf] }
 0x142   :  { %342 = vst [vmem:[#allocation3 + $0x3c] sm:$0xf] %v341_v15  ;;  %344 = vst [vmem:[#allocation3 + $0x40] sm:$0xf] %v343_v16  ;;  %v347_v18 = vld [vmem:[%s20129_s17 + $0x44] sm:$0xf] }
 0x143   :  { %346 = vst [vmem:[#allocation3 + $0x44] sm:$0xf] %v345_v17  ;;  %v349_v19 = vld [vmem:[%s20129_s17 + $0x4c] sm:$0xf]  ;;  %v351_v20 = vld [vmem:[%s20129_s17 + $0x50] sm:$0xf] }
 0x144   :  { %348 = vst [vmem:[#allocation3 + $0x48] sm:$0xf] %v347_v18  ;;  %350 = vst [vmem:[#allocation3 + $0x4c] sm:$0xf] %v349_v19  ;;  %v353_v21 = vld [vmem:[%s20129_s17 + $0x58] sm:$0xf] }
 0x145   :  { %352 = vst [vmem:[#allocation3 + $0x50] sm:$0xf] %v351_v20  ;;  %v355_v22 = vld [vmem:[%s20129_s17 + $0x54] sm:$0xf]  ;;  %v357_v23 = vld [vmem:[%s20129_s17 + $0x5c] sm:$0xf] }
 0x146   :  { %354 = vst [vmem:[#allocation3 + $0x54] sm:$0xf] %v353_v21  ;;  %356 = vst [vmem:[#allocation3 + $0x58] sm:$0xf] %v355_v22  ;;  %v359_v24 = vld [vmem:[%s20129_s17 + $0x60] sm:$0xf] }
 0x147   :  { %358 = vst [vmem:[#allocation3 + $0x5c] sm:$0xf] %v357_v23  ;;  %v361_v25 = vld [vmem:[%s20129_s17 + $0x68] sm:$0xf]  ;;  %v363_v26 = vld [vmem:[%s20129_s17 + $0x64] sm:$0xf] }
 0x148   :  { %360 = vst [vmem:[#allocation3 + $0x60] sm:$0xf] %v359_v24  ;;  %362 = vst [vmem:[#allocation3 + $0x64] sm:$0xf] %v361_v25  ;;  %v365_v27 = vld [vmem:[%s20129_s17 + $0x6c] sm:$0xf] }
 0x149   :  { %364 = vst [vmem:[#allocation3 + $0x68] sm:$0xf] %v363_v26  ;;  %v367_v28 = vld [vmem:[%s20129_s17 + $0x70] sm:$0xf]  ;;  %v369_v29 = vld [vmem:[%s20129_s17 + $0x78] sm:$0xf] }
 0x14a   :  { %366 = vst [vmem:[#allocation3 + $0x6c] sm:$0xf] %v365_v27  ;;  %368 = vst [vmem:[#allocation3 + $0x70] sm:$0xf] %v367_v28  ;;  %v371_v30 = vld [vmem:[%s20129_s17 + $0x74] sm:$0xf] }
 0x14b   :  { %370 = vst [vmem:[#allocation3 + $0x74] sm:$0xf] %v369_v29  ;;  %v373_v31 = vld [vmem:[%s20129_s17 + $0x7c] sm:$0xf]  ;;  %372 = vst [vmem:[#allocation3 + $0x78] sm:$0xf] %v371_v30 }
 0x14c   :  { %374 = vst [vmem:[#allocation3 + $0x7c] sm:$0xf] %v373_v31 }
 0x14d   :  { %469 = vsyncadd [#allocation7], 2048  ;;  %s20130_s21 = sld [smem:[#allocation67_spill]]  ;;  %s20131_s15 = sld [smem:[#allocation66_spill]] }
 0x14e   :  { %s16576_s9 = smov [#allocation4]  }
 0x14f   :  { %s478_s16 = sshll.u32 %s16576_s9, 4  ;;  %s479_s16 = int_to_ptr.vmem [resolvable:$true] %s478_s16 }
 0x153   :  { %v520_v32 = vld [vmem:[%s20130_s21] sm:$0xff]  ;;  %v522_v33 = vld [vmem:[%s20130_s21 + $0x8] sm:$0xff]  ;;  %v524_v34 = vld [vmem:[%s20130_s21 + $0x10] sm:$0xff]  ;;  %s16410_s8 = scalar_lea.hbm %s20131_s15, 6400 }
 0x154   :  { %521 = vst [vmem:[#allocation5] sm:$0xff] %v520_v32  ;;  %523 = vst [vmem:[#allocation5 + $0x8] sm:$0xff] %v522_v33  ;;  %v526_v35 = vld [vmem:[%s20130_s21 + $0x18] sm:$0xff]  ;;  %v528_v36 = vld [vmem:[%s20130_s21 + $0x20] sm:$0xff]  ;;  %p16411_p0 = scmp.ne.s32.totalorder %s20131_s15, %s16410_s8  ;;  %p16414_p1 = scmp.lt.u32.totalorder %s16410_s8, %s20131_s15 }
 0x155   :  { %525 = vst [vmem:[#allocation5 + $0x10] sm:$0xff] %v524_v34  ;;  %527 = vst [vmem:[#allocation5 + $0x18] sm:$0xff] %v526_v35  ;;  %v530_v37 = vld [vmem:[%s20130_s21 + $0x28] sm:$0xff]  ;;  %v532_v38 = vld [vmem:[%s20130_s21 + $0x30] sm:$0xff] }
 0x156   :  { %529 = vst [vmem:[#allocation5 + $0x20] sm:$0xff] %v528_v36  ;;  %v534_v39 = vld [vmem:[%s20130_s21 + $0x38] sm:$0xff]  ;;  %p16416_p2 = pnand %p16414_p1, %p16411_p0 }
 0x158   :  { %16419 = shalt.err (!%p16416_p2)  }
 0x159   :  { %s16420_s20 = scalar_lea.vmem %s479_s16, 6400  ;;  %p16425_p4 = scmp.lt.s32.totalorder %s479_s16, %s479_s16 }
 0x15a   :  { %p16421_p3 = scmp.ne.s32.totalorder %s479_s16, %s16420_s20  ;;  %p16426_p5 = scmp.lt.s32.totalorder %s16420_s20, %s16420_s20 }
 0x15c   :  { %p16427_p6 = por %p16426_p5, %p16425_p4 }
 0x15e   :  { %p16428_p7 = pnand %p16427_p6, %p16421_p3 }
 0x160   :  { %16431 = shalt.err (!%p16428_p7)  }
 0x161   :  { %481 = dma.hbm_to_vmem [thread:$0]  %s20131_s15, 6400, %s479_s16, [#allocation7 + $0x1]  ;;  %531 = vst [vmem:[#allocation5 + $0x28] sm:$0xff] %v530_v37  ;;  %533 = vst [vmem:[#allocation5 + $0x30] sm:$0xff] %v532_v38  ;;  %v536_v40 = vld [vmem:[%s20130_s21 + $0x40] sm:$0xff]  ;;  %v538_v41 = vld [vmem:[%s20130_s21 + $0x48] sm:$0xff] }
 0x162   :  { %535 = vst [vmem:[#allocation5 + $0x38] sm:$0xff] %v534_v39  ;;  %v540_v42 = vld [vmem:[%s20130_s21 + $0x50] sm:$0xff]  ;;  %537 = vst [vmem:[#allocation5 + $0x40] sm:$0xff] %v536_v40  ;;  %v542_v43 = vld [vmem:[%s20130_s21 + $0x58] sm:$0xff] }
 0x163   :  { %539 = vst [vmem:[#allocation5 + $0x48] sm:$0xff] %v538_v41  ;;  %541 = vst [vmem:[#allocation5 + $0x50] sm:$0xff] %v540_v42  ;;  %v544_v44 = vld [vmem:[%s20130_s21 + $0x60] sm:$0xff]  ;;  %v546_v45 = vld [vmem:[%s20130_s21 + $0x68] sm:$0xff] }
 0x164   :  { %543 = vst [vmem:[#allocation5 + $0x58] sm:$0xff] %v542_v43  ;;  %545 = vst [vmem:[#allocation5 + $0x60] sm:$0xff] %v544_v44  ;;  %v548_v46 = vld [vmem:[%s20130_s21 + $0x70] sm:$0xff]  ;;  %v550_v47 = vld [vmem:[%s20130_s21 + $0x78] sm:$0xff] }
 0x165   :  { %547 = vst [vmem:[#allocation5 + $0x68] sm:$0xff] %v546_v45  ;;  %v552_v48 = vld [vmem:[%s20130_s21 + $0x80] sm:$0xff]  ;;  %549 = vst [vmem:[#allocation5 + $0x70] sm:$0xff] %v548_v46  ;;  %v554_v49 = vld [vmem:[%s20130_s21 + $0x88] sm:$0xff] }
 0x166   :  { %551 = vst [vmem:[#allocation5 + $0x78] sm:$0xff] %v550_v47  ;;  %553 = vst [vmem:[#allocation5 + $0x80] sm:$0xff] %v552_v48  ;;  %v556_v50 = vld [vmem:[%s20130_s21 + $0x90] sm:$0xff]  ;;  %v558_v51 = vld [vmem:[%s20130_s21 + $0x98] sm:$0xff] }
 0x167   :  { %555 = vst [vmem:[#allocation5 + $0x88] sm:$0xff] %v554_v49  ;;  %557 = vst [vmem:[#allocation5 + $0x90] sm:$0xff] %v556_v50  ;;  %v560_v52 = vld [vmem:[%s20130_s21 + $0xa0] sm:$0xff]  ;;  %v562_v53 = vld [vmem:[%s20130_s21 + $0xa8] sm:$0xff] }
 0x168   :  { %559 = vst [vmem:[#allocation5 + $0x98] sm:$0xff] %v558_v51  ;;  %v564_v54 = vld [vmem:[%s20130_s21 + $0xb0] sm:$0xff]  ;;  %561 = vst [vmem:[#allocation5 + $0xa0] sm:$0xff] %v560_v52  ;;  %v566_v55 = vld [vmem:[%s20130_s21 + $0xb8] sm:$0xff] }
 0x169   :  { %563 = vst [vmem:[#allocation5 + $0xa8] sm:$0xff] %v562_v53  ;;  %565 = vst [vmem:[#allocation5 + $0xb0] sm:$0xff] %v564_v54  ;;  %v568_v56 = vld [vmem:[%s20130_s21 + $0xc0] sm:$0xff]  ;;  %v570_v57 = vld [vmem:[%s20130_s21 + $0xc8] sm:$0xff] }
 0x16a   :  { %567 = vst [vmem:[#allocation5 + $0xb8] sm:$0xff] %v566_v55  ;;  %569 = vst [vmem:[#allocation5 + $0xc0] sm:$0xff] %v568_v56  ;;  %v572_v58 = vld [vmem:[%s20130_s21 + $0xd0] sm:$0xff]  ;;  %v574_v59 = vld [vmem:[%s20130_s21 + $0xd8] sm:$0xff] }
 0x16b   :  { %571 = vst [vmem:[#allocation5 + $0xc8] sm:$0xff] %v570_v57  ;;  %v576_v60 = vld [vmem:[%s20130_s21 + $0xe0] sm:$0xff]  ;;  %573 = vst [vmem:[#allocation5 + $0xd0] sm:$0xff] %v572_v58  ;;  %v578_v61 = vld [vmem:[%s20130_s21 + $0xe8] sm:$0xff] }
 0x16c   :  { %575 = vst [vmem:[#allocation5 + $0xd8] sm:$0xff] %v574_v59  ;;  %577 = vst [vmem:[#allocation5 + $0xe0] sm:$0xff] %v576_v60  ;;  %v580_v62 = vld [vmem:[%s20130_s21 + $0xf0] sm:$0xff]  ;;  %v582_v63 = vld [vmem:[%s20130_s21 + $0xf8] sm:$0xff] }
 0x16d   :  { %579 = vst [vmem:[#allocation5 + $0xe8] sm:$0xff] %v578_v61  ;;  %581 = vst [vmem:[#allocation5 + $0xf0] sm:$0xff] %v580_v62  ;;  %v584_v0 = vld [vmem:[%s20130_s21 + $0x100] sm:$0xff]  ;;  %v586_v1 = vld [vmem:[%s20130_s21 + $0x108] sm:$0xff] }
 0x16e   :  { %583 = vst [vmem:[#allocation5 + $0xf8] sm:$0xff] %v582_v63  ;;  %v588_v2 = vld [vmem:[%s20130_s21 + $0x110] sm:$0xff]  ;;  %585 = vst [vmem:[#allocation5 + $0x100] sm:$0xff] %v584_v0  ;;  %v590_v3 = vld [vmem:[%s20130_s21 + $0x118] sm:$0xff] }
 0x16f   :  { %587 = vst [vmem:[#allocation5 + $0x108] sm:$0xff] %v586_v1  ;;  %589 = vst [vmem:[#allocation5 + $0x110] sm:$0xff] %v588_v2  ;;  %v592_v4 = vld [vmem:[%s20130_s21 + $0x120] sm:$0xff]  ;;  %v594_v5 = vld [vmem:[%s20130_s21 + $0x128] sm:$0xff] }
 0x170   :  { %591 = vst [vmem:[#allocation5 + $0x118] sm:$0xff] %v590_v3  ;;  %593 = vst [vmem:[#allocation5 + $0x120] sm:$0xff] %v592_v4  ;;  %v596_v6 = vld [vmem:[%s20130_s21 + $0x130] sm:$0xff]  ;;  %v598_v7 = vld [vmem:[%s20130_s21 + $0x138] sm:$0xff] }
 0x171   :  { %595 = vst [vmem:[#allocation5 + $0x128] sm:$0xff] %v594_v5  ;;  %v600_v8 = vld [vmem:[%s20130_s21 + $0x140] sm:$0xff]  ;;  %597 = vst [vmem:[#allocation5 + $0x130] sm:$0xff] %v596_v6  ;;  %v602_v9 = vld [vmem:[%s20130_s21 + $0x148] sm:$0xff] }
 0x172   :  { %599 = vst [vmem:[#allocation5 + $0x138] sm:$0xff] %v598_v7  ;;  %601 = vst [vmem:[#allocation5 + $0x140] sm:$0xff] %v600_v8  ;;  %v604_v10 = vld [vmem:[%s20130_s21 + $0x150] sm:$0xff]  ;;  %v606_v11 = vld [vmem:[%s20130_s21 + $0x158] sm:$0xff] }
 0x173   :  { %603 = vst [vmem:[#allocation5 + $0x148] sm:$0xff] %v602_v9  ;;  %605 = vst [vmem:[#allocation5 + $0x150] sm:$0xff] %v604_v10  ;;  %v608_v12 = vld [vmem:[%s20130_s21 + $0x160] sm:$0xff]  ;;  %v610_v13 = vld [vmem:[%s20130_s21 + $0x168] sm:$0xff] }
 0x174   :  { %607 = vst [vmem:[#allocation5 + $0x158] sm:$0xff] %v606_v11  ;;  %v612_v14 = vld [vmem:[%s20130_s21 + $0x170] sm:$0xff]  ;;  %609 = vst [vmem:[#allocation5 + $0x160] sm:$0xff] %v608_v12  ;;  %v614_v15 = vld [vmem:[%s20130_s21 + $0x178] sm:$0xff] }
 0x175   :  { %611 = vst [vmem:[#allocation5 + $0x168] sm:$0xff] %v610_v13  ;;  %613 = vst [vmem:[#allocation5 + $0x170] sm:$0xff] %v612_v14  ;;  %v616_v16 = vld [vmem:[%s20130_s21 + $0x180] sm:$0xff]  ;;  %v618_v17 = vld [vmem:[%s20130_s21 + $0x188] sm:$0xff] }
 0x176   :  { %615 = vst [vmem:[#allocation5 + $0x178] sm:$0xff] %v614_v15  ;;  %617 = vst [vmem:[#allocation5 + $0x180] sm:$0xff] %v616_v16  ;;  %v620_v18 = vld [vmem:[%s20130_s21 + $0x190] sm:$0xff]  ;;  %v622_v19 = vld [vmem:[%s20130_s21 + $0x198] sm:$0xff] }
 0x177   :  { %619 = vst [vmem:[#allocation5 + $0x188] sm:$0xff] %v618_v17  ;;  %v624_v20 = vld [vmem:[%s20130_s21 + $0x1a0] sm:$0xff]  ;;  %621 = vst [vmem:[#allocation5 + $0x190] sm:$0xff] %v620_v18  ;;  %v626_v21 = vld [vmem:[%s20130_s21 + $0x1a8] sm:$0xff] }
 0x178   :  { %623 = vst [vmem:[#allocation5 + $0x198] sm:$0xff] %v622_v19  ;;  %625 = vst [vmem:[#allocation5 + $0x1a0] sm:$0xff] %v624_v20  ;;  %v628_v22 = vld [vmem:[%s20130_s21 + $0x1b0] sm:$0xff]  ;;  %v630_v23 = vld [vmem:[%s20130_s21 + $0x1b8] sm:$0xff] }
 0x179   :  { %627 = vst [vmem:[#allocation5 + $0x1a8] sm:$0xff] %v626_v21  ;;  %629 = vst [vmem:[#allocation5 + $0x1b0] sm:$0xff] %v628_v22  ;;  %v632_v24 = vld [vmem:[%s20130_s21 + $0x1c0] sm:$0xff]  ;;  %v634_v25 = vld [vmem:[%s20130_s21 + $0x1c8] sm:$0xff] }
 0x17a   :  { %631 = vst [vmem:[#allocation5 + $0x1b8] sm:$0xff] %v630_v23  ;;  %v636_v26 = vld [vmem:[%s20130_s21 + $0x1d0] sm:$0xff]  ;;  %633 = vst [vmem:[#allocation5 + $0x1c0] sm:$0xff] %v632_v24  ;;  %v638_v27 = vld [vmem:[%s20130_s21 + $0x1d8] sm:$0xff] }
 0x17b   :  { %635 = vst [vmem:[#allocation5 + $0x1c8] sm:$0xff] %v634_v25  ;;  %637 = vst [vmem:[#allocation5 + $0x1d0] sm:$0xff] %v636_v26  ;;  %v640_v28 = vld [vmem:[%s20130_s21 + $0x1e0] sm:$0xff]  ;;  %v642_v29 = vld [vmem:[%s20130_s21 + $0x1e8] sm:$0xff] }
 0x17c   :  { %639 = vst [vmem:[#allocation5 + $0x1d8] sm:$0xff] %v638_v27  ;;  %641 = vst [vmem:[#allocation5 + $0x1e0] sm:$0xff] %v640_v28  ;;  %v644_v30 = vld [vmem:[%s20130_s21 + $0x1f0] sm:$0xff]  ;;  %v646_v31 = vld [vmem:[%s20130_s21 + $0x1f8] sm:$0xff] }
 0x17d   :  { %643 = vst [vmem:[#allocation5 + $0x1e8] sm:$0xff] %v642_v29  ;;  %v648_v32 = vld [vmem:[%s20130_s21 + $0x200] sm:$0xff]  ;;  %645 = vst [vmem:[#allocation5 + $0x1f0] sm:$0xff] %v644_v30  ;;  %v650_v33 = vld [vmem:[%s20130_s21 + $0x208] sm:$0xff] }
 0x17e   :  { %647 = vst [vmem:[#allocation5 + $0x1f8] sm:$0xff] %v646_v31  ;;  %649 = vst [vmem:[#allocation5 + $0x200] sm:$0xff] %v648_v32  ;;  %v652_v34 = vld [vmem:[%s20130_s21 + $0x210] sm:$0xff]  ;;  %v654_v35 = vld [vmem:[%s20130_s21 + $0x218] sm:$0xff] }
 0x17f   :  { %651 = vst [vmem:[#allocation5 + $0x208] sm:$0xff] %v650_v33  ;;  %653 = vst [vmem:[#allocation5 + $0x210] sm:$0xff] %v652_v34  ;;  %v656_v36 = vld [vmem:[%s20130_s21 + $0x220] sm:$0xff]  ;;  %v658_v37 = vld [vmem:[%s20130_s21 + $0x228] sm:$0xff] }
 0x180   :  { %655 = vst [vmem:[#allocation5 + $0x218] sm:$0xff] %v654_v35  ;;  %v660_v38 = vld [vmem:[%s20130_s21 + $0x230] sm:$0xff]  ;;  %657 = vst [vmem:[#allocation5 + $0x220] sm:$0xff] %v656_v36  ;;  %v662_v39 = vld [vmem:[%s20130_s21 + $0x238] sm:$0xff] }
 0x181   :  { %659 = vst [vmem:[#allocation5 + $0x228] sm:$0xff] %v658_v37  ;;  %661 = vst [vmem:[#allocation5 + $0x230] sm:$0xff] %v660_v38  ;;  %v664_v40 = vld [vmem:[%s20130_s21 + $0x240] sm:$0xff]  ;;  %v666_v41 = vld [vmem:[%s20130_s21 + $0x248] sm:$0xff] }
 0x182   :  { %663 = vst [vmem:[#allocation5 + $0x238] sm:$0xff] %v662_v39  ;;  %665 = vst [vmem:[#allocation5 + $0x240] sm:$0xff] %v664_v40  ;;  %v668_v42 = vld [vmem:[%s20130_s21 + $0x250] sm:$0xff]  ;;  %v670_v43 = vld [vmem:[%s20130_s21 + $0x258] sm:$0xff] }
 0x183   :  { %667 = vst [vmem:[#allocation5 + $0x248] sm:$0xff] %v666_v41  ;;  %v672_v44 = vld [vmem:[%s20130_s21 + $0x260] sm:$0xff]  ;;  %669 = vst [vmem:[#allocation5 + $0x250] sm:$0xff] %v668_v42  ;;  %v674_v45 = vld [vmem:[%s20130_s21 + $0x268] sm:$0xff] }
 0x184   :  { %671 = vst [vmem:[#allocation5 + $0x258] sm:$0xff] %v670_v43  ;;  %673 = vst [vmem:[#allocation5 + $0x260] sm:$0xff] %v672_v44  ;;  %v676_v46 = vld [vmem:[%s20130_s21 + $0x270] sm:$0xff]  ;;  %v678_v47 = vld [vmem:[%s20130_s21 + $0x278] sm:$0xff] }
 0x185   :  { %675 = vst [vmem:[#allocation5 + $0x268] sm:$0xff] %v674_v45  ;;  %677 = vst [vmem:[#allocation5 + $0x270] sm:$0xff] %v676_v46  ;;  %v680_v48 = vld [vmem:[%s20130_s21 + $0x280] sm:$0xff]  ;;  %v682_v49 = vld [vmem:[%s20130_s21 + $0x288] sm:$0xff] }
 0x186   :  { %679 = vst [vmem:[#allocation5 + $0x278] sm:$0xff] %v678_v47  ;;  %v684_v50 = vld [vmem:[%s20130_s21 + $0x290] sm:$0xff]  ;;  %681 = vst [vmem:[#allocation5 + $0x280] sm:$0xff] %v680_v48  ;;  %v686_v51 = vld [vmem:[%s20130_s21 + $0x298] sm:$0xff] }
 0x187   :  { %683 = vst [vmem:[#allocation5 + $0x288] sm:$0xff] %v682_v49  ;;  %685 = vst [vmem:[#allocation5 + $0x290] sm:$0xff] %v684_v50  ;;  %v688_v52 = vld [vmem:[%s20130_s21 + $0x2a0] sm:$0xff]  ;;  %v690_v53 = vld [vmem:[%s20130_s21 + $0x2a8] sm:$0xff] }
 0x188   :  { %687 = vst [vmem:[#allocation5 + $0x298] sm:$0xff] %v686_v51  ;;  %689 = vst [vmem:[#allocation5 + $0x2a0] sm:$0xff] %v688_v52  ;;  %v692_v54 = vld [vmem:[%s20130_s21 + $0x2b0] sm:$0xff]  ;;  %v694_v55 = vld [vmem:[%s20130_s21 + $0x2b8] sm:$0xff] }
 0x189   :  { %691 = vst [vmem:[#allocation5 + $0x2a8] sm:$0xff] %v690_v53  ;;  %v696_v56 = vld [vmem:[%s20130_s21 + $0x2c0] sm:$0xff]  ;;  %693 = vst [vmem:[#allocation5 + $0x2b0] sm:$0xff] %v692_v54  ;;  %v698_v57 = vld [vmem:[%s20130_s21 + $0x2c8] sm:$0xff] }
 0x18a   :  { %695 = vst [vmem:[#allocation5 + $0x2b8] sm:$0xff] %v694_v55  ;;  %697 = vst [vmem:[#allocation5 + $0x2c0] sm:$0xff] %v696_v56  ;;  %v700_v58 = vld [vmem:[%s20130_s21 + $0x2d0] sm:$0xff]  ;;  %v702_v59 = vld [vmem:[%s20130_s21 + $0x2d8] sm:$0xff] }
 0x18b   :  { %699 = vst [vmem:[#allocation5 + $0x2c8] sm:$0xff] %v698_v57  ;;  %701 = vst [vmem:[#allocation5 + $0x2d0] sm:$0xff] %v700_v58  ;;  %v704_v60 = vld [vmem:[%s20130_s21 + $0x2e0] sm:$0xff]  ;;  %v706_v61 = vld [vmem:[%s20130_s21 + $0x2e8] sm:$0xff] }
 0x18c   :  { %703 = vst [vmem:[#allocation5 + $0x2d8] sm:$0xff] %v702_v59  ;;  %v708_v62 = vld [vmem:[%s20130_s21 + $0x2f0] sm:$0xff]  ;;  %705 = vst [vmem:[#allocation5 + $0x2e0] sm:$0xff] %v704_v60  ;;  %v710_v63 = vld [vmem:[%s20130_s21 + $0x2f8] sm:$0xff] }
 0x18d   :  { %707 = vst [vmem:[#allocation5 + $0x2e8] sm:$0xff] %v706_v61  ;;  %709 = vst [vmem:[#allocation5 + $0x2f0] sm:$0xff] %v708_v62  ;;  %v712_v0 = vld [vmem:[%s20130_s21 + $0x300] sm:$0xff]  ;;  %v714_v1 = vld [vmem:[%s20130_s21 + $0x308] sm:$0xff] }
 0x18e   :  { %711 = vst [vmem:[#allocation5 + $0x2f8] sm:$0xff] %v710_v63  ;;  %713 = vst [vmem:[#allocation5 + $0x300] sm:$0xff] %v712_v0  ;;  %v716_v2 = vld [vmem:[%s20130_s21 + $0x310] sm:$0xff]  ;;  %v718_v3 = vld [vmem:[%s20130_s21 + $0x318] sm:$0xff] }
 0x18f   :  { %715 = vst [vmem:[#allocation5 + $0x308] sm:$0xff] %v714_v1  ;;  %v720_v4 = vld [vmem:[%s20130_s21 + $0x320] sm:$0xff]  ;;  %717 = vst [vmem:[#allocation5 + $0x310] sm:$0xff] %v716_v2  ;;  %v722_v5 = vld [vmem:[%s20130_s21 + $0x328] sm:$0xff] }
 0x190   :  { %719 = vst [vmem:[#allocation5 + $0x318] sm:$0xff] %v718_v3  ;;  %721 = vst [vmem:[#allocation5 + $0x320] sm:$0xff] %v720_v4  ;;  %v724_v6 = vld [vmem:[%s20130_s21 + $0x330] sm:$0xff]  ;;  %v726_v7 = vld [vmem:[%s20130_s21 + $0x338] sm:$0xff] }
 0x191   :  { %723 = vst [vmem:[#allocation5 + $0x328] sm:$0xff] %v722_v5  ;;  %725 = vst [vmem:[#allocation5 + $0x330] sm:$0xff] %v724_v6  ;;  %v728_v8 = vld [vmem:[%s20130_s21 + $0x340] sm:$0xff]  ;;  %v730_v9 = vld [vmem:[%s20130_s21 + $0x348] sm:$0xff] }
 0x192   :  { %727 = vst [vmem:[#allocation5 + $0x338] sm:$0xff] %v726_v7  ;;  %v732_v10 = vld [vmem:[%s20130_s21 + $0x350] sm:$0xff]  ;;  %729 = vst [vmem:[#allocation5 + $0x340] sm:$0xff] %v728_v8  ;;  %v734_v11 = vld [vmem:[%s20130_s21 + $0x358] sm:$0xff] }
 0x193   :  { %731 = vst [vmem:[#allocation5 + $0x348] sm:$0xff] %v730_v9  ;;  %733 = vst [vmem:[#allocation5 + $0x350] sm:$0xff] %v732_v10  ;;  %v736_v12 = vld [vmem:[%s20130_s21 + $0x360] sm:$0xff]  ;;  %v738_v13 = vld [vmem:[%s20130_s21 + $0x368] sm:$0xff] }
 0x194   :  { %735 = vst [vmem:[#allocation5 + $0x358] sm:$0xff] %v734_v11  ;;  %737 = vst [vmem:[#allocation5 + $0x360] sm:$0xff] %v736_v12  ;;  %v740_v14 = vld [vmem:[%s20130_s21 + $0x370] sm:$0xff]  ;;  %v742_v15 = vld [vmem:[%s20130_s21 + $0x378] sm:$0xff] }
 0x195   :  { %739 = vst [vmem:[#allocation5 + $0x368] sm:$0xff] %v738_v13  ;;  %v744_v16 = vld [vmem:[%s20130_s21 + $0x380] sm:$0xff]  ;;  %741 = vst [vmem:[#allocation5 + $0x370] sm:$0xff] %v740_v14  ;;  %v746_v17 = vld [vmem:[%s20130_s21 + $0x388] sm:$0xff] }
 0x196   :  { %743 = vst [vmem:[#allocation5 + $0x378] sm:$0xff] %v742_v15  ;;  %745 = vst [vmem:[#allocation5 + $0x380] sm:$0xff] %v744_v16  ;;  %v748_v18 = vld [vmem:[%s20130_s21 + $0x390] sm:$0xff]  ;;  %v750_v19 = vld [vmem:[%s20130_s21 + $0x398] sm:$0xff] }
 0x197   :  { %747 = vst [vmem:[#allocation5 + $0x388] sm:$0xff] %v746_v17  ;;  %749 = vst [vmem:[#allocation5 + $0x390] sm:$0xff] %v748_v18  ;;  %v752_v20 = vld [vmem:[%s20130_s21 + $0x3a0] sm:$0xff]  ;;  %v754_v21 = vld [vmem:[%s20130_s21 + $0x3a8] sm:$0xff] }
 0x198   :  { %751 = vst [vmem:[#allocation5 + $0x398] sm:$0xff] %v750_v19  ;;  %v756_v22 = vld [vmem:[%s20130_s21 + $0x3b0] sm:$0xff]  ;;  %753 = vst [vmem:[#allocation5 + $0x3a0] sm:$0xff] %v752_v20  ;;  %v758_v23 = vld [vmem:[%s20130_s21 + $0x3b8] sm:$0xff] }
 0x199   :  { %755 = vst [vmem:[#allocation5 + $0x3a8] sm:$0xff] %v754_v21  ;;  %757 = vst [vmem:[#allocation5 + $0x3b0] sm:$0xff] %v756_v22  ;;  %v760_v24 = vld [vmem:[%s20130_s21 + $0x3c0] sm:$0xff]  ;;  %v762_v25 = vld [vmem:[%s20130_s21 + $0x3c8] sm:$0xff] }
 0x19a   :  { %759 = vst [vmem:[#allocation5 + $0x3b8] sm:$0xff] %v758_v23  ;;  %761 = vst [vmem:[#allocation5 + $0x3c0] sm:$0xff] %v760_v24  ;;  %v764_v26 = vld [vmem:[%s20130_s21 + $0x3d0] sm:$0xff]  ;;  %v766_v27 = vld [vmem:[%s20130_s21 + $0x3d8] sm:$0xff] }
 0x19b   :  { %763 = vst [vmem:[#allocation5 + $0x3c8] sm:$0xff] %v762_v25  ;;  %v768_v28 = vld [vmem:[%s20130_s21 + $0x3e0] sm:$0xff]  ;;  %765 = vst [vmem:[#allocation5 + $0x3d0] sm:$0xff] %v764_v26  ;;  %v770_v29 = vld [vmem:[%s20130_s21 + $0x3e8] sm:$0xff] }
 0x19c   :  { %767 = vst [vmem:[#allocation5 + $0x3d8] sm:$0xff] %v766_v27  ;;  %769 = vst [vmem:[#allocation5 + $0x3e0] sm:$0xff] %v768_v28  ;;  %v772_v30 = vld [vmem:[%s20130_s21 + $0x3f0] sm:$0xff]  ;;  %v774_v31 = vld [vmem:[%s20130_s21 + $0x3f8] sm:$0xff] }
 0x19d   :  { %771 = vst [vmem:[#allocation5 + $0x3e8] sm:$0xff] %v770_v29  ;;  %773 = vst [vmem:[#allocation5 + $0x3f0] sm:$0xff] %v772_v30  ;;  %v776_v32 = vld [vmem:[%s20130_s21 + $0x400] sm:$0xff]  ;;  %v778_v33 = vld [vmem:[%s20130_s21 + $0x408] sm:$0xff] }
 0x19e   :  { %775 = vst [vmem:[#allocation5 + $0x3f8] sm:$0xff] %v774_v31  ;;  %v780_v34 = vld [vmem:[%s20130_s21 + $0x410] sm:$0xff]  ;;  %777 = vst [vmem:[#allocation5 + $0x400] sm:$0xff] %v776_v32  ;;  %v782_v35 = vld [vmem:[%s20130_s21 + $0x418] sm:$0xff] }
 0x19f   :  { %779 = vst [vmem:[#allocation5 + $0x408] sm:$0xff] %v778_v33  ;;  %781 = vst [vmem:[#allocation5 + $0x410] sm:$0xff] %v780_v34  ;;  %v784_v36 = vld [vmem:[%s20130_s21 + $0x420] sm:$0xff]  ;;  %v786_v37 = vld [vmem:[%s20130_s21 + $0x428] sm:$0xff] }
 0x1a0   :  { %783 = vst [vmem:[#allocation5 + $0x418] sm:$0xff] %v782_v35  ;;  %785 = vst [vmem:[#allocation5 + $0x420] sm:$0xff] %v784_v36  ;;  %v788_v38 = vld [vmem:[%s20130_s21 + $0x430] sm:$0xff]  ;;  %v790_v39 = vld [vmem:[%s20130_s21 + $0x438] sm:$0xff] }
 0x1a1   :  { %787 = vst [vmem:[#allocation5 + $0x428] sm:$0xff] %v786_v37  ;;  %v792_v40 = vld [vmem:[%s20130_s21 + $0x440] sm:$0xff]  ;;  %789 = vst [vmem:[#allocation5 + $0x430] sm:$0xff] %v788_v38  ;;  %v794_v41 = vld [vmem:[%s20130_s21 + $0x448] sm:$0xff] }
 0x1a2   :  { %791 = vst [vmem:[#allocation5 + $0x438] sm:$0xff] %v790_v39  ;;  %793 = vst [vmem:[#allocation5 + $0x440] sm:$0xff] %v792_v40  ;;  %v796_v42 = vld [vmem:[%s20130_s21 + $0x450] sm:$0xff]  ;;  %v798_v43 = vld [vmem:[%s20130_s21 + $0x458] sm:$0xff] }
 0x1a3   :  { %795 = vst [vmem:[#allocation5 + $0x448] sm:$0xff] %v794_v41  ;;  %797 = vst [vmem:[#allocation5 + $0x450] sm:$0xff] %v796_v42  ;;  %v800_v44 = vld [vmem:[%s20130_s21 + $0x460] sm:$0xff]  ;;  %v802_v45 = vld [vmem:[%s20130_s21 + $0x468] sm:$0xff] }
 0x1a4   :  { %799 = vst [vmem:[#allocation5 + $0x458] sm:$0xff] %v798_v43  ;;  %v804_v46 = vld [vmem:[%s20130_s21 + $0x470] sm:$0xff]  ;;  %801 = vst [vmem:[#allocation5 + $0x460] sm:$0xff] %v800_v44  ;;  %v806_v47 = vld [vmem:[%s20130_s21 + $0x478] sm:$0xff] }
 0x1a5   :  { %803 = vst [vmem:[#allocation5 + $0x468] sm:$0xff] %v802_v45  ;;  %805 = vst [vmem:[#allocation5 + $0x470] sm:$0xff] %v804_v46  ;;  %v808_v48 = vld [vmem:[%s20130_s21 + $0x480] sm:$0xff]  ;;  %v810_v49 = vld [vmem:[%s20130_s21 + $0x488] sm:$0xff] }
 0x1a6   :  { %807 = vst [vmem:[#allocation5 + $0x478] sm:$0xff] %v806_v47  ;;  %809 = vst [vmem:[#allocation5 + $0x480] sm:$0xff] %v808_v48  ;;  %v812_v50 = vld [vmem:[%s20130_s21 + $0x490] sm:$0xff]  ;;  %v814_v51 = vld [vmem:[%s20130_s21 + $0x498] sm:$0xff] }
 0x1a7   :  { %811 = vst [vmem:[#allocation5 + $0x488] sm:$0xff] %v810_v49  ;;  %v816_v52 = vld [vmem:[%s20130_s21 + $0x4a0] sm:$0xff]  ;;  %813 = vst [vmem:[#allocation5 + $0x490] sm:$0xff] %v812_v50  ;;  %v818_v53 = vld [vmem:[%s20130_s21 + $0x4a8] sm:$0xff] }
 0x1a8   :  { %815 = vst [vmem:[#allocation5 + $0x498] sm:$0xff] %v814_v51  ;;  %817 = vst [vmem:[#allocation5 + $0x4a0] sm:$0xff] %v816_v52  ;;  %v820_v54 = vld [vmem:[%s20130_s21 + $0x4b0] sm:$0xff]  ;;  %v822_v55 = vld [vmem:[%s20130_s21 + $0x4b8] sm:$0xff] }
 0x1a9   :  { %819 = vst [vmem:[#allocation5 + $0x4a8] sm:$0xff] %v818_v53  ;;  %821 = vst [vmem:[#allocation5 + $0x4b0] sm:$0xff] %v820_v54  ;;  %v824_v56 = vld [vmem:[%s20130_s21 + $0x4c0] sm:$0xff]  ;;  %v826_v57 = vld [vmem:[%s20130_s21 + $0x4c8] sm:$0xff] }
 0x1aa   :  { %823 = vst [vmem:[#allocation5 + $0x4b8] sm:$0xff] %v822_v55  ;;  %v828_v58 = vld [vmem:[%s20130_s21 + $0x4d0] sm:$0xff]  ;;  %825 = vst [vmem:[#allocation5 + $0x4c0] sm:$0xff] %v824_v56  ;;  %v830_v59 = vld [vmem:[%s20130_s21 + $0x4d8] sm:$0xff] }
 0x1ab   :  { %827 = vst [vmem:[#allocation5 + $0x4c8] sm:$0xff] %v826_v57  ;;  %829 = vst [vmem:[#allocation5 + $0x4d0] sm:$0xff] %v828_v58  ;;  %v832_v60 = vld [vmem:[%s20130_s21 + $0x4e0] sm:$0xff]  ;;  %v834_v61 = vld [vmem:[%s20130_s21 + $0x4e8] sm:$0xff] }
 0x1ac   :  { %831 = vst [vmem:[#allocation5 + $0x4d8] sm:$0xff] %v830_v59  ;;  %833 = vst [vmem:[#allocation5 + $0x4e0] sm:$0xff] %v832_v60  ;;  %v836_v62 = vld [vmem:[%s20130_s21 + $0x4f0] sm:$0xff]  ;;  %v838_v63 = vld [vmem:[%s20130_s21 + $0x4f8] sm:$0xff] }
 0x1ad   :  { %835 = vst [vmem:[#allocation5 + $0x4e8] sm:$0xff] %v834_v61  ;;  %v840_v0 = vld [vmem:[%s20130_s21 + $0x500] sm:$0xff]  ;;  %837 = vst [vmem:[#allocation5 + $0x4f0] sm:$0xff] %v836_v62  ;;  %v842_v1 = vld [vmem:[%s20130_s21 + $0x508] sm:$0xff] }
 0x1ae   :  { %839 = vst [vmem:[#allocation5 + $0x4f8] sm:$0xff] %v838_v63  ;;  %841 = vst [vmem:[#allocation5 + $0x500] sm:$0xff] %v840_v0  ;;  %v844_v2 = vld [vmem:[%s20130_s21 + $0x510] sm:$0xff]  ;;  %v846_v3 = vld [vmem:[%s20130_s21 + $0x518] sm:$0xff] }
 0x1af   :  { %843 = vst [vmem:[#allocation5 + $0x508] sm:$0xff] %v842_v1  ;;  %845 = vst [vmem:[#allocation5 + $0x510] sm:$0xff] %v844_v2  ;;  %v848_v4 = vld [vmem:[%s20130_s21 + $0x520] sm:$0xff]  ;;  %v850_v5 = vld [vmem:[%s20130_s21 + $0x528] sm:$0xff] }
 0x1b0   :  { %847 = vst [vmem:[#allocation5 + $0x518] sm:$0xff] %v846_v3  ;;  %v852_v6 = vld [vmem:[%s20130_s21 + $0x530] sm:$0xff]  ;;  %849 = vst [vmem:[#allocation5 + $0x520] sm:$0xff] %v848_v4  ;;  %v854_v7 = vld [vmem:[%s20130_s21 + $0x538] sm:$0xff] }
 0x1b1   :  { %851 = vst [vmem:[#allocation5 + $0x528] sm:$0xff] %v850_v5  ;;  %853 = vst [vmem:[#allocation5 + $0x530] sm:$0xff] %v852_v6  ;;  %v856_v8 = vld [vmem:[%s20130_s21 + $0x540] sm:$0xff]  ;;  %v858_v9 = vld [vmem:[%s20130_s21 + $0x548] sm:$0xff] }
 0x1b2   :  { %855 = vst [vmem:[#allocation5 + $0x538] sm:$0xff] %v854_v7  ;;  %857 = vst [vmem:[#allocation5 + $0x540] sm:$0xff] %v856_v8  ;;  %v860_v10 = vld [vmem:[%s20130_s21 + $0x550] sm:$0xff]  ;;  %v862_v11 = vld [vmem:[%s20130_s21 + $0x558] sm:$0xff] }
 0x1b3   :  { %859 = vst [vmem:[#allocation5 + $0x548] sm:$0xff] %v858_v9  ;;  %v864_v12 = vld [vmem:[%s20130_s21 + $0x560] sm:$0xff]  ;;  %861 = vst [vmem:[#allocation5 + $0x550] sm:$0xff] %v860_v10  ;;  %v866_v13 = vld [vmem:[%s20130_s21 + $0x568] sm:$0xff] }
 0x1b4   :  { %863 = vst [vmem:[#allocation5 + $0x558] sm:$0xff] %v862_v11  ;;  %865 = vst [vmem:[#allocation5 + $0x560] sm:$0xff] %v864_v12  ;;  %v868_v14 = vld [vmem:[%s20130_s21 + $0x570] sm:$0xff]  ;;  %v870_v15 = vld [vmem:[%s20130_s21 + $0x578] sm:$0xff] }
 0x1b5   :  { %867 = vst [vmem:[#allocation5 + $0x568] sm:$0xff] %v866_v13  ;;  %869 = vst [vmem:[#allocation5 + $0x570] sm:$0xff] %v868_v14  ;;  %v872_v16 = vld [vmem:[%s20130_s21 + $0x580] sm:$0xff]  ;;  %v874_v17 = vld [vmem:[%s20130_s21 + $0x588] sm:$0xff] }
 0x1b6   :  { %871 = vst [vmem:[#allocation5 + $0x578] sm:$0xff] %v870_v15  ;;  %v876_v18 = vld [vmem:[%s20130_s21 + $0x590] sm:$0xff]  ;;  %873 = vst [vmem:[#allocation5 + $0x580] sm:$0xff] %v872_v16  ;;  %v878_v19 = vld [vmem:[%s20130_s21 + $0x598] sm:$0xff] }
 0x1b7   :  { %875 = vst [vmem:[#allocation5 + $0x588] sm:$0xff] %v874_v17  ;;  %877 = vst [vmem:[#allocation5 + $0x590] sm:$0xff] %v876_v18  ;;  %v880_v20 = vld [vmem:[%s20130_s21 + $0x5a0] sm:$0xff]  ;;  %v882_v21 = vld [vmem:[%s20130_s21 + $0x5a8] sm:$0xff] }
 0x1b8   :  { %879 = vst [vmem:[#allocation5 + $0x598] sm:$0xff] %v878_v19  ;;  %881 = vst [vmem:[#allocation5 + $0x5a0] sm:$0xff] %v880_v20  ;;  %v884_v22 = vld [vmem:[%s20130_s21 + $0x5b0] sm:$0xff]  ;;  %v886_v23 = vld [vmem:[%s20130_s21 + $0x5b8] sm:$0xff] }
 0x1b9   :  { %883 = vst [vmem:[#allocation5 + $0x5a8] sm:$0xff] %v882_v21  ;;  %v888_v24 = vld [vmem:[%s20130_s21 + $0x5c0] sm:$0xff]  ;;  %885 = vst [vmem:[#allocation5 + $0x5b0] sm:$0xff] %v884_v22  ;;  %v890_v25 = vld [vmem:[%s20130_s21 + $0x5c8] sm:$0xff] }
 0x1ba   :  { %887 = vst [vmem:[#allocation5 + $0x5b8] sm:$0xff] %v886_v23  ;;  %889 = vst [vmem:[#allocation5 + $0x5c0] sm:$0xff] %v888_v24  ;;  %v892_v26 = vld [vmem:[%s20130_s21 + $0x5d0] sm:$0xff]  ;;  %v894_v27 = vld [vmem:[%s20130_s21 + $0x5d8] sm:$0xff] }
 0x1bb   :  { %891 = vst [vmem:[#allocation5 + $0x5c8] sm:$0xff] %v890_v25  ;;  %893 = vst [vmem:[#allocation5 + $0x5d0] sm:$0xff] %v892_v26  ;;  %v896_v28 = vld [vmem:[%s20130_s21 + $0x5e0] sm:$0xff]  ;;  %v898_v29 = vld [vmem:[%s20130_s21 + $0x5e8] sm:$0xff] }
 0x1bc   :  { %895 = vst [vmem:[#allocation5 + $0x5d8] sm:$0xff] %v894_v27  ;;  %v900_v30 = vld [vmem:[%s20130_s21 + $0x5f0] sm:$0xff]  ;;  %897 = vst [vmem:[#allocation5 + $0x5e0] sm:$0xff] %v896_v28  ;;  %v902_v31 = vld [vmem:[%s20130_s21 + $0x5f8] sm:$0xff] }
 0x1bd   :  { %899 = vst [vmem:[#allocation5 + $0x5e8] sm:$0xff] %v898_v29  ;;  %901 = vst [vmem:[#allocation5 + $0x5f0] sm:$0xff] %v900_v30  ;;  %v904_v32 = vld [vmem:[%s20130_s21 + $0x600] sm:$0xff]  ;;  %v906_v33 = vld [vmem:[%s20130_s21 + $0x608] sm:$0xff] }
 0x1be   :  { %903 = vst [vmem:[#allocation5 + $0x5f8] sm:$0xff] %v902_v31  ;;  %905 = vst [vmem:[#allocation5 + $0x600] sm:$0xff] %v904_v32  ;;  %v908_v34 = vld [vmem:[%s20130_s21 + $0x610] sm:$0xff]  ;;  %v910_v35 = vld [vmem:[%s20130_s21 + $0x618] sm:$0xff] }
 0x1bf   :  { %907 = vst [vmem:[#allocation5 + $0x608] sm:$0xff] %v906_v33  ;;  %v912_v36 = vld [vmem:[%s20130_s21 + $0x620] sm:$0xff]  ;;  %909 = vst [vmem:[#allocation5 + $0x610] sm:$0xff] %v908_v34  ;;  %v914_v37 = vld [vmem:[%s20130_s21 + $0x628] sm:$0xff] }
 0x1c0   :  { %911 = vst [vmem:[#allocation5 + $0x618] sm:$0xff] %v910_v35  ;;  %913 = vst [vmem:[#allocation5 + $0x620] sm:$0xff] %v912_v36  ;;  %v916_v38 = vld [vmem:[%s20130_s21 + $0x630] sm:$0xff]  ;;  %v918_v39 = vld [vmem:[%s20130_s21 + $0x638] sm:$0xff] }
 0x1c1   :  { %915 = vst [vmem:[#allocation5 + $0x628] sm:$0xff] %v914_v37  ;;  %917 = vst [vmem:[#allocation5 + $0x630] sm:$0xff] %v916_v38  ;;  %v920_v40 = vld [vmem:[%s20130_s21 + $0x640] sm:$0xff]  ;;  %v922_v41 = vld [vmem:[%s20130_s21 + $0x648] sm:$0xff] }
 0x1c2   :  { %919 = vst [vmem:[#allocation5 + $0x638] sm:$0xff] %v918_v39  ;;  %v924_v42 = vld [vmem:[%s20130_s21 + $0x650] sm:$0xff]  ;;  %921 = vst [vmem:[#allocation5 + $0x640] sm:$0xff] %v920_v40  ;;  %v926_v43 = vld [vmem:[%s20130_s21 + $0x658] sm:$0xff] }
 0x1c3   :  { %923 = vst [vmem:[#allocation5 + $0x648] sm:$0xff] %v922_v41  ;;  %925 = vst [vmem:[#allocation5 + $0x650] sm:$0xff] %v924_v42  ;;  %v928_v44 = vld [vmem:[%s20130_s21 + $0x660] sm:$0xff]  ;;  %v930_v45 = vld [vmem:[%s20130_s21 + $0x668] sm:$0xff] }
 0x1c4   :  { %927 = vst [vmem:[#allocation5 + $0x658] sm:$0xff] %v926_v43  ;;  %929 = vst [vmem:[#allocation5 + $0x660] sm:$0xff] %v928_v44  ;;  %v932_v46 = vld [vmem:[%s20130_s21 + $0x670] sm:$0xff]  ;;  %v934_v47 = vld [vmem:[%s20130_s21 + $0x678] sm:$0xff] }
 0x1c5   :  { %931 = vst [vmem:[#allocation5 + $0x668] sm:$0xff] %v930_v45  ;;  %v936_v48 = vld [vmem:[%s20130_s21 + $0x680] sm:$0xff]  ;;  %933 = vst [vmem:[#allocation5 + $0x670] sm:$0xff] %v932_v46  ;;  %v938_v49 = vld [vmem:[%s20130_s21 + $0x688] sm:$0xff] }
 0x1c6   :  { %935 = vst [vmem:[#allocation5 + $0x678] sm:$0xff] %v934_v47  ;;  %937 = vst [vmem:[#allocation5 + $0x680] sm:$0xff] %v936_v48  ;;  %v940_v50 = vld [vmem:[%s20130_s21 + $0x690] sm:$0xff]  ;;  %v942_v51 = vld [vmem:[%s20130_s21 + $0x698] sm:$0xff] }
 0x1c7   :  { %939 = vst [vmem:[#allocation5 + $0x688] sm:$0xff] %v938_v49  ;;  %941 = vst [vmem:[#allocation5 + $0x690] sm:$0xff] %v940_v50  ;;  %v944_v52 = vld [vmem:[%s20130_s21 + $0x6a0] sm:$0xff]  ;;  %v946_v53 = vld [vmem:[%s20130_s21 + $0x6a8] sm:$0xff] }
 0x1c8   :  { %943 = vst [vmem:[#allocation5 + $0x698] sm:$0xff] %v942_v51  ;;  %v948_v54 = vld [vmem:[%s20130_s21 + $0x6b0] sm:$0xff]  ;;  %945 = vst [vmem:[#allocation5 + $0x6a0] sm:$0xff] %v944_v52  ;;  %v950_v55 = vld [vmem:[%s20130_s21 + $0x6b8] sm:$0xff] }
 0x1c9   :  { %947 = vst [vmem:[#allocation5 + $0x6a8] sm:$0xff] %v946_v53  ;;  %949 = vst [vmem:[#allocation5 + $0x6b0] sm:$0xff] %v948_v54  ;;  %v952_v56 = vld [vmem:[%s20130_s21 + $0x6c0] sm:$0xff]  ;;  %v954_v57 = vld [vmem:[%s20130_s21 + $0x6c8] sm:$0xff] }
 0x1ca   :  { %951 = vst [vmem:[#allocation5 + $0x6b8] sm:$0xff] %v950_v55  ;;  %953 = vst [vmem:[#allocation5 + $0x6c0] sm:$0xff] %v952_v56  ;;  %v956_v58 = vld [vmem:[%s20130_s21 + $0x6d0] sm:$0xff]  ;;  %v958_v59 = vld [vmem:[%s20130_s21 + $0x6d8] sm:$0xff] }
 0x1cb   :  { %955 = vst [vmem:[#allocation5 + $0x6c8] sm:$0xff] %v954_v57  ;;  %v11314_v60 = vld [vmem:[%s20130_s21 + $0x6e0] sm:$0xf]  ;;  %957 = vst [vmem:[#allocation5 + $0x6d0] sm:$0xff] %v956_v58 }
 0x1cc   :  { %959 = vst [vmem:[#allocation5 + $0x6d8] sm:$0xff] %v958_v59  ;;  %970 = vst [vmem:[#allocation5 + $0x6e0] sm:$0xf] %v11314_v60 }
 0x1cd   :  { %974 = vsyncadd [#allocation7 + $0x2], 28224  ;;  %s20132_s18 = sld [smem:[#allocation68_spill]] }
 0x1d3   :  { %v17075_v61 = vld [vmem:[%s20132_s18] sm:$0xff]  ;;  %v17078_v62 = vld [vmem:[%s20132_s18 + $0x8] sm:$0xff]  ;;  %v17081_v63 = vld [vmem:[%s20132_s18 + $0x10] sm:$0xff] }
 0x1d4   :  { %20133 = vst [vmem:[#allocation71_spill] sm:$0xff] %v17075_v61  ;;  %20134 = vst [vmem:[#allocation72_spill] sm:$0xff] %v17078_v62  ;;  %v17084_v0 = vld [vmem:[%s20132_s18 + $0x18] sm:$0xff]  ;;  %v17087_v1 = vld [vmem:[%s20132_s18 + $0x20] sm:$0xff] }
 0x1d5   :  { %20135 = vst [vmem:[#allocation73_spill] sm:$0xff] %v17081_v63  ;;  %20136 = vst [vmem:[#allocation74_spill] sm:$0xff] %v17084_v0  ;;  %v17090_v2 = vld [vmem:[%s20132_s18 + $0x28] sm:$0xff]  ;;  %v17093_v3 = vld [vmem:[%s20132_s18 + $0x30] sm:$0xff] }
 0x1d6   :  { %20137 = vst [vmem:[#allocation75_spill] sm:$0xff] %v17087_v1  ;;  %20138 = vst [vmem:[#allocation76_spill] sm:$0xff] %v17090_v2  ;;  %v17096_v4 = vld [vmem:[%s20132_s18 + $0x38] sm:$0xff]  ;;  %v17099_v5 = vld [vmem:[%s20132_s18 + $0x40] sm:$0xff] }
 0x1d7   :  { %20139 = vst [vmem:[#allocation77_spill] sm:$0xff] %v17093_v3  ;;  %20140 = vst [vmem:[#allocation78_spill] sm:$0xff] %v17096_v4  ;;  %v17102_v6 = vld [vmem:[%s20132_s18 + $0x48] sm:$0xff]  ;;  %v17105_v7 = vld [vmem:[%s20132_s18 + $0x50] sm:$0xff] }
 0x1d8   :  { %20141 = vst [vmem:[#allocation79_spill] sm:$0xff] %v17099_v5  ;;  %20142 = vst [vmem:[#allocation80_spill] sm:$0xff] %v17102_v6  ;;  %v17108_v8 = vld [vmem:[%s20132_s18 + $0x58] sm:$0xff]  ;;  %v17111_v9 = vld [vmem:[%s20132_s18 + $0x60] sm:$0xff] }
 0x1d9   :  { %20143 = vst [vmem:[#allocation81_spill] sm:$0xff] %v17105_v7  ;;  %20144 = vst [vmem:[#allocation82_spill] sm:$0xff] %v17108_v8  ;;  %v17114_v10 = vld [vmem:[%s20132_s18 + $0x68] sm:$0xff]  ;;  %v17117_v11 = vld [vmem:[%s20132_s18 + $0x70] sm:$0xff] }
 0x1da   :  { %20145 = vst [vmem:[#allocation83_spill] sm:$0xff] %v17111_v9  ;;  %20146 = vst [vmem:[#allocation84_spill] sm:$0xff] %v17114_v10  ;;  %v17120_v12 = vld [vmem:[%s20132_s18 + $0x78] sm:$0xff]  ;;  %v17123_v13 = vld [vmem:[%s20132_s18 + $0x80] sm:$0xff] }
 0x1db   :  { %20147 = vst [vmem:[#allocation85_spill] sm:$0xff] %v17117_v11  ;;  %20148 = vst [vmem:[#allocation86_spill] sm:$0xff] %v17120_v12  ;;  %v17126_v14 = vld [vmem:[%s20132_s18 + $0x88] sm:$0xff]  ;;  %v17129_v15 = vld [vmem:[%s20132_s18 + $0x90] sm:$0xff] }
 0x1dc   :  { %20149 = vst [vmem:[#allocation87_spill] sm:$0xff] %v17123_v13  ;;  %20150 = vst [vmem:[#allocation88_spill] sm:$0xff] %v17126_v14  ;;  %v17132_v16 = vld [vmem:[%s20132_s18 + $0x98] sm:$0xff]  ;;  %v17135_v17 = vld [vmem:[%s20132_s18 + $0xa0] sm:$0xff] }
 0x1dd   :  { %20151 = vst [vmem:[#allocation89_spill] sm:$0xff] %v17129_v15  ;;  %20152 = vst [vmem:[#allocation90_spill] sm:$0xff] %v17132_v16  ;;  %v17138_v18 = vld [vmem:[%s20132_s18 + $0xa8] sm:$0xff]  ;;  %v17141_v19 = vld [vmem:[%s20132_s18 + $0xb0] sm:$0xff] }
 0x1de   :  { %20153 = vst [vmem:[#allocation91_spill] sm:$0xff] %v17135_v17  ;;  %20154 = vst [vmem:[#allocation92_spill] sm:$0xff] %v17138_v18  ;;  %v17144_v20 = vld [vmem:[%s20132_s18 + $0xb8] sm:$0xff]  ;;  %v17147_v21 = vld [vmem:[%s20132_s18 + $0xc0] sm:$0xff] }
 0x1df   :  { %20155 = vst [vmem:[#allocation93_spill] sm:$0xff] %v17141_v19  ;;  %20156 = vst [vmem:[#allocation94_spill] sm:$0xff] %v17144_v20  ;;  %v17150_v22 = vld [vmem:[%s20132_s18 + $0xc8] sm:$0xff]  ;;  %v17153_v23 = vld [vmem:[%s20132_s18 + $0xd0] sm:$0xff] }
 0x1e0   :  { %20157 = vst [vmem:[#allocation95_spill] sm:$0xff] %v17147_v21  ;;  %20158 = vst [vmem:[#allocation96_spill] sm:$0xff] %v17150_v22  ;;  %v17156_v24 = vld [vmem:[%s20132_s18 + $0xd8] sm:$0xff]  ;;  %v17159_v25 = vld [vmem:[%s20132_s18 + $0xe0] sm:$0xff] }
 0x1e1   :  { %20159 = vst [vmem:[#allocation97_spill] sm:$0xff] %v17153_v23  ;;  %20160 = vst [vmem:[#allocation98_spill] sm:$0xff] %v17156_v24  ;;  %v17162_v26 = vld [vmem:[%s20132_s18 + $0xe8] sm:$0xff]  ;;  %v17165_v27 = vld [vmem:[%s20132_s18 + $0xf0] sm:$0xff] }
 0x1e2   :  { %20161 = vst [vmem:[#allocation99_spill] sm:$0xff] %v17159_v25  ;;  %20162 = vst [vmem:[#allocation100_spill] sm:$0xff] %v17162_v26  ;;  %v17168_v28 = vld [vmem:[%s20132_s18 + $0xf8] sm:$0xff]  ;;  %v17171_v29 = vld [vmem:[%s20132_s18 + $0x100] sm:$0xff] }
 0x1e3   :  { %20163 = vst [vmem:[#allocation101_spill] sm:$0xff] %v17165_v27  ;;  %20164 = vst [vmem:[#allocation102_spill] sm:$0xff] %v17168_v28  ;;  %v17174_v30 = vld [vmem:[%s20132_s18 + $0x108] sm:$0xff]  ;;  %v17177_v31 = vld [vmem:[%s20132_s18 + $0x110] sm:$0xff] }
 0x1e4   :  { %20165 = vst [vmem:[#allocation103_spill] sm:$0xff] %v17171_v29  ;;  %20166 = vst [vmem:[#allocation104_spill] sm:$0xff] %v17174_v30  ;;  %v17180_v32 = vld [vmem:[%s20132_s18 + $0x118] sm:$0xff]  ;;  %v17183_v33 = vld [vmem:[%s20132_s18 + $0x120] sm:$0xff] }
 0x1e5   :  { %20167 = vst [vmem:[#allocation105_spill] sm:$0xff] %v17177_v31  ;;  %20168 = vst [vmem:[#allocation106_spill] sm:$0xff] %v17180_v32  ;;  %v17186_v34 = vld [vmem:[%s20132_s18 + $0x128] sm:$0xff]  ;;  %v17189_v35 = vld [vmem:[%s20132_s18 + $0x130] sm:$0xff] }
 0x1e6   :  { %20169 = vst [vmem:[#allocation107_spill] sm:$0xff] %v17183_v33  ;;  %20170 = vst [vmem:[#allocation108_spill] sm:$0xff] %v17186_v34  ;;  %v17192_v36 = vld [vmem:[%s20132_s18 + $0x138] sm:$0xff]  ;;  %v17195_v37 = vld [vmem:[%s20132_s18 + $0x140] sm:$0xff] }
 0x1e7   :  { %20171 = vst [vmem:[#allocation109_spill] sm:$0xff] %v17189_v35  ;;  %20172 = vst [vmem:[#allocation110_spill] sm:$0xff] %v17192_v36  ;;  %v17198_v38 = vld [vmem:[%s20132_s18 + $0x148] sm:$0xff]  ;;  %v17201_v39 = vld [vmem:[%s20132_s18 + $0x150] sm:$0xff] }
 0x1e8   :  { %20173 = vst [vmem:[#allocation111_spill] sm:$0xff] %v17195_v37  ;;  %20174 = vst [vmem:[#allocation112_spill] sm:$0xff] %v17198_v38  ;;  %v17204_v40 = vld [vmem:[%s20132_s18 + $0x158] sm:$0xff]  ;;  %v17207_v41 = vld [vmem:[%s20132_s18 + $0x160] sm:$0xff] }
 0x1e9   :  { %20175 = vst [vmem:[#allocation113_spill] sm:$0xff] %v17201_v39  ;;  %20176 = vst [vmem:[#allocation114_spill] sm:$0xff] %v17204_v40  ;;  %v17210_v42 = vld [vmem:[%s20132_s18 + $0x168] sm:$0xff]  ;;  %v17213_v43 = vld [vmem:[%s20132_s18 + $0x170] sm:$0xff] }
 0x1ea   :  { %20177 = vst [vmem:[#allocation115_spill] sm:$0xff] %v17207_v41  ;;  %20178 = vst [vmem:[#allocation116_spill] sm:$0xff] %v17210_v42  ;;  %v17216_v44 = vld [vmem:[%s20132_s18 + $0x178] sm:$0xff]  ;;  %v17219_v45 = vld [vmem:[%s20132_s18 + $0x180] sm:$0xff] }
 0x1eb   :  { %20179 = vst [vmem:[#allocation117_spill] sm:$0xff] %v17213_v43  ;;  %20180 = vst [vmem:[#allocation118_spill] sm:$0xff] %v17216_v44  ;;  %v17222_v46 = vld [vmem:[%s20132_s18 + $0x188] sm:$0xff] }
 0x1ec   :  { %20181 = vst [vmem:[#allocation119_spill] sm:$0xff] %v17219_v45  ;;  %20182 = vst [vmem:[#allocation120_spill] sm:$0xff] %v17222_v46 }
 0x1ed   :  { %1115 = vsyncadd [#allocation7 + $0x3], 6400  ;;  %v14869_v47 = vld [vmem:[#allocation8 + $0x4] ss:$28 sps:$4 sm:$0xff]   ;;  %v19960_v49 = vmov 0   ;;  %s20183_s29 = sld [smem:[#allocation56_spill]] }
 0x1ee   :  { %v14871_v48 = vld [vmem:[#allocation8] ss:$28 sps:$4 sm:$0xff]   ;;  %1367 = vmatprep.mubr.bf16.mxu0 %v19960_v49  ;;  %1408 = vmatprep.mubr.bf16.mxu1 %v19960_v49  ;;  %v14874_v51 = vld [vmem:[#allocation8 + $0x38] ss:$28 sps:$4 sm:$0xff]   ;;  %v14881_v53 = vld [vmem:[#allocation8 + $0xc] ss:$28 sps:$4 sm:$0xff]  }
 0x1ef   :  { %v14872_v50 = vld [vmem:[#allocation8 + $0x3c] ss:$28 sps:$4 sm:$0xff]   ;;  %1335 = vmatprep.subr.bf16.mxu0 %v14869_v47  ;;  %v14875_v52 = vld [vmem:[#allocation8 + $0x74] ss:$28 sps:$4 sm:$0xff]   ;;  %v14883_v54 = vld [vmem:[#allocation8 + $0x8] ss:$28 sps:$4 sm:$0xff]   ;;  %1376 = vmatprep.subr.bf16.mxu1 %v14881_v53 }
 0x1f0   :  { %1336 = vmatpush1.bf16.msra.mxu0 %v14871_v48  ;;  %v14877_v55 = vld [vmem:[#allocation8 + $0x70] ss:$28 sps:$4 sm:$0xff]   ;;  %v14884_v56 = vld [vmem:[#allocation8 + $0x44] ss:$28 sps:$4 sm:$0xff]   ;;  %1377 = vmatpush1.bf16.msra.mxu1 %v14883_v54  ;;  %v14887_v59 = vld [vmem:[#allocation8 + $0x7c] ss:$28 sps:$4 sm:$0xff]  }
 0x1f1   :  { %1337 = vmatprep.subr.bf16.mxu0 %v14872_v50  ;;  %v14878_v57 = vld [vmem:[#allocation8 + $0xac] ss:$28 sps:$4 sm:$0xff]   ;;  %v14886_v58 = vld [vmem:[#allocation8 + $0x40] ss:$28 sps:$4 sm:$0xff]   ;;  %1378 = vmatprep.subr.bf16.mxu1 %v14884_v56  ;;  %v14889_v48 = vld [vmem:[#allocation8 + $0x78] ss:$28 sps:$4 sm:$0xff]  }
 0x1f2   :  { %v14880_v60 = vld [vmem:[#allocation8 + $0xa8] ss:$28 sps:$4 sm:$0xff]   ;;  %v14895_v50 = vld [vmem:[#allocation8 + $0x14] ss:$28 sps:$4 sm:$0xff]   ;;  %vm1331_vm0 = vcmask 523264   ;;  %s20185_s22 = sld [smem:[#allocation58_spill]] }
 0x1f3   :  { %v1116_v47 = vld [vmem:[%s20183_s29] sm:$0xff]  ;;  %v14890_v49 = vld [vmem:[#allocation8 + $0xb4] ss:$28 sps:$4 sm:$0xff]   ;;  %vm16579_vm1 = vmmov 0   ;;  %s20186_s3 = sld [smem:[#allocation57_spill]]  ;;  %s20192_s24 = sld [smem:[#allocation60_spill]] }
 0x1f4   :  { %1338 = vmatpush1.bf16.msra.mxu0 %v14874_v51  ;;  %1379 = vmatpush1.bf16.msra.mxu1 %v14886_v58  ;;  %v1117_v46 = vpack.c.bf16 %v1116_v47, %v1116_v47  ;;  %v14892_v51 = vld [vmem:[#allocation8 + $0xb0] ss:$28 sps:$4 sm:$0xff]   ;;  %v14896_v54 = vld [vmem:[#allocation8 + $0x48] ss:$28 sps:$4 sm:$0xff]   ;;  %v19962_v58 = vmov 0.0   ;;  %vm2734_vm2 = vcmask 261120  }
 0x1f5   :  { %1339 = vmatprep.subr.bf16.mxu0 %v14875_v52  ;;  %1380 = vmatprep.subr.bf16.mxu1 %v14887_v59  ;;  %v14893_v53 = vld [vmem:[#allocation8 + $0x10] ss:$28 sps:$4 sm:$0xff]   ;;  %v14901_v56 = vld [vmem:[#allocation8 + $0x84] ss:$28 sps:$4 sm:$0xff]   ;;  %v14902_v47 = vld [vmem:[#allocation8 + $0xb8] ss:$28 sps:$4 sm:$0xff]  }
 0x1f6   :  { %v14898_v52 = vld [vmem:[#allocation8 + $0x4c] ss:$28 sps:$4 sm:$0xff]   ;;  %v14899_v59 = vld [vmem:[#allocation8 + $0x80] ss:$28 sps:$4 sm:$0xff]   ;;  %s20193_s1 = sld [smem:[#allocation61_spill]]  ;;  %s20194_s19 = sld [smem:[#allocation59_spill]] }
 0x1f7   :  { %vm3464_vm3 = vcmask 949248   ;;  %vm3468_vm4 = vcmask 1041408   ;;  %vm3672_vm5 = vcmask 1043456   ;;  %s20196_s6 = sld [smem:[#allocation62_spill]]  ;;  %vm3668_vm6 = vcmask 588800   ;;  %v4046_v15 = vld [vmem:[#allocation17 + $0x1a0] sm:$0xff] }
 0x1f8   :  { %1340 = vmatpush1.bf16.msra.mxu0 %v14877_v55  ;;  %1381 = vmatpush1.bf16.msra.mxu1 %v14889_v48  ;;  %v20184_v55 = vmov 0   ;;  %v14907_v48 = vld [vmem:[#allocation8 + $0x88] ss:$28 sps:$4 sm:$0xff]   ;;  %v14986_v45 = vld [vmem:[%s20185_s22 + $0x18c] ss:$16 sps:$4 sm:$0xff]   ;;  %vm3757_vm7 = vcmask 1040384  }
 0x1f9   :  { %1341 = vmatprep.subr.bf16.mxu0 %v14878_v57  ;;  %1382 = vmatprep.subr.bf16.mxu1 %v14890_v49  ;;  %v14905_v57 = vld [vmem:[#allocation8 + $0x18] ss:$28 sps:$4 sm:$0xff]   ;;  %v15008_v18 = vld [vmem:[%s20185_s22 + $0x208] ss:$16 sps:$4 sm:$0xff]   ;;  %vm3753_vm8 = vcmask 408576   ;;  %vm3836_vm9 = vcmask 162816  }
 0x1fa   :  { %v14904_v49 = vld [vmem:[#allocation8 + $0xbc] ss:$28 sps:$4 sm:$0xff]   ;;  %v15005_v27 = vld [vmem:[%s20185_s22 + $0x200] ss:$16 sps:$4 sm:$0xff]   ;;  %s20197_s23 = sld [smem:[#allocation70_spill]]  ;;  %s20207_s26 = sld [smem:[#allocation63_spill]] }
 0x1fb   :  { %v15013_v25 = vld [vmem:[%s20185_s22 + $0x224] ss:$16 sps:$4 sm:$0xff]   ;;  %v3813_v43 = vld [vmem:[#allocation16 + $0x58] sm:$0xf]  ;;  %s20379_s28 = sld [smem:[#allocation64_spill]] }
 0x1fc   :  { %1342 = vmatpush1.bf16.msra.mxu0 %v14880_v60  ;;  %1383 = vmatpush1.bf16.msra.mxu1 %v14892_v51  ;;  %v14906_v60 = vld [vmem:[#allocation8 + $0x50] ss:$28 sps:$4 sm:$0xff]   ;;  %v14909_v51 = vld [vmem:[%s20185_s22] ss:$16 sps:$4 sm:$0xff]  }
 0x1fd   :  { %1417 = vmatprep.subr.bf16.mxu0 %v14895_v50  ;;  %12145 = vmatprep.subr.bf16.mxu1 %v19962_v58  ;;  %v14911_v50 = vld [vmem:[%s20185_s22 + $0x4] ss:$16 sps:$4 sm:$0xff]   ;;  %v4017_v34 = vld [vmem:[#allocation17 + $0xb8] sm:$0xff] }
 0x1fe   :  { %v4054_v14 = vld [vmem:[#allocation17 + $0x1e0] sm:$0xff]  ;;  %v4021_v42 = vld [vmem:[#allocation17 + $0xd8] sm:$0xff]  ;;  %v4028_v40 = vld [vmem:[#allocation17 + $0x110] sm:$0xff] }
 0x1ff   :  { %11343 = vmatmul.mubr.msk.bf16.vlgmr.msra.gmra.mrb[0].mxu0 %vm1331_vm0, %v1117_v46  ;;  %11344 = vmatmul.mubr.msk.bf16.vlgmr.msra.gmra.mrb[0].mxu1 %vm1331_vm0, %v1117_v46  ;;  %v4029_v41 = vld [vmem:[#allocation17 + $0x118] sm:$0xff]  ;;  %v4032_v31 = vld [vmem:[#allocation17 + $0x130] sm:$0xff] }
 0x200   :  { %1418 = vmatpush1.bf16.msra.mxu0 %v14893_v53  ;;  %1449 = vmatprep.mubr.bf16.mxu0 %v20184_v55  ;;  %v14908_v53 = vld [vmem:[#allocation8 + $0xc0] ss:$28 sps:$4 sm:$0xff]  }
 0x201   :  { %1419 = vmatprep.subr.bf16.mxu0 %v14898_v52  ;;  %12146 = vmatpush3.bf16.msra.mxu1 %v14905_v57  ;;  %v14917_v52 = vld [vmem:[%s20185_s22 + $0x24] ss:$16 sps:$4 sm:$0xff]   ;;  %v14912_v57 = vld [vmem:[%s20185_s22 + $0x8] ss:$16 sps:$4 sm:$0xff]  }
 0x202   :  { %12147 = vmatprep.subr.bf16.mxu1 %v19962_v58  ;;  %12153 = vmatprep.mubr.msk.bf16.mxu1 %vm16579_vm1, %v19962_v58  ;;  %v4033_v32 = vld [vmem:[#allocation17 + $0x138] sm:$0xff]  ;;  %v4036_v39 = vld [vmem:[#allocation17 + $0x150] sm:$0xff] }
 0x203   :  { %v4040_v30 = vld [vmem:[#allocation17 + $0x170] sm:$0xff] }
 0x204   :  { %1420 = vmatpush1.bf16.msra.mxu0 %v14896_v54  ;;  %v14914_v54 = vld [vmem:[%s20185_s22 + $0xc] ss:$16 sps:$4 sm:$0xff]   ;;  %v4044_v38 = vld [vmem:[#allocation17 + $0x190] sm:$0xff] }
 0x205   :  { %1421 = vmatprep.subr.bf16.mxu0 %v14901_v56  ;;  %12148 = vmatpush3.bf16.msra.mxu1 %v14906_v60  ;;  %v14915_v56 = vld [vmem:[%s20185_s22 + $0x20] ss:$16 sps:$4 sm:$0xff]  }
 0x206   :  { %12149 = vmatprep.subr.bf16.mxu1 %v19962_v58  ;;  %v14921_v60 = vld [vmem:[%s20185_s22 + $0x40] ss:$16 sps:$4 sm:$0xff]  }
 0x207   :  { %v4048_v29 = vld [vmem:[#allocation17 + $0x1b0] sm:$0xff] }
 0x208   :  { %1422 = vmatpush1.bf16.msra.mxu0 %v14899_v59  ;;  %v14923_v59 = vld [vmem:[%s20185_s22 + $0x44] ss:$16 sps:$4 sm:$0xff]  }
 0x209   :  { %1423 = vmatprep.subr.bf16.mxu0 %v14904_v49  ;;  %12150 = vmatpush3.bf16.msra.mxu1 %v14907_v48  ;;  %v14920_v49 = vld [vmem:[%s20185_s22 + $0x2c] ss:$16 sps:$4 sm:$0xff]   ;;  %v14929_v48 = vld [vmem:[%s20185_s22 + $0x64] ss:$16 sps:$4 sm:$0xff]  }
 0x20a   :  { %12151 = vmatprep.subr.bf16.mxu1 %v19962_v58  ;;  %v14971_v58 = vld [vmem:[%s20185_s22 + $0x144] ss:$16 sps:$4 sm:$0xff]  }
 0x20b   :  { %v4052_v37 = vld [vmem:[#allocation17 + $0x1d0] sm:$0xff] }
 0x20c   :  { %1424 = vmatpush1.bf16.msra.mxu0 %v14902_v47  ;;  %v14918_v47 = vld [vmem:[%s20185_s22 + $0x28] ss:$16 sps:$4 sm:$0xff]  }
 0x20d   :  { %2738 = vmatprep.subr.bf16.mxu0 %v14911_v50  ;;  %12152 = vmatpush3.bf16.msra.mxu1 %v14908_v53  ;;  %v14926_v50 = vld [vmem:[%s20185_s22 + $0x4c] ss:$16 sps:$4 sm:$0xff]   ;;  %v14924_v53 = vld [vmem:[%s20185_s22 + $0x48] ss:$16 sps:$4 sm:$0xff]  }
 0x20e   :  { %2902 = vmatprep.subr.bf16.mxu1 %v14914_v54  ;;  %v14933_v54 = vld [vmem:[%s20185_s22 + $0x80] ss:$16 sps:$4 sm:$0xff]  }
 0x20f   :  { %11345 = vmatmul.mubr.msk.bf16.vlgmr.msra.gmra.mrb[4].mxu0 %vm1331_vm0, %v1117_v46  ;;  %v4056_v21 = vld [vmem:[#allocation17 + $0x1f0] sm:$0xff] }
 0x210   :  { %2739 = vmatpush1.bf16.msra.mxu0 %v14909_v51  ;;  %12154 = vmatmul.mubr.msk.bf16.vlgmr.msra.gmra.mrb[4].mxu1 %vm1331_vm0, %v1117_v46  ;;  %v14927_v51 = vld [vmem:[%s20185_s22 + $0x60] ss:$16 sps:$4 sm:$0xff]   ;;  %v14935_v46 = vld [vmem:[%s20185_s22 + $0x84] ss:$16 sps:$4 sm:$0xff]  }
 0x211   :  { %2740 = vmatprep.subr.bf16.mxu0 %v14917_v52  ;;  %2903 = vmatpush1.bf16.msra.mxu1 %v14912_v57  ;;  %v14932_v52 = vld [vmem:[%s20185_s22 + $0x6c] ss:$16 sps:$4 sm:$0xff]   ;;  %v14941_v57 = vld [vmem:[%s20185_s22 + $0xa4] ss:$16 sps:$4 sm:$0xff]  }
 0x212   :  { %2904 = vmatprep.subr.bf16.mxu1 %v14920_v49  ;;  %v14939_v49 = vld [vmem:[%s20185_s22 + $0xa0] ss:$16 sps:$4 sm:$0xff]  }
 0x214   :  { %2741 = vmatpush1.bf16.msra.mxu0 %v14915_v56  ;;  %v14930_v56 = vld [vmem:[%s20185_s22 + $0x68] ss:$16 sps:$4 sm:$0xff]  }
 0x215   :  { %2742 = vmatprep.subr.bf16.mxu0 %v14923_v59  ;;  %2905 = vmatpush1.bf16.msra.mxu1 %v14918_v47  ;;  %v14938_v59 = vld [vmem:[%s20185_s22 + $0x8c] ss:$16 sps:$4 sm:$0xff]   ;;  %v14947_v47 = vld [vmem:[%s20185_s22 + $0xc4] ss:$16 sps:$4 sm:$0xff]  }
 0x216   :  { %2906 = vmatprep.subr.bf16.mxu1 %v14926_v50  ;;  %v14942_v50 = vld [vmem:[%s20185_s22 + $0xa8] ss:$16 sps:$4 sm:$0xff]  }
 0x218   :  { %2743 = vmatpush1.bf16.msra.mxu0 %v14921_v60  ;;  %v14936_v60 = vld [vmem:[%s20185_s22 + $0x88] ss:$16 sps:$4 sm:$0xff]  }
 0x219   :  { %2744 = vmatprep.subr.bf16.mxu0 %v14929_v48  ;;  %2907 = vmatpush1.bf16.msra.mxu1 %v14924_v53  ;;  %v14944_v48 = vld [vmem:[%s20185_s22 + $0xac] ss:$16 sps:$4 sm:$0xff]  }
 0x21a   :  { %2908 = vmatprep.subr.bf16.mxu1 %v14932_v52  ;;  %v14950_v53 = vld [vmem:[%s20185_s22 + $0xcc] ss:$16 sps:$4 sm:$0xff]   ;;  %v14951_v52 = vld [vmem:[%s20185_s22 + $0xe0] ss:$16 sps:$4 sm:$0xff]  }
 0x21c   :  { %2745 = vmatpush1.bf16.msra.mxu0 %v14927_v51  ;;  %v14945_v51 = vld [vmem:[%s20185_s22 + $0xc0] ss:$16 sps:$4 sm:$0xff]  }
 0x21d   :  { %2746 = vmatprep.subr.bf16.mxu0 %v14935_v46  ;;  %2909 = vmatpush1.bf16.msra.mxu1 %v14930_v56  ;;  %v14953_v46 = vld [vmem:[%s20185_s22 + $0xe4] ss:$16 sps:$4 sm:$0xff]  }
 0x21e   :  { %2910 = vmatprep.subr.bf16.mxu1 %v14938_v59  ;;  %v14959_v56 = vld [vmem:[%s20185_s22 + $0x104] ss:$16 sps:$4 sm:$0xff]   ;;  %v14957_v59 = vld [vmem:[%s20185_s22 + $0x100] ss:$16 sps:$4 sm:$0xff]  }
 0x220   :  { %2747 = vmatpush1.bf16.msra.mxu0 %v14933_v54  ;;  %v14948_v54 = vld [vmem:[%s20185_s22 + $0xc8] ss:$16 sps:$4 sm:$0xff]  }
 0x221   :  { %2748 = vmatprep.subr.bf16.mxu0 %v14941_v57  ;;  %2911 = vmatpush1.bf16.msra.mxu1 %v14936_v60  ;;  %v14956_v57 = vld [vmem:[%s20185_s22 + $0xec] ss:$16 sps:$4 sm:$0xff]   ;;  %v14965_v60 = vld [vmem:[%s20185_s22 + $0x124] ss:$16 sps:$4 sm:$0xff]  }
 0x222   :  { %2912 = vmatprep.subr.bf16.mxu1 %v14944_v48  ;;  %v14963_v48 = vld [vmem:[%s20185_s22 + $0x120] ss:$16 sps:$4 sm:$0xff]  }
 0x224   :  { %2749 = vmatpush1.bf16.msra.mxu0 %v14939_v49  ;;  %v14954_v49 = vld [vmem:[%s20185_s22 + $0xe8] ss:$16 sps:$4 sm:$0xff]  }
 0x225   :  { %2750 = vmatprep.subr.bf16.mxu0 %v14947_v47  ;;  %2913 = vmatpush1.bf16.msra.mxu1 %v14942_v50  ;;  %v14962_v47 = vld [vmem:[%s20185_s22 + $0x10c] ss:$16 sps:$4 sm:$0xff]  }
 0x226   :  { %2914 = vmatprep.subr.bf16.mxu1 %v14950_v53  ;;  %v14968_v50 = vld [vmem:[%s20185_s22 + $0x12c] ss:$16 sps:$4 sm:$0xff]   ;;  %v14969_v53 = vld [vmem:[%s20185_s22 + $0x140] ss:$16 sps:$4 sm:$0xff]  }
 0x228   :  { %2751 = vmatpush1.bf16.msra.mxu0 %v14945_v51  ;;  %v14960_v51 = vld [vmem:[%s20185_s22 + $0x108] ss:$16 sps:$4 sm:$0xff]  }
 0x229   :  { %2752 = vmatprep.subr.bf16.mxu0 %v14953_v46  ;;  %2915 = vmatpush1.bf16.msra.mxu1 %v14948_v54  ;;  %v14966_v46 = vld [vmem:[%s20185_s22 + $0x128] ss:$16 sps:$4 sm:$0xff]   ;;  %v14974_v54 = vld [vmem:[%s20185_s22 + $0x14c] ss:$16 sps:$4 sm:$0xff]  }
 0x22a   :  { %2916 = vmatprep.subr.bf16.mxu1 %v14956_v57  ;;  %v14972_v57 = vld [vmem:[%s20185_s22 + $0x148] ss:$16 sps:$4 sm:$0xff]  }
 0x22c   :  { %2753 = vmatpush1.bf16.msra.mxu0 %v14951_v52  ;;  %v14977_v52 = vld [vmem:[%s20185_s22 + $0x164] ss:$16 sps:$4 sm:$0xff]  }
 0x22d   :  { %2754 = vmatprep.subr.bf16.mxu0 %v14959_v56  ;;  %2917 = vmatpush1.bf16.msra.mxu1 %v14954_v49  ;;  %v14975_v56 = vld [vmem:[%s20185_s22 + $0x160] ss:$16 sps:$4 sm:$0xff]   ;;  %v14980_v49 = vld [vmem:[%s20185_s22 + $0x16c] ss:$16 sps:$4 sm:$0xff]  }
 0x22e   :  { %2918 = vmatprep.subr.bf16.mxu1 %v14962_v47  ;;  %v14978_v47 = vld [vmem:[%s20185_s22 + $0x168] ss:$16 sps:$4 sm:$0xff]  }
 0x230   :  { %2755 = vmatpush1.bf16.msra.mxu0 %v14957_v59  ;;  %v14983_v59 = vld [vmem:[%s20185_s22 + $0x184] ss:$16 sps:$4 sm:$0xff]  }
 0x231   :  { %2756 = vmatprep.subr.bf16.mxu0 %v14965_v60  ;;  %2919 = vmatpush1.bf16.msra.mxu1 %v14960_v51  ;;  %v14981_v60 = vld [vmem:[%s20185_s22 + $0x180] ss:$16 sps:$4 sm:$0xff]   ;;  %v14984_v51 = vld [vmem:[%s20185_s22 + $0x188] ss:$16 sps:$4 sm:$0xff]  }
 0x232   :  { %2920 = vmatprep.subr.bf16.mxu1 %v14968_v50  ;;  %v14992_v50 = vld [vmem:[%s20185_s22 + $0x1ac] ss:$16 sps:$4 sm:$0xff]  }
 0x234   :  { %2757 = vmatpush1.bf16.msra.mxu0 %v14963_v48  ;;  %v14989_v48 = vld [vmem:[%s20185_s22 + $0x1a4] ss:$16 sps:$4 sm:$0xff]  }
 0x235   :  { %2758 = vmatprep.subr.bf16.mxu0 %v14971_v58  ;;  %2921 = vmatpush1.bf16.msra.mxu1 %v14966_v46  ;;  %v14987_v58 = vld [vmem:[%s20185_s22 + $0x1a0] ss:$16 sps:$4 sm:$0xff]   ;;  %v14995_v46 = vld [vmem:[%s20185_s22 + $0x1c4] ss:$16 sps:$4 sm:$0xff]  }
 0x236   :  { %2922 = vmatprep.subr.bf16.mxu1 %v14974_v54  ;;  %v14993_v54 = vld [vmem:[%s20185_s22 + $0x1c0] ss:$16 sps:$4 sm:$0xff]  }
 0x238   :  { %2759 = vmatpush1.bf16.msra.mxu0 %v14969_v53  ;;  %v14990_v53 = vld [vmem:[%s20185_s22 + $0x1a8] ss:$16 sps:$4 sm:$0xff]  }
 0x239   :  { %2760 = vmatprep.subr.bf16.mxu0 %v14977_v52  ;;  %2923 = vmatpush1.bf16.msra.mxu1 %v14972_v57  ;;  %v14998_v52 = vld [vmem:[%s20185_s22 + $0x1cc] ss:$16 sps:$4 sm:$0xff]   ;;  %v15001_v57 = vld [vmem:[%s20185_s22 + $0x1e4] ss:$16 sps:$4 sm:$0xff]  }
 0x23a   :  { %2924 = vmatprep.subr.bf16.mxu1 %v14980_v49  ;;  %v15002_v49 = vld [vmem:[%s20185_s22 + $0x1e8] ss:$16 sps:$4 sm:$0xff]  }
 0x23c   :  { %2761 = vmatpush1.bf16.msra.mxu0 %v14975_v56  ;;  %v14996_v56 = vld [vmem:[%s20185_s22 + $0x1c8] ss:$16 sps:$4 sm:$0xff]  }
 0x23d   :  { %2762 = vmatprep.subr.bf16.mxu0 %v14983_v59  ;;  %2925 = vmatpush1.bf16.msra.mxu1 %v14978_v47  ;;  %v14999_v59 = vld [vmem:[%s20185_s22 + $0x1e0] ss:$16 sps:$4 sm:$0xff]   ;;  %v15010_v47 = vld [vmem:[%s20185_s22 + $0x20c] ss:$16 sps:$4 sm:$0xff]  }
 0x23e   :  { %2926 = vmatprep.subr.bf16.mxu1 %v14986_v45  ;;  %v15004_v45 = vld [vmem:[%s20185_s22 + $0x1ec] ss:$16 sps:$4 sm:$0xff]  }
 0x240   :  { %2763 = vmatpush1.bf16.msra.mxu0 %v14981_v60  ;;  %v15007_v60 = vld [vmem:[%s20185_s22 + $0x204] ss:$16 sps:$4 sm:$0xff]  }
 0x241   :  { %2764 = vmatprep.subr.bf16.mxu0 %v14989_v48  ;;  %2927 = vmatpush1.bf16.msra.mxu1 %v14984_v51  ;;  %v1152_v48 = vlaneseq }
 0x242   :  { %2928 = vmatprep.subr.bf16.mxu1 %v14992_v50  ;;  %v17310_v50 = vld [vmem:[%s20186_s3] sm:$0x7f] }
 0x244   :  { %2765 = vmatpush1.bf16.msra.mxu0 %v14987_v58  ;;  %v17304_v58 = vshrl.u32 %v1152_v48, 7 }
 0x245   :  { %2929 = vmatpush1.bf16.msra.mxu1 %v14990_v53  ;;  %2766 = vmatprep.subr.bf16.mxu0 %v14995_v46 }
 0x246   :  { %2930 = vmatprep.subr.bf16.mxu1 %v14998_v52  ;;  %20187 = vst [vmem:[#allocation121_spill] sm:$0xff] %v17304_v58  ;;  %v17307_v51 = vsub.s32 0, %v17304_v58  ;;  %v17313_v53 = vsub.s32 1, %v17304_v58 }
 0x248   :  { %2767 = vmatpush1.bf16.msra.mxu0 %v14993_v54  ;;  %20188 = vst [vmem:[#allocation122_spill] sm:$0xff] %v17307_v51  ;;  %20189 = vst [vmem:[#allocation123_spill] sm:$0xff] %v17313_v53  ;;  %v1155_v46 = vrot.slane %v17310_v50, %v17307_v51  ;;  %v1159_v52 = vrot.slane %v17310_v50, %v17313_v53  ;;  %v17320_v54 = vsub.s32 3, %v17304_v58 }
 0x249   :  { %2931 = vmatpush1.bf16.msra.mxu1 %v14996_v56  ;;  %2768 = vmatprep.subr.bf16.mxu0 %v15001_v57 }
 0x24a   :  { %2932 = vmatprep.subr.bf16.mxu1 %v15004_v45  ;;  %20190 = vst [vmem:[#allocation124_spill] sm:$0xff] %v17320_v54  ;;  %v1167_v48 = vrot.slane %v17310_v50, %v17320_v54 }
 0x24c   :  { %2769 = vmatpush1.bf16.msra.mxu0 %v14999_v59 }
 0x24d   :  { %2933 = vmatpush1.bf16.msra.mxu1 %v15002_v49  ;;  %2779 = vmatprep.subr.bf16.mxu0 %v15007_v60 }
 0x24e   :  { %2943 = vmatprep.subr.bf16.mxu1 %v15010_v47 }
 0x2d2   :  { %v1369_v56 = vpop.f32.mrb[0].mxu0  ;;  %v17324_v28 = vpop.f32.mrb[0].mxu1 }
 0x2d3   :  { %v1370_v57 = vadd.f32 %v1369_v56, %v1155_v46  ;;  %v1371_v45 = vpop.f32.mrb[1].mxu0  ;;  %v1412_v26 = vpop.f32.mrb[1].mxu1  ;;  %v15016_v46 = vld [vmem:[%s20185_s22 + $0x22c] ss:$16 sps:$4 sm:$0xff]  }
 0x2d4   :  { %v1372_v59 = vadd.f32 %v1371_v45, %v1159_v52  ;;  %v1373_v49 = vpop.f32.mrb[2].mxu0  ;;  %v1413_v52 = vadd.f32 %v1412_v26, %v1167_v48  ;;  %v1414_v56 = vpop.f32.mrb[2].mxu1  ;;  %v15011_v45 = vld [vmem:[%s20185_s22 + $0x220] ss:$16 sps:$4 sm:$0xff]  }
 0x2d5   :  { %v1498_v60 = vmax.f32 %v1370_v57, 0.0  ;;  %v1374_v47 = vpop.f32.mrb[3].mxu0  ;;  %v1415_v57 = vpop.f32.mrb[3].mxu1  ;;  %v15019_v49 = vld [vmem:[%s20185_s22 + $0x244] ss:$16 sps:$4 sm:$0xff]  }
 0x2d6   :  { %v1499_v20 = vmax.f32 %v1372_v59, 0.0  ;;  %v15014_v59 = vld [vmem:[%s20185_s22 + $0x228] ss:$16 sps:$4 sm:$0xff]   ;;  %v15023_v48 = vld [vmem:[%s20185_s22 + $0x260] ss:$16 sps:$4 sm:$0xff]  }
 0x2d7   :  { %v1505_v17 = vpack.c.bf16 %v1498_v60, %v1498_v60  ;;  %v15022_v60 = vld [vmem:[%s20185_s22 + $0x24c] ss:$16 sps:$4 sm:$0xff]   ;;  %v15031_v56 = vld [vmem:[%s20185_s22 + $0x284] ss:$16 sps:$4 sm:$0xff]  }
 0x2d8   :  { %v1506_v19 = vpack.c.bf16 %v1499_v20, %v1499_v20  ;;  %v1501_v20 = vmax.f32 %v1413_v52, 0.0  ;;  %v15034_v57 = vld [vmem:[%s20185_s22 + $0x28c] ss:$16 sps:$4 sm:$0xff]  }
 0x2da   :  { %2770 = vmatprep.mubr.bf16.mxu0 %v1506_v19  ;;  %2934 = vmatprep.mubr.bf16.mxu1 %v1506_v19  ;;  %v1508_v26 = vpack.c.bf16 %v1501_v20, %v1501_v20  ;;  %v15020_v19 = vld [vmem:[%s20185_s22 + $0x248] ss:$16 sps:$4 sm:$0xff]  }
 0x2db   :  { %2771 = vmatmul.mubr.bf16.vlgmr.msra.gmra.mrb[8].mxu0 %v1505_v17  ;;  %2935 = vmatmul.mubr.bf16.vlgmr.msra.gmra.mrb[8].mxu1 %v1505_v17  ;;  %v15017_v17 = vld [vmem:[%s20185_s22 + $0x240] ss:$16 sps:$4 sm:$0xff]  }
 0x2dc   :  { %2780 = vmatpush1.bf16.msra.mxu0 %v15005_v27  ;;  %2944 = vmatpush1.bf16.msra.mxu1 %v15008_v18  ;;  %v15025_v18 = vld [vmem:[%s20185_s22 + $0x264] ss:$16 sps:$4 sm:$0xff]   ;;  %v15028_v27 = vld [vmem:[%s20185_s22 + $0x26c] ss:$16 sps:$4 sm:$0xff]  }
 0x2dd   :  { %2781 = vmatprep.subr.bf16.mxu0 %v15013_v25  ;;  %2945 = vmatprep.subr.bf16.mxu1 %v15016_v46  ;;  %v15026_v46 = vld [vmem:[%s20185_s22 + $0x268] ss:$16 sps:$4 sm:$0xff]  }
 0x2de   :  { %2811 = vmatprep.mubr.bf16.mxu0 %v1508_v26  ;;  %2975 = vmatprep.mubr.bf16.mxu1 %v1508_v26  ;;  %v15037_v26 = vld [vmem:[%s20185_s22 + $0x2a4] ss:$16 sps:$4 sm:$0xff]  }
 0x2e0   :  { %2782 = vmatpush1.bf16.msra.mxu0 %v15011_v45  ;;  %2946 = vmatpush1.bf16.msra.mxu1 %v15014_v59  ;;  %v15029_v59 = vld [vmem:[%s20185_s22 + $0x280] ss:$16 sps:$4 sm:$0xff]  }
 0x2e1   :  { %2783 = vmatprep.subr.bf16.mxu0 %v15019_v49  ;;  %2947 = vmatprep.subr.bf16.mxu1 %v15022_v60  ;;  %v15032_v49 = vld [vmem:[%s20185_s22 + $0x288] ss:$16 sps:$4 sm:$0xff]  }
 0x2e2   :  { %v17338_v25 = vpop.f32.mrb[4].mxu0 }
 0x2e3   :  { %v17340_v47 = vpop.f32.mrb[5].mxu0  ;;  %v17346_v45 = vpop.f32.mrb[4].mxu1 }
 0x2e4   :  { %2784 = vmatpush1.bf16.msra.mxu0 %v15017_v17  ;;  %2948 = vmatpush1.bf16.msra.mxu1 %v15020_v19  ;;  %v1455_v52 = vpop.f32.mrb[6].mxu0  ;;  %v12155_v60 = vpop.f32.mrb[5].mxu1  ;;  %v15040_v17 = vld [vmem:[%s20185_s22 + $0x2ac] ss:$16 sps:$4 sm:$0xff]  }
 0x2e5   :  { %2785 = vmatprep.subr.bf16.mxu0 %v15025_v18  ;;  %2949 = vmatprep.subr.bf16.mxu1 %v15028_v27  ;;  %v1456_v20 = vpop.f32.mrb[7].mxu0  ;;  %v1495_v19 = vpop.f32.mrb[6].mxu1  ;;  %v15035_v27 = vld [vmem:[%s20185_s22 + $0x2a0] ss:$16 sps:$4 sm:$0xff]   ;;  %v15046_v52 = vld [vmem:[%s20185_s22 + $0x2cc] ss:$16 sps:$4 sm:$0xff]  }
 0x2e6   :  { %v12156_v18 = vpop.f32.mrb[7].mxu1  ;;  %v15049_v20 = vld [vmem:[%s20185_s22 + $0x2e4] ss:$16 sps:$4 sm:$0xff]   ;;  %v15050_v60 = vld [vmem:[%s20185_s22 + $0x2e8] ss:$16 sps:$4 sm:$0xff]  }
 0x2e7   :  { %v15053_v19 = vld [vmem:[%s20185_s22 + $0x300] ss:$16 sps:$4 sm:$0xff]   ;;  %v15056_v18 = vld [vmem:[%s20185_s22 + $0x308] ss:$16 sps:$4 sm:$0xff]  }
 0x2e8   :  { %2786 = vmatpush1.bf16.msra.mxu0 %v15023_v48  ;;  %2950 = vmatpush1.bf16.msra.mxu1 %v15026_v46  ;;  %v15038_v48 = vld [vmem:[%s20185_s22 + $0x2a8] ss:$16 sps:$4 sm:$0xff]   ;;  %v15043_v46 = vld [vmem:[%s20185_s22 + $0x2c4] ss:$16 sps:$4 sm:$0xff]  }
 0x2e9   :  { %2787 = vmatprep.subr.bf16.mxu0 %v15031_v56  ;;  %2951 = vmatprep.subr.bf16.mxu1 %v15034_v57  ;;  %v15041_v56 = vld [vmem:[%s20185_s22 + $0x2c0] ss:$16 sps:$4 sm:$0xff]   ;;  %v15044_v57 = vld [vmem:[%s20185_s22 + $0x2c8] ss:$16 sps:$4 sm:$0xff]  }
 0x2ec   :  { %2788 = vmatpush1.bf16.msra.mxu0 %v15029_v59  ;;  %2952 = vmatpush1.bf16.msra.mxu1 %v15032_v49  ;;  %v15052_v59 = vld [vmem:[%s20185_s22 + $0x2ec] ss:$16 sps:$4 sm:$0xff]   ;;  %v15047_v49 = vld [vmem:[%s20185_s22 + $0x2e0] ss:$16 sps:$4 sm:$0xff]  }
 0x2ed   :  { %2789 = vmatprep.subr.bf16.mxu0 %v15037_v26  ;;  %2953 = vmatprep.subr.bf16.mxu1 %v15040_v17  ;;  %v15055_v26 = vld [vmem:[%s20185_s22 + $0x304] ss:$16 sps:$4 sm:$0xff]   ;;  %v15058_v17 = vld [vmem:[%s20185_s22 + $0x30c] ss:$16 sps:$4 sm:$0xff]  }
 0x2f0   :  { %2790 = vmatpush1.bf16.msra.mxu0 %v15035_v27  ;;  %2954 = vmatpush1.bf16.msra.mxu1 %v15038_v48  ;;  %v15061_v27 = vld [vmem:[%s20185_s22 + $0x324] ss:$16 sps:$4 sm:$0xff]   ;;  %v15064_v48 = vld [vmem:[%s20185_s22 + $0x32c] ss:$16 sps:$4 sm:$0xff]  }
 0x2f1   :  { %2791 = vmatprep.subr.bf16.mxu0 %v15043_v46  ;;  %2955 = vmatprep.subr.bf16.mxu1 %v15046_v52  ;;  %v15059_v46 = vld [vmem:[%s20185_s22 + $0x320] ss:$16 sps:$4 sm:$0xff]   ;;  %v15062_v52 = vld [vmem:[%s20185_s22 + $0x328] ss:$16 sps:$4 sm:$0xff]  }
 0x2f4   :  { %2792 = vmatpush1.bf16.msra.mxu0 %v15041_v56  ;;  %2956 = vmatpush1.bf16.msra.mxu1 %v15044_v57  ;;  %v15067_v56 = vld [vmem:[%s20185_s22 + $0x344] ss:$16 sps:$4 sm:$0xff]   ;;  %v15070_v57 = vld [vmem:[%s20185_s22 + $0x34c] ss:$16 sps:$4 sm:$0xff]  }
 0x2f5   :  { %2793 = vmatprep.subr.bf16.mxu0 %v15049_v20  ;;  %2957 = vmatprep.subr.bf16.mxu1 %v15052_v59  ;;  %v15065_v20 = vld [vmem:[%s20185_s22 + $0x340] ss:$16 sps:$4 sm:$0xff]   ;;  %v15068_v59 = vld [vmem:[%s20185_s22 + $0x348] ss:$16 sps:$4 sm:$0xff]  }
 0x2f8   :  { %2794 = vmatpush1.bf16.msra.mxu0 %v15047_v49  ;;  %2958 = vmatpush1.bf16.msra.mxu1 %v15050_v60  ;;  %v15073_v49 = vld [vmem:[%s20185_s22 + $0x364] ss:$16 sps:$4 sm:$0xff]   ;;  %v15076_v60 = vld [vmem:[%s20185_s22 + $0x36c] ss:$16 sps:$4 sm:$0xff]  }
 0x2f9   :  { %2795 = vmatprep.subr.bf16.mxu0 %v15055_v26  ;;  %2959 = vmatprep.subr.bf16.mxu1 %v15058_v17  ;;  %v15071_v26 = vld [vmem:[%s20185_s22 + $0x360] ss:$16 sps:$4 sm:$0xff]   ;;  %v15074_v17 = vld [vmem:[%s20185_s22 + $0x368] ss:$16 sps:$4 sm:$0xff]  }
 0x2fc   :  { %2796 = vmatpush1.bf16.msra.mxu0 %v15053_v19  ;;  %2960 = vmatpush1.bf16.msra.mxu1 %v15056_v18  ;;  %v15079_v19 = vld [vmem:[%s20185_s22 + $0x384] ss:$16 sps:$4 sm:$0xff]   ;;  %v15082_v18 = vld [vmem:[%s20185_s22 + $0x38c] ss:$16 sps:$4 sm:$0xff]  }
 0x2fd   :  { %2797 = vmatprep.subr.bf16.mxu0 %v15061_v27  ;;  %2961 = vmatprep.subr.bf16.mxu1 %v15064_v48  ;;  %v17381_v27 = vsub.s32 2, %v17304_v58  ;;  %v15077_v48 = vld [vmem:[%s20185_s22 + $0x380] ss:$16 sps:$4 sm:$0xff]  }
 0x2ff   :  { %20191 = vst [vmem:[#allocation125_spill] sm:$0xff] %v17381_v27 }
 0x300   :  { %2798 = vmatpush1.bf16.msra.mxu0 %v15059_v46  ;;  %2962 = vmatpush1.bf16.msra.mxu1 %v15062_v52  ;;  %v15080_v46 = vld [vmem:[%s20185_s22 + $0x388] ss:$16 sps:$4 sm:$0xff]   ;;  %v15085_v52 = vld [vmem:[%s20185_s22 + $0x3a4] ss:$16 sps:$4 sm:$0xff]  }
 0x301   :  { %2799 = vmatprep.subr.bf16.mxu0 %v15067_v56  ;;  %2963 = vmatprep.subr.bf16.mxu1 %v15070_v57  ;;  %v15088_v56 = vld [vmem:[%s20185_s22 + $0x3ac] ss:$16 sps:$4 sm:$0xff]   ;;  %v19964_v57 = vsub.s32 5, %v17304_v58 }
 0x304   :  { %2800 = vmatpush1.bf16.msra.mxu0 %v15065_v20  ;;  %2964 = vmatpush1.bf16.msra.mxu1 %v15068_v59  ;;  %v1163_v20 = vrot.slane %v17310_v50, %v17381_v27  ;;  %v15083_v59 = vld [vmem:[%s20185_s22 + $0x3a0] ss:$16 sps:$4 sm:$0xff]  }
 0x305   :  { %2801 = vmatprep.subr.bf16.mxu0 %v15073_v49  ;;  %2965 = vmatprep.subr.bf16.mxu1 %v15076_v60  ;;  %v15086_v49 = vld [vmem:[%s20185_s22 + $0x3a8] ss:$16 sps:$4 sm:$0xff]   ;;  %v15091_v60 = vld [vmem:[%s20185_s22 + $0x3c4] ss:$16 sps:$4 sm:$0xff]  }
 0x308   :  { %2802 = vmatpush1.bf16.msra.mxu0 %v15071_v26  ;;  %2966 = vmatpush1.bf16.msra.mxu1 %v15074_v17  ;;  %v15094_v26 = vld [vmem:[%s20185_s22 + $0x3cc] ss:$16 sps:$4 sm:$0xff]   ;;  %v1175_v17 = vrot.slane %v17310_v50, %v19964_v57  ;;  %v15101_v57 = vld [vmem:[%s20185_s22 + $0x400] ss:$16 sps:$4 sm:$0xff]  }
 0x309   :  { %2803 = vmatprep.subr.bf16.mxu0 %v15079_v19  ;;  %2967 = vmatprep.subr.bf16.mxu1 %v15082_v18  ;;  %v1411_v19 = vadd.f32 %v17324_v28, %v1163_v20  ;;  %v15089_v18 = vld [vmem:[%s20185_s22 + $0x3c0] ss:$16 sps:$4 sm:$0xff]   ;;  %v15098_v20 = vld [vmem:[%s20185_s22 + $0x3e8] ss:$16 sps:$4 sm:$0xff]  }
 0x30a   :  { %v15095_v28 = vld [vmem:[%s20185_s22 + $0x3e0] ss:$16 sps:$4 sm:$0xff]  }
 0x30b   :  { %v1500_v16 = vmax.f32 %v1411_v19, 0.0  ;;  %v15112_v19 = vld [vmem:[%s20185_s22 + $0x42c] ss:$16 sps:$4 sm:$0xff]  }
 0x30c   :  { %2804 = vmatpush1.bf16.msra.mxu0 %v15077_v48  ;;  %2968 = vmatpush1.bf16.msra.mxu1 %v15080_v46  ;;  %v15092_v48 = vld [vmem:[%s20185_s22 + $0x3c8] ss:$16 sps:$4 sm:$0xff]   ;;  %v15097_v46 = vld [vmem:[%s20185_s22 + $0x3e4] ss:$16 sps:$4 sm:$0xff]  }
 0x30d   :  { %2805 = vmatprep.subr.bf16.mxu0 %v15085_v52  ;;  %2969 = vmatprep.subr.bf16.mxu1 %v15088_v56  ;;  %v15100_v52 = vld [vmem:[%s20185_s22 + $0x3ec] ss:$16 sps:$4 sm:$0xff]   ;;  %v1454_v56 = vadd.f32 %v17340_v47, %v1175_v17  ;;  %v15104_v47 = vld [vmem:[%s20185_s22 + $0x408] ss:$16 sps:$4 sm:$0xff]   ;;  %v15109_v17 = vld [vmem:[%s20185_s22 + $0x424] ss:$16 sps:$4 sm:$0xff]  }
 0x310   :  { %2806 = vmatpush1.bf16.msra.mxu0 %v15083_v59  ;;  %2970 = vmatpush1.bf16.msra.mxu1 %v15086_v49  ;;  %v15103_v59 = vld [vmem:[%s20185_s22 + $0x404] ss:$16 sps:$4 sm:$0xff]   ;;  %v15106_v49 = vld [vmem:[%s20185_s22 + $0x40c] ss:$16 sps:$4 sm:$0xff]  }
 0x311   :  { %2807 = vmatprep.subr.bf16.mxu0 %v15091_v60  ;;  %2971 = vmatprep.subr.bf16.mxu1 %v15094_v26  ;;  %v1503_v60 = vmax.f32 %v1454_v56, 0.0  ;;  %v1507_v26 = vpack.c.bf16 %v1500_v16, %v1500_v16  ;;  %v15107_v16 = vld [vmem:[%s20185_s22 + $0x420] ss:$16 sps:$4 sm:$0xff]  }
 0x312   :  { %v15113_v56 = vld [vmem:[%s20185_s22 + $0x440] ss:$16 sps:$4 sm:$0xff]  }
 0x314   :  { %2808 = vmatpush1.bf16.msra.mxu0 %v15089_v18  ;;  %2972 = vmatpush1.bf16.msra.mxu1 %v15092_v48  ;;  %v1510_v18 = vpack.c.bf16 %v1503_v60, %v1503_v60  ;;  %v15110_v48 = vld [vmem:[%s20185_s22 + $0x428] ss:$16 sps:$4 sm:$0xff]   ;;  %v15127_v60 = vld [vmem:[%s20185_s22 + $0x484] ss:$16 sps:$4 sm:$0xff]  }
 0x315   :  { %2809 = vmatprep.subr.bf16.mxu0 %v15097_v46  ;;  %2973 = vmatprep.subr.bf16.mxu1 %v15100_v52  ;;  %v15115_v46 = vld [vmem:[%s20185_s22 + $0x444] ss:$16 sps:$4 sm:$0xff]   ;;  %v15118_v52 = vld [vmem:[%s20185_s22 + $0x44c] ss:$16 sps:$4 sm:$0xff]  }
 0x318   :  { %2810 = vmatpush1.bf16.msra.mxu0 %v15095_v28  ;;  %2974 = vmatpush1.bf16.msra.mxu1 %v15098_v20  ;;  %v15121_v28 = vld [vmem:[%s20185_s22 + $0x464] ss:$16 sps:$4 sm:$0xff]   ;;  %v15124_v20 = vld [vmem:[%s20185_s22 + $0x46c] ss:$16 sps:$4 sm:$0xff]  }
 0x319   :  { %2820 = vmatprep.subr.bf16.mxu0 %v15103_v59  ;;  %2984 = vmatprep.subr.bf16.mxu1 %v15106_v49  ;;  %v15119_v59 = vld [vmem:[%s20185_s22 + $0x460] ss:$16 sps:$4 sm:$0xff]   ;;  %v15122_v49 = vld [vmem:[%s20185_s22 + $0x468] ss:$16 sps:$4 sm:$0xff]  }
 0x31b   :  { %2812 = vmatmul.mubr.bf16.vlgmr.msra.gmra.mrb[8].mxu0 %v1507_v26  ;;  %2976 = vmatmul.mubr.bf16.vlgmr.msra.gmra.mrb[8].mxu1 %v1507_v26  ;;  %v15130_v26 = vld [vmem:[%s20185_s22 + $0x48c] ss:$16 sps:$4 sm:$0xff]  }
 0x31c   :  { %2821 = vmatpush1.bf16.msra.mxu0 %v15101_v57  ;;  %2985 = vmatpush1.bf16.msra.mxu1 %v15104_v47  ;;  %v15116_v57 = vld [vmem:[%s20185_s22 + $0x448] ss:$16 sps:$4 sm:$0xff]   ;;  %v15125_v47 = vld [vmem:[%s20185_s22 + $0x480] ss:$16 sps:$4 sm:$0xff]  }
 0x31d   :  { %2822 = vmatprep.subr.bf16.mxu0 %v15109_v17  ;;  %2986 = vmatprep.subr.bf16.mxu1 %v15112_v19  ;;  %v15128_v17 = vld [vmem:[%s20185_s22 + $0x488] ss:$16 sps:$4 sm:$0xff]   ;;  %v15133_v19 = vld [vmem:[%s20185_s22 + $0x4a4] ss:$16 sps:$4 sm:$0xff]  }
 0x31e   :  { %2852 = vmatprep.mubr.bf16.mxu0 %v1510_v18  ;;  %3016 = vmatprep.mubr.bf16.mxu1 %v1510_v18  ;;  %v15136_v18 = vld [vmem:[%s20185_s22 + $0x4ac] ss:$16 sps:$4 sm:$0xff]  }
 0x320   :  { %2823 = vmatpush1.bf16.msra.mxu0 %v15107_v16  ;;  %2987 = vmatpush1.bf16.msra.mxu1 %v15110_v48  ;;  %v15131_v16 = vld [vmem:[%s20185_s22 + $0x4a0] ss:$16 sps:$4 sm:$0xff]   ;;  %v15134_v48 = vld [vmem:[%s20185_s22 + $0x4a8] ss:$16 sps:$4 sm:$0xff]  }
 0x321   :  { %2824 = vmatprep.subr.bf16.mxu0 %v15115_v46  ;;  %2988 = vmatprep.subr.bf16.mxu1 %v15118_v52  ;;  %v15139_v46 = vld [vmem:[%s20185_s22 + $0x4c4] ss:$16 sps:$4 sm:$0xff]   ;;  %v15142_v52 = vld [vmem:[%s20185_s22 + $0x4cc] ss:$16 sps:$4 sm:$0xff]  }
 0x324   :  { %2825 = vmatpush1.bf16.msra.mxu0 %v15113_v56  ;;  %2989 = vmatpush1.bf16.msra.mxu1 %v15116_v57  ;;  %v15137_v56 = vld [vmem:[%s20185_s22 + $0x4c0] ss:$16 sps:$4 sm:$0xff]   ;;  %v15140_v57 = vld [vmem:[%s20185_s22 + $0x4c8] ss:$16 sps:$4 sm:$0xff]  }
 0x325   :  { %2826 = vmatprep.subr.bf16.mxu0 %v15121_v28  ;;  %2990 = vmatprep.subr.bf16.mxu1 %v15124_v20  ;;  %v15145_v28 = vld [vmem:[%s20185_s22 + $0x4e4] ss:$16 sps:$4 sm:$0xff]   ;;  %v15148_v20 = vld [vmem:[%s20185_s22 + $0x4ec] ss:$16 sps:$4 sm:$0xff]  }
 0x328   :  { %2827 = vmatpush1.bf16.msra.mxu0 %v15119_v59  ;;  %2991 = vmatpush1.bf16.msra.mxu1 %v15122_v49  ;;  %v15143_v59 = vld [vmem:[%s20185_s22 + $0x4e0] ss:$16 sps:$4 sm:$0xff]   ;;  %v15146_v49 = vld [vmem:[%s20185_s22 + $0x4e8] ss:$16 sps:$4 sm:$0xff]  }
 0x329   :  { %2828 = vmatprep.subr.bf16.mxu0 %v15127_v60  ;;  %2992 = vmatprep.subr.bf16.mxu1 %v15130_v26  ;;  %v15151_v60 = vld [vmem:[%s20185_s22 + $0x504] ss:$16 sps:$4 sm:$0xff]   ;;  %v15154_v26 = vld [vmem:[%s20185_s22 + $0x50c] ss:$16 sps:$4 sm:$0xff]  }
 0x32c   :  { %2829 = vmatpush1.bf16.msra.mxu0 %v15125_v47  ;;  %2993 = vmatpush1.bf16.msra.mxu1 %v15128_v17  ;;  %v15149_v47 = vld [vmem:[%s20185_s22 + $0x500] ss:$16 sps:$4 sm:$0xff]   ;;  %v15152_v17 = vld [vmem:[%s20185_s22 + $0x508] ss:$16 sps:$4 sm:$0xff]  }
 0x32d   :  { %2830 = vmatprep.subr.bf16.mxu0 %v15133_v19  ;;  %2994 = vmatprep.subr.bf16.mxu1 %v15136_v18  ;;  %v15157_v19 = vld [vmem:[%s20185_s22 + $0x524] ss:$16 sps:$4 sm:$0xff]   ;;  %v15160_v18 = vld [vmem:[%s20185_s22 + $0x52c] ss:$16 sps:$4 sm:$0xff]  }
 0x330   :  { %2831 = vmatpush1.bf16.msra.mxu0 %v15131_v16  ;;  %2995 = vmatpush1.bf16.msra.mxu1 %v15134_v48  ;;  %v15155_v16 = vld [vmem:[%s20185_s22 + $0x520] ss:$16 sps:$4 sm:$0xff]   ;;  %v15158_v48 = vld [vmem:[%s20185_s22 + $0x528] ss:$16 sps:$4 sm:$0xff]  }
 0x331   :  { %2832 = vmatprep.subr.bf16.mxu0 %v15139_v46  ;;  %2996 = vmatprep.subr.bf16.mxu1 %v15142_v52  ;;  %v15163_v46 = vld [vmem:[%s20185_s22 + $0x544] ss:$16 sps:$4 sm:$0xff]   ;;  %v15166_v52 = vld [vmem:[%s20185_s22 + $0x54c] ss:$16 sps:$4 sm:$0xff]  }
 0x334   :  { %2833 = vmatpush1.bf16.msra.mxu0 %v15137_v56  ;;  %2997 = vmatpush1.bf16.msra.mxu1 %v15140_v57  ;;  %v15161_v56 = vld [vmem:[%s20185_s22 + $0x540] ss:$16 sps:$4 sm:$0xff]   ;;  %v15164_v57 = vld [vmem:[%s20185_s22 + $0x548] ss:$16 sps:$4 sm:$0xff]  }
 0x335   :  { %2834 = vmatprep.subr.bf16.mxu0 %v15145_v28  ;;  %2998 = vmatprep.subr.bf16.mxu1 %v15148_v20  ;;  %v15169_v28 = vld [vmem:[%s20185_s22 + $0x564] ss:$16 sps:$4 sm:$0xff]   ;;  %v15172_v20 = vld [vmem:[%s20185_s22 + $0x56c] ss:$16 sps:$4 sm:$0xff]  }
 0x338   :  { %2835 = vmatpush1.bf16.msra.mxu0 %v15143_v59  ;;  %2999 = vmatpush1.bf16.msra.mxu1 %v15146_v49  ;;  %v15167_v59 = vld [vmem:[%s20185_s22 + $0x560] ss:$16 sps:$4 sm:$0xff]   ;;  %v15170_v49 = vld [vmem:[%s20185_s22 + $0x568] ss:$16 sps:$4 sm:$0xff]  }
 0x339   :  { %2836 = vmatprep.subr.bf16.mxu0 %v15151_v60  ;;  %3000 = vmatprep.subr.bf16.mxu1 %v15154_v26  ;;  %v15175_v60 = vld [vmem:[%s20185_s22 + $0x584] ss:$16 sps:$4 sm:$0xff]   ;;  %v15178_v26 = vld [vmem:[%s20185_s22 + $0x58c] ss:$16 sps:$4 sm:$0xff]  }
 0x33c   :  { %2837 = vmatpush1.bf16.msra.mxu0 %v15149_v47  ;;  %3001 = vmatpush1.bf16.msra.mxu1 %v15152_v17  ;;  %v15173_v47 = vld [vmem:[%s20185_s22 + $0x580] ss:$16 sps:$4 sm:$0xff]   ;;  %v15176_v17 = vld [vmem:[%s20185_s22 + $0x588] ss:$16 sps:$4 sm:$0xff]  }
 0x33d   :  { %2838 = vmatprep.subr.bf16.mxu0 %v15157_v19  ;;  %3002 = vmatprep.subr.bf16.mxu1 %v15160_v18  ;;  %v15181_v19 = vld [vmem:[%s20185_s22 + $0x5a4] ss:$16 sps:$4 sm:$0xff]   ;;  %v15184_v18 = vld [vmem:[%s20185_s22 + $0x5ac] ss:$16 sps:$4 sm:$0xff]  }
 0x340   :  { %2839 = vmatpush1.bf16.msra.mxu0 %v15155_v16  ;;  %3003 = vmatpush1.bf16.msra.mxu1 %v15158_v48  ;;  %v19965_v16 = vsub.s32 4, %v17304_v58  ;;  %v15179_v48 = vld [vmem:[%s20185_s22 + $0x5a0] ss:$16 sps:$4 sm:$0xff]  }
 0x341   :  { %2840 = vmatprep.subr.bf16.mxu0 %v15163_v46  ;;  %3004 = vmatprep.subr.bf16.mxu1 %v15166_v52  ;;  %v15182_v46 = vld [vmem:[%s20185_s22 + $0x5a8] ss:$16 sps:$4 sm:$0xff]  }
 0x342   :  { %v1171_v52 = vrot.slane %v17310_v50, %v19965_v16 }
 0x344   :  { %2841 = vmatpush1.bf16.msra.mxu0 %v15161_v56  ;;  %3005 = vmatpush1.bf16.msra.mxu1 %v15164_v57  ;;  %v15187_v56 = vld [vmem:[%s20185_s22 + $0x5c4] ss:$16 sps:$4 sm:$0xff]   ;;  %v15190_v57 = vld [vmem:[%s20185_s22 + $0x5cc] ss:$16 sps:$4 sm:$0xff]  }
 0x345   :  { %2842 = vmatprep.subr.bf16.mxu0 %v15169_v28  ;;  %3006 = vmatprep.subr.bf16.mxu1 %v15172_v20  ;;  %v15185_v28 = vld [vmem:[%s20185_s22 + $0x5c0] ss:$16 sps:$4 sm:$0xff]   ;;  %v15188_v20 = vld [vmem:[%s20185_s22 + $0x5c8] ss:$16 sps:$4 sm:$0xff]  }
 0x348   :  { %2843 = vmatpush1.bf16.msra.mxu0 %v15167_v59  ;;  %3007 = vmatpush1.bf16.msra.mxu1 %v15170_v49  ;;  %v1452_v59 = vadd.f32 %v17338_v25, %v1171_v52  ;;  %v15193_v49 = vld [vmem:[%s20185_s22 + $0x5e4] ss:$16 sps:$4 sm:$0xff]   ;;  %v15200_v52 = vld [vmem:[%s20185_s22 + $0x608] ss:$16 sps:$4 sm:$0xff]  }
 0x349   :  { %2844 = vmatprep.subr.bf16.mxu0 %v15175_v60  ;;  %3008 = vmatprep.subr.bf16.mxu1 %v15178_v26  ;;  %v15196_v60 = vld [vmem:[%s20185_s22 + $0x5ec] ss:$16 sps:$4 sm:$0xff]   ;;  %v19966_v26 = vsub.s32 6, %v17304_v58  ;;  %v15257_v58 = vld [vmem:[%s20192_s24 + $0x100] ss:$8 sps:$4 sm:$0xff]  }
 0x34b   :  { %v1179_v25 = vrot.slane %v17310_v50, %v19966_v26  ;;  %v15203_v50 = vld [vmem:[%s20185_s22 + $0x620] ss:$16 sps:$4 sm:$0xff]  }
 0x34c   :  { %2845 = vmatpush1.bf16.msra.mxu0 %v15173_v47  ;;  %3009 = vmatpush1.bf16.msra.mxu1 %v15176_v17  ;;  %v15191_v47 = vld [vmem:[%s20185_s22 + $0x5e0] ss:$16 sps:$4 sm:$0xff]   ;;  %v15194_v17 = vld [vmem:[%s20185_s22 + $0x5e8] ss:$16 sps:$4 sm:$0xff]  }
 0x34d   :  { %2846 = vmatprep.subr.bf16.mxu0 %v15181_v19  ;;  %3010 = vmatprep.subr.bf16.mxu1 %v15184_v18  ;;  %v1502_v19 = vmax.f32 %v1452_v59, 0.0  ;;  %v15199_v18 = vld [vmem:[%s20185_s22 + $0x604] ss:$16 sps:$4 sm:$0xff]   ;;  %v15206_v59 = vld [vmem:[%s20185_s22 + $0x628] ss:$16 sps:$4 sm:$0xff]  }
 0x350   :  { %2847 = vmatpush1.bf16.msra.mxu0 %v15179_v48  ;;  %3011 = vmatpush1.bf16.msra.mxu1 %v15182_v46  ;;  %v15202_v48 = vld [vmem:[%s20185_s22 + $0x60c] ss:$16 sps:$4 sm:$0xff]   ;;  %v15197_v46 = vld [vmem:[%s20185_s22 + $0x600] ss:$16 sps:$4 sm:$0xff]  }
 0x351   :  { %2848 = vmatprep.subr.bf16.mxu0 %v15187_v56  ;;  %3012 = vmatprep.subr.bf16.mxu1 %v15190_v57  ;;  %v1509_v56 = vpack.c.bf16 %v1502_v19, %v1502_v19  ;;  %v15205_v57 = vld [vmem:[%s20185_s22 + $0x624] ss:$16 sps:$4 sm:$0xff]   ;;  %v15212_v19 = vld [vmem:[%s20192_s24 + $0x10] ss:$8 sps:$4 sm:$0xff]  }
 0x354   :  { %2849 = vmatpush1.bf16.msra.mxu0 %v15185_v28  ;;  %3013 = vmatpush1.bf16.msra.mxu1 %v15188_v20  ;;  %v15208_v28 = vld [vmem:[%s20185_s22 + $0x62c] ss:$16 sps:$4 sm:$0xff]   ;;  %v1493_v20 = vadd.f32 %v17346_v45, %v1179_v25 }
 0x355   :  { %2850 = vmatprep.subr.bf16.mxu0 %v15193_v49  ;;  %3014 = vmatprep.subr.bf16.mxu1 %v15196_v60  ;;  %v15211_v49 = vld [vmem:[%s20192_s24 + $0x4] ss:$8 sps:$4 sm:$0xff]   ;;  %v15220_v25 = vld [vmem:[%s20192_s24 + $0x34] ss:$8 sps:$4 sm:$0xff]  }
 0x356   :  { %v1504_v60 = vmax.f32 %v1493_v20, 0.0  ;;  %v15229_v20 = vld [vmem:[%s20192_s24 + $0x64] ss:$8 sps:$4 sm:$0xff]  }
 0x358   :  { %2851 = vmatpush1.bf16.msra.mxu0 %v15191_v47  ;;  %3015 = vmatpush1.bf16.msra.mxu1 %v15194_v17  ;;  %v1511_v45 = vpack.c.bf16 %v1504_v60, %v1504_v60  ;;  %v15209_v47 = vld [vmem:[%s20192_s24] ss:$8 sps:$4 sm:$0xff]   ;;  %v15214_v17 = vld [vmem:[%s20192_s24 + $0x14] ss:$8 sps:$4 sm:$0xff]   ;;  %v15235_v60 = vld [vmem:[%s20192_s24 + $0x84] ss:$8 sps:$4 sm:$0xff]  }
 0x359   :  { %2861 = vmatprep.subr.bf16.mxu0 %v15199_v18  ;;  %3025 = vmatprep.subr.bf16.mxu1 %v15202_v48  ;;  %v15217_v18 = vld [vmem:[%s20192_s24 + $0x24] ss:$8 sps:$4 sm:$0xff]   ;;  %v15215_v48 = vld [vmem:[%s20192_s24 + $0x20] ss:$8 sps:$4 sm:$0xff]  }
 0x35b   :  { %2853 = vmatmul.mubr.bf16.vlgmr.msra.gmra.mrb[8].mxu0 %v1509_v56  ;;  %3017 = vmatmul.mubr.bf16.vlgmr.msra.gmra.mrb[8].mxu1 %v1509_v56  ;;  %v15221_v56 = vld [vmem:[%s20192_s24 + $0x40] ss:$8 sps:$4 sm:$0xff]  }
 0x35c   :  { %2862 = vmatpush1.bf16.msra.mxu0 %v15197_v46  ;;  %3026 = vmatpush1.bf16.msra.mxu1 %v15200_v52  ;;  %v15218_v46 = vld [vmem:[%s20192_s24 + $0x30] ss:$8 sps:$4 sm:$0xff]   ;;  %v15223_v52 = vld [vmem:[%s20192_s24 + $0x44] ss:$8 sps:$4 sm:$0xff]  }
 0x35d   :  { %2863 = vmatprep.subr.bf16.mxu0 %v15205_v57  ;;  %3027 = vmatprep.subr.bf16.mxu1 %v15208_v28  ;;  %v15226_v57 = vld [vmem:[%s20192_s24 + $0x54] ss:$8 sps:$4 sm:$0xff]   ;;  %v15224_v28 = vld [vmem:[%s20192_s24 + $0x50] ss:$8 sps:$4 sm:$0xff]  }
 0x35e   :  { %2893 = vmatprep.mubr.bf16.mxu0 %v20184_v55  ;;  %3057 = vmatprep.mubr.bf16.mxu1 %v20184_v55 }
 0x360   :  { %2864 = vmatpush1.bf16.msra.mxu0 %v15203_v50  ;;  %3028 = vmatpush1.bf16.msra.mxu1 %v15206_v59  ;;  %v15227_v50 = vld [vmem:[%s20192_s24 + $0x60] ss:$8 sps:$4 sm:$0xff]   ;;  %v15232_v59 = vld [vmem:[%s20192_s24 + $0x74] ss:$8 sps:$4 sm:$0xff]  }
 0x361   :  { %3475 = vmatprep.subr.bf16.mxu0 %v15211_v49  ;;  %3676 = vmatprep.subr.bf16.mxu1 %v20184_v55  ;;  %v15230_v49 = vld [vmem:[%s20192_s24 + $0x70] ss:$8 sps:$4 sm:$0xff]  }
 0x367   :  { %11547 = vmatmul.mubr.msk.bf16.vlgmr.msra.gmra.mrb[8].mxu0 %vm2734_vm2, %v1511_v45  ;;  %11548 = vmatmul.mubr.msk.bf16.vlgmr.msra.gmra.mrb[8].mxu1 %vm2734_vm2, %v1511_v45  ;;  %v15233_v45 = vld [vmem:[%s20192_s24 + $0x80] ss:$8 sps:$4 sm:$0xff]  }
 0x368   :  { %3476 = vmatpush1.bf16.msra.mxu0 %v15209_v47  ;;  %v15238_v47 = vld [vmem:[%s20192_s24 + $0x94] ss:$8 sps:$4 sm:$0xff]  }
 0x369   :  { %3477 = vmatprep.subr.bf16.mxu0 %v15214_v17  ;;  %v15236_v17 = vld [vmem:[%s20192_s24 + $0x90] ss:$8 sps:$4 sm:$0xff]  }
 0x36c   :  { %3478 = vmatpush1.bf16.msra.mxu0 %v15212_v19  ;;  %v15241_v19 = vld [vmem:[%s20192_s24 + $0xa4] ss:$8 sps:$4 sm:$0xff]  }
 0x36d   :  { %3479 = vmatprep.subr.bf16.mxu0 %v15217_v18  ;;  %v15239_v18 = vld [vmem:[%s20192_s24 + $0xa0] ss:$8 sps:$4 sm:$0xff]  }
 0x370   :  { %3480 = vmatpush1.bf16.msra.mxu0 %v15215_v48  ;;  %v15244_v48 = vld [vmem:[%s20192_s24 + $0xb4] ss:$8 sps:$4 sm:$0xff]  }
 0x371   :  { %3481 = vmatprep.subr.bf16.mxu0 %v15220_v25  ;;  %v15242_v25 = vld [vmem:[%s20192_s24 + $0xb0] ss:$8 sps:$4 sm:$0xff]  }
 0x374   :  { %3482 = vmatpush1.bf16.msra.mxu0 %v15218_v46  ;;  %v15247_v46 = vld [vmem:[%s20192_s24 + $0xc4] ss:$8 sps:$4 sm:$0xff]  }
 0x375   :  { %3483 = vmatprep.subr.bf16.mxu0 %v15223_v52  ;;  %v15245_v52 = vld [vmem:[%s20192_s24 + $0xc0] ss:$8 sps:$4 sm:$0xff]  }
 0x378   :  { %3484 = vmatpush1.bf16.msra.mxu0 %v15221_v56  ;;  %v15250_v56 = vld [vmem:[%s20192_s24 + $0xd4] ss:$8 sps:$4 sm:$0xff]  }
 0x379   :  { %3485 = vmatprep.subr.bf16.mxu0 %v15226_v57  ;;  %v15248_v57 = vld [vmem:[%s20192_s24 + $0xd0] ss:$8 sps:$4 sm:$0xff]  }
 0x37c   :  { %3486 = vmatpush1.bf16.msra.mxu0 %v15224_v28  ;;  %v15253_v28 = vld [vmem:[%s20192_s24 + $0xe4] ss:$8 sps:$4 sm:$0xff]  }
 0x37d   :  { %3487 = vmatprep.subr.bf16.mxu0 %v15229_v20  ;;  %v15251_v20 = vld [vmem:[%s20192_s24 + $0xe0] ss:$8 sps:$4 sm:$0xff]  }
 0x380   :  { %3488 = vmatpush1.bf16.msra.mxu0 %v15227_v50  ;;  %v15256_v50 = vld [vmem:[%s20192_s24 + $0xf4] ss:$8 sps:$4 sm:$0xff]  }
 0x381   :  { %3489 = vmatprep.subr.bf16.mxu0 %v15232_v59  ;;  %v15254_v59 = vld [vmem:[%s20192_s24 + $0xf0] ss:$8 sps:$4 sm:$0xff]  }
 0x384   :  { %3490 = vmatpush1.bf16.msra.mxu0 %v15230_v49  ;;  %v15259_v49 = vld [vmem:[%s20192_s24 + $0x104] ss:$8 sps:$4 sm:$0xff]  }
 0x385   :  { %3491 = vmatprep.subr.bf16.mxu0 %v15235_v60  ;;  %v15304_v60 = vld [vmem:[%s20193_s1] sm:$0xff]  }
 0x386   :  { %3677 = vmatpush1.bf16.msra.mxu1 %v15304_v60 }
 0x387   :  { %3678 = vmatprep.subr.bf16.mxu1 %v20184_v55 }
 0x388   :  { %3492 = vmatpush1.bf16.msra.mxu0 %v15233_v45  ;;  %v15305_v45 = vld [vmem:[%s20193_s1 + $0x8] sm:$0xff]  }
 0x389   :  { %3493 = vmatprep.subr.bf16.mxu0 %v15238_v47  ;;  %v15306_v47 = vld [vmem:[%s20193_s1 + $0x10] sm:$0xff]  }
 0x38a   :  { %3679 = vmatpush1.bf16.msra.mxu1 %v15305_v45 }
 0x38b   :  { %3680 = vmatprep.subr.bf16.mxu1 %v20184_v55 }
 0x38c   :  { %3494 = vmatpush1.bf16.msra.mxu0 %v15236_v17  ;;  %v15307_v17 = vld [vmem:[%s20193_s1 + $0x18] sm:$0xff]  }
 0x38d   :  { %3495 = vmatprep.subr.bf16.mxu0 %v15241_v19  ;;  %v15308_v19 = vld [vmem:[%s20193_s1 + $0x20] sm:$0xff]  }
 0x38e   :  { %3681 = vmatpush1.bf16.msra.mxu1 %v15306_v47 }
 0x38f   :  { %3682 = vmatprep.subr.bf16.mxu1 %v20184_v55 }
 0x390   :  { %3496 = vmatpush1.bf16.msra.mxu0 %v15239_v18  ;;  %v15309_v18 = vld [vmem:[%s20193_s1 + $0x28] sm:$0xff]  }
 0x391   :  { %3497 = vmatprep.subr.bf16.mxu0 %v15244_v48  ;;  %v15310_v48 = vld [vmem:[%s20193_s1 + $0x30] sm:$0xff]  }
 0x392   :  { %3683 = vmatpush1.bf16.msra.mxu1 %v15307_v17 }
 0x393   :  { %3684 = vmatprep.subr.bf16.mxu1 %v20184_v55 }
 0x394   :  { %3498 = vmatpush1.bf16.msra.mxu0 %v15242_v25  ;;  %v15311_v25 = vld [vmem:[%s20193_s1 + $0x38] sm:$0xff]  }
 0x395   :  { %3499 = vmatprep.subr.bf16.mxu0 %v15247_v46  ;;  %v15312_v46 = vld [vmem:[%s20193_s1 + $0x40] sm:$0xff]  }
 0x396   :  { %3685 = vmatpush1.bf16.msra.mxu1 %v15308_v19 }
 0x397   :  { %3686 = vmatprep.subr.bf16.mxu1 %v20184_v55 }
 0x398   :  { %3500 = vmatpush1.bf16.msra.mxu0 %v15245_v52  ;;  %v15313_v52 = vld [vmem:[%s20193_s1 + $0x48] sm:$0xff]  }
 0x399   :  { %3501 = vmatprep.subr.bf16.mxu0 %v15250_v56  ;;  %v15314_v56 = vld [vmem:[%s20193_s1 + $0x50] sm:$0xff]  }
 0x39a   :  { %3687 = vmatpush1.bf16.msra.mxu1 %v15309_v18 }
 0x39b   :  { %3688 = vmatprep.subr.bf16.mxu1 %v20184_v55 }
 0x39c   :  { %3502 = vmatpush1.bf16.msra.mxu0 %v15248_v57  ;;  %v17548_v57 = vld [vmem:[%s20194_s19] sm:$0xf] }
 0x39d   :  { %3503 = vmatprep.subr.bf16.mxu0 %v15253_v28  ;;  %v1717_v28 = vrot.slane %v17548_v57, %v17307_v51 }
 0x39e   :  { %3689 = vmatpush1.bf16.msra.mxu1 %v15310_v48 }
 0x39f   :  { %3690 = vmatprep.subr.bf16.mxu1 %v20184_v55 }
 0x3a0   :  { %3504 = vmatpush1.bf16.msra.mxu0 %v15251_v20  ;;  %v1721_v20 = vrot.slane %v17548_v57, %v17313_v53 }
 0x3a1   :  { %3505 = vmatprep.subr.bf16.mxu0 %v15256_v50  ;;  %v1729_v50 = vrot.slane %v17548_v57, %v17320_v54 }
 0x3a2   :  { %3691 = vmatpush1.bf16.msra.mxu1 %v15311_v25 }
 0x3a3   :  { %3692 = vmatprep.subr.bf16.mxu1 %v20184_v55 }
 0x3a4   :  { %3506 = vmatpush1.bf16.msra.mxu0 %v15254_v59 }
 0x3a5   :  { %3516 = vmatprep.subr.bf16.mxu0 %v15259_v49 }
 0x3a6   :  { %3693 = vmatpush1.bf16.msra.mxu1 %v15312_v46 }
 0x3a7   :  { %3694 = vmatprep.subr.bf16.mxu1 %v20184_v55 }
 0x3aa   :  { %3695 = vmatpush1.bf16.msra.mxu1 %v15313_v52 }
 0x3ab   :  { %3696 = vmatprep.subr.bf16.mxu1 %v20184_v55 }
 0x3ae   :  { %3697 = vmatpush1.bf16.msra.mxu1 %v15314_v56 }
 0x3af   :  { %3698 = vmatprep.subr.bf16.mxu1 %v20184_v55 }
 0x43a   :  { %v2895_v59 = vpop.f32.mrb[8].mxu0  ;;  %v17556_v49 = vpop.f32.mrb[8].mxu1 }
 0x43b   :  { %v14757_v60 = vadd.f32 %v2895_v59, %v1717_v28  ;;  %v2897_v45 = vpop.f32.mrb[9].mxu0  ;;  %v3061_v47 = vpop.f32.mrb[9].mxu1  ;;  %v15262_v28 = vld [vmem:[%s20192_s24 + $0x114] ss:$8 sps:$4 sm:$0xff]   ;;  %v15265_v59 = vld [vmem:[%s20192_s24 + $0x124] ss:$8 sps:$4 sm:$0xff]  }
 0x43c   :  { %v14758_v17 = vadd.f32 %v2897_v45, %v1721_v20  ;;  %v14760_v19 = vadd.f32 %v3061_v47, %v1729_v50  ;;  %v2899_v18 = vpop.f32.mrb[10].mxu0  ;;  %v3063_v48 = vpop.f32.mrb[10].mxu1  ;;  %v15260_v50 = vld [vmem:[%s20192_s24 + $0x110] ss:$8 sps:$4 sm:$0xff]   ;;  %v15268_v45 = vld [vmem:[%s20192_s24 + $0x134] ss:$8 sps:$4 sm:$0xff]  }
 0x43d   :  { %v3066_v25 = vmax.f32 %v14757_v60, 0.0  ;;  %v2900_v46 = vpop.f32.mrb[11].mxu0  ;;  %v3064_v52 = vpop.f32.mrb[11].mxu1  ;;  %v15263_v60 = vld [vmem:[%s20192_s24 + $0x120] ss:$8 sps:$4 sm:$0xff]  }
 0x43e   :  { %v3067_v56 = vmax.f32 %v14758_v17, 0.0  ;;  %v3069_v16 = vmax.f32 %v14760_v19, 0.0  ;;  %v15272_v47 = vld [vmem:[%s20192_s24 + $0x150] ss:$8 sps:$4 sm:$0xff]   ;;  %v15277_v17 = vld [vmem:[%s20192_s24 + $0x164] ss:$8 sps:$4 sm:$0xff]  }
 0x43f   :  { %v3070_v24 = vpack.c.bf16 %v3066_v25, %v3066_v25  ;;  %v15275_v19 = vld [vmem:[%s20192_s24 + $0x160] ss:$8 sps:$4 sm:$0xff]   ;;  %v15280_v18 = vld [vmem:[%s20192_s24 + $0x174] ss:$8 sps:$4 sm:$0xff]   ;;  %v15278_v48 = vld [vmem:[%s20192_s24 + $0x170] ss:$8 sps:$4 sm:$0xff]  }
 0x440   :  { %v3071_v26 = vpack.c.bf16 %v3067_v56, %v3067_v56  ;;  %v3073_v20 = vpack.c.bf16 %v3069_v16, %v3069_v16  ;;  %v15266_v16 = vld [vmem:[%s20192_s24 + $0x130] ss:$8 sps:$4 sm:$0xff]   ;;  %v15283_v25 = vld [vmem:[%s20192_s24 + $0x184] ss:$8 sps:$4 sm:$0xff]   ;;  %v15281_v46 = vld [vmem:[%s20192_s24 + $0x180] ss:$8 sps:$4 sm:$0xff]  }
 0x441   :  { %v15286_v52 = vld [vmem:[%s20192_s24 + $0x194] ss:$8 sps:$4 sm:$0xff]   ;;  %v15284_v56 = vld [vmem:[%s20192_s24 + $0x190] ss:$8 sps:$4 sm:$0xff]  }
 0x442   :  { %3507 = vmatprep.mubr.bf16.mxu0 %v3071_v26  ;;  %v15274_v26 = vld [vmem:[%s20192_s24 + $0x154] ss:$8 sps:$4 sm:$0xff]  }
 0x443   :  { %3508 = vmatmul.mubr.bf16.vlgmr.msra.gmra.mrb[12].mxu0 %v3070_v24  ;;  %v15271_v24 = vld [vmem:[%s20192_s24 + $0x144] ss:$8 sps:$4 sm:$0xff]  }
 0x444   :  { %3517 = vmatpush1.bf16.msra.mxu0 %v15257_v58  ;;  %11614 = vmatprep.mubr.msk.bf16.mxu0 %vm3464_vm3, %v3073_v20  ;;  %v15269_v58 = vld [vmem:[%s20192_s24 + $0x140] ss:$8 sps:$4 sm:$0xff]  }
 0x445   :  { %3518 = vmatprep.subr.bf16.mxu0 %v15262_v28  ;;  %v15289_v28 = vld [vmem:[%s20192_s24 + $0x1a4] ss:$8 sps:$4 sm:$0xff]   ;;  %v15287_v20 = vld [vmem:[%s20192_s24 + $0x1a0] ss:$8 sps:$4 sm:$0xff]  }
 0x448   :  { %3519 = vmatpush1.bf16.msra.mxu0 %v15260_v50  ;;  %v15292_v50 = vld [vmem:[%s20192_s24 + $0x1b4] ss:$8 sps:$4 sm:$0xff]  }
 0x449   :  { %3520 = vmatprep.subr.bf16.mxu0 %v15265_v59  ;;  %v15290_v59 = vld [vmem:[%s20192_s24 + $0x1b0] ss:$8 sps:$4 sm:$0xff]  }
 0x44c   :  { %3521 = vmatpush1.bf16.msra.mxu0 %v15263_v60  ;;  %v15295_v60 = vld [vmem:[%s20192_s24 + $0x1c4] ss:$8 sps:$4 sm:$0xff]  }
 0x44d   :  { %3522 = vmatprep.subr.bf16.mxu0 %v15268_v45  ;;  %v15293_v45 = vld [vmem:[%s20192_s24 + $0x1c0] ss:$8 sps:$4 sm:$0xff]  }
 0x450   :  { %3523 = vmatpush1.bf16.msra.mxu0 %v15266_v16  ;;  %v15298_v16 = vld [vmem:[%s20192_s24 + $0x1d4] ss:$8 sps:$4 sm:$0xff]  }
 0x451   :  { %3524 = vmatprep.subr.bf16.mxu0 %v15271_v24  ;;  %v15296_v24 = vld [vmem:[%s20192_s24 + $0x1d0] ss:$8 sps:$4 sm:$0xff]  }
 0x454   :  { %3525 = vmatpush1.bf16.msra.mxu0 %v15269_v58  ;;  %v1725_v58 = vrot.slane %v17548_v57, %v17381_v27 }
 0x455   :  { %3526 = vmatprep.subr.bf16.mxu0 %v15274_v26  ;;  %v15301_v26 = vld [vmem:[%s20192_s24 + $0x1e4] ss:$8 sps:$4 sm:$0xff]  }
 0x458   :  { %3527 = vmatpush1.bf16.msra.mxu0 %v15272_v47  ;;  %v3136_v47 = vld [vmem:[%s20192_s24 + $0x1f0] sm:$0x33] }
 0x459   :  { %3528 = vmatprep.subr.bf16.mxu0 %v15277_v17  ;;  %v15299_v17 = vld [vmem:[%s20192_s24 + $0x1e0] ss:$8 sps:$4 sm:$0xff]  }
 0x45c   :  { %3529 = vmatpush1.bf16.msra.mxu0 %v15275_v19  ;;  %v14759_v19 = vadd.f32 %v17556_v49, %v1725_v58  ;;  %v15316_v49 = vld [vmem:[%s20193_s1 + $0x60] ss:$0 sps:$4 sm:$0xff]  }
 0x45d   :  { %3530 = vmatprep.subr.bf16.mxu0 %v15280_v18  ;;  %v11612_v18 = vcombine.high %v3136_v47, %v3136_v47 }
 0x460   :  { %3531 = vmatpush1.bf16.msra.mxu0 %v15278_v48  ;;  %v11611_v48 = vcombine.low %v3136_v47, %v3136_v47 }
 0x461   :  { %3532 = vmatprep.subr.bf16.mxu0 %v15283_v25  ;;  %v3068_v25 = vmax.f32 %v14759_v19, 0.0 }
 0x463   :  { %v3072_v57 = vpack.c.bf16 %v3068_v25, %v3068_v25  ;;  %v15318_v25 = vld [vmem:[%s20196_s6 + $0x8] sm:$0xff]  }
 0x464   :  { %3533 = vmatpush1.bf16.msra.mxu0 %v15281_v46  ;;  %v3470_v46 = vsel %vm3468_vm4, %v11611_v48, 0 }
 0x465   :  { %3534 = vmatprep.subr.bf16.mxu0 %v15286_v52  ;;  %v20195_v52 = vmov 0.0  }
 0x468   :  { %3535 = vmatpush1.bf16.msra.mxu0 %v15284_v56  ;;  %v15315_v56 = vld [vmem:[%s20193_s1 + $0x58] sm:$0xff]  }
 0x469   :  { %3536 = vmatprep.subr.bf16.mxu0 %v15289_v28  ;;  %3699 = vmatpush1.bf16.msra.mxu1 %v15315_v56  ;;  %v3674_v28 = vsel %vm3672_vm5, %v15316_v49, 0  ;;  %v3803_v49 = vld [vmem:[#allocation16 + $0x8] sm:$0xff] }
 0x46a   :  { %3700 = vmatprep.subr.bf16.mxu1 %v20184_v55 }
 0x46c   :  { %3537 = vmatpush1.bf16.msra.mxu0 %v15287_v20  ;;  %v3137_v20 = vld [vmem:[#allocation11] sm:$0x3] }
 0x46d   :  { %3538 = vmatprep.subr.bf16.mxu0 %v15292_v50  ;;  %3701 = vmatpush1.bf16.msra.mxu1 %v3674_v28  ;;  %v3142_v50 = vrot.slane %v3137_v20, %v17307_v51  ;;  %v3807_v28 = vld [vmem:[#allocation16 + $0x28] sm:$0xff] }
 0x46e   :  { %12157 = vmatprep.subr.bf16.mxu1 %v20195_v52 }
 0x470   :  { %3539 = vmatpush1.bf16.msra.mxu0 %v15290_v59  ;;  %v3146_v59 = vrot.slane %v3137_v20, %v17313_v53  ;;  %v12189_v20 = vpack.c.bf16 %v3807_v28, %v3803_v49  ;;  %v3999_v49 = vld [vmem:[#allocation17 + $0x28] sm:$0xff] }
 0x471   :  { %3540 = vmatprep.subr.bf16.mxu0 %v15295_v60 }
 0x474   :  { %3541 = vmatpush1.bf16.msra.mxu0 %v15293_v45 }
 0x475   :  { %3542 = vmatprep.subr.bf16.mxu0 %v15298_v16 }
 0x478   :  { %3543 = vmatpush1.bf16.msra.mxu0 %v15296_v24 }
 0x479   :  { %3544 = vmatprep.subr.bf16.mxu0 %v15301_v26 }
 0x47c   :  { %3545 = vmatpush1.bf16.msra.mxu0 %v15299_v17 }
 0x47d   :  { %11613 = vmatprep.subr.msk.bf16.mxu0 %vm3468_vm4, %v11612_v18  ;;  %v15317_v18 = vld [vmem:[%s20196_s6] sm:$0xff]  }
 0x480   :  { %3547 = vmatpush1.bf16.msra.mxu0 %v3470_v46  ;;  %v15319_v46 = vld [vmem:[%s20196_s6 + $0x10] sm:$0xff]  }
 0x483   :  { %3549 = vmatmul.mubr.bf16.vlgmr.msra.gmra.mrb[12].mxu0 %v3072_v57  ;;  %v15320_v57 = vld [vmem:[%s20196_s6 + $0x18] ss:$0 sps:$4 sm:$0x11]  }
 0x484   :  { %4294 = vmatprep.mubr.f32.mxu0 %v20195_v52  ;;  %v3759_v56 = vsel %vm3757_vm7, %v15320_v57, 0 }
 0x556   :  { %v3550_v60 = vpop.f32.mrb[12].mxu0 }
 0x557   :  { %v14761_v45 = vadd.f32 %v3550_v60, %v3142_v50  ;;  %v3552_v16 = vpop.f32.mrb[13].mxu0  ;;  %v11615_v50 = vld [vmem:[#allocation13] ss:$0 sm:$0xff] }
 0x558   :  { %v14762_v24 = vadd.f32 %v3552_v16, %v3146_v59  ;;  %v3554_v58 = vpop.f32.mrb[14].mxu0  ;;  %v3802_v16 = vld [vmem:[#allocation16] sm:$0xff] }
 0x559   :  { %v3557_v26 = vmax.f32 %v14761_v45, 0.0  ;;  %v3555_v47 = vpop.f32.mrb[15].mxu0 }
 0x55a   :  { %v3558_v17 = vmax.f32 %v14762_v24, 0.0  ;;  %v3806_v24 = vld [vmem:[#allocation16 + $0x20] sm:$0xff] }
 0x55b   :  { %v3559_v48 = vpack.c.bf16 %v3557_v26, %v3557_v26 }
 0x55c   :  { %v3560_v19 = vpack.c.bf16 %v3558_v17, %v3558_v17  ;;  %v12191_v17 = vpack.c.bf16 %v3806_v24, %v3802_v16  ;;  %v4002_v24 = vld [vmem:[#allocation17 + $0x40] sm:$0xff] }
 0x55e   :  { %11629 = vmatprep.mubr.msk.bf16.mxu1 %vm3668_vm6, %v3560_v19 }
 0x55f   :  { %3709 = vmatmul.mubr.bf16.vlgmr.msra.gmra.mrb[12].mxu1 %v3559_v48  ;;  %v3805_v48 = vld [vmem:[#allocation16 + $0x18] sm:$0xff] }
 0x560   :  { %12158 = vmatpush3.bf16.msra.mxu1 %v15317_v18  ;;  %12165 = vmatprep.mubr.msk.bf16.mxu1 %vm16579_vm1, %v20195_v52  ;;  %v3811_v18 = vld [vmem:[#allocation16 + $0x48] sm:$0xf] }
 0x561   :  { %12159 = vmatprep.subr.bf16.mxu1 %v20195_v52 }
 0x564   :  { %12160 = vmatpush3.bf16.msra.mxu1 %v15318_v25  ;;  %v3809_v25 = vld [vmem:[#allocation16 + $0x38] sm:$0xff] }
 0x565   :  { %12161 = vmatprep.subr.bf16.mxu1 %v20195_v52  ;;  %v12193_v57 = vpack.c.bf16 %v3809_v25, %v3805_v48  ;;  %v4014_v48 = vld [vmem:[#allocation17 + $0xa0] sm:$0xff] }
 0x568   :  { %12162 = vmatpush3.bf16.msra.mxu1 %v15319_v46  ;;  %v3810_v46 = vld [vmem:[#allocation16 + $0x40] sm:$0xf] }
 0x569   :  { %12163 = vmatprep.subr.bf16.mxu1 %v20195_v52 }
 0x56c   :  { %12164 = vmatpush3.bf16.msra.mxu1 %v3759_v56  ;;  %v3995_v56 = vld [vmem:[#allocation17 + $0x8] sm:$0xff] }
 0x56d   :  { %12190 = vmatprep.subr.bf16.mxu1 %v12189_v20  ;;  %v17615_v28 = vpack.c.bf16 %v3999_v49, %v3995_v56  ;;  %v3994_v20 = vld [vmem:[#allocation17] sm:$0xff] }
 0x56e   :  { %v4018_v49 = vld [vmem:[#allocation17 + $0xc0] sm:$0xff] }
 0x56f   :  { %12262 = vmatprep.subr.bf16.mxu0 %v17615_v28 }
 0x632   :  { %v3710_v59 = vpop.f32.mrb[12].mxu1 }
 0x633   :  { %v3711_v60 = vadd.f32 %v11615_v50, %v3710_v59  ;;  %v3712_v45 = vpop.f32.mrb[13].mxu1  ;;  %v3998_v50 = vld [vmem:[#allocation17 + $0x20] sm:$0xff] }
 0x634   :  { %v3713_v58 = vpop.f32.mrb[14].mxu1  ;;  %v17617_v59 = vpack.c.bf16 %v3998_v50, %v3994_v20  ;;  %v4007_v45 = vld [vmem:[#allocation17 + $0x68] sm:$0xff]  ;;  %v4022_v20 = vld [vmem:[#allocation17 + $0xe0] sm:$0xff] }
 0x635   :  { %v3716_v26 = vmax.f32 %v3711_v60, 0.0  ;;  %v3714_v47 = vpop.f32.mrb[15].mxu1  ;;  %v4003_v60 = vld [vmem:[#allocation17 + $0x48] sm:$0xff]  ;;  %v4006_v58 = vld [vmem:[#allocation17 + $0x60] sm:$0xff]  ;;  %v17635_v50 = vpack.c.bf16 %v4022_v20, %v4018_v49 }
 0x636   :  { %12264 = vmatpush1.bf16.msra.mxu0 %v17617_v59  ;;  %v17621_v16 = vpack.c.bf16 %v4007_v45, %v4003_v60  ;;  %v4011_v47 = vld [vmem:[#allocation17 + $0x88] sm:$0xff]  ;;  %v4038_v49 = vld [vmem:[#allocation17 + $0x160] sm:$0xff] }
 0x637   :  { %v3717_v19 = vpack.c.bf16 %v3716_v26, %v3716_v26  ;;  %v17623_v26 = vpack.c.bf16 %v4006_v58, %v4002_v24  ;;  %v4027_v60 = vld [vmem:[#allocation17 + $0x108] sm:$0xff]  ;;  %v4026_v58 = vld [vmem:[#allocation17 + $0x100] sm:$0xff] }
 0x638   :  { %12266 = vmatprep.subr.bf16.mxu0 %v17621_v16  ;;  %v4031_v45 = vld [vmem:[#allocation17 + $0x128] sm:$0xff] }
 0x639   :  { %12166 = vmatmul.mubr.msk.bf16.vlgmr.msra.gmra.mrb[16].mxu1 %vm3753_vm8, %v3717_v19  ;;  %v17639_v24 = vpack.c.bf16 %v4031_v45, %v4027_v60  ;;  %v4043_v60 = vld [vmem:[#allocation17 + $0x188] sm:$0xff] }
 0x63a   :  { %12192 = vmatpush1.bf16.msra.mxu1 %v12191_v17  ;;  %3916 = vmatprep.mubr.f32.mxu1 %v20195_v52  ;;  %v4015_v17 = vld [vmem:[#allocation17 + $0xa8] sm:$0xff] }
 0x63b   :  { %11636 = vmatprep.subr.msk.mxu1 %vm3672_vm5, %v3811_v18  ;;  %12268 = vmatpush1.bf16.msra.mxu0 %v17623_v26  ;;  %v17627_v19 = vpack.c.bf16 %v4015_v17, %v4011_v47  ;;  %v4010_v18 = vld [vmem:[#allocation17 + $0x80] sm:$0xff]  ;;  %v4047_v45 = vld [vmem:[#allocation17 + $0x1a8] sm:$0xff] }
 0x63c   :  { %v17629_v25 = vpack.c.bf16 %v4014_v48, %v4010_v18  ;;  %v4030_v47 = vld [vmem:[#allocation17 + $0x120] sm:$0xff]  ;;  %v4035_v18 = vld [vmem:[#allocation17 + $0x148] sm:$0xff] }
 0x63d   :  { %12270 = vmatprep.subr.bf16.mxu0 %v17627_v19  ;;  %v17641_v17 = vpack.c.bf16 %v4030_v47, %v4026_v58  ;;  %v4039_v48 = vld [vmem:[#allocation17 + $0x168] sm:$0xff]  ;;  %v17651_v58 = vpack.c.bf16 %v4047_v45, %v4043_v60  ;;  %v4042_v47 = vld [vmem:[#allocation17 + $0x180] sm:$0xff]  ;;  %v3804_v60 = vld [vmem:[#allocation16 + $0x10] sm:$0xff] }
 0x63e   :  { %11637 = vmatpush1.msk.msra.mxu1 %vm3672_vm5, %v3810_v46  ;;  %v4019_v46 = vld [vmem:[#allocation17 + $0xc8] sm:$0xff]  ;;  %v17653_v23 = vpack.c.bf16 %v4046_v15, %v4042_v47  ;;  %v11630_v15 = vld [vmem:[#allocation14] ss:$0 sm:$0xff]  ;;  %v3808_v45 = vld [vmem:[#allocation16 + $0x30] sm:$0xff] }
 0x63f   :  { %12194 = vmatprep.subr.bf16.mxu1 %v12193_v57  ;;  %v4023_v57 = vld [vmem:[#allocation17 + $0xe8] sm:$0xff]  ;;  %12272 = vmatpush1.bf16.msra.mxu0 %v17629_v25 }
 0x640   :  { %v17633_v56 = vpack.c.bf16 %v4023_v57, %v4019_v46  ;;  %v17645_v46 = vpack.c.bf16 %v4039_v48, %v4035_v18  ;;  %v4034_v57 = vld [vmem:[#allocation17 + $0x140] sm:$0xff]  ;;  %v4051_v18 = vld [vmem:[#allocation17 + $0x1c8] sm:$0xff] }
 0x641   :  { %v17647_v20 = vpack.c.bf16 %v4038_v49, %v4034_v57  ;;  %v4055_v48 = vld [vmem:[#allocation17 + $0x1e8] sm:$0xff]  ;;  %v4050_v49 = vld [vmem:[#allocation17 + $0x1c0] sm:$0xff] }
 0x642   :  { %12274 = vmatprep.subr.bf16.mxu0 %v17633_v56  ;;  %v17657_v57 = vpack.c.bf16 %v4055_v48, %v4051_v18  ;;  %v17659_v22 = vpack.c.bf16 %v4054_v14, %v4050_v49  ;;  %v12195_v18 = vpack.c.bf16 %v3808_v45, %v3804_v60  ;;  %v3812_v14 = vld [vmem:[#allocation16 + $0x50] sm:$0xf]  ;;  %v4005_v49 = vld [vmem:[#allocation17 + $0x58] sm:$0xff] }
 0x643   :  { %12276 = vmatpush1.bf16.msra.mxu0 %v17635_v50  ;;  %v4058_v60 = vld [vmem:[%s20197_s23] sm:$0x1] }
 0x644   :  { %12278 = vmatprep.subr.bf16.mxu0 %v17639_v24 }
 0x647   :  { %12280 = vmatpush1.bf16.msra.mxu0 %v17641_v17 }
 0x648   :  { %12282 = vmatprep.subr.bf16.mxu0 %v17645_v46 }
 0x64b   :  { %12284 = vmatpush1.bf16.msra.mxu0 %v17647_v20 }
 0x64c   :  { %12286 = vmatprep.subr.bf16.mxu0 %v17651_v58 }
 0x64f   :  { %12288 = vmatpush1.bf16.msra.mxu0 %v17653_v23 }
 0x650   :  { %12290 = vmatprep.subr.bf16.mxu0 %v17657_v57 }
 0x653   :  { %12292 = vmatpush1.bf16.msra.mxu0 %v17659_v22 }
 0x654   :  { %12326 = vmatprep.subr.bf16.mxu0 %v17615_v28 }
 0x70c   :  { %v3795_v47 = vpop.f32.mrb[16].mxu1 }
 0x70d   :  { %v3796_v13 = vadd.f32 %v11630_v15, %v3795_v47  ;;  %v12167_v36 = vpop.f32.mrb[17].mxu1  ;;  %v4009_v15 = vld [vmem:[#allocation17 + $0x78] sm:$0xff] }
 0x70e   :  { %v3798_v44 = vpop.f32.mrb[18].mxu1  ;;  %v17690_v47 = vpack.c.bf16 %v4009_v15, %v4005_v49  ;;  %v4025_v49 = vld [vmem:[#allocation17 + $0xf8] sm:$0xff] }
 0x70f   :  { %v3801_v48 = vmax.f32 %v3796_v13, 0.0  ;;  %v12168_v35 = vpop.f32.mrb[19].mxu1  ;;  %v3997_v13 = vld [vmem:[#allocation17 + $0x18] sm:$0xff]  ;;  %v4000_v44 = vld [vmem:[#allocation17 + $0x30] sm:$0xff]  ;;  %v17703_v33 = vpack.c.bf16 %v4025_v49, %v4021_v42  ;;  %v17712_v42 = vpack.c.bf16 %v4032_v31, %v4028_v40 }
 0x710   :  { %v4001_v35 = vld [vmem:[#allocation17 + $0x38] sm:$0xff] }
 0x711   :  { %11638 = vmatmul.mubr.msk.f32.vlgmr.msra.gmra.mrb[20].mxu1 %vm3836_vm9, %v3801_v48  ;;  %v17683_v36 = vpack.c.bf16 %v4001_v35, %v3997_v13  ;;  %v4053_v31 = vld [vmem:[#allocation17 + $0x1d8] sm:$0xff] }
 0x712   :  { %12196 = vmatpush1.bf16.msra.mxu1 %v12195_v18  ;;  %3987 = vmatprep.mubr.f32.mxu1 %v20195_v52  ;;  %v4004_v18 = vld [vmem:[#allocation17 + $0x50] sm:$0xff]  ;;  %v4057_v40 = vld [vmem:[#allocation17 + $0x1f8] sm:$0xff] }
 0x713   :  { %11639 = vmatprep.subr.msk.mxu1 %vm3672_vm5, %v3813_v43  ;;  %v3996_v43 = vld [vmem:[#allocation17 + $0x10] sm:$0xff] }
 0x714   :  { %v17687_v45 = vpack.c.bf16 %v4000_v44, %v3996_v43  ;;  %v4012_v43 = vld [vmem:[#allocation17 + $0x90] sm:$0xff] }
 0x715   :  { %v4016_v44 = vld [vmem:[#allocation17 + $0xb0] sm:$0xff] }
 0x716   :  { %11640 = vmatpush1.msk.msra.mxu1 %vm3672_vm5, %v3812_v14  ;;  %v4013_v14 = vld [vmem:[#allocation17 + $0x98] sm:$0xff]  ;;  %v17700_v15 = vpack.c.bf16 %v4016_v44, %v4012_v43 }
 0x717   :  { %11641 = vmatmul.mubr.msk.f32.vlgmr.msra.gmra.mrb[22].mxu1 %vm3836_vm9, %v3801_v48  ;;  %12198 = vmatprep.subr.bf16.mxu1 %v17615_v28  ;;  %v4008_v48 = vld [vmem:[#allocation17 + $0x70] sm:$0xff]  ;;  %v17697_v35 = vpack.c.bf16 %v4017_v34, %v4013_v14  ;;  %v17709_v14 = vpack.c.bf16 %v4033_v32, %v4029_v41  ;;  %v4037_v43 = vld [vmem:[#allocation17 + $0x158] sm:$0xff]  ;;  %v17718_v32 = vpack.c.bf16 %v4040_v30, %v4036_v39  ;;  %v3814_v39 = vld [vmem:[#allocation19] sm:$0xf] }
 0x718   :  { %12200 = vmatpush1.bf16.msra.mxu1 %v17617_v59  ;;  %4124 = vmatprep.mubr.f32.mxu1 %v20195_v52  ;;  %v17693_v13 = vpack.c.bf16 %v4008_v48, %v4004_v18  ;;  %v4020_v18 = vld [vmem:[#allocation17 + $0xd0] sm:$0xff]  ;;  %v4041_v44 = vld [vmem:[#allocation17 + $0x178] sm:$0xff]  ;;  %v17730_v30 = vpack.c.bf16 %v4056_v21, %v4052_v37  ;;  %v3827_v1 = vrot.slane %v3814_v39, %v17381_v27 }
 0x719   :  { %12202 = vmatprep.subr.bf16.mxu1 %v17621_v16  ;;  %v4024_v48 = vld [vmem:[#allocation17 + $0xf0] sm:$0xff]  ;;  %v17715_v49 = vpack.c.bf16 %v4041_v44, %v4037_v43  ;;  %v17724_v43 = vpack.c.bf16 %v4048_v29, %v4044_v38  ;;  %v17727_v44 = vpack.c.bf16 %v4057_v40, %v4053_v31  ;;  %v3819_v31 = vrot.slane %v3814_v39, %v17307_v51 }
 0x71a   :  { %v17706_v34 = vpack.c.bf16 %v4024_v48, %v4020_v18  ;;  %v4045_v18 = vld [vmem:[#allocation17 + $0x198] sm:$0xff]  ;;  %v3831_v0 = vrot.slane %v3814_v39, %v17320_v54  ;;  %v5639_v51 = vld [vmem:[%s20207_s26 + $0x2f0] sm:$0xff] }
 0x71b   :  { %v4049_v48 = vld [vmem:[#allocation17 + $0x1b8] sm:$0xff] }
 0x71c   :  { %12204 = vmatpush1.bf16.msra.mxu1 %v17623_v26  ;;  %v17721_v41 = vpack.c.bf16 %v4049_v48, %v4045_v18  ;;  %v3823_v48 = vrot.slane %v3814_v39, %v17313_v53  ;;  %v5635_v53 = vld [vmem:[%s20207_s26 + $0x2d0] sm:$0xff] }
 0x71d   :  { %12206 = vmatprep.subr.bf16.mxu1 %v17627_v19 }
 0x720   :  { %12208 = vmatpush1.bf16.msra.mxu1 %v17629_v25 }
 0x721   :  { %12210 = vmatprep.subr.bf16.mxu1 %v17633_v56 }
 0x724   :  { %12212 = vmatpush1.bf16.msra.mxu1 %v17635_v50 }
 0x725   :  { %12214 = vmatprep.subr.bf16.mxu1 %v17639_v24 }
 0x728   :  { %12216 = vmatpush1.bf16.msra.mxu1 %v17641_v17 }
 0x729   :  { %12218 = vmatprep.subr.bf16.mxu1 %v17645_v46 }
 0x72c   :  { %12220 = vmatpush1.bf16.msra.mxu1 %v17647_v20 }
 0x72d   :  { %12222 = vmatprep.subr.bf16.mxu1 %v17651_v58 }
 0x730   :  { %12224 = vmatpush1.bf16.msra.mxu1 %v17653_v23 }
 0x731   :  { %12226 = vmatprep.subr.bf16.mxu1 %v17657_v57 }
 0x734   :  { %12228 = vmatpush1.bf16.msra.mxu1 %v17659_v22 }
 0x735   :  { %12230 = vmatprep.subr.bf16.mxu1 %v17683_v36 }
 0x737   :  { %4125 = vmatmul.mubr.f32.vlgmr.msra.gmra.mrb[24].mxu1 %v4058_v60 }
 0x738   :  { %12232 = vmatpush1.bf16.msra.mxu1 %v17687_v45  ;;  %4195 = vmatprep.mubr.f32.mxu1 %v20195_v52 }
 0x739   :  { %12234 = vmatprep.subr.bf16.mxu1 %v17690_v47 }
 0x73c   :  { %12236 = vmatpush1.bf16.msra.mxu1 %v17693_v13 }
 0x73d   :  { %12238 = vmatprep.subr.bf16.mxu1 %v17697_v35 }
 0x740   :  { %12240 = vmatpush1.bf16.msra.mxu1 %v17700_v15 }
 0x741   :  { %12242 = vmatprep.subr.bf16.mxu1 %v17703_v33 }
 0x744   :  { %12244 = vmatpush1.bf16.msra.mxu1 %v17706_v34 }
 0x745   :  { %12246 = vmatprep.subr.bf16.mxu1 %v17709_v14 }
 0x748   :  { %12248 = vmatpush1.bf16.msra.mxu1 %v17712_v42 }
 0x749   :  { %12250 = vmatprep.subr.bf16.mxu1 %v17715_v49 }
 0x74c   :  { %12252 = vmatpush1.bf16.msra.mxu1 %v17718_v32 }
 0x74d   :  { %12254 = vmatprep.subr.bf16.mxu1 %v17721_v41 }
 0x750   :  { %12256 = vmatpush1.bf16.msra.mxu1 %v17724_v43 }
 0x751   :  { %12258 = vmatprep.subr.bf16.mxu1 %v17727_v44 }
 0x754   :  { %12260 = vmatpush1.bf16.msra.mxu1 %v17730_v30 }
 0x755   :  { %12294 = vmatprep.subr.bf16.mxu1 %v17683_v36 }
 0x757   :  { %4196 = vmatmul.mubr.f32.vlgmr.msra.gmra.mrb[26].mxu1 %v4058_v60 }
 0x758   :  { %12296 = vmatpush1.bf16.msra.mxu1 %v17687_v45  ;;  %4365 = vmatprep.mubr.f32.mxu1 %v20195_v52 }
 0x759   :  { %12298 = vmatprep.subr.bf16.mxu1 %v17690_v47 }
 0x75c   :  { %12300 = vmatpush1.bf16.msra.mxu1 %v17693_v13 }
 0x75d   :  { %12302 = vmatprep.subr.bf16.mxu1 %v17697_v35 }
 0x760   :  { %12304 = vmatpush1.bf16.msra.mxu1 %v17700_v15 }
 0x761   :  { %12306 = vmatprep.subr.bf16.mxu1 %v17703_v33 }
 0x764   :  { %12308 = vmatpush1.bf16.msra.mxu1 %v17706_v34 }
 0x765   :  { %12310 = vmatprep.subr.bf16.mxu1 %v17709_v14 }
 0x768   :  { %12312 = vmatpush1.bf16.msra.mxu1 %v17712_v42 }
 0x769   :  { %12314 = vmatprep.subr.bf16.mxu1 %v17715_v49 }
 0x76c   :  { %12316 = vmatpush1.bf16.msra.mxu1 %v17718_v32 }
 0x76d   :  { %12318 = vmatprep.subr.bf16.mxu1 %v17721_v41 }
 0x770   :  { %12320 = vmatpush1.bf16.msra.mxu1 %v17724_v43 }
 0x771   :  { %12322 = vmatprep.subr.bf16.mxu1 %v17727_v44 }
 0x774   :  { %12324 = vmatpush1.bf16.msra.mxu1 %v17730_v30 }
 0x775   :  { %12358 = vmatprep.subr.bf16.mxu1 %v17683_v36 }
 0x7e4   :  { %v3918_v21 = vpop.f32.mrb[20].mxu1 }
 0x7e5   :  { %v3920_v29 = vpop.f32.mrb[21].mxu1  ;;  %v17756_v4 = vadd.f32 %v3918_v21, %v3819_v31  ;;  %v4059_v31 = vld [vmem:[%s16738_s27] sm:$0x1] }
 0x7e6   :  { %v17754_v40 = vadd.f32 %v3920_v29, %v3823_v48 }
 0x7e7   :  { %20199 = vst [vmem:[#allocation127_spill] sm:$0xff] %v17756_v4 }
 0x7e8   :  { %20198 = vst [vmem:[#allocation126_spill] sm:$0xff] %v17754_v40 }
 0x7ea   :  { %v3989_v37 = vpop.f32.mrb[22].mxu1 }
 0x7eb   :  { %v3991_v38 = vpop.f32.mrb[23].mxu1  ;;  %v17762_v29 = vadd.f32 %v3989_v37, %v3827_v1 }
 0x7ec   :  { %v17764_v48 = vadd.f32 %v3991_v38, %v3831_v0 }
 0x7ed   :  { %20200 = vst [vmem:[#allocation128_spill] sm:$0xff] %v17762_v29 }
 0x7ee   :  { %20201 = vst [vmem:[#allocation129_spill] sm:$0xff] %v17764_v48 }
 0x80a   :  { %v4126_v60 = vpop.f32.mrb[24].mxu1 }
 0x80b   :  { %v4128_v18 = vpop.f32.mrb[25].mxu1  ;;  %v4202_v3 = vadd.f32 %v4126_v60, %v17756_v4 }
 0x80c   :  { %v4203_v12 = vadd.f32 %v4128_v18, %v17754_v40 }
 0x80d   :  { %v11642_v2 = vmul.f32 -1.442695, %v4202_v3 }
 0x80e   :  { %v11643_v11 = vmul.f32 -1.442695, %v4203_v12 }
 0x810   :  { %15321 = vpow2.f32 %v11643_v11 }
 0x811   :  { %15323 = vpow2.f32 %v11642_v2 }
 0x81a   :  { %v15322_v10 = vpop.eup %15321 }
 0x81b   :  { %v15324_v9 = vpop.eup %15323  ;;  %v4216_v8 = vadd.f32 1.0, %v15322_v10 }
 0x81c   :  { %v4215_v21 = vadd.f32 1.0, %v15324_v9 }
 0x81d   :  { %15325 = vrcp.f32 %v4216_v8 }
 0x81e   :  { %15327 = vrcp.f32 %v4215_v21 }
 0x827   :  { %v15326_v11 = vpop.eup %15325 }
 0x828   :  { %v15328_v39 = vpop.eup %15327  ;;  %v4225_v37 = vmul.f32 %v15326_v11, %v4059_v31 }
 0x82a   :  { %v4197_v18 = vpop.f32.mrb[26].mxu1 }
 0x82b   :  { %v4204_v60 = vadd.f32 %v4197_v18, %v17762_v29  ;;  %v4199_v12 = vpop.f32.mrb[27].mxu1 }
 0x82c   :  { %v4205_v2 = vadd.f32 %v4199_v12, %v17764_v48 }
 0x82d   :  { %v11644_v3 = vmul.f32 -1.442695, %v4204_v60 }
 0x82e   :  { %15329 = vtanh.f32 %v4205_v2 }
 0x82f   :  { %15331 = vpow2.f32 %v11644_v3 }
 0x838   :  { %v15330_v10 = vpop.eup %15329 }
 0x839   :  { %v15332_v1 = vpop.eup %15331  ;;  %v4226_v9 = vmul.f32 %v15330_v10, %v15328_v39 }
 0x83a   :  { %v4217_v0 = vadd.f32 1.0, %v15332_v1 }
 0x83b   :  { %v17769_v38 = vadd.f32 %v4226_v9, %v4225_v37 }
 0x83c   :  { %15333 = vrcp.f32 %v4217_v0 }
 0x83d   :  { %15335 = vtanh.f32 %v17769_v38 }
 0x846   :  { %v15334_v8 = vpop.eup %15333 }
 0x847   :  { %v15336_v18 = vpop.eup %15335 }
 0x848   :  { %v17772_v12 = vmul.f32 %v15336_v18, %v15334_v8 }
 0x84a   :  { %4295 = vmatmul.mubr.f32.vlgmr.msra.gmra.mrb[16].mxu0 %v17772_v12  ;;  %4366 = vmatmul.mubr.f32.vlgmr.msra.gmra.mrb[28].mxu1 %v17772_v12 }
 0x84b   :  { %12328 = vmatpush1.bf16.msra.mxu0 %v17617_v59  ;;  %12360 = vmatpush1.bf16.msra.mxu1 %v17687_v45 }
 0x84c   :  { %12330 = vmatprep.subr.bf16.mxu0 %v17621_v16  ;;  %12362 = vmatprep.subr.bf16.mxu1 %v17690_v47 }
 0x84d   :  { %4482 = vmatprep.mubr.f32.mxu0 %v20195_v52  ;;  %4553 = vmatprep.mubr.f32.mxu1 %v20195_v52 }
 0x84f   :  { %12332 = vmatpush1.bf16.msra.mxu0 %v17623_v26  ;;  %12364 = vmatpush1.bf16.msra.mxu1 %v17693_v13 }
 0x850   :  { %12334 = vmatprep.subr.bf16.mxu0 %v17627_v19  ;;  %12366 = vmatprep.subr.bf16.mxu1 %v17697_v35 }
 0x853   :  { %12336 = vmatpush1.bf16.msra.mxu0 %v17629_v25  ;;  %12368 = vmatpush1.bf16.msra.mxu1 %v17700_v15 }
 0x854   :  { %12338 = vmatprep.subr.bf16.mxu0 %v17633_v56  ;;  %12370 = vmatprep.subr.bf16.mxu1 %v17703_v33 }
 0x857   :  { %12340 = vmatpush1.bf16.msra.mxu0 %v17635_v50  ;;  %12372 = vmatpush1.bf16.msra.mxu1 %v17706_v34 }
 0x858   :  { %12342 = vmatprep.subr.bf16.mxu0 %v17639_v24  ;;  %12374 = vmatprep.subr.bf16.mxu1 %v17709_v14 }
 0x85b   :  { %12344 = vmatpush1.bf16.msra.mxu0 %v17641_v17  ;;  %12376 = vmatpush1.bf16.msra.mxu1 %v17712_v42 }
 0x85c   :  { %12346 = vmatprep.subr.bf16.mxu0 %v17645_v46  ;;  %12378 = vmatprep.subr.bf16.mxu1 %v17715_v49 }
 0x85f   :  { %12348 = vmatpush1.bf16.msra.mxu0 %v17647_v20  ;;  %12380 = vmatpush1.bf16.msra.mxu1 %v17718_v32 }
 0x860   :  { %12350 = vmatprep.subr.bf16.mxu0 %v17651_v58  ;;  %12382 = vmatprep.subr.bf16.mxu1 %v17721_v41 }
 0x863   :  { %12352 = vmatpush1.bf16.msra.mxu0 %v17653_v23  ;;  %12384 = vmatpush1.bf16.msra.mxu1 %v17724_v43 }
 0x864   :  { %12354 = vmatprep.subr.bf16.mxu0 %v17657_v57  ;;  %12386 = vmatprep.subr.bf16.mxu1 %v17727_v44 }
 0x867   :  { %12356 = vmatpush1.bf16.msra.mxu0 %v17659_v22  ;;  %12388 = vmatpush1.bf16.msra.mxu1 %v17730_v30 }
 0x868   :  { %12390 = vmatprep.subr.bf16.mxu0 %v17615_v28  ;;  %12422 = vmatprep.subr.bf16.mxu1 %v17683_v36 }
 0x91d   :  { %v4296_v21 = vpop.f32.mrb[16].mxu0  ;;  %v4367_v60 = vpop.f32.mrb[28].mxu1 }
 0x91e   :  { %v4376_v2 = vrot.slane %v4296_v21, 7  ;;  %v4298_v3 = vpop.f32.mrb[17].mxu0  ;;  %v4369_v11 = vpop.f32.mrb[29].mxu1  ;;  %v4378_v9 = vrot.slane %v4367_v60, 7  ;;  %v4408_v60 = vrot.slane %v17769_v38, 7 }
 0x91f   :  { %v4377_v31 = vrot.slane %v4298_v3, 7  ;;  %v4379_v0 = vrot.slane %v4369_v11, 7 }
 0x920   :  { %v4384_v39 = vadd.f32 %v4376_v2, %v17756_v4  ;;  %v4386_v8 = vadd.f32 %v4378_v9, %v17762_v29 }
 0x921   :  { %v4385_v10 = vadd.f32 %v4377_v31, %v17754_v40  ;;  %v4387_v18 = vadd.f32 %v4379_v0, %v17764_v48 }
 0x922   :  { %v11645_v1 = vmul.f32 -1.442695, %v4384_v39  ;;  %v11647_v63 = vmul.f32 -1.442695, %v4386_v8 }
 0x923   :  { %v11646_v37 = vmul.f32 -1.442695, %v4385_v10 }
 0x924   :  { %15337 = vpow2.f32 %v11645_v1 }
 0x925   :  { %15339 = vpow2.f32 %v11646_v37 }
 0x926   :  { %15341 = vtanh.f32 %v4387_v18 }
 0x927   :  { %15343 = vpow2.f32 %v11647_v63 }
 0x92e   :  { %v15338_v7 = vpop.eup %15337 }
 0x92f   :  { %v4397_v21 = vadd.f32 1.0, %v15338_v7  ;;  %v15340_v62 = vpop.eup %15339 }
 0x930   :  { %v4398_v2 = vadd.f32 1.0, %v15340_v62  ;;  %v15342_v3 = vpop.eup %15341 }
 0x931   :  { %15345 = vrcp.f32 %v4397_v21  ;;  %v15344_v31 = vpop.eup %15343 }
 0x932   :  { %15347 = vrcp.f32 %v4398_v2  ;;  %v4399_v1 = vadd.f32 1.0, %v15344_v31 }
 0x934   :  { %15349 = vrcp.f32 %v4399_v1 }
 0x93b   :  { %v15346_v39 = vpop.eup %15345 }
 0x93c   :  { %v4411_v10 = vmul.f32 %v15346_v39, %v15342_v3  ;;  %v15348_v11 = vpop.eup %15347 }
 0x93d   :  { %v4410_v37 = vmul.f32 %v15348_v11, %v4408_v60 }
 0x93e   :  { %v15350_v7 = vpop.eup %15349 }
 0x93f   :  { %v17815_v9 = vadd.f32 %v4411_v10, %v4410_v37 }
 0x941   :  { %15351 = vtanh.f32 %v17815_v9 }
 0x94b   :  { %v15352_v0 = vpop.eup %15351 }
 0x94c   :  { %v4414_v63 = vmul.f32 %v15352_v0, %v15350_v7 }
 0x94e   :  { %v17818_v8 = vrot.slane %v4414_v63, 1 }
 0x950   :  { %20202 = vst [vmem:[#allocation130_spill] sm:$0xff] %v17818_v8  ;;  %4483 = vmatmul.mubr.f32.vlgmr.msra.gmra.mrb[18].mxu0 %v17818_v8  ;;  %4554 = vmatmul.mubr.f32.vlgmr.msra.gmra.mrb[30].mxu1 %v17818_v8  ;;  %v5631_v8 = vld [vmem:[%s20207_s26 + $0x2b0] sm:$0xff] }
 0x951   :  { %12392 = vmatpush1.bf16.msra.mxu0 %v17617_v59  ;;  %12424 = vmatpush1.bf16.msra.mxu1 %v17687_v45 }
 0x952   :  { %12394 = vmatprep.subr.bf16.mxu0 %v17621_v16  ;;  %12426 = vmatprep.subr.bf16.mxu1 %v17690_v47 }
 0x953   :  { %4670 = vmatprep.mubr.f32.mxu0 %v20195_v52  ;;  %4741 = vmatprep.mubr.f32.mxu1 %v20195_v52 }
 0x955   :  { %12396 = vmatpush1.bf16.msra.mxu0 %v17623_v26  ;;  %12428 = vmatpush1.bf16.msra.mxu1 %v17693_v13 }
 0x956   :  { %12398 = vmatprep.subr.bf16.mxu0 %v17627_v19  ;;  %12430 = vmatprep.subr.bf16.mxu1 %v17697_v35 }
 0x959   :  { %12400 = vmatpush1.bf16.msra.mxu0 %v17629_v25  ;;  %12432 = vmatpush1.bf16.msra.mxu1 %v17700_v15 }
 0x95a   :  { %12402 = vmatprep.subr.bf16.mxu0 %v17633_v56  ;;  %12434 = vmatprep.subr.bf16.mxu1 %v17703_v33 }
 0x95d   :  { %12404 = vmatpush1.bf16.msra.mxu0 %v17635_v50  ;;  %12436 = vmatpush1.bf16.msra.mxu1 %v17706_v34 }
 0x95e   :  { %12406 = vmatprep.subr.bf16.mxu0 %v17639_v24  ;;  %12438 = vmatprep.subr.bf16.mxu1 %v17709_v14 }
 0x961   :  { %12408 = vmatpush1.bf16.msra.mxu0 %v17641_v17  ;;  %12440 = vmatpush1.bf16.msra.mxu1 %v17712_v42 }
 0x962   :  { %12410 = vmatprep.subr.bf16.mxu0 %v17645_v46  ;;  %12442 = vmatprep.subr.bf16.mxu1 %v17715_v49 }
 0x965   :  { %12412 = vmatpush1.bf16.msra.mxu0 %v17647_v20  ;;  %12444 = vmatpush1.bf16.msra.mxu1 %v17718_v32 }
 0x966   :  { %12414 = vmatprep.subr.bf16.mxu0 %v17651_v58  ;;  %12446 = vmatprep.subr.bf16.mxu1 %v17721_v41 }
 0x969   :  { %12416 = vmatpush1.bf16.msra.mxu0 %v17653_v23  ;;  %12448 = vmatpush1.bf16.msra.mxu1 %v17724_v43 }
 0x96a   :  { %12418 = vmatprep.subr.bf16.mxu0 %v17657_v57  ;;  %12450 = vmatprep.subr.bf16.mxu1 %v17727_v44 }
 0x96d   :  { %12420 = vmatpush1.bf16.msra.mxu0 %v17659_v22  ;;  %12452 = vmatpush1.bf16.msra.mxu1 %v17730_v30 }
 0x96e   :  { %12454 = vmatprep.subr.bf16.mxu0 %v17615_v28  ;;  %12486 = vmatprep.subr.bf16.mxu1 %v17683_v36 }
 0xa23   :  { %v4484_v62 = vpop.f32.mrb[18].mxu0  ;;  %v4555_v38 = vpop.f32.mrb[30].mxu1 }
 0xa24   :  { %v4564_v18 = vrot.slane %v4484_v62, 6  ;;  %v4486_v21 = vpop.f32.mrb[19].mxu0  ;;  %v4557_v2 = vpop.f32.mrb[31].mxu1  ;;  %v4566_v11 = vrot.slane %v4555_v38, 6  ;;  %v4596_v38 = vrot.slane %v17815_v9, 7 }
 0xa25   :  { %v4565_v3 = vrot.slane %v4486_v21, 6  ;;  %v4567_v1 = vrot.slane %v4557_v2, 6 }
 0xa26   :  { %v4572_v31 = vadd.f32 %v4564_v18, %v17756_v4  ;;  %v4574_v37 = vadd.f32 %v4566_v11, %v17762_v29 }
 0xa27   :  { %v4573_v39 = vadd.f32 %v4565_v3, %v17754_v40  ;;  %v4575_v7 = vadd.f32 %v4567_v1, %v17764_v48 }
 0xa28   :  { %v11648_v60 = vmul.f32 -1.442695, %v4572_v31  ;;  %v11650_v0 = vmul.f32 -1.442695, %v4574_v37 }
 0xa29   :  { %v11649_v10 = vmul.f32 -1.442695, %v4573_v39 }
 0xa2a   :  { %15353 = vpow2.f32 %v11648_v60 }
 0xa2b   :  { %15355 = vpow2.f32 %v11649_v10 }
 0xa2c   :  { %15357 = vtanh.f32 %v4575_v7 }
 0xa2d   :  { %15359 = vpow2.f32 %v11650_v0 }
 0xa34   :  { %v15354_v63 = vpop.eup %15353 }
 0xa35   :  { %v4585_v62 = vadd.f32 1.0, %v15354_v63  ;;  %v15356_v6 = vpop.eup %15355 }
 0xa36   :  { %v4586_v18 = vadd.f32 1.0, %v15356_v6  ;;  %v15358_v21 = vpop.eup %15357 }
 0xa37   :  { %15361 = vrcp.f32 %v4585_v62  ;;  %v15360_v3 = vpop.eup %15359 }
 0xa38   :  { %15363 = vrcp.f32 %v4586_v18  ;;  %v4587_v60 = vadd.f32 1.0, %v15360_v3 }
 0xa3a   :  { %15365 = vrcp.f32 %v4587_v60 }
 0xa41   :  { %v15362_v31 = vpop.eup %15361 }
 0xa42   :  { %v4599_v39 = vmul.f32 %v15362_v31, %v15358_v21  ;;  %v15364_v2 = vpop.eup %15363 }
 0xa43   :  { %v4598_v10 = vmul.f32 %v15364_v2, %v4596_v38 }
 0xa44   :  { %v15366_v1 = vpop.eup %15365 }
 0xa45   :  { %v17861_v11 = vadd.f32 %v4599_v39, %v4598_v10 }
 0xa47   :  { %15367 = vtanh.f32 %v17861_v11 }
 0xa51   :  { %v15368_v37 = vpop.eup %15367 }
 0xa52   :  { %v4602_v7 = vmul.f32 %v15368_v37, %v15366_v1 }
 0xa54   :  { %v17864_v0 = vrot.slane %v4602_v7, 2 }
 0xa56   :  { %20203 = vst [vmem:[#allocation131_spill] sm:$0xff] %v17864_v0  ;;  %4671 = vmatmul.mubr.f32.vlgmr.msra.gmra.mrb[20].mxu0 %v17864_v0  ;;  %4742 = vmatmul.mubr.f32.vlgmr.msra.gmra.mrb[32].mxu1 %v17864_v0  ;;  %v5627_v0 = vld [vmem:[%s20207_s26 + $0x290] sm:$0xff] }
 0xa57   :  { %12456 = vmatpush1.bf16.msra.mxu0 %v17617_v59  ;;  %12488 = vmatpush1.bf16.msra.mxu1 %v17687_v45 }
 0xa58   :  { %12458 = vmatprep.subr.bf16.mxu0 %v17621_v16  ;;  %12490 = vmatprep.subr.bf16.mxu1 %v17690_v47 }
 0xa59   :  { %4858 = vmatprep.mubr.f32.mxu0 %v20195_v52  ;;  %4929 = vmatprep.mubr.f32.mxu1 %v20195_v52 }
 0xa5b   :  { %12460 = vmatpush1.bf16.msra.mxu0 %v17623_v26  ;;  %12492 = vmatpush1.bf16.msra.mxu1 %v17693_v13 }
 0xa5c   :  { %12462 = vmatprep.subr.bf16.mxu0 %v17627_v19  ;;  %12494 = vmatprep.subr.bf16.mxu1 %v17697_v35 }
 0xa5f   :  { %12464 = vmatpush1.bf16.msra.mxu0 %v17629_v25  ;;  %12496 = vmatpush1.bf16.msra.mxu1 %v17700_v15 }
 0xa60   :  { %12466 = vmatprep.subr.bf16.mxu0 %v17633_v56  ;;  %12498 = vmatprep.subr.bf16.mxu1 %v17703_v33 }
 0xa63   :  { %12468 = vmatpush1.bf16.msra.mxu0 %v17635_v50  ;;  %12500 = vmatpush1.bf16.msra.mxu1 %v17706_v34 }
 0xa64   :  { %12470 = vmatprep.subr.bf16.mxu0 %v17639_v24  ;;  %12502 = vmatprep.subr.bf16.mxu1 %v17709_v14 }
 0xa67   :  { %12472 = vmatpush1.bf16.msra.mxu0 %v17641_v17  ;;  %12504 = vmatpush1.bf16.msra.mxu1 %v17712_v42 }
 0xa68   :  { %12474 = vmatprep.subr.bf16.mxu0 %v17645_v46  ;;  %12506 = vmatprep.subr.bf16.mxu1 %v17715_v49 }
 0xa6b   :  { %12476 = vmatpush1.bf16.msra.mxu0 %v17647_v20  ;;  %12508 = vmatpush1.bf16.msra.mxu1 %v17718_v32 }
 0xa6c   :  { %12478 = vmatprep.subr.bf16.mxu0 %v17651_v58  ;;  %12510 = vmatprep.subr.bf16.mxu1 %v17721_v41 }
 0xa6f   :  { %12480 = vmatpush1.bf16.msra.mxu0 %v17653_v23  ;;  %12512 = vmatpush1.bf16.msra.mxu1 %v17724_v43 }
 0xa70   :  { %12482 = vmatprep.subr.bf16.mxu0 %v17657_v57  ;;  %12514 = vmatprep.subr.bf16.mxu1 %v17727_v44 }
 0xa73   :  { %12484 = vmatpush1.bf16.msra.mxu0 %v17659_v22  ;;  %12516 = vmatpush1.bf16.msra.mxu1 %v17730_v30 }
 0xa74   :  { %12518 = vmatprep.subr.bf16.mxu0 %v17615_v28  ;;  %12550 = vmatprep.subr.bf16.mxu1 %v17683_v36 }
 0xb29   :  { %v4672_v6 = vpop.f32.mrb[20].mxu0  ;;  %v4743_v9 = vpop.f32.mrb[32].mxu1 }
 0xb2a   :  { %v4752_v63 = vrot.slane %v4672_v6, 5  ;;  %v4674_v62 = vpop.f32.mrb[21].mxu0  ;;  %v4745_v18 = vpop.f32.mrb[33].mxu1  ;;  %v4754_v2 = vrot.slane %v4743_v9, 5  ;;  %v4784_v9 = vrot.slane %v17861_v11, 7 }
 0xb2b   :  { %v4753_v21 = vrot.slane %v4674_v62, 5  ;;  %v4755_v60 = vrot.slane %v4745_v18, 5 }
 0xb2c   :  { %v4760_v3 = vadd.f32 %v4752_v63, %v17756_v4  ;;  %v4762_v10 = vadd.f32 %v4754_v2, %v17762_v29 }
 0xb2d   :  { %v4761_v31 = vadd.f32 %v4753_v21, %v17754_v40  ;;  %v4763_v1 = vadd.f32 %v4755_v60, %v17764_v48 }
 0xb2e   :  { %v11651_v38 = vmul.f32 -1.442695, %v4760_v3  ;;  %v11653_v37 = vmul.f32 -1.442695, %v4762_v10 }
 0xb2f   :  { %v11652_v39 = vmul.f32 -1.442695, %v4761_v31 }
 0xb30   :  { %15369 = vpow2.f32 %v11651_v38 }
 0xb31   :  { %15371 = vpow2.f32 %v11652_v39 }
 0xb32   :  { %15373 = vtanh.f32 %v4763_v1 }
 0xb33   :  { %15375 = vpow2.f32 %v11653_v37 }
 0xb3a   :  { %v15370_v7 = vpop.eup %15369 }
 0xb3b   :  { %v4773_v6 = vadd.f32 1.0, %v15370_v7  ;;  %v15372_v61 = vpop.eup %15371 }
 0xb3c   :  { %v4774_v63 = vadd.f32 1.0, %v15372_v61  ;;  %v15374_v62 = vpop.eup %15373 }
 0xb3d   :  { %15377 = vrcp.f32 %v4773_v6  ;;  %v15376_v21 = vpop.eup %15375 }
 0xb3e   :  { %15379 = vrcp.f32 %v4774_v63  ;;  %v4775_v38 = vadd.f32 1.0, %v15376_v21 }
 0xb40   :  { %15381 = vrcp.f32 %v4775_v38 }
 0xb47   :  { %v15378_v3 = vpop.eup %15377 }
 0xb48   :  { %v4787_v31 = vmul.f32 %v15378_v3, %v15374_v62  ;;  %v15380_v18 = vpop.eup %15379 }
 0xb49   :  { %v4786_v39 = vmul.f32 %v15380_v18, %v4784_v9 }
 0xb4a   :  { %v15382_v60 = vpop.eup %15381 }
 0xb4b   :  { %v17907_v2 = vadd.f32 %v4787_v31, %v4786_v39 }
 0xb4d   :  { %15383 = vtanh.f32 %v17907_v2 }
 0xb57   :  { %v15384_v10 = vpop.eup %15383 }
 0xb58   :  { %v4790_v1 = vmul.f32 %v15384_v10, %v15382_v60 }
 0xb5a   :  { %v17910_v37 = vrot.slane %v4790_v1, 3 }
 0xb5c   :  { %20204 = vst [vmem:[#allocation132_spill] sm:$0xff] %v17910_v37  ;;  %4859 = vmatmul.mubr.f32.vlgmr.msra.gmra.mrb[22].mxu0 %v17910_v37  ;;  %4930 = vmatmul.mubr.f32.vlgmr.msra.gmra.mrb[34].mxu1 %v17910_v37 }
 0xb5d   :  { %12520 = vmatpush1.bf16.msra.mxu0 %v17617_v59  ;;  %12552 = vmatpush1.bf16.msra.mxu1 %v17687_v45 }
 0xb5e   :  { %12522 = vmatprep.subr.bf16.mxu0 %v17621_v16  ;;  %12554 = vmatprep.subr.bf16.mxu1 %v17690_v47 }
 0xb5f   :  { %5046 = vmatprep.mubr.f32.mxu0 %v20195_v52  ;;  %5117 = vmatprep.mubr.f32.mxu1 %v20195_v52 }
 0xb61   :  { %12524 = vmatpush1.bf16.msra.mxu0 %v17623_v26  ;;  %12556 = vmatpush1.bf16.msra.mxu1 %v17693_v13 }
 0xb62   :  { %12526 = vmatprep.subr.bf16.mxu0 %v17627_v19  ;;  %12558 = vmatprep.subr.bf16.mxu1 %v17697_v35 }
 0xb65   :  { %12528 = vmatpush1.bf16.msra.mxu0 %v17629_v25  ;;  %12560 = vmatpush1.bf16.msra.mxu1 %v17700_v15 }
 0xb66   :  { %12530 = vmatprep.subr.bf16.mxu0 %v17633_v56  ;;  %12562 = vmatprep.subr.bf16.mxu1 %v17703_v33 }
 0xb69   :  { %12532 = vmatpush1.bf16.msra.mxu0 %v17635_v50  ;;  %12564 = vmatpush1.bf16.msra.mxu1 %v17706_v34 }
 0xb6a   :  { %12534 = vmatprep.subr.bf16.mxu0 %v17639_v24  ;;  %12566 = vmatprep.subr.bf16.mxu1 %v17709_v14 }
 0xb6d   :  { %12536 = vmatpush1.bf16.msra.mxu0 %v17641_v17  ;;  %12568 = vmatpush1.bf16.msra.mxu1 %v17712_v42 }
 0xb6e   :  { %12538 = vmatprep.subr.bf16.mxu0 %v17645_v46  ;;  %12570 = vmatprep.subr.bf16.mxu1 %v17715_v49 }
 0xb71   :  { %12540 = vmatpush1.bf16.msra.mxu0 %v17647_v20  ;;  %12572 = vmatpush1.bf16.msra.mxu1 %v17718_v32 }
 0xb72   :  { %12542 = vmatprep.subr.bf16.mxu0 %v17651_v58  ;;  %12574 = vmatprep.subr.bf16.mxu1 %v17721_v41 }
 0xb75   :  { %12544 = vmatpush1.bf16.msra.mxu0 %v17653_v23  ;;  %12576 = vmatpush1.bf16.msra.mxu1 %v17724_v43 }
 0xb76   :  { %12546 = vmatprep.subr.bf16.mxu0 %v17657_v57  ;;  %12578 = vmatprep.subr.bf16.mxu1 %v17727_v44 }
 0xb79   :  { %12548 = vmatpush1.bf16.msra.mxu0 %v17659_v22  ;;  %12580 = vmatpush1.bf16.msra.mxu1 %v17730_v30 }
 0xb7a   :  { %12582 = vmatprep.subr.bf16.mxu0 %v17615_v28  ;;  %12614 = vmatprep.subr.bf16.mxu1 %v17683_v36 }
 0xc2f   :  { %v4860_v61 = vpop.f32.mrb[22].mxu0  ;;  %v4931_v11 = vpop.f32.mrb[34].mxu1 }
 0xc30   :  { %v4940_v7 = vrot.slane %v4860_v61, 4  ;;  %v4862_v6 = vpop.f32.mrb[23].mxu0  ;;  %v4933_v63 = vpop.f32.mrb[35].mxu1  ;;  %v4942_v18 = vrot.slane %v4931_v11, 4  ;;  %v4972_v11 = vrot.slane %v17907_v2, 7 }
 0xc31   :  { %v4941_v62 = vrot.slane %v4862_v6, 4  ;;  %v4943_v38 = vrot.slane %v4933_v63, 4 }
 0xc32   :  { %v4948_v21 = vadd.f32 %v4940_v7, %v17756_v4  ;;  %v4950_v39 = vadd.f32 %v4942_v18, %v17762_v29 }
 0xc33   :  { %v4949_v3 = vadd.f32 %v4941_v62, %v17754_v40  ;;  %v4951_v60 = vadd.f32 %v4943_v38, %v17764_v48 }
 0xc34   :  { %v11654_v9 = vmul.f32 -1.442695, %v4948_v21  ;;  %v11656_v10 = vmul.f32 -1.442695, %v4950_v39 }
 0xc35   :  { %v11655_v31 = vmul.f32 -1.442695, %v4949_v3 }
 0xc36   :  { %15385 = vpow2.f32 %v11654_v9 }
 0xc37   :  { %15387 = vpow2.f32 %v11655_v31 }
 0xc38   :  { %15389 = vtanh.f32 %v4951_v60 }
 0xc39   :  { %15391 = vpow2.f32 %v11656_v10 }
 0xc40   :  { %v15386_v1 = vpop.eup %15385 }
 0xc41   :  { %v4961_v61 = vadd.f32 1.0, %v15386_v1  ;;  %v15388_v5 = vpop.eup %15387 }
 0xc42   :  { %v4962_v7 = vadd.f32 1.0, %v15388_v5  ;;  %v15390_v6 = vpop.eup %15389 }
 0xc43   :  { %15393 = vrcp.f32 %v4961_v61  ;;  %v15392_v62 = vpop.eup %15391 }
 0xc44   :  { %15395 = vrcp.f32 %v4962_v7  ;;  %v4963_v9 = vadd.f32 1.0, %v15392_v62 }
 0xc46   :  { %15397 = vrcp.f32 %v4963_v9 }
 0xc4d   :  { %v15394_v21 = vpop.eup %15393 }
 0xc4e   :  { %v4975_v3 = vmul.f32 %v15394_v21, %v15390_v6  ;;  %v15396_v63 = vpop.eup %15395 }
 0xc4f   :  { %v4974_v31 = vmul.f32 %v15396_v63, %v4972_v11 }
 0xc50   :  { %v15398_v38 = vpop.eup %15397 }
 0xc51   :  { %v17953_v18 = vadd.f32 %v4975_v3, %v4974_v31 }
 0xc53   :  { %15399 = vtanh.f32 %v17953_v18 }
 0xc5d   :  { %v15400_v39 = vpop.eup %15399 }
 0xc5e   :  { %v4978_v60 = vmul.f32 %v15400_v39, %v15398_v38 }
 0xc60   :  { %v17956_v10 = vrot.slane %v4978_v60, 4 }
 0xc62   :  { %20205 = vst [vmem:[#allocation133_spill] sm:$0xff] %v17956_v10  ;;  %5047 = vmatmul.mubr.f32.vlgmr.msra.gmra.mrb[24].mxu0 %v17956_v10  ;;  %5118 = vmatmul.mubr.f32.vlgmr.msra.gmra.mrb[36].mxu1 %v17956_v10 }
 0xc63   :  { %12584 = vmatpush1.bf16.msra.mxu0 %v17617_v59  ;;  %12616 = vmatpush1.bf16.msra.mxu1 %v17687_v45 }
 0xc64   :  { %12586 = vmatprep.subr.bf16.mxu0 %v17621_v16  ;;  %12618 = vmatprep.subr.bf16.mxu1 %v17690_v47 }
 0xc65   :  { %5234 = vmatprep.mubr.f32.mxu0 %v20195_v52  ;;  %5305 = vmatprep.mubr.f32.mxu1 %v20195_v52 }
 0xc67   :  { %12588 = vmatpush1.bf16.msra.mxu0 %v17623_v26  ;;  %12620 = vmatpush1.bf16.msra.mxu1 %v17693_v13 }
 0xc68   :  { %12590 = vmatprep.subr.bf16.mxu0 %v17627_v19  ;;  %12622 = vmatprep.subr.bf16.mxu1 %v17697_v35 }
 0xc6b   :  { %12592 = vmatpush1.bf16.msra.mxu0 %v17629_v25  ;;  %12624 = vmatpush1.bf16.msra.mxu1 %v17700_v15 }
 0xc6c   :  { %12594 = vmatprep.subr.bf16.mxu0 %v17633_v56  ;;  %12626 = vmatprep.subr.bf16.mxu1 %v17703_v33 }
 0xc6f   :  { %12596 = vmatpush1.bf16.msra.mxu0 %v17635_v50  ;;  %12628 = vmatpush1.bf16.msra.mxu1 %v17706_v34 }
 0xc70   :  { %12598 = vmatprep.subr.bf16.mxu0 %v17639_v24  ;;  %12630 = vmatprep.subr.bf16.mxu1 %v17709_v14 }
 0xc73   :  { %12600 = vmatpush1.bf16.msra.mxu0 %v17641_v17  ;;  %12632 = vmatpush1.bf16.msra.mxu1 %v17712_v42 }
 0xc74   :  { %12602 = vmatprep.subr.bf16.mxu0 %v17645_v46  ;;  %12634 = vmatprep.subr.bf16.mxu1 %v17715_v49 }
 0xc77   :  { %12604 = vmatpush1.bf16.msra.mxu0 %v17647_v20  ;;  %12636 = vmatpush1.bf16.msra.mxu1 %v17718_v32 }
 0xc78   :  { %12606 = vmatprep.subr.bf16.mxu0 %v17651_v58  ;;  %12638 = vmatprep.subr.bf16.mxu1 %v17721_v41 }
 0xc7b   :  { %12608 = vmatpush1.bf16.msra.mxu0 %v17653_v23  ;;  %12640 = vmatpush1.bf16.msra.mxu1 %v17724_v43 }
 0xc7c   :  { %12610 = vmatprep.subr.bf16.mxu0 %v17657_v57  ;;  %12642 = vmatprep.subr.bf16.mxu1 %v17727_v44 }
 0xc7f   :  { %12612 = vmatpush1.bf16.msra.mxu0 %v17659_v22  ;;  %12644 = vmatpush1.bf16.msra.mxu1 %v17730_v30 }
 0xc80   :  { %12646 = vmatprep.subr.bf16.mxu0 %v17615_v28  ;;  %12678 = vmatprep.subr.bf16.mxu1 %v17683_v36 }
 0xd35   :  { %v5048_v5 = vpop.f32.mrb[24].mxu0  ;;  %v5119_v2 = vpop.f32.mrb[36].mxu1 }
 0xd36   :  { %v5128_v1 = vrot.slane %v5048_v5, 3  ;;  %v5050_v61 = vpop.f32.mrb[25].mxu0  ;;  %v5121_v7 = vpop.f32.mrb[37].mxu1  ;;  %v5130_v63 = vrot.slane %v5119_v2, 3  ;;  %v5160_v2 = vrot.slane %v17953_v18, 7 }
 0xd37   :  { %v5129_v6 = vrot.slane %v5050_v61, 3  ;;  %v5131_v9 = vrot.slane %v5121_v7, 3 }
 0xd38   :  { %v5136_v62 = vadd.f32 %v5128_v1, %v17756_v4  ;;  %v5138_v28 = vadd.f32 %v5130_v63, %v17762_v29 }
 0xd39   :  { %v5137_v21 = vadd.f32 %v5129_v6, %v17754_v40  ;;  %v5139_v36 = vadd.f32 %v5131_v9, %v17764_v48 }
 0xd3a   :  { %v11657_v11 = vmul.f32 -1.442695, %v5136_v62  ;;  %v11659_v31 = vmul.f32 -1.442695, %v5138_v28 }
 0xd3b   :  { %v11658_v3 = vmul.f32 -1.442695, %v5137_v21 }
 0xd3c   :  { %15401 = vpow2.f32 %v11657_v11 }
 0xd3d   :  { %15403 = vpow2.f32 %v11658_v3 }
 0xd3e   :  { %15405 = vtanh.f32 %v5139_v36 }
 0xd3f   :  { %15407 = vpow2.f32 %v11659_v31 }
 0xd46   :  { %v15402_v38 = vpop.eup %15401 }
 0xd47   :  { %v5149_v39 = vadd.f32 1.0, %v15402_v38  ;;  %v15404_v60 = vpop.eup %15403 }
 0xd48   :  { %v5150_v5 = vadd.f32 1.0, %v15404_v60  ;;  %v15406_v1 = vpop.eup %15405  ;;  %v5545_v60 = vld [vmem:[%s20207_s26] sm:$0xff] }
 0xd49   :  { %15409 = vrcp.f32 %v5149_v39  ;;  %v15408_v61 = vpop.eup %15407 }
 0xd4a   :  { %15411 = vrcp.f32 %v5150_v5  ;;  %v5151_v21 = vadd.f32 1.0, %v15408_v61  ;;  %v5549_v5 = vld [vmem:[%s20207_s26 + $0x20] sm:$0xff]  ;;  %v5547_v61 = vld [vmem:[%s20207_s26 + $0x10] sm:$0xff] }
 0xd4c   :  { %15413 = vrcp.f32 %v5151_v21  ;;  %v5556_v21 = vld [vmem:[%s20207_s26 + $0x58] sm:$0xff] }
 0xd53   :  { %v15410_v6 = vpop.eup %15409 }
 0xd54   :  { %v5163_v62 = vmul.f32 %v15410_v6, %v15406_v1  ;;  %v15412_v7 = vpop.eup %15411  ;;  %v5551_v6 = vld [vmem:[%s20207_s26 + $0x30] sm:$0xff] }
 0xd55   :  { %v5162_v11 = vmul.f32 %v15412_v7, %v5160_v2  ;;  %v5554_v2 = vld [vmem:[%s20207_s26 + $0x48] sm:$0xff] }
 0xd56   :  { %v15414_v63 = vpop.eup %15413  ;;  %v5558_v7 = vld [vmem:[%s20207_s26 + $0x68] sm:$0xff] }
 0xd57   :  { %v17999_v3 = vadd.f32 %v5163_v62, %v5162_v11  ;;  %v5560_v11 = vld [vmem:[%s20207_s26 + $0x78] sm:$0xff] }
 0xd59   :  { %15415 = vtanh.f32 %v17999_v3 }
 0xd63   :  { %v15416_v9 = vpop.eup %15415 }
 0xd64   :  { %v5166_v28 = vmul.f32 %v15416_v9, %v15414_v63  ;;  %v18064_v63 = vpack.c.bf16 %v5549_v5, %v5545_v60  ;;  %v18066_v9 = vpack.c.bf16 %v5551_v6, %v5547_v61  ;;  %v5578_v60 = vld [vmem:[%s20207_s26 + $0x108] sm:$0xff]  ;;  %v5584_v61 = vld [vmem:[%s20207_s26 + $0x138] sm:$0xff] }
 0xd65   :  { %v5582_v5 = vld [vmem:[%s20207_s26 + $0x128] sm:$0xff] }
 0xd66   :  { %v18002_v36 = vrot.slane %v5166_v28, 5  ;;  %v5553_v28 = vld [vmem:[%s20207_s26 + $0x40] sm:$0xff] }
 0xd68   :  { %20206 = vst [vmem:[#allocation134_spill] sm:$0xff] %v18002_v36  ;;  %5235 = vmatmul.mubr.f32.vlgmr.msra.gmra.mrb[26].mxu0 %v18002_v36  ;;  %5306 = vmatmul.mubr.f32.vlgmr.msra.gmra.mrb[38].mxu1 %v18002_v36  ;;  %v5623_v36 = vld [vmem:[%s20207_s26 + $0x270] sm:$0xff] }
 0xd69   :  { %12648 = vmatpush1.bf16.msra.mxu0 %v17617_v59  ;;  %12680 = vmatpush1.bf16.msra.mxu1 %v17687_v45  ;;  %v5550_v59 = vld [vmem:[%s20207_s26 + $0x28] sm:$0xff] }
 0xd6a   :  { %12650 = vmatprep.subr.bf16.mxu0 %v17621_v16  ;;  %12682 = vmatprep.subr.bf16.mxu1 %v17690_v47  ;;  %v5548_v16 = vld [vmem:[%s20207_s26 + $0x18] sm:$0xff] }
 0xd6b   :  { %5422 = vmatprep.mubr.f32.mxu0 %v20195_v52  ;;  %5493 = vmatprep.mubr.f32.mxu1 %v20195_v52 }
 0xd6d   :  { %12652 = vmatpush1.bf16.msra.mxu0 %v17623_v26  ;;  %12684 = vmatpush1.bf16.msra.mxu1 %v17693_v13 }
 0xd6e   :  { %12654 = vmatprep.subr.bf16.mxu0 %v17627_v19  ;;  %12686 = vmatprep.subr.bf16.mxu1 %v17697_v35  ;;  %v5552_v19 = vld [vmem:[%s20207_s26 + $0x38] sm:$0xff] }
 0xd71   :  { %12656 = vmatpush1.bf16.msra.mxu0 %v17629_v25  ;;  %12688 = vmatpush1.bf16.msra.mxu1 %v17700_v15  ;;  %v18044_v25 = vpack.c.bf16 %v5552_v19, %v5548_v16  ;;  %v18072_v16 = vpack.c.bf16 %v5558_v7, %v5554_v2  ;;  %v18074_v19 = vpack.c.bf16 %v5560_v11, %v5556_v21  ;;  %v5581_v7 = vld [vmem:[%s20207_s26 + $0x120] sm:$0xff] }
 0xd72   :  { %12658 = vmatprep.subr.bf16.mxu0 %v17633_v56  ;;  %12690 = vmatprep.subr.bf16.mxu1 %v17703_v33  ;;  %v5546_v33 = vld [vmem:[%s20207_s26 + $0x8] sm:$0xff]  ;;  %v18135_v21 = vpack.c.bf16 %v5582_v5, %v5578_v60 }
 0xd73   :  { %v18041_v26 = vpack.c.bf16 %v5550_v59, %v5546_v33  ;;  %20209 = vst [vmem:[#allocation136_spill] sm:$0xff] %v18044_v25  ;;  %v5557_v33 = vld [vmem:[%s20207_s26 + $0x60] sm:$0xff] }
 0xd75   :  { %12660 = vmatpush1.bf16.msra.mxu0 %v17635_v50  ;;  %12692 = vmatpush1.bf16.msra.mxu1 %v17706_v34  ;;  %20208 = vst [vmem:[#allocation135_spill] sm:$0xff] %v18041_v26 }
 0xd76   :  { %12662 = vmatprep.subr.bf16.mxu0 %v17639_v24  ;;  %12694 = vmatprep.subr.bf16.mxu1 %v17709_v14 }
 0xd79   :  { %12664 = vmatpush1.bf16.msra.mxu0 %v17641_v17  ;;  %12696 = vmatpush1.bf16.msra.mxu1 %v17712_v42 }
 0xd7a   :  { %12666 = vmatprep.subr.bf16.mxu0 %v17645_v46  ;;  %12698 = vmatprep.subr.bf16.mxu1 %v17715_v49 }
 0xd7d   :  { %12668 = vmatpush1.bf16.msra.mxu0 %v17647_v20  ;;  %12700 = vmatpush1.bf16.msra.mxu1 %v17718_v32 }
 0xd7e   :  { %12670 = vmatprep.subr.bf16.mxu0 %v17651_v58  ;;  %12702 = vmatprep.subr.bf16.mxu1 %v17721_v41 }
 0xd81   :  { %12672 = vmatpush1.bf16.msra.mxu0 %v17653_v23  ;;  %12704 = vmatpush1.bf16.msra.mxu1 %v17724_v43 }
 0xd82   :  { %12674 = vmatprep.subr.bf16.mxu0 %v17657_v57  ;;  %12706 = vmatprep.subr.bf16.mxu1 %v17727_v44  ;;  %v5348_v44 = vrot.slane %v17999_v3, 7 }
 0xd85   :  { %12676 = vmatpush1.bf16.msra.mxu0 %v17659_v22  ;;  %12708 = vmatpush1.bf16.msra.mxu1 %v17730_v30 }
 0xd86   :  { %12710 = vmatprep.subr.bf16.mxu0 %v18041_v26  ;;  %12774 = vmatprep.subr.bf16.mxu1 %v18044_v25 }
 0xe3b   :  { %v5236_v23 = vpop.f32.mrb[26].mxu0  ;;  %v5307_v56 = vpop.f32.mrb[38].mxu1 }
 0xe3c   :  { %v5316_v50 = vrot.slane %v5236_v23, 2  ;;  %v5238_v24 = vpop.f32.mrb[27].mxu0  ;;  %v5309_v17 = vpop.f32.mrb[39].mxu1  ;;  %v5318_v45 = vrot.slane %v5307_v56, 2  ;;  %v5555_v23 = vld [vmem:[%s20207_s26 + $0x50] sm:$0xff] }
 0xe3d   :  { %v5317_v22 = vrot.slane %v5238_v24, 2  ;;  %v5319_v47 = vrot.slane %v5309_v17, 2  ;;  %v5559_v56 = vld [vmem:[%s20207_s26 + $0x70] sm:$0xff]  ;;  %v5566_v24 = vld [vmem:[%s20207_s26 + $0xa8] sm:$0xff]  ;;  %v5564_v17 = vld [vmem:[%s20207_s26 + $0x98] sm:$0xff] }
 0xe3e   :  { %v5324_v46 = vadd.f32 %v5316_v50, %v17756_v4  ;;  %v5326_v13 = vadd.f32 %v5318_v45, %v17762_v29  ;;  %v5562_v50 = vld [vmem:[%s20207_s26 + $0x88] sm:$0xff]  ;;  %v5565_v45 = vld [vmem:[%s20207_s26 + $0xa0] sm:$0xff]  ;;  %v5643_v29 = vld [vmem:[%s20207_s26 + $0x310] sm:$0xff] }
 0xe3f   :  { %v5325_v20 = vadd.f32 %v5317_v22, %v17754_v40  ;;  %v5327_v35 = vadd.f32 %v5319_v47, %v17764_v48  ;;  %v5568_v22 = vld [vmem:[%s20207_s26 + $0xb8] sm:$0xff]  ;;  %v18095_v47 = vpack.c.bf16 %v5566_v24, %v5562_v50  ;;  %v5647_v40 = vld [vmem:[%s20207_s26 + $0x330] sm:$0xff] }
 0xe40   :  { %v11660_v58 = vmul.f32 -1.442695, %v5324_v46  ;;  %v11662_v15 = vmul.f32 -1.442695, %v5326_v13  ;;  %v11666_v46 = vld [vmem:[%s20197_s23 + $0x1] sm:$0x1]  ;;  %v18097_v13 = vpack.c.bf16 %v5568_v22, %v5564_v17 }
 0xe41   :  { %v11661_v57 = vmul.f32 -1.442695, %v5325_v20  ;;  %v18087_v20 = vpack.c.bf16 %v5557_v33, %v5553_v28  ;;  %v5583_v28 = vld [vmem:[%s20207_s26 + $0x130] sm:$0xff]  ;;  %v5586_v33 = vld [vmem:[%s20207_s26 + $0x148] sm:$0xff]  ;;  %v5592_v50 = vld [vmem:[%s20207_s26 + $0x178] sm:$0xff] }
 0xe42   :  { %15417 = vpow2.f32 %v11660_v58  ;;  %v18089_v58 = vpack.c.bf16 %v5559_v56, %v5555_v23  ;;  %v5590_v23 = vld [vmem:[%s20207_s26 + $0x168] sm:$0xff]  ;;  %v5588_v56 = vld [vmem:[%s20207_s26 + $0x158] sm:$0xff]  ;;  %v5585_v22 = vld [vmem:[%s20207_s26 + $0x140] sm:$0xff] }
 0xe43   :  { %15419 = vpow2.f32 %v11661_v57  ;;  %v5561_v57 = vld [vmem:[%s20207_s26 + $0x80] sm:$0xff] }
 0xe44   :  { %15421 = vtanh.f32 %v5327_v35  ;;  %v5563_v35 = vld [vmem:[%s20207_s26 + $0x90] sm:$0xff] }
 0xe45   :  { %15423 = vpow2.f32 %v11662_v15  ;;  %v5567_v15 = vld [vmem:[%s20207_s26 + $0xb0] sm:$0xff] }
 0xe4c   :  { %v15418_v34 = vpop.eup %15417 }
 0xe4d   :  { %v5337_v14 = vadd.f32 1.0, %v15418_v34  ;;  %v15420_v42 = vpop.eup %15419  ;;  %v5570_v34 = vld [vmem:[%s20207_s26 + $0xc8] sm:$0xff] }
 0xe4e   :  { %v5338_v49 = vadd.f32 1.0, %v15420_v42  ;;  %v15422_v32 = vpop.eup %15421  ;;  %v5572_v42 = vld [vmem:[%s20207_s26 + $0xd8] sm:$0xff] }
 0xe4f   :  { %15425 = vrcp.f32 %v5337_v14  ;;  %v15424_v41 = vpop.eup %15423  ;;  %v5574_v14 = vld [vmem:[%s20207_s26 + $0xe8] sm:$0xff] }
 0xe50   :  { %15427 = vrcp.f32 %v5338_v49  ;;  %v5339_v31 = vadd.f32 1.0, %v15424_v41  ;;  %v5576_v49 = vld [vmem:[%s20207_s26 + $0xf8] sm:$0xff]  ;;  %v18109_v41 = vpack.c.bf16 %v5567_v15, %v5563_v35  ;;  %v5587_v35 = vld [vmem:[%s20207_s26 + $0x150] sm:$0xff] }
 0xe51   :  { %v5591_v15 = vld [vmem:[%s20207_s26 + $0x170] sm:$0xff] }
 0xe52   :  { %15429 = vrcp.f32 %v5339_v31  ;;  %v5571_v31 = vld [vmem:[%s20207_s26 + $0xd0] sm:$0xff] }
 0xe59   :  { %v15426_v43 = vpop.eup %15425 }
 0xe5a   :  { %v5351_v30 = vmul.f32 %v15426_v43, %v15422_v32  ;;  %v15428_v18 = vpop.eup %15427  ;;  %v18107_v32 = vpack.c.bf16 %v5565_v45, %v5561_v57  ;;  %v5569_v43 = vld [vmem:[%s20207_s26 + $0xc0] sm:$0xff]  ;;  %v18155_v57 = vpack.c.bf16 %v5590_v23, %v5586_v33  ;;  %v18157_v45 = vpack.c.bf16 %v5592_v50, %v5588_v56 }
 0xe5b   :  { %v5350_v38 = vmul.f32 %v15428_v18, %v5348_v44  ;;  %v5573_v44 = vld [vmem:[%s20207_s26 + $0xe0] sm:$0xff]  ;;  %v18117_v18 = vpack.c.bf16 %v5576_v49, %v5572_v42  ;;  %v5596_v42 = vld [vmem:[%s20207_s26 + $0x198] sm:$0xff] }
 0xe5c   :  { %v15430_v1 = vpop.eup %15429  ;;  %v18127_v6 = vpack.c.bf16 %v5573_v44, %v5569_v43  ;;  %v5600_v49 = vld [vmem:[%s20207_s26 + $0x1b8] sm:$0xff]  ;;  %v18169_v44 = vpack.c.bf16 %v5591_v15, %v5587_v35  ;;  %v5601_v56 = vld [vmem:[%s20207_s26 + $0x1c0] sm:$0xff]  ;;  %v5603_v35 = vld [vmem:[%s20207_s26 + $0x1d0] sm:$0xff] }
 0xe5d   :  { %v18053_v39 = vadd.f32 %v5351_v30, %v5350_v38  ;;  %v18115_v30 = vpack.c.bf16 %v5574_v14, %v5570_v34  ;;  %v5575_v38 = vld [vmem:[%s20207_s26 + $0xf0] sm:$0xff]  ;;  %v5594_v34 = vld [vmem:[%s20207_s26 + $0x188] sm:$0xff]  ;;  %v18177_v5 = vpack.c.bf16 %v5600_v49, %v5596_v42  ;;  %v5605_v50 = vld [vmem:[%s20207_s26 + $0x1e0] sm:$0xff] }
 0xe5e   :  { %v18129_v2 = vpack.c.bf16 %v5575_v38, %v5571_v31  ;;  %v5598_v14 = vld [vmem:[%s20207_s26 + $0x1a8] sm:$0xff]  ;;  %v5593_v31 = vld [vmem:[%s20207_s26 + $0x180] sm:$0xff]  ;;  %v5607_v15 = vld [vmem:[%s20207_s26 + $0x1f0] sm:$0xff] }
 0xe5f   :  { %20210 = vst [vmem:[#allocation137_spill] sm:$0xff] %v18053_v39  ;;  %15431 = vtanh.f32 %v18053_v39  ;;  %v5597_v38 = vld [vmem:[%s20207_s26 + $0x1a0] sm:$0xff]  ;;  %v18175_v60 = vpack.c.bf16 %v5598_v14, %v5594_v34  ;;  %v5610_v34 = vld [vmem:[%s20207_s26 + $0x208] sm:$0xff]  ;;  %v5612_v42 = vld [vmem:[%s20207_s26 + $0x218] sm:$0xff] }
 0xe60   :  { %v18187_v33 = vpack.c.bf16 %v5597_v38, %v5593_v31  ;;  %v5614_v14 = vld [vmem:[%s20207_s26 + $0x228] sm:$0xff]  ;;  %v5616_v49 = vld [vmem:[%s20207_s26 + $0x238] sm:$0xff]  ;;  %v18207_v31 = vpack.c.bf16 %v5605_v50, %v5601_v56  ;;  %v18209_v38 = vpack.c.bf16 %v5607_v15, %v5603_v35 }
 0xe61   :  { %v5618_v56 = vld [vmem:[%s20207_s26 + $0x248] sm:$0xff]  ;;  %v5620_v35 = vld [vmem:[%s20207_s26 + $0x258] sm:$0xff] }
 0xe62   :  { %v5622_v50 = vld [vmem:[%s20207_s26 + $0x268] sm:$0xff]  ;;  %v5624_v15 = vld [vmem:[%s20207_s26 + $0x278] sm:$0xff] }
 0xe63   :  { %v18235_v52 = vpack.c.bf16 %v5622_v50, %v5618_v56  ;;  %v18237_v55 = vpack.c.bf16 %v5624_v15, %v5620_v35  ;;  %v5625_v35 = vld [vmem:[%s20207_s26 + $0x280] sm:$0xff] }
 0xe64   :  { %v5629_v15 = vld [vmem:[%s20207_s26 + $0x2a0] sm:$0xff] }
 0xe69   :  { %v15432_v62 = vpop.eup %15431 }
 0xe6a   :  { %v5354_v3 = vmul.f32 %v15432_v62, %v15430_v1  ;;  %v5580_v1 = vld [vmem:[%s20207_s26 + $0x118] sm:$0xff]  ;;  %v5577_v62 = vld [vmem:[%s20207_s26 + $0x100] sm:$0xff] }
 0xe6b   :  { %v18137_v11 = vpack.c.bf16 %v5584_v61, %v5580_v1  ;;  %v18147_v24 = vpack.c.bf16 %v5581_v7, %v5577_v62  ;;  %v5595_v1 = vld [vmem:[%s20207_s26 + $0x190] sm:$0xff]  ;;  %v5602_v62 = vld [vmem:[%s20207_s26 + $0x1c8] sm:$0xff] }
 0xe6c   :  { %v18070_v59 = vrot.slane %v5354_v3, 6  ;;  %v5579_v3 = vld [vmem:[%s20207_s26 + $0x110] sm:$0xff]  ;;  %v5606_v7 = vld [vmem:[%s20207_s26 + $0x1e8] sm:$0xff] }
 0xe6d   :  { %v18149_v17 = vpack.c.bf16 %v5583_v28, %v5579_v3  ;;  %v5599_v61 = vld [vmem:[%s20207_s26 + $0x1b0] sm:$0xff]  ;;  %v5604_v3 = vld [vmem:[%s20207_s26 + $0x1d8] sm:$0xff] }
 0xe6e   :  { %20211 = vst [vmem:[#allocation138_spill] sm:$0xff] %v18070_v59  ;;  %5423 = vmatmul.mubr.f32.vlgmr.msra.gmra.mrb[28].mxu0 %v18070_v59  ;;  %5494 = vmatmul.mubr.f32.vlgmr.msra.gmra.mrb[40].mxu1 %v18070_v59  ;;  %v5608_v28 = vld [vmem:[%s20207_s26 + $0x1f8] sm:$0xff]  ;;  %v18189_v23 = vpack.c.bf16 %v5599_v61, %v5595_v1  ;;  %v5609_v1 = vld [vmem:[%s20207_s26 + $0x200] sm:$0xff]  ;;  %v5619_v59 = vld [vmem:[%s20207_s26 + $0x250] sm:$0xff] }
 0xe6f   :  { %12712 = vmatpush1.bf16.msra.mxu0 %v18064_v63  ;;  %12776 = vmatpush1.bf16.msra.mxu1 %v18066_v9  ;;  %v5613_v61 = vld [vmem:[%s20207_s26 + $0x220] sm:$0xff]  ;;  %v18249_v50 = vpack.c.bf16 %v5623_v36, %v5619_v59  ;;  %v5638_v36 = vld [vmem:[%s20207_s26 + $0x2e8] sm:$0xff]  ;;  %v5636_v59 = vld [vmem:[%s20207_s26 + $0x2d8] sm:$0xff] }
 0xe70   :  { %12714 = vmatprep.subr.bf16.mxu0 %v18072_v16  ;;  %12778 = vmatprep.subr.bf16.mxu1 %v18074_v19 }
 0xe71   :  { %5763 = vmatprep.mubr.f32.mxu0 %v11666_v46  ;;  %5834 = vmatprep.mubr.f32.mxu1 %v11666_v46  ;;  %v5589_v46 = vld [vmem:[%s20207_s26 + $0x160] sm:$0xff] }
 0xe72   :  { %v18167_v43 = vpack.c.bf16 %v5589_v46, %v5585_v22  ;;  %v18195_v22 = vpack.c.bf16 %v5606_v7, %v5602_v62  ;;  %v18197_v46 = vpack.c.bf16 %v5608_v28, %v5604_v3  ;;  %v18215_v62 = vpack.c.bf16 %v5614_v14, %v5610_v34  ;;  %v5611_v3 = vld [vmem:[%s20207_s26 + $0x210] sm:$0xff] }
 0xe73   :  { %12716 = vmatpush1.bf16.msra.mxu0 %v18087_v20  ;;  %12780 = vmatpush1.bf16.msra.mxu1 %v18089_v58  ;;  %v18217_v7 = vpack.c.bf16 %v5616_v49, %v5612_v42  ;;  %v5615_v28 = vld [vmem:[%s20207_s26 + $0x230] sm:$0xff]  ;;  %v18227_v34 = vpack.c.bf16 %v5613_v61, %v5609_v1  ;;  %v5617_v42 = vld [vmem:[%s20207_s26 + $0x240] sm:$0xff]  ;;  %v5626_v1 = vld [vmem:[%s20207_s26 + $0x288] sm:$0xff] }
 0xe74   :  { %12718 = vmatprep.subr.bf16.mxu0 %v18095_v47  ;;  %12782 = vmatprep.subr.bf16.mxu1 %v18097_v13  ;;  %v18229_v14 = vpack.c.bf16 %v5615_v28, %v5611_v3  ;;  %v5621_v49 = vld [vmem:[%s20207_s26 + $0x260] sm:$0xff]  ;;  %v5630_v61 = vld [vmem:[%s20207_s26 + $0x2a8] sm:$0xff]  ;;  %v5628_v3 = vld [vmem:[%s20207_s26 + $0x298] sm:$0xff] }
 0xe75   :  { %v5632_v28 = vld [vmem:[%s20207_s26 + $0x2b8] sm:$0xff]  ;;  %v18247_v56 = vpack.c.bf16 %v5621_v49, %v5617_v42  ;;  %v18255_v10 = vpack.c.bf16 %v5630_v61, %v5626_v1  ;;  %v5634_v42 = vld [vmem:[%s20207_s26 + $0x2c8] sm:$0xff]  ;;  %v18267_v1 = vpack.c.bf16 %v5629_v15, %v5625_v35  ;;  %v18269_v61 = vpack.c.bf16 %v5631_v8, %v5627_v0 }
 0xe76   :  { %v18257_v37 = vpack.c.bf16 %v5632_v28, %v5628_v3  ;;  %v5640_v49 = vld [vmem:[%s20207_s26 + $0x2f8] sm:$0xff]  ;;  %v5633_v3 = vld [vmem:[%s20207_s26 + $0x2c0] sm:$0xff]  ;;  %v18275_v54 = vpack.c.bf16 %v5638_v36, %v5634_v42  ;;  %v5642_v35 = vld [vmem:[%s20207_s26 + $0x308] sm:$0xff]  ;;  %v18289_v36 = vpack.c.bf16 %v5639_v51, %v5635_v53 }
 0xe77   :  { %12720 = vmatpush1.bf16.msra.mxu0 %v18107_v32  ;;  %12784 = vmatpush1.bf16.msra.mxu1 %v18109_v41  ;;  %20212 = vst [vmem:[#allocation139_spill] sm:$0xff] %v18269_v61  ;;  %v5637_v28 = vld [vmem:[%s20207_s26 + $0x2e0] sm:$0xff]  ;;  %v18277_v27 = vpack.c.bf16 %v5640_v49, %v5636_v59  ;;  %v5646_v8 = vld [vmem:[%s20207_s26 + $0x328] sm:$0xff]  ;;  %v5644_v0 = vld [vmem:[%s20207_s26 + $0x318] sm:$0xff] }
 0xe78   :  { %12722 = vmatprep.subr.bf16.mxu0 %v18115_v30  ;;  %12786 = vmatprep.subr.bf16.mxu1 %v18117_v18  ;;  %20213 = vst [vmem:[#allocation140_spill] sm:$0xff] %v18275_v54  ;;  %v5648_v15 = vld [vmem:[%s20207_s26 + $0x338] sm:$0xff]  ;;  %v18287_v42 = vpack.c.bf16 %v5637_v28, %v5633_v3  ;;  %20216 = vst [vmem:[#allocation143_spill] sm:$0xff] %v18289_v36  ;;  %v5641_v59 = vld [vmem:[%s20207_s26 + $0x300] sm:$0xff]  ;;  %v18295_v39 = vpack.c.bf16 %v5646_v8, %v5642_v35 }
 0xe79   :  { %20214 = vst [vmem:[#allocation141_spill] sm:$0xff] %v18277_v27  ;;  %v5645_v49 = vld [vmem:[%s20207_s26 + $0x320] sm:$0xff]  ;;  %v18297_v48 = vpack.c.bf16 %v5648_v15, %v5644_v0  ;;  %v5650_v3 = vld [vmem:[%s20207_s26 + $0x348] sm:$0xff]  ;;  %v5652_v53 = vld [vmem:[%s20207_s26 + $0x358] sm:$0xff]  ;;  %v18309_v8 = vpack.c.bf16 %v5647_v40, %v5643_v29 }
 0xe7a   :  { %20215 = vst [vmem:[#allocation142_spill] sm:$0xff] %v18287_v42  ;;  %20217 = vst [vmem:[#allocation144_spill] sm:$0xff] %v18295_v39  ;;  %v5654_v51 = vld [vmem:[%s20207_s26 + $0x368] sm:$0xff]  ;;  %v5656_v28 = vld [vmem:[%s20207_s26 + $0x378] sm:$0xff]  ;;  %v18307_v35 = vpack.c.bf16 %v5645_v49, %v5641_v59 }
 0xe7b   :  { %12724 = vmatpush1.bf16.msra.mxu0 %v18127_v6  ;;  %12788 = vmatpush1.bf16.msra.mxu1 %v18129_v2  ;;  %20218 = vst [vmem:[#allocation145_spill] sm:$0xff] %v18297_v48  ;;  %20220 = vst [vmem:[#allocation147_spill] sm:$0xff] %v18309_v8  ;;  %v5649_v0 = vld [vmem:[%s20207_s26 + $0x340] sm:$0xff]  ;;  %v18315_v4 = vpack.c.bf16 %v5654_v51, %v5650_v3  ;;  %v5658_v59 = vld [vmem:[%s20207_s26 + $0x388] sm:$0xff] }
 0xe7c   :  { %12726 = vmatprep.subr.bf16.mxu0 %v18135_v21  ;;  %12790 = vmatprep.subr.bf16.mxu1 %v18137_v11  ;;  %20219 = vst [vmem:[#allocation146_spill] sm:$0xff] %v18307_v35  ;;  %v5653_v15 = vld [vmem:[%s20207_s26 + $0x360] sm:$0xff]  ;;  %v5662_v40 = vld [vmem:[%s20207_s26 + $0x3a8] sm:$0xff]  ;;  %v5660_v29 = vld [vmem:[%s20207_s26 + $0x398] sm:$0xff] }
 0xe7d   :  { %20221 = vst [vmem:[#allocation148_spill] sm:$0xff] %v18315_v4  ;;  %v5664_v49 = vld [vmem:[%s20207_s26 + $0x3b8] sm:$0xff]  ;;  %v18327_v3 = vpack.c.bf16 %v5653_v15, %v5649_v0  ;;  %v5666_v0 = vld [vmem:[%s20207_s26 + $0x3c8] sm:$0xff] }
 0xe7e   :  { %v5670_v15 = vld [vmem:[%s20207_s26 + $0x3e8] sm:$0xff] }
 0xe7f   :  { %12728 = vmatpush1.bf16.msra.mxu0 %v18147_v24  ;;  %12792 = vmatpush1.bf16.msra.mxu1 %v18149_v17  ;;  %20223 = vst [vmem:[#allocation150_spill] sm:$0xff] %v18327_v3 }
 0xe80   :  { %12730 = vmatprep.subr.bf16.mxu0 %v18155_v57  ;;  %12794 = vmatprep.subr.bf16.mxu1 %v18157_v45 }
 0xe83   :  { %12732 = vmatpush1.bf16.msra.mxu0 %v18167_v43  ;;  %12796 = vmatpush1.bf16.msra.mxu1 %v18169_v44 }
 0xe84   :  { %12734 = vmatprep.subr.bf16.mxu0 %v18175_v60  ;;  %12798 = vmatprep.subr.bf16.mxu1 %v18177_v5 }
 0xe87   :  { %12736 = vmatpush1.bf16.msra.mxu0 %v18187_v33  ;;  %12800 = vmatpush1.bf16.msra.mxu1 %v18189_v23 }
 0xe88   :  { %12738 = vmatprep.subr.bf16.mxu0 %v18195_v22  ;;  %12802 = vmatprep.subr.bf16.mxu1 %v18197_v46 }
 0xe8b   :  { %12740 = vmatpush1.bf16.msra.mxu0 %v18207_v31  ;;  %12804 = vmatpush1.bf16.msra.mxu1 %v18209_v38 }
 0xe8c   :  { %12742 = vmatprep.subr.bf16.mxu0 %v18215_v62  ;;  %12806 = vmatprep.subr.bf16.mxu1 %v18217_v7 }
 0xe8f   :  { %12744 = vmatpush1.bf16.msra.mxu0 %v18227_v34  ;;  %12808 = vmatpush1.bf16.msra.mxu1 %v18229_v14 }
 0xe90   :  { %12746 = vmatprep.subr.bf16.mxu0 %v18235_v52  ;;  %12810 = vmatprep.subr.bf16.mxu1 %v18237_v55 }
 0xe93   :  { %12748 = vmatpush1.bf16.msra.mxu0 %v18247_v56  ;;  %12812 = vmatpush1.bf16.msra.mxu1 %v18249_v50 }
 0xe94   :  { %12750 = vmatprep.subr.bf16.mxu0 %v18255_v10  ;;  %12814 = vmatprep.subr.bf16.mxu1 %v18257_v37 }
 0xe97   :  { %12752 = vmatpush1.bf16.msra.mxu0 %v18267_v1  ;;  %12816 = vmatpush1.bf16.msra.mxu1 %v18269_v61  ;;  %v5671_v61 = vld [vmem:[%s20207_s26 + $0x3f0] sm:$0xff] }
 0xe98   :  { %12754 = vmatprep.subr.bf16.mxu0 %v18275_v54  ;;  %12818 = vmatprep.subr.bf16.mxu1 %v18277_v27  ;;  %v18317_v27 = vpack.c.bf16 %v5656_v28, %v5652_v53  ;;  %v5651_v54 = vld [vmem:[%s20207_s26 + $0x350] sm:$0xff]  ;;  %v5657_v53 = vld [vmem:[%s20207_s26 + $0x380] sm:$0xff] }
 0xe99   :  { %v5661_v28 = vld [vmem:[%s20207_s26 + $0x3a0] sm:$0xff] }
 0xe9a   :  { %20222 = vst [vmem:[#allocation149_spill] sm:$0xff] %v18317_v27 }
 0xe9b   :  { %12756 = vmatpush1.bf16.msra.mxu0 %v18287_v42  ;;  %12820 = vmatpush1.bf16.msra.mxu1 %v18289_v36  ;;  %v5655_v42 = vld [vmem:[%s20207_s26 + $0x370] sm:$0xff] }
 0xe9c   :  { %12758 = vmatprep.subr.bf16.mxu0 %v18295_v39  ;;  %12822 = vmatprep.subr.bf16.mxu1 %v18297_v48  ;;  %v18329_v51 = vpack.c.bf16 %v5655_v42, %v5651_v54  ;;  %v18335_v48 = vpack.c.bf16 %v5662_v40, %v5658_v59  ;;  %v18337_v39 = vpack.c.bf16 %v5664_v49, %v5660_v29  ;;  %v5659_v36 = vld [vmem:[%s20207_s26 + $0x390] sm:$0xff]  ;;  %v5668_v54 = vld [vmem:[%s20207_s26 + $0x3d8] sm:$0xff]  ;;  %v5665_v59 = vld [vmem:[%s20207_s26 + $0x3c0] sm:$0xff] }
 0xe9d   :  { %v5672_v42 = vld [vmem:[%s20207_s26 + $0x3f8] sm:$0xff]  ;;  %v18354_v40 = vpack.c.bf16 %v5670_v15, %v5666_v0  ;;  %v5669_v49 = vld [vmem:[%s20207_s26 + $0x3e0] sm:$0xff] }
 0xe9e   :  { %20224 = vst [vmem:[#allocation151_spill] sm:$0xff] %v18329_v51  ;;  %20225 = vst [vmem:[#allocation152_spill] sm:$0xff] %v18335_v48  ;;  %v18356_v29 = vpack.c.bf16 %v5672_v42, %v5668_v54  ;;  %v20238_v0 = vld [vmem:[#allocation144_spill] sm:$0xff]  ;;  %v20239_v15 = vld [vmem:[#allocation145_spill] sm:$0xff] }
 0xe9f   :  { %12760 = vmatpush1.bf16.msra.mxu0 %v18307_v35  ;;  %12824 = vmatpush1.bf16.msra.mxu1 %v18309_v8  ;;  %20226 = vst [vmem:[#allocation153_spill] sm:$0xff] %v18337_v39  ;;  %v5663_v35 = vld [vmem:[%s20207_s26 + $0x3b0] sm:$0xff]  ;;  %20229 = vst [vmem:[#allocation156_spill] sm:$0xff] %v18354_v40  ;;  %v20240_v54 = vld [vmem:[#allocation146_spill] sm:$0xff] }
 0xea0   :  { %12762 = vmatprep.subr.bf16.mxu0 %v18315_v4  ;;  %12826 = vmatprep.subr.bf16.mxu1 %v18317_v27  ;;  %v18347_v4 = vpack.c.bf16 %v5661_v28, %v5657_v53  ;;  %v18349_v27 = vpack.c.bf16 %v5663_v35, %v5659_v36  ;;  %20230 = vst [vmem:[#allocation157_spill] sm:$0xff] %v18356_v29  ;;  %v5667_v8 = vld [vmem:[%s20207_s26 + $0x3d0] sm:$0xff]  ;;  %v20235_v35 = vld [vmem:[#allocation141_spill] sm:$0xff] }
 0xea1   :  { %v18363_v53 = vpack.c.bf16 %v5669_v49, %v5665_v59  ;;  %v18365_v36 = vpack.c.bf16 %v5671_v61, %v5667_v8  ;;  %v20234_v61 = vld [vmem:[#allocation140_spill] sm:$0xff]  ;;  %v20236_v8 = vld [vmem:[#allocation142_spill] sm:$0xff]  ;;  %v20237_v28 = vld [vmem:[#allocation143_spill] sm:$0xff] }
 0xea2   :  { %20227 = vst [vmem:[#allocation154_spill] sm:$0xff] %v18347_v4  ;;  %20228 = vst [vmem:[#allocation155_spill] sm:$0xff] %v18349_v27  ;;  %v20241_v42 = vld [vmem:[#allocation147_spill] sm:$0xff]  ;;  %v20242_v59 = vld [vmem:[#allocation148_spill] sm:$0xff] }
 0xea3   :  { %12764 = vmatpush1.bf16.msra.mxu0 %v18327_v3  ;;  %12828 = vmatpush1.bf16.msra.mxu1 %v18329_v51  ;;  %20231 = vst [vmem:[#allocation158_spill] sm:$0xff] %v18363_v53  ;;  %20232 = vst [vmem:[#allocation159_spill] sm:$0xff] %v18365_v36  ;;  %v20243_v49 = vld [vmem:[#allocation149_spill] sm:$0xff] }
 0xea4   :  { %12766 = vmatprep.subr.bf16.mxu0 %v18335_v48  ;;  %12830 = vmatprep.subr.bf16.mxu1 %v18337_v39 }
 0xea7   :  { %12768 = vmatpush1.bf16.msra.mxu0 %v18347_v4  ;;  %12832 = vmatpush1.bf16.msra.mxu1 %v18349_v27 }
 0xea8   :  { %12770 = vmatprep.subr.bf16.mxu0 %v18354_v40  ;;  %12834 = vmatprep.subr.bf16.mxu1 %v18356_v29 }
 0xeab   :  { %12772 = vmatpush1.bf16.msra.mxu0 %v18363_v53  ;;  %12836 = vmatpush1.bf16.msra.mxu1 %v18365_v36 }
 0xeac   :  { %12838 = vmatprep.subr.bf16.mxu0 %v18041_v26  ;;  %12902 = vmatprep.subr.bf16.mxu1 %v18044_v25 }
 0xeae   :  { %5764 = vmatmul.mubr.f32.vlgmr.msra.gmra.mrb[30].mxu0 %v17772_v12  ;;  %5835 = vmatmul.mubr.f32.vlgmr.msra.gmra.mrb[42].mxu1 %v17772_v12  ;;  %v20233_v12 = vld [vmem:[#allocation139_spill] sm:$0xff] }
 0xeaf   :  { %12840 = vmatpush1.bf16.msra.mxu0 %v18064_v63  ;;  %12904 = vmatpush1.bf16.msra.mxu1 %v18066_v9 }
 0xeb0   :  { %12842 = vmatprep.subr.bf16.mxu0 %v18072_v16  ;;  %12906 = vmatprep.subr.bf16.mxu1 %v18074_v19 }
 0xeb3   :  { %12844 = vmatpush1.bf16.msra.mxu0 %v18087_v20  ;;  %12908 = vmatpush1.bf16.msra.mxu1 %v18089_v58 }
 0xeb4   :  { %12846 = vmatprep.subr.bf16.mxu0 %v18095_v47  ;;  %12910 = vmatprep.subr.bf16.mxu1 %v18097_v13 }
 0xeb7   :  { %12848 = vmatpush1.bf16.msra.mxu0 %v18107_v32  ;;  %12912 = vmatpush1.bf16.msra.mxu1 %v18109_v41 }
 0xeb8   :  { %12850 = vmatprep.subr.bf16.mxu0 %v18115_v30  ;;  %12914 = vmatprep.subr.bf16.mxu1 %v18117_v18 }
 0xebb   :  { %12852 = vmatpush1.bf16.msra.mxu0 %v18127_v6  ;;  %12916 = vmatpush1.bf16.msra.mxu1 %v18129_v2 }
 0xebc   :  { %12854 = vmatprep.subr.bf16.mxu0 %v18135_v21  ;;  %12918 = vmatprep.subr.bf16.mxu1 %v18137_v11 }
 0xebf   :  { %12856 = vmatpush1.bf16.msra.mxu0 %v18147_v24  ;;  %12920 = vmatpush1.bf16.msra.mxu1 %v18149_v17 }
 0xec0   :  { %12858 = vmatprep.subr.bf16.mxu0 %v18155_v57  ;;  %12922 = vmatprep.subr.bf16.mxu1 %v18157_v45 }
 0xec3   :  { %12860 = vmatpush1.bf16.msra.mxu0 %v18167_v43  ;;  %12924 = vmatpush1.bf16.msra.mxu1 %v18169_v44 }
 0xec4   :  { %12862 = vmatprep.subr.bf16.mxu0 %v18175_v60  ;;  %12926 = vmatprep.subr.bf16.mxu1 %v18177_v5 }
 0xec7   :  { %12864 = vmatpush1.bf16.msra.mxu0 %v18187_v33  ;;  %12928 = vmatpush1.bf16.msra.mxu1 %v18189_v23 }
 0xec8   :  { %12866 = vmatprep.subr.bf16.mxu0 %v18195_v22  ;;  %12930 = vmatprep.subr.bf16.mxu1 %v18197_v46 }
 0xecb   :  { %12868 = vmatpush1.bf16.msra.mxu0 %v18207_v31  ;;  %12932 = vmatpush1.bf16.msra.mxu1 %v18209_v38 }
 0xecc   :  { %12870 = vmatprep.subr.bf16.mxu0 %v18215_v62  ;;  %12934 = vmatprep.subr.bf16.mxu1 %v18217_v7 }
 0xecf   :  { %12872 = vmatpush1.bf16.msra.mxu0 %v18227_v34  ;;  %12936 = vmatpush1.bf16.msra.mxu1 %v18229_v14 }
 0xed0   :  { %12874 = vmatprep.subr.bf16.mxu0 %v18235_v52  ;;  %12938 = vmatprep.subr.bf16.mxu1 %v18237_v55 }
 0xed3   :  { %12876 = vmatpush1.bf16.msra.mxu0 %v18247_v56  ;;  %12940 = vmatpush1.bf16.msra.mxu1 %v18249_v50 }
 0xed4   :  { %12878 = vmatprep.subr.bf16.mxu0 %v18255_v10  ;;  %12942 = vmatprep.subr.bf16.mxu1 %v18257_v37 }
 0xed7   :  { %12880 = vmatpush1.bf16.msra.mxu0 %v18267_v1  ;;  %12944 = vmatpush1.bf16.msra.mxu1 %v20233_v12 }
 0xed8   :  { %12882 = vmatprep.subr.bf16.mxu0 %v20234_v61  ;;  %12946 = vmatprep.subr.bf16.mxu1 %v20235_v35 }
 0xedb   :  { %12884 = vmatpush1.bf16.msra.mxu0 %v20236_v8  ;;  %12948 = vmatpush1.bf16.msra.mxu1 %v20237_v28 }
 0xedc   :  { %12886 = vmatprep.subr.bf16.mxu0 %v20238_v0  ;;  %12950 = vmatprep.subr.bf16.mxu1 %v20239_v15  ;;  %v20246_v15 = vld [vmem:[#allocation128_spill] sm:$0xff]  ;;  %v20247_v0 = vld [vmem:[#allocation129_spill] sm:$0xff] }
 0xedf   :  { %12888 = vmatpush1.bf16.msra.mxu0 %v20240_v54  ;;  %12952 = vmatpush1.bf16.msra.mxu1 %v20241_v42  ;;  %v20245_v42 = vld [vmem:[#allocation126_spill] sm:$0xff] }
 0xee0   :  { %12890 = vmatprep.subr.bf16.mxu0 %v20242_v59  ;;  %12954 = vmatprep.subr.bf16.mxu1 %v20243_v49  ;;  %v20244_v59 = vld [vmem:[#allocation127_spill] sm:$0xff] }
 0xee3   :  { %12892 = vmatpush1.bf16.msra.mxu0 %v18327_v3  ;;  %12956 = vmatpush1.bf16.msra.mxu1 %v18329_v51 }
 0xee4   :  { %12894 = vmatprep.subr.bf16.mxu0 %v18335_v48  ;;  %12958 = vmatprep.subr.bf16.mxu1 %v18337_v39 }
 0xee7   :  { %12896 = vmatpush1.bf16.msra.mxu0 %v18347_v4  ;;  %12960 = vmatpush1.bf16.msra.mxu1 %v18349_v27 }
 0xee8   :  { %12898 = vmatprep.subr.bf16.mxu0 %v18354_v40  ;;  %12962 = vmatprep.subr.bf16.mxu1 %v18356_v29 }
 0xeeb   :  { %12900 = vmatpush1.bf16.msra.mxu0 %v18363_v53  ;;  %12964 = vmatpush1.bf16.msra.mxu1 %v18365_v36 }
 0xeec   :  { %12966 = vmatprep.subr.bf16.mxu0 %v18041_v26  ;;  %13030 = vmatprep.subr.bf16.mxu1 %v18044_v25 }
 0xf41   :  { %v5424_v51 = vpop.f32.mrb[28].mxu0  ;;  %v5495_v48 = vpop.f32.mrb[40].mxu1 }
 0xf42   :  { %v5504_v3 = vrot.slane %v5424_v51, 1  ;;  %v5426_v39 = vpop.f32.mrb[29].mxu0  ;;  %v5497_v49 = vpop.f32.mrb[41].mxu1  ;;  %v5506_v53 = vrot.slane %v5495_v48, 1 }
 0xf43   :  { %v5505_v4 = vrot.slane %v5426_v39, 1  ;;  %v5507_v36 = vrot.slane %v5497_v49, 1 }
 0xf44   :  { %v5512_v27 = vadd.f32 %v5504_v3, %v20244_v59  ;;  %v5514_v26 = vadd.f32 %v5506_v53, %v20246_v15 }
 0xf45   :  { %v5513_v40 = vadd.f32 %v5505_v4, %v20245_v42  ;;  %v5515_v25 = vadd.f32 %v5507_v36, %v20247_v0  ;;  %v20252_v0 = vld [vmem:[#allocation123_spill] sm:$0xff] }
 0xf46   :  { %v11663_v54 = vmul.f32 -1.442695, %v5512_v27  ;;  %v11665_v28 = vmul.f32 -1.442695, %v5514_v26 }
 0xf47   :  { %v11664_v29 = vmul.f32 -1.442695, %v5513_v40  ;;  %v20248_v40 = vld [vmem:[#allocation137_spill] sm:$0xff] }
 0xf48   :  { %15433 = vpow2.f32 %v11663_v54  ;;  %v5536_v48 = vrot.slane %v20248_v40, 7 }
 0xf49   :  { %15435 = vpow2.f32 %v11664_v29 }
 0xf4a   :  { %15437 = vtanh.f32 %v5515_v25 }
 0xf4b   :  { %15439 = vpow2.f32 %v11665_v28 }
 0xf52   :  { %v15434_v8 = vpop.eup %15433 }
 0xf53   :  { %v5525_v51 = vadd.f32 1.0, %v15434_v8  ;;  %v15436_v35 = vpop.eup %15435  ;;  %v20250_v8 = vld [vmem:[#allocation122_spill] sm:$0xff] }
 0xf54   :  { %v5526_v39 = vadd.f32 1.0, %v15436_v35  ;;  %v15438_v4 = vpop.eup %15437  ;;  %v5673_v35 = vld [vmem:[#allocation20] sm:$0xf] }
 0xf55   :  { %15441 = vrcp.f32 %v5525_v51  ;;  %v15440_v27 = vpop.eup %15439  ;;  %v18448_v28 = vrot.slane %v5673_v35, %v20250_v8  ;;  %v18451_v59 = vrot.slane %v5673_v35, %v20252_v0 }
 0xf56   :  { %15443 = vrcp.f32 %v5526_v39  ;;  %v5527_v42 = vadd.f32 1.0, %v15440_v27 }
 0xf57   :  { %20251 = vst [vmem:[#allocation140_spill] sm:$0xff] %v18448_v28  ;;  %20253 = vst [vmem:[#allocation127_spill] sm:$0xff] %v18451_v59 }
 0xf58   :  { %15445 = vrcp.f32 %v5527_v42  ;;  %v20256_v42 = vld [vmem:[#allocation124_spill] sm:$0xff] }
 0xf5f   :  { %v15442_v3 = vpop.eup %15441 }
 0xf60   :  { %v5539_v29 = vmul.f32 %v15442_v3, %v15438_v4  ;;  %v15444_v54 = vpop.eup %15443 }
 0xf61   :  { %v5538_v53 = vmul.f32 %v15444_v54, %v5536_v48 }
 0xf62   :  { %v15446_v26 = vpop.eup %15445 }
 0xf63   :  { %v5540_v15 = vadd.f32 %v5539_v29, %v5538_v53  ;;  %v20254_v29 = vld [vmem:[#allocation125_spill] sm:$0xff]  ;;  %v18459_v53 = vrot.slane %v5673_v35, %v20256_v42 }
 0xf64   :  { %v18456_v54 = vrot.slane %v5673_v35, %v20254_v29  ;;  %v11667_v29 = vld [vmem:[%s16738_s27 + $0x1] sm:$0x1] }
 0xf65   :  { %15447 = vtanh.f32 %v5540_v15  ;;  %5544 = vst [vmem:[#allocation34 - $0x7] sm:$0x80] %v5540_v15  ;;  %20257 = vst [vmem:[#allocation128_spill] sm:$0xff] %v18459_v53 }
 0xf66   :  { %20255 = vst [vmem:[#allocation126_spill] sm:$0xff] %v18456_v54 }
 0xf6f   :  { %v15448_v25 = vpop.eup %15447 }
 0xf70   :  { %v18444_v36 = vmul.f32 %v15448_v25, %v15446_v26 }
 0xf72   :  { %20249 = vst [vmem:[#allocation139_spill] sm:$0xff] %v18444_v36  ;;  %5543 = vst [vmem:[#allocation32 - $0x7] sm:$0x80] %v18444_v36 }
 0xf81   :  { %v5765_v49 = vpop.f32.mrb[30].mxu0  ;;  %v5836_v51 = vpop.f32.mrb[42].mxu1 }
 0xf82   :  { %v5766_v39 = vadd.f32 %v5765_v49, %v18448_v28  ;;  %v5767_v4 = vpop.f32.mrb[31].mxu0  ;;  %v5838_v27 = vpop.f32.mrb[43].mxu1  ;;  %v5837_v15 = vadd.f32 %v5836_v51, %v18456_v54 }
 0xf83   :  { %v5768_v3 = vadd.f32 %v5767_v4, %v18451_v59  ;;  %v5839_v26 = vadd.f32 %v5838_v27, %v18459_v53 }
 0xf84   :  { %v11668_v40 = vmul.f32 -1.442695, %v5766_v39  ;;  %v11670_v25 = vmul.f32 -1.442695, %v5837_v15 }
 0xf85   :  { %v11669_v48 = vmul.f32 -1.442695, %v5768_v3 }
 0xf86   :  { %15449 = vpow2.f32 %v11668_v40 }
 0xf87   :  { %15451 = vpow2.f32 %v11669_v48 }
 0xf88   :  { %15453 = vtanh.f32 %v5839_v26 }
 0xf89   :  { %15455 = vpow2.f32 %v11670_v25 }
 0xf90   :  { %v15450_v49 = vpop.eup %15449 }
 0xf91   :  { %v5850_v0 = vadd.f32 1.0, %v15450_v49  ;;  %v15452_v4 = vpop.eup %15451  ;;  %v20259_v49 = vld [vmem:[#allocation130_spill] sm:$0xff] }
 0xf92   :  { %v5851_v39 = vadd.f32 1.0, %v15452_v4  ;;  %v15454_v3 = vpop.eup %15453  ;;  %v20264_v4 = vld [vmem:[#allocation145_spill] sm:$0xff] }
 0xf93   :  { %15457 = vrcp.f32 %v5850_v0  ;;  %v15456_v40 = vpop.eup %15455 }
 0xf94   :  { %15459 = vrcp.f32 %v5851_v39  ;;  %v5852_v42 = vadd.f32 1.0, %v15456_v40  ;;  %v20265_v39 = vld [vmem:[#allocation146_spill] sm:$0xff]  ;;  %v20267_v40 = vld [vmem:[#allocation148_spill] sm:$0xff] }
 0xf96   :  { %15461 = vrcp.f32 %v5852_v42  ;;  %v20263_v42 = vld [vmem:[#allocation144_spill] sm:$0xff] }
 0xf9d   :  { %v15458_v48 = vpop.eup %15457 }
 0xf9e   :  { %v5861_v8 = vmul.f32 %v15458_v48, %v15454_v3  ;;  %v15460_v35 = vpop.eup %15459  ;;  %v20266_v3 = vld [vmem:[#allocation147_spill] sm:$0xff]  ;;  %v20268_v48 = vld [vmem:[#allocation149_spill] sm:$0xff] }
 0xf9f   :  { %v5860_v36 = vmul.f32 %v15460_v35, %v11667_v29  ;;  %v20262_v29 = vld [vmem:[#allocation143_spill] sm:$0xff]  ;;  %v20269_v35 = vld [vmem:[#allocation150_spill] sm:$0xff] }
 0xfa0   :  { %v15462_v27 = vpop.eup %15461 }
 0xfa1   :  { %v18464_v51 = vadd.f32 %v5861_v8, %v5860_v36  ;;  %v20260_v36 = vld [vmem:[#allocation141_spill] sm:$0xff]  ;;  %v20261_v8 = vld [vmem:[#allocation142_spill] sm:$0xff] }
 0xfa3   :  { %15463 = vtanh.f32 %v18464_v51 }
 0xfad   :  { %v15464_v15 = vpop.eup %15463 }
 0xfae   :  { %v18467_v26 = vmul.f32 %v15464_v15, %v15462_v27  ;;  %v20270_v27 = vld [vmem:[#allocation151_spill] sm:$0xff]  ;;  %v20271_v15 = vld [vmem:[#allocation152_spill] sm:$0xff] }
 0xfb0   :  { %20258 = vst [vmem:[#allocation129_spill] sm:$0xff] %v18467_v26  ;;  %v5866_v0 = vrot.slane %v18467_v26, 7  ;;  %v20275_v26 = vld [vmem:[#allocation156_spill] sm:$0xff] }
 0xfb2   :  { %v5867_v25 = vrot.slane %v5866_v0, 1  ;;  %v20272_v0 = vld [vmem:[#allocation153_spill] sm:$0xff] }
 0xfb4   :  { %5933 = vmatprep.mubr.f32.mxu0 %v5867_v25  ;;  %6004 = vmatprep.mubr.f32.mxu1 %v5867_v25  ;;  %v20273_v25 = vld [vmem:[#allocation154_spill] sm:$0xff] }
 0xfb5   :  { %5934 = vmatmul.mubr.f32.vlgmr.msra.gmra.mrb[32].mxu0 %v20259_v49  ;;  %6005 = vmatmul.mubr.f32.vlgmr.msra.gmra.mrb[44].mxu1 %v20259_v49  ;;  %v20274_v49 = vld [vmem:[#allocation155_spill] sm:$0xff] }
 0xfb6   :  { %12968 = vmatpush1.bf16.msra.mxu0 %v18064_v63  ;;  %13032 = vmatpush1.bf16.msra.mxu1 %v18066_v9 }
 0xfb7   :  { %12970 = vmatprep.subr.bf16.mxu0 %v18072_v16  ;;  %13034 = vmatprep.subr.bf16.mxu1 %v18074_v19 }
 0xfba   :  { %12972 = vmatpush1.bf16.msra.mxu0 %v18087_v20  ;;  %13036 = vmatpush1.bf16.msra.mxu1 %v18089_v58 }
 0xfbb   :  { %12974 = vmatprep.subr.bf16.mxu0 %v18095_v47  ;;  %13038 = vmatprep.subr.bf16.mxu1 %v18097_v13 }
 0xfbe   :  { %12976 = vmatpush1.bf16.msra.mxu0 %v18107_v32  ;;  %13040 = vmatpush1.bf16.msra.mxu1 %v18109_v41 }
 0xfbf   :  { %12978 = vmatprep.subr.bf16.mxu0 %v18115_v30  ;;  %13042 = vmatprep.subr.bf16.mxu1 %v18117_v18 }
 0xfc2   :  { %12980 = vmatpush1.bf16.msra.mxu0 %v18127_v6  ;;  %13044 = vmatpush1.bf16.msra.mxu1 %v18129_v2 }
 0xfc3   :  { %12982 = vmatprep.subr.bf16.mxu0 %v18135_v21  ;;  %13046 = vmatprep.subr.bf16.mxu1 %v18137_v11 }
 0xfc6   :  { %12984 = vmatpush1.bf16.msra.mxu0 %v18147_v24  ;;  %13048 = vmatpush1.bf16.msra.mxu1 %v18149_v17 }
 0xfc7   :  { %12986 = vmatprep.subr.bf16.mxu0 %v18155_v57  ;;  %13050 = vmatprep.subr.bf16.mxu1 %v18157_v45 }
 0xfca   :  { %12988 = vmatpush1.bf16.msra.mxu0 %v18167_v43  ;;  %13052 = vmatpush1.bf16.msra.mxu1 %v18169_v44 }
 0xfcb   :  { %12990 = vmatprep.subr.bf16.mxu0 %v18175_v60  ;;  %13054 = vmatprep.subr.bf16.mxu1 %v18177_v5 }
 0xfce   :  { %12992 = vmatpush1.bf16.msra.mxu0 %v18187_v33  ;;  %13056 = vmatpush1.bf16.msra.mxu1 %v18189_v23 }
 0xfcf   :  { %12994 = vmatprep.subr.bf16.mxu0 %v18195_v22  ;;  %13058 = vmatprep.subr.bf16.mxu1 %v18197_v46 }
 0xfd2   :  { %12996 = vmatpush1.bf16.msra.mxu0 %v18207_v31  ;;  %13060 = vmatpush1.bf16.msra.mxu1 %v18209_v38 }
 0xfd3   :  { %12998 = vmatprep.subr.bf16.mxu0 %v18215_v62  ;;  %13062 = vmatprep.subr.bf16.mxu1 %v18217_v7 }
 0xfd6   :  { %13000 = vmatpush1.bf16.msra.mxu0 %v18227_v34  ;;  %13064 = vmatpush1.bf16.msra.mxu1 %v18229_v14 }
 0xfd7   :  { %13002 = vmatprep.subr.bf16.mxu0 %v18235_v52  ;;  %13066 = vmatprep.subr.bf16.mxu1 %v18237_v55 }
 0xfda   :  { %13004 = vmatpush1.bf16.msra.mxu0 %v18247_v56  ;;  %13068 = vmatpush1.bf16.msra.mxu1 %v18249_v50 }
 0xfdb   :  { %13006 = vmatprep.subr.bf16.mxu0 %v18255_v10  ;;  %13070 = vmatprep.subr.bf16.mxu1 %v18257_v37 }
 0xfde   :  { %13008 = vmatpush1.bf16.msra.mxu0 %v18267_v1  ;;  %13072 = vmatpush1.bf16.msra.mxu1 %v20233_v12 }
 0xfdf   :  { %13010 = vmatprep.subr.bf16.mxu0 %v20234_v61  ;;  %13074 = vmatprep.subr.bf16.mxu1 %v20260_v36 }
 0xfe2   :  { %13012 = vmatpush1.bf16.msra.mxu0 %v20261_v8  ;;  %13076 = vmatpush1.bf16.msra.mxu1 %v20262_v29 }
 0xfe3   :  { %13014 = vmatprep.subr.bf16.mxu0 %v20263_v42  ;;  %13078 = vmatprep.subr.bf16.mxu1 %v20264_v4 }
 0xfe6   :  { %13016 = vmatpush1.bf16.msra.mxu0 %v20265_v39  ;;  %13080 = vmatpush1.bf16.msra.mxu1 %v20266_v3  ;;  %v20276_v39 = vld [vmem:[#allocation157_spill] sm:$0xff]  ;;  %v20277_v3 = vld [vmem:[#allocation158_spill] sm:$0xff] }
 0xfe7   :  { %13018 = vmatprep.subr.bf16.mxu0 %v20267_v40  ;;  %13082 = vmatprep.subr.bf16.mxu1 %v20268_v48  ;;  %v20278_v40 = vld [vmem:[#allocation159_spill] sm:$0xff] }
 0xfe8   :  { %v20279_v48 = vld [vmem:[#allocation135_spill] sm:$0xff] }
 0xfea   :  { %13020 = vmatpush1.bf16.msra.mxu0 %v20269_v35  ;;  %13084 = vmatpush1.bf16.msra.mxu1 %v20270_v27  ;;  %v20280_v35 = vld [vmem:[#allocation136_spill] sm:$0xff] }
 0xfeb   :  { %13022 = vmatprep.subr.bf16.mxu0 %v20271_v15  ;;  %13086 = vmatprep.subr.bf16.mxu1 %v20272_v0 }
 0xfee   :  { %13024 = vmatpush1.bf16.msra.mxu0 %v20273_v25  ;;  %13088 = vmatpush1.bf16.msra.mxu1 %v20274_v49 }
 0xfef   :  { %13026 = vmatprep.subr.bf16.mxu0 %v20275_v26  ;;  %13090 = vmatprep.subr.bf16.mxu1 %v20276_v39 }
 0xff2   :  { %13028 = vmatpush1.bf16.msra.mxu0 %v20277_v3  ;;  %13092 = vmatpush1.bf16.msra.mxu1 %v20278_v40 }
 0xff3   :  { %13094 = vmatprep.subr.bf16.mxu0 %v20279_v48  ;;  %13158 = vmatprep.subr.bf16.mxu1 %v20280_v35 }
0x1088   :  { %v5935_v27 = vpop.f32.mrb[32].mxu0  ;;  %v6006_v15 = vpop.f32.mrb[44].mxu1 }
0x1089   :  { %v5936_v0 = vadd.f32 %v5935_v27, %v18448_v28  ;;  %v5937_v4 = vpop.f32.mrb[33].mxu0  ;;  %v6008_v25 = vpop.f32.mrb[45].mxu1  ;;  %v6007_v3 = vadd.f32 %v6006_v15, %v18456_v54 }
0x108a   :  { %v5938_v49 = vadd.f32 %v5937_v4, %v18451_v59  ;;  %v6009_v40 = vadd.f32 %v6008_v25, %v18459_v53  ;;  %v20286_v25 = vld [vmem:[#allocation145_spill] sm:$0xff] }
0x108b   :  { %v11671_v42 = vmul.f32 -1.442695, %v5936_v0  ;;  %v11673_v39 = vmul.f32 -1.442695, %v6007_v3 }
0x108c   :  { %v11672_v26 = vmul.f32 -1.442695, %v5938_v49 }
0x108d   :  { %15465 = vpow2.f32 %v11671_v42 }
0x108e   :  { %15467 = vpow2.f32 %v11672_v26 }
0x108f   :  { %15469 = vtanh.f32 %v6009_v40 }
0x1090   :  { %15471 = vpow2.f32 %v11673_v39 }
0x1097   :  { %v15466_v48 = vpop.eup %15465 }
0x1098   :  { %v6020_v29 = vadd.f32 1.0, %v15466_v48  ;;  %v15468_v35 = vpop.eup %15467 }
0x1099   :  { %v6021_v27 = vadd.f32 1.0, %v15468_v35  ;;  %v15470_v28 = vpop.eup %15469  ;;  %v20282_v35 = vld [vmem:[#allocation131_spill] sm:$0xff] }
0x109a   :  { %15473 = vrcp.f32 %v6020_v29  ;;  %v15472_v8 = vpop.eup %15471 }
0x109b   :  { %15475 = vrcp.f32 %v6021_v27  ;;  %v6022_v42 = vadd.f32 1.0, %v15472_v8  ;;  %v20285_v8 = vld [vmem:[#allocation144_spill] sm:$0xff]  ;;  %v20287_v27 = vld [vmem:[#allocation146_spill] sm:$0xff] }
0x109d   :  { %15477 = vrcp.f32 %v6022_v42  ;;  %v20291_v42 = vld [vmem:[#allocation150_spill] sm:$0xff] }
0x10a4   :  { %v15474_v4 = vpop.eup %15473 }
0x10a5   :  { %v6031_v0 = vmul.f32 %v15474_v4, %v15470_v28  ;;  %v15476_v49 = vpop.eup %15475  ;;  %v20283_v28 = vld [vmem:[#allocation142_spill] sm:$0xff]  ;;  %v20288_v4 = vld [vmem:[#allocation147_spill] sm:$0xff] }
0x10a6   :  { %v6030_v26 = vmul.f32 %v15476_v49, %v18464_v51  ;;  %v20284_v51 = vld [vmem:[#allocation143_spill] sm:$0xff]  ;;  %v20290_v49 = vld [vmem:[#allocation149_spill] sm:$0xff] }
0x10a7   :  { %v15478_v3 = vpop.eup %15477 }
0x10a8   :  { %v18541_v15 = vadd.f32 %v6031_v0, %v6030_v26  ;;  %v20289_v0 = vld [vmem:[#allocation148_spill] sm:$0xff]  ;;  %v20292_v26 = vld [vmem:[#allocation151_spill] sm:$0xff] }
0x10aa   :  { %15479 = vtanh.f32 %v18541_v15 }
0x10b4   :  { %v15480_v40 = vpop.eup %15479 }
0x10b5   :  { %v18544_v48 = vmul.f32 %v15480_v40, %v15478_v3  ;;  %v20293_v3 = vld [vmem:[#allocation152_spill] sm:$0xff]  ;;  %v20294_v40 = vld [vmem:[#allocation153_spill] sm:$0xff] }
0x10b7   :  { %20281 = vst [vmem:[#allocation137_spill] sm:$0xff] %v18544_v48  ;;  %v6036_v29 = vrot.slane %v18544_v48, 6  ;;  %v20298_v48 = vld [vmem:[#allocation157_spill] sm:$0xff] }
0x10b9   :  { %v6037_v39 = vrot.slane %v6036_v29, 2  ;;  %v20295_v29 = vld [vmem:[#allocation154_spill] sm:$0xff] }
0x10bb   :  { %6103 = vmatprep.mubr.f32.mxu0 %v6037_v39  ;;  %6174 = vmatprep.mubr.f32.mxu1 %v6037_v39  ;;  %v20296_v39 = vld [vmem:[#allocation155_spill] sm:$0xff] }
0x10bc   :  { %6104 = vmatmul.mubr.f32.vlgmr.msra.gmra.mrb[34].mxu0 %v20282_v35  ;;  %6175 = vmatmul.mubr.f32.vlgmr.msra.gmra.mrb[46].mxu1 %v20282_v35  ;;  %v20297_v35 = vld [vmem:[#allocation156_spill] sm:$0xff] }
0x10bd   :  { %13096 = vmatpush1.bf16.msra.mxu0 %v18064_v63  ;;  %13160 = vmatpush1.bf16.msra.mxu1 %v18066_v9 }
0x10be   :  { %13098 = vmatprep.subr.bf16.mxu0 %v18072_v16  ;;  %13162 = vmatprep.subr.bf16.mxu1 %v18074_v19 }
0x10c1   :  { %13100 = vmatpush1.bf16.msra.mxu0 %v18087_v20  ;;  %13164 = vmatpush1.bf16.msra.mxu1 %v18089_v58 }
0x10c2   :  { %13102 = vmatprep.subr.bf16.mxu0 %v18095_v47  ;;  %13166 = vmatprep.subr.bf16.mxu1 %v18097_v13 }
0x10c5   :  { %13104 = vmatpush1.bf16.msra.mxu0 %v18107_v32  ;;  %13168 = vmatpush1.bf16.msra.mxu1 %v18109_v41 }
0x10c6   :  { %13106 = vmatprep.subr.bf16.mxu0 %v18115_v30  ;;  %13170 = vmatprep.subr.bf16.mxu1 %v18117_v18 }
0x10c9   :  { %13108 = vmatpush1.bf16.msra.mxu0 %v18127_v6  ;;  %13172 = vmatpush1.bf16.msra.mxu1 %v18129_v2 }
0x10ca   :  { %13110 = vmatprep.subr.bf16.mxu0 %v18135_v21  ;;  %13174 = vmatprep.subr.bf16.mxu1 %v18137_v11 }
0x10cd   :  { %13112 = vmatpush1.bf16.msra.mxu0 %v18147_v24  ;;  %13176 = vmatpush1.bf16.msra.mxu1 %v18149_v17 }
0x10ce   :  { %13114 = vmatprep.subr.bf16.mxu0 %v18155_v57  ;;  %13178 = vmatprep.subr.bf16.mxu1 %v18157_v45 }
0x10d1   :  { %13116 = vmatpush1.bf16.msra.mxu0 %v18167_v43  ;;  %13180 = vmatpush1.bf16.msra.mxu1 %v18169_v44 }
0x10d2   :  { %13118 = vmatprep.subr.bf16.mxu0 %v18175_v60  ;;  %13182 = vmatprep.subr.bf16.mxu1 %v18177_v5 }
0x10d5   :  { %13120 = vmatpush1.bf16.msra.mxu0 %v18187_v33  ;;  %13184 = vmatpush1.bf16.msra.mxu1 %v18189_v23 }
0x10d6   :  { %13122 = vmatprep.subr.bf16.mxu0 %v18195_v22  ;;  %13186 = vmatprep.subr.bf16.mxu1 %v18197_v46 }
0x10d9   :  { %13124 = vmatpush1.bf16.msra.mxu0 %v18207_v31  ;;  %13188 = vmatpush1.bf16.msra.mxu1 %v18209_v38 }
0x10da   :  { %13126 = vmatprep.subr.bf16.mxu0 %v18215_v62  ;;  %13190 = vmatprep.subr.bf16.mxu1 %v18217_v7 }
0x10dd   :  { %13128 = vmatpush1.bf16.msra.mxu0 %v18227_v34  ;;  %13192 = vmatpush1.bf16.msra.mxu1 %v18229_v14 }
0x10de   :  { %13130 = vmatprep.subr.bf16.mxu0 %v18235_v52  ;;  %13194 = vmatprep.subr.bf16.mxu1 %v18237_v55 }
0x10e1   :  { %13132 = vmatpush1.bf16.msra.mxu0 %v18247_v56  ;;  %13196 = vmatpush1.bf16.msra.mxu1 %v18249_v50 }
0x10e2   :  { %13134 = vmatprep.subr.bf16.mxu0 %v18255_v10  ;;  %13198 = vmatprep.subr.bf16.mxu1 %v18257_v37 }
0x10e5   :  { %13136 = vmatpush1.bf16.msra.mxu0 %v18267_v1  ;;  %13200 = vmatpush1.bf16.msra.mxu1 %v20233_v12 }
0x10e6   :  { %13138 = vmatprep.subr.bf16.mxu0 %v20234_v61  ;;  %13202 = vmatprep.subr.bf16.mxu1 %v20260_v36 }
0x10e9   :  { %13140 = vmatpush1.bf16.msra.mxu0 %v20283_v28  ;;  %13204 = vmatpush1.bf16.msra.mxu1 %v20284_v51 }
0x10ea   :  { %13142 = vmatprep.subr.bf16.mxu0 %v20285_v8  ;;  %13206 = vmatprep.subr.bf16.mxu1 %v20286_v25 }
0x10ed   :  { %13144 = vmatpush1.bf16.msra.mxu0 %v20287_v27  ;;  %13208 = vmatpush1.bf16.msra.mxu1 %v20288_v4  ;;  %v20299_v4 = vld [vmem:[#allocation158_spill] sm:$0xff]  ;;  %v20303_v27 = vld [vmem:[#allocation140_spill] sm:$0xff] }
0x10ee   :  { %13146 = vmatprep.subr.bf16.mxu0 %v20289_v0  ;;  %13210 = vmatprep.subr.bf16.mxu1 %v20290_v49  ;;  %v20300_v0 = vld [vmem:[#allocation159_spill] sm:$0xff] }
0x10ef   :  { %v20301_v49 = vld [vmem:[#allocation135_spill] sm:$0xff] }
0x10f1   :  { %13148 = vmatpush1.bf16.msra.mxu0 %v20291_v42  ;;  %13212 = vmatpush1.bf16.msra.mxu1 %v20292_v26  ;;  %v20302_v42 = vld [vmem:[#allocation136_spill] sm:$0xff] }
0x10f2   :  { %13150 = vmatprep.subr.bf16.mxu0 %v20293_v3  ;;  %13214 = vmatprep.subr.bf16.mxu1 %v20294_v40 }
0x10f5   :  { %13152 = vmatpush1.bf16.msra.mxu0 %v20295_v29  ;;  %13216 = vmatpush1.bf16.msra.mxu1 %v20296_v39 }
0x10f6   :  { %13154 = vmatprep.subr.bf16.mxu0 %v20297_v35  ;;  %13218 = vmatprep.subr.bf16.mxu1 %v20298_v48 }
0x10f9   :  { %13156 = vmatpush1.bf16.msra.mxu0 %v20299_v4  ;;  %13220 = vmatpush1.bf16.msra.mxu1 %v20300_v0 }
0x10fa   :  { %13222 = vmatprep.subr.bf16.mxu0 %v20301_v49  ;;  %13286 = vmatprep.subr.bf16.mxu1 %v20302_v42 }
0x118f   :  { %v6105_v26 = vpop.f32.mrb[34].mxu0  ;;  %v6176_v3 = vpop.f32.mrb[46].mxu1 }
0x1190   :  { %v6106_v40 = vadd.f32 %v6105_v26, %v20303_v27  ;;  %v6107_v25 = vpop.f32.mrb[35].mxu0  ;;  %v6178_v29 = vpop.f32.mrb[47].mxu1  ;;  %v6177_v4 = vadd.f32 %v6176_v3, %v18456_v54 }
0x1191   :  { %v6108_v39 = vadd.f32 %v6107_v25, %v18451_v59  ;;  %v6179_v0 = vadd.f32 %v6178_v29, %v18459_v53  ;;  %v20309_v29 = vld [vmem:[#allocation145_spill] sm:$0xff] }
0x1192   :  { %v11674_v8 = vmul.f32 -1.442695, %v6106_v40  ;;  %v11676_v48 = vmul.f32 -1.442695, %v6177_v4 }
0x1193   :  { %v11675_v35 = vmul.f32 -1.442695, %v6108_v39 }
0x1194   :  { %15481 = vpow2.f32 %v11674_v8 }
0x1195   :  { %15483 = vpow2.f32 %v11675_v35 }
0x1196   :  { %15485 = vtanh.f32 %v6179_v0 }
0x1197   :  { %15487 = vpow2.f32 %v11676_v48 }
0x119e   :  { %v15482_v49 = vpop.eup %15481 }
0x119f   :  { %v6190_v51 = vadd.f32 1.0, %v15482_v49  ;;  %v15484_v42 = vpop.eup %15483 }
0x11a0   :  { %v6191_v26 = vadd.f32 1.0, %v15484_v42  ;;  %v15486_v27 = vpop.eup %15485  ;;  %v20305_v42 = vld [vmem:[#allocation132_spill] sm:$0xff] }
0x11a1   :  { %15489 = vrcp.f32 %v6190_v51  ;;  %v15488_v28 = vpop.eup %15487 }
0x11a2   :  { %15491 = vrcp.f32 %v6191_v26  ;;  %v6192_v8 = vadd.f32 1.0, %v15488_v28  ;;  %v20307_v28 = vld [vmem:[#allocation143_spill] sm:$0xff]  ;;  %v20310_v26 = vld [vmem:[#allocation146_spill] sm:$0xff] }
0x11a4   :  { %15493 = vrcp.f32 %v6192_v8  ;;  %v20314_v8 = vld [vmem:[#allocation150_spill] sm:$0xff] }
0x11ab   :  { %v15490_v25 = vpop.eup %15489 }
0x11ac   :  { %v6201_v40 = vmul.f32 %v15490_v25, %v15486_v27  ;;  %v15492_v39 = vpop.eup %15491  ;;  %v20308_v27 = vld [vmem:[#allocation144_spill] sm:$0xff]  ;;  %v20311_v25 = vld [vmem:[#allocation147_spill] sm:$0xff] }
0x11ad   :  { %v6200_v35 = vmul.f32 %v15492_v39, %v18541_v15  ;;  %v20306_v15 = vld [vmem:[#allocation142_spill] sm:$0xff]  ;;  %v20313_v39 = vld [vmem:[#allocation149_spill] sm:$0xff] }
0x11ae   :  { %v15494_v4 = vpop.eup %15493 }
0x11af   :  { %v18618_v3 = vadd.f32 %v6201_v40, %v6200_v35  ;;  %v20312_v40 = vld [vmem:[#allocation148_spill] sm:$0xff]  ;;  %v20315_v35 = vld [vmem:[#allocation151_spill] sm:$0xff] }
0x11b1   :  { %15495 = vtanh.f32 %v18618_v3 }
0x11bb   :  { %v15496_v0 = vpop.eup %15495 }
0x11bc   :  { %v18621_v49 = vmul.f32 %v15496_v0, %v15494_v4  ;;  %v20316_v4 = vld [vmem:[#allocation152_spill] sm:$0xff]  ;;  %v20317_v0 = vld [vmem:[#allocation153_spill] sm:$0xff] }
0x11be   :  { %20304 = vst [vmem:[#allocation130_spill] sm:$0xff] %v18621_v49  ;;  %v6206_v48 = vrot.slane %v18621_v49, 5  ;;  %v20321_v49 = vld [vmem:[#allocation157_spill] sm:$0xff] }
0x11c0   :  { %v6207_v51 = vrot.slane %v6206_v48, 3  ;;  %v20318_v48 = vld [vmem:[#allocation154_spill] sm:$0xff] }
0x11c2   :  { %6273 = vmatprep.mubr.f32.mxu0 %v6207_v51  ;;  %6344 = vmatprep.mubr.f32.mxu1 %v6207_v51  ;;  %v20319_v51 = vld [vmem:[#allocation155_spill] sm:$0xff] }
0x11c3   :  { %6274 = vmatmul.mubr.f32.vlgmr.msra.gmra.mrb[36].mxu0 %v20305_v42  ;;  %6345 = vmatmul.mubr.f32.vlgmr.msra.gmra.mrb[48].mxu1 %v20305_v42  ;;  %v20320_v42 = vld [vmem:[#allocation156_spill] sm:$0xff] }
0x11c4   :  { %13224 = vmatpush1.bf16.msra.mxu0 %v18064_v63  ;;  %13288 = vmatpush1.bf16.msra.mxu1 %v18066_v9 }
0x11c5   :  { %13226 = vmatprep.subr.bf16.mxu0 %v18072_v16  ;;  %13290 = vmatprep.subr.bf16.mxu1 %v18074_v19 }
0x11c8   :  { %13228 = vmatpush1.bf16.msra.mxu0 %v18087_v20  ;;  %13292 = vmatpush1.bf16.msra.mxu1 %v18089_v58 }
0x11c9   :  { %13230 = vmatprep.subr.bf16.mxu0 %v18095_v47  ;;  %13294 = vmatprep.subr.bf16.mxu1 %v18097_v13 }
0x11cc   :  { %13232 = vmatpush1.bf16.msra.mxu0 %v18107_v32  ;;  %13296 = vmatpush1.bf16.msra.mxu1 %v18109_v41 }
0x11cd   :  { %13234 = vmatprep.subr.bf16.mxu0 %v18115_v30  ;;  %13298 = vmatprep.subr.bf16.mxu1 %v18117_v18 }
0x11d0   :  { %13236 = vmatpush1.bf16.msra.mxu0 %v18127_v6  ;;  %13300 = vmatpush1.bf16.msra.mxu1 %v18129_v2 }
0x11d1   :  { %13238 = vmatprep.subr.bf16.mxu0 %v18135_v21  ;;  %13302 = vmatprep.subr.bf16.mxu1 %v18137_v11 }
0x11d4   :  { %13240 = vmatpush1.bf16.msra.mxu0 %v18147_v24  ;;  %13304 = vmatpush1.bf16.msra.mxu1 %v18149_v17 }
0x11d5   :  { %13242 = vmatprep.subr.bf16.mxu0 %v18155_v57  ;;  %13306 = vmatprep.subr.bf16.mxu1 %v18157_v45 }
0x11d8   :  { %13244 = vmatpush1.bf16.msra.mxu0 %v18167_v43  ;;  %13308 = vmatpush1.bf16.msra.mxu1 %v18169_v44 }
0x11d9   :  { %13246 = vmatprep.subr.bf16.mxu0 %v18175_v60  ;;  %13310 = vmatprep.subr.bf16.mxu1 %v18177_v5 }
0x11dc   :  { %13248 = vmatpush1.bf16.msra.mxu0 %v18187_v33  ;;  %13312 = vmatpush1.bf16.msra.mxu1 %v18189_v23 }
0x11dd   :  { %13250 = vmatprep.subr.bf16.mxu0 %v18195_v22  ;;  %13314 = vmatprep.subr.bf16.mxu1 %v18197_v46 }
0x11e0   :  { %13252 = vmatpush1.bf16.msra.mxu0 %v18207_v31  ;;  %13316 = vmatpush1.bf16.msra.mxu1 %v18209_v38 }
0x11e1   :  { %13254 = vmatprep.subr.bf16.mxu0 %v18215_v62  ;;  %13318 = vmatprep.subr.bf16.mxu1 %v18217_v7 }
0x11e4   :  { %13256 = vmatpush1.bf16.msra.mxu0 %v18227_v34  ;;  %13320 = vmatpush1.bf16.msra.mxu1 %v18229_v14 }
0x11e5   :  { %13258 = vmatprep.subr.bf16.mxu0 %v18235_v52  ;;  %13322 = vmatprep.subr.bf16.mxu1 %v18237_v55 }
0x11e8   :  { %13260 = vmatpush1.bf16.msra.mxu0 %v18247_v56  ;;  %13324 = vmatpush1.bf16.msra.mxu1 %v18249_v50 }
0x11e9   :  { %13262 = vmatprep.subr.bf16.mxu0 %v18255_v10  ;;  %13326 = vmatprep.subr.bf16.mxu1 %v18257_v37 }
0x11ec   :  { %13264 = vmatpush1.bf16.msra.mxu0 %v18267_v1  ;;  %13328 = vmatpush1.bf16.msra.mxu1 %v20233_v12 }
0x11ed   :  { %13266 = vmatprep.subr.bf16.mxu0 %v20234_v61  ;;  %13330 = vmatprep.subr.bf16.mxu1 %v20260_v36 }
0x11f0   :  { %13268 = vmatpush1.bf16.msra.mxu0 %v20306_v15  ;;  %13332 = vmatpush1.bf16.msra.mxu1 %v20307_v28 }
0x11f1   :  { %13270 = vmatprep.subr.bf16.mxu0 %v20308_v27  ;;  %13334 = vmatprep.subr.bf16.mxu1 %v20309_v29 }
0x11f4   :  { %13272 = vmatpush1.bf16.msra.mxu0 %v20310_v26  ;;  %13336 = vmatpush1.bf16.msra.mxu1 %v20311_v25  ;;  %v20322_v25 = vld [vmem:[#allocation158_spill] sm:$0xff]  ;;  %v20326_v26 = vld [vmem:[#allocation140_spill] sm:$0xff] }
0x11f5   :  { %13274 = vmatprep.subr.bf16.mxu0 %v20312_v40  ;;  %13338 = vmatprep.subr.bf16.mxu1 %v20313_v39  ;;  %v20323_v40 = vld [vmem:[#allocation159_spill] sm:$0xff] }
0x11f6   :  { %v20324_v39 = vld [vmem:[#allocation135_spill] sm:$0xff] }
0x11f8   :  { %13276 = vmatpush1.bf16.msra.mxu0 %v20314_v8  ;;  %13340 = vmatpush1.bf16.msra.mxu1 %v20315_v35  ;;  %v20325_v8 = vld [vmem:[#allocation136_spill] sm:$0xff] }
0x11f9   :  { %13278 = vmatprep.subr.bf16.mxu0 %v20316_v4  ;;  %13342 = vmatprep.subr.bf16.mxu1 %v20317_v0 }
0x11fc   :  { %13280 = vmatpush1.bf16.msra.mxu0 %v20318_v48  ;;  %13344 = vmatpush1.bf16.msra.mxu1 %v20319_v51 }
0x11fd   :  { %13282 = vmatprep.subr.bf16.mxu0 %v20320_v42  ;;  %13346 = vmatprep.subr.bf16.mxu1 %v20321_v49 }
0x1200   :  { %13284 = vmatpush1.bf16.msra.mxu0 %v20322_v25  ;;  %13348 = vmatpush1.bf16.msra.mxu1 %v20323_v40 }
0x1201   :  { %13350 = vmatprep.subr.bf16.mxu0 %v20324_v39  ;;  %13414 = vmatprep.subr.bf16.mxu1 %v20325_v8 }
0x1296   :  { %v6275_v35 = vpop.f32.mrb[36].mxu0  ;;  %v6346_v4 = vpop.f32.mrb[48].mxu1 }
0x1297   :  { %v6276_v0 = vadd.f32 %v6275_v35, %v20326_v26  ;;  %v6277_v29 = vpop.f32.mrb[37].mxu0  ;;  %v6348_v48 = vpop.f32.mrb[49].mxu1  ;;  %v6347_v25 = vadd.f32 %v6346_v4, %v18456_v54 }
0x1298   :  { %v6278_v51 = vadd.f32 %v6277_v29, %v18451_v59  ;;  %v6349_v40 = vadd.f32 %v6348_v48, %v18459_v53  ;;  %v20332_v48 = vld [vmem:[#allocation145_spill] sm:$0xff] }
0x1299   :  { %v11677_v27 = vmul.f32 -1.442695, %v6276_v0  ;;  %v11679_v49 = vmul.f32 -1.442695, %v6347_v25 }
0x129a   :  { %v11678_v42 = vmul.f32 -1.442695, %v6278_v51 }
0x129b   :  { %15497 = vpow2.f32 %v11677_v27 }
0x129c   :  { %15499 = vpow2.f32 %v11678_v42 }
0x129d   :  { %15501 = vtanh.f32 %v6349_v40 }
0x129e   :  { %15503 = vpow2.f32 %v11679_v49 }
0x12a5   :  { %v15498_v39 = vpop.eup %15497 }
0x12a6   :  { %v6360_v28 = vadd.f32 1.0, %v15498_v39  ;;  %v15500_v8 = vpop.eup %15499 }
0x12a7   :  { %v6361_v35 = vadd.f32 1.0, %v15500_v8  ;;  %v15502_v26 = vpop.eup %15501  ;;  %v20328_v8 = vld [vmem:[#allocation133_spill] sm:$0xff] }
0x12a8   :  { %15505 = vrcp.f32 %v6360_v28  ;;  %v15504_v15 = vpop.eup %15503 }
0x12a9   :  { %15507 = vrcp.f32 %v6361_v35  ;;  %v6362_v27 = vadd.f32 1.0, %v15504_v15  ;;  %v20330_v15 = vld [vmem:[#allocation143_spill] sm:$0xff]  ;;  %v20333_v35 = vld [vmem:[#allocation146_spill] sm:$0xff] }
0x12ab   :  { %15509 = vrcp.f32 %v6362_v27  ;;  %v20337_v27 = vld [vmem:[#allocation150_spill] sm:$0xff] }
0x12b2   :  { %v15506_v29 = vpop.eup %15505 }
0x12b3   :  { %v6371_v0 = vmul.f32 %v15506_v29, %v15502_v26  ;;  %v15508_v51 = vpop.eup %15507  ;;  %v20331_v26 = vld [vmem:[#allocation144_spill] sm:$0xff]  ;;  %v20334_v29 = vld [vmem:[#allocation147_spill] sm:$0xff] }
0x12b4   :  { %v6370_v42 = vmul.f32 %v15508_v51, %v18618_v3  ;;  %v20329_v3 = vld [vmem:[#allocation142_spill] sm:$0xff]  ;;  %v20336_v51 = vld [vmem:[#allocation149_spill] sm:$0xff] }
0x12b5   :  { %v15510_v25 = vpop.eup %15509 }
0x12b6   :  { %v18695_v4 = vadd.f32 %v6371_v0, %v6370_v42  ;;  %v20335_v0 = vld [vmem:[#allocation148_spill] sm:$0xff]  ;;  %v20338_v42 = vld [vmem:[#allocation151_spill] sm:$0xff] }
0x12b8   :  { %15511 = vtanh.f32 %v18695_v4 }
0x12c2   :  { %v15512_v40 = vpop.eup %15511 }
0x12c3   :  { %v18698_v39 = vmul.f32 %v15512_v40, %v15510_v25  ;;  %v20339_v25 = vld [vmem:[#allocation152_spill] sm:$0xff]  ;;  %v20340_v40 = vld [vmem:[#allocation153_spill] sm:$0xff] }
0x12c5   :  { %20327 = vst [vmem:[#allocation141_spill] sm:$0xff] %v18698_v39  ;;  %v6376_v49 = vrot.slane %v18698_v39, 4  ;;  %v20344_v39 = vld [vmem:[#allocation157_spill] sm:$0xff] }
0x12c7   :  { %v6377_v28 = vrot.slane %v6376_v49, 4  ;;  %v20341_v49 = vld [vmem:[#allocation154_spill] sm:$0xff] }
0x12c9   :  { %6443 = vmatprep.mubr.f32.mxu0 %v6377_v28  ;;  %6514 = vmatprep.mubr.f32.mxu1 %v6377_v28  ;;  %v20342_v28 = vld [vmem:[#allocation155_spill] sm:$0xff] }
0x12ca   :  { %6444 = vmatmul.mubr.f32.vlgmr.msra.gmra.mrb[38].mxu0 %v20328_v8  ;;  %6515 = vmatmul.mubr.f32.vlgmr.msra.gmra.mrb[50].mxu1 %v20328_v8  ;;  %v20343_v8 = vld [vmem:[#allocation156_spill] sm:$0xff] }
0x12cb   :  { %13352 = vmatpush1.bf16.msra.mxu0 %v18064_v63  ;;  %13416 = vmatpush1.bf16.msra.mxu1 %v18066_v9 }
0x12cc   :  { %13354 = vmatprep.subr.bf16.mxu0 %v18072_v16  ;;  %13418 = vmatprep.subr.bf16.mxu1 %v18074_v19 }
0x12cf   :  { %13356 = vmatpush1.bf16.msra.mxu0 %v18087_v20  ;;  %13420 = vmatpush1.bf16.msra.mxu1 %v18089_v58 }
0x12d0   :  { %13358 = vmatprep.subr.bf16.mxu0 %v18095_v47  ;;  %13422 = vmatprep.subr.bf16.mxu1 %v18097_v13 }
0x12d3   :  { %13360 = vmatpush1.bf16.msra.mxu0 %v18107_v32  ;;  %13424 = vmatpush1.bf16.msra.mxu1 %v18109_v41 }
0x12d4   :  { %13362 = vmatprep.subr.bf16.mxu0 %v18115_v30  ;;  %13426 = vmatprep.subr.bf16.mxu1 %v18117_v18 }
0x12d7   :  { %13364 = vmatpush1.bf16.msra.mxu0 %v18127_v6  ;;  %13428 = vmatpush1.bf16.msra.mxu1 %v18129_v2 }
0x12d8   :  { %13366 = vmatprep.subr.bf16.mxu0 %v18135_v21  ;;  %13430 = vmatprep.subr.bf16.mxu1 %v18137_v11 }
0x12db   :  { %13368 = vmatpush1.bf16.msra.mxu0 %v18147_v24  ;;  %13432 = vmatpush1.bf16.msra.mxu1 %v18149_v17 }
0x12dc   :  { %13370 = vmatprep.subr.bf16.mxu0 %v18155_v57  ;;  %13434 = vmatprep.subr.bf16.mxu1 %v18157_v45 }
0x12df   :  { %13372 = vmatpush1.bf16.msra.mxu0 %v18167_v43  ;;  %13436 = vmatpush1.bf16.msra.mxu1 %v18169_v44 }
0x12e0   :  { %13374 = vmatprep.subr.bf16.mxu0 %v18175_v60  ;;  %13438 = vmatprep.subr.bf16.mxu1 %v18177_v5 }
0x12e3   :  { %13376 = vmatpush1.bf16.msra.mxu0 %v18187_v33  ;;  %13440 = vmatpush1.bf16.msra.mxu1 %v18189_v23 }
0x12e4   :  { %13378 = vmatprep.subr.bf16.mxu0 %v18195_v22  ;;  %13442 = vmatprep.subr.bf16.mxu1 %v18197_v46 }
0x12e7   :  { %13380 = vmatpush1.bf16.msra.mxu0 %v18207_v31  ;;  %13444 = vmatpush1.bf16.msra.mxu1 %v18209_v38 }
0x12e8   :  { %13382 = vmatprep.subr.bf16.mxu0 %v18215_v62  ;;  %13446 = vmatprep.subr.bf16.mxu1 %v18217_v7 }
0x12eb   :  { %13384 = vmatpush1.bf16.msra.mxu0 %v18227_v34  ;;  %13448 = vmatpush1.bf16.msra.mxu1 %v18229_v14 }
0x12ec   :  { %13386 = vmatprep.subr.bf16.mxu0 %v18235_v52  ;;  %13450 = vmatprep.subr.bf16.mxu1 %v18237_v55 }
0x12ef   :  { %13388 = vmatpush1.bf16.msra.mxu0 %v18247_v56  ;;  %13452 = vmatpush1.bf16.msra.mxu1 %v18249_v50 }
0x12f0   :  { %13390 = vmatprep.subr.bf16.mxu0 %v18255_v10  ;;  %13454 = vmatprep.subr.bf16.mxu1 %v18257_v37 }
0x12f3   :  { %13392 = vmatpush1.bf16.msra.mxu0 %v18267_v1  ;;  %13456 = vmatpush1.bf16.msra.mxu1 %v20233_v12 }
0x12f4   :  { %13394 = vmatprep.subr.bf16.mxu0 %v20234_v61  ;;  %13458 = vmatprep.subr.bf16.mxu1 %v20260_v36 }
0x12f7   :  { %13396 = vmatpush1.bf16.msra.mxu0 %v20329_v3  ;;  %13460 = vmatpush1.bf16.msra.mxu1 %v20330_v15 }
0x12f8   :  { %13398 = vmatprep.subr.bf16.mxu0 %v20331_v26  ;;  %13462 = vmatprep.subr.bf16.mxu1 %v20332_v48 }
0x12fb   :  { %13400 = vmatpush1.bf16.msra.mxu0 %v20333_v35  ;;  %13464 = vmatpush1.bf16.msra.mxu1 %v20334_v29  ;;  %v20345_v29 = vld [vmem:[#allocation158_spill] sm:$0xff]  ;;  %v20349_v35 = vld [vmem:[#allocation140_spill] sm:$0xff] }
0x12fc   :  { %13402 = vmatprep.subr.bf16.mxu0 %v20335_v0  ;;  %13466 = vmatprep.subr.bf16.mxu1 %v20336_v51  ;;  %v20346_v0 = vld [vmem:[#allocation159_spill] sm:$0xff] }
0x12fd   :  { %v20347_v51 = vld [vmem:[#allocation135_spill] sm:$0xff] }
0x12ff   :  { %13404 = vmatpush1.bf16.msra.mxu0 %v20337_v27  ;;  %13468 = vmatpush1.bf16.msra.mxu1 %v20338_v42  ;;  %v20348_v27 = vld [vmem:[#allocation136_spill] sm:$0xff] }
0x1300   :  { %13406 = vmatprep.subr.bf16.mxu0 %v20339_v25  ;;  %13470 = vmatprep.subr.bf16.mxu1 %v20340_v40 }
0x1303   :  { %13408 = vmatpush1.bf16.msra.mxu0 %v20341_v49  ;;  %13472 = vmatpush1.bf16.msra.mxu1 %v20342_v28 }
0x1304   :  { %13410 = vmatprep.subr.bf16.mxu0 %v20343_v8  ;;  %13474 = vmatprep.subr.bf16.mxu1 %v20344_v39 }
0x1307   :  { %13412 = vmatpush1.bf16.msra.mxu0 %v20345_v29  ;;  %13476 = vmatpush1.bf16.msra.mxu1 %v20346_v0 }
0x1308   :  { %13478 = vmatprep.subr.bf16.mxu0 %v20347_v51  ;;  %13542 = vmatprep.subr.bf16.mxu1 %v20348_v27 }
0x139d   :  { %v6445_v42 = vpop.f32.mrb[38].mxu0  ;;  %v6516_v25 = vpop.f32.mrb[50].mxu1 }
0x139e   :  { %v6446_v40 = vadd.f32 %v6445_v42, %v20349_v35  ;;  %v6447_v48 = vpop.f32.mrb[39].mxu0  ;;  %v6518_v49 = vpop.f32.mrb[51].mxu1  ;;  %v6517_v29 = vadd.f32 %v6516_v25, %v18456_v54 }
0x139f   :  { %v6448_v28 = vadd.f32 %v6447_v48, %v18451_v59  ;;  %v6519_v0 = vadd.f32 %v6518_v49, %v18459_v53  ;;  %v20355_v49 = vld [vmem:[#allocation145_spill] sm:$0xff] }
0x13a0   :  { %v11680_v26 = vmul.f32 -1.442695, %v6446_v40  ;;  %v11682_v39 = vmul.f32 -1.442695, %v6517_v29 }
0x13a1   :  { %v11681_v8 = vmul.f32 -1.442695, %v6448_v28 }
0x13a2   :  { %15513 = vpow2.f32 %v11680_v26 }
0x13a3   :  { %15515 = vpow2.f32 %v11681_v8 }
0x13a4   :  { %15517 = vtanh.f32 %v6519_v0 }
0x13a5   :  { %15519 = vpow2.f32 %v11682_v39 }
0x13ac   :  { %v15514_v51 = vpop.eup %15513 }
0x13ad   :  { %v6530_v15 = vadd.f32 1.0, %v15514_v51  ;;  %v15516_v27 = vpop.eup %15515 }
0x13ae   :  { %v6531_v42 = vadd.f32 1.0, %v15516_v27  ;;  %v15518_v35 = vpop.eup %15517  ;;  %v20351_v27 = vld [vmem:[#allocation134_spill] sm:$0xff] }
0x13af   :  { %15521 = vrcp.f32 %v6530_v15  ;;  %v15520_v3 = vpop.eup %15519 }
0x13b0   :  { %15523 = vrcp.f32 %v6531_v42  ;;  %v6532_v26 = vadd.f32 1.0, %v15520_v3  ;;  %v20353_v3 = vld [vmem:[#allocation143_spill] sm:$0xff]  ;;  %v20356_v42 = vld [vmem:[#allocation146_spill] sm:$0xff] }
0x13b2   :  { %15525 = vrcp.f32 %v6532_v26  ;;  %v20360_v26 = vld [vmem:[#allocation150_spill] sm:$0xff] }
0x13b9   :  { %v15522_v48 = vpop.eup %15521 }
0x13ba   :  { %v6541_v40 = vmul.f32 %v15522_v48, %v15518_v35  ;;  %v15524_v28 = vpop.eup %15523  ;;  %v20354_v35 = vld [vmem:[#allocation144_spill] sm:$0xff]  ;;  %v20357_v48 = vld [vmem:[#allocation147_spill] sm:$0xff] }
0x13bb   :  { %v6540_v8 = vmul.f32 %v15524_v28, %v18695_v4  ;;  %v20352_v4 = vld [vmem:[#allocation142_spill] sm:$0xff]  ;;  %v20359_v28 = vld [vmem:[#allocation149_spill] sm:$0xff] }
0x13bc   :  { %v15526_v29 = vpop.eup %15525 }
0x13bd   :  { %v18772_v25 = vadd.f32 %v6541_v40, %v6540_v8  ;;  %v20358_v40 = vld [vmem:[#allocation148_spill] sm:$0xff]  ;;  %v20361_v8 = vld [vmem:[#allocation151_spill] sm:$0xff] }
0x13bf   :  { %15527 = vtanh.f32 %v18772_v25 }
0x13c9   :  { %v15528_v0 = vpop.eup %15527 }
0x13ca   :  { %v18775_v51 = vmul.f32 %v15528_v0, %v15526_v29  ;;  %v20362_v29 = vld [vmem:[#allocation152_spill] sm:$0xff]  ;;  %v20363_v0 = vld [vmem:[#allocation153_spill] sm:$0xff] }
0x13cc   :  { %20350 = vst [vmem:[#allocation131_spill] sm:$0xff] %v18775_v51  ;;  %v6546_v39 = vrot.slane %v18775_v51, 3  ;;  %v20367_v51 = vld [vmem:[#allocation157_spill] sm:$0xff] }
0x13ce   :  { %v6547_v15 = vrot.slane %v6546_v39, 5  ;;  %v20364_v39 = vld [vmem:[#allocation154_spill] sm:$0xff] }
0x13d0   :  { %6613 = vmatprep.mubr.f32.mxu0 %v6547_v15  ;;  %6684 = vmatprep.mubr.f32.mxu1 %v6547_v15  ;;  %v20365_v15 = vld [vmem:[#allocation155_spill] sm:$0xff] }
0x13d1   :  { %6614 = vmatmul.mubr.f32.vlgmr.msra.gmra.mrb[40].mxu0 %v20351_v27  ;;  %6685 = vmatmul.mubr.f32.vlgmr.msra.gmra.mrb[52].mxu1 %v20351_v27  ;;  %v20366_v27 = vld [vmem:[#allocation156_spill] sm:$0xff] }
0x13d2   :  { %13480 = vmatpush1.bf16.msra.mxu0 %v18064_v63  ;;  %13544 = vmatpush1.bf16.msra.mxu1 %v18066_v9 }
0x13d3   :  { %13482 = vmatprep.subr.bf16.mxu0 %v18072_v16  ;;  %13546 = vmatprep.subr.bf16.mxu1 %v18074_v19 }
0x13d6   :  { %13484 = vmatpush1.bf16.msra.mxu0 %v18087_v20  ;;  %13548 = vmatpush1.bf16.msra.mxu1 %v18089_v58 }
0x13d7   :  { %13486 = vmatprep.subr.bf16.mxu0 %v18095_v47  ;;  %13550 = vmatprep.subr.bf16.mxu1 %v18097_v13 }
0x13da   :  { %13488 = vmatpush1.bf16.msra.mxu0 %v18107_v32  ;;  %13552 = vmatpush1.bf16.msra.mxu1 %v18109_v41 }
0x13db   :  { %13490 = vmatprep.subr.bf16.mxu0 %v18115_v30  ;;  %13554 = vmatprep.subr.bf16.mxu1 %v18117_v18 }
0x13de   :  { %13492 = vmatpush1.bf16.msra.mxu0 %v18127_v6  ;;  %13556 = vmatpush1.bf16.msra.mxu1 %v18129_v2 }
0x13df   :  { %13494 = vmatprep.subr.bf16.mxu0 %v18135_v21  ;;  %13558 = vmatprep.subr.bf16.mxu1 %v18137_v11 }
0x13e2   :  { %13496 = vmatpush1.bf16.msra.mxu0 %v18147_v24  ;;  %13560 = vmatpush1.bf16.msra.mxu1 %v18149_v17 }
0x13e3   :  { %13498 = vmatprep.subr.bf16.mxu0 %v18155_v57  ;;  %13562 = vmatprep.subr.bf16.mxu1 %v18157_v45 }
0x13e6   :  { %13500 = vmatpush1.bf16.msra.mxu0 %v18167_v43  ;;  %13564 = vmatpush1.bf16.msra.mxu1 %v18169_v44 }
0x13e7   :  { %13502 = vmatprep.subr.bf16.mxu0 %v18175_v60  ;;  %13566 = vmatprep.subr.bf16.mxu1 %v18177_v5 }
0x13ea   :  { %13504 = vmatpush1.bf16.msra.mxu0 %v18187_v33  ;;  %13568 = vmatpush1.bf16.msra.mxu1 %v18189_v23 }
0x13eb   :  { %13506 = vmatprep.subr.bf16.mxu0 %v18195_v22  ;;  %13570 = vmatprep.subr.bf16.mxu1 %v18197_v46 }
0x13ee   :  { %13508 = vmatpush1.bf16.msra.mxu0 %v18207_v31  ;;  %13572 = vmatpush1.bf16.msra.mxu1 %v18209_v38 }
0x13ef   :  { %13510 = vmatprep.subr.bf16.mxu0 %v18215_v62  ;;  %13574 = vmatprep.subr.bf16.mxu1 %v18217_v7 }
0x13f2   :  { %13512 = vmatpush1.bf16.msra.mxu0 %v18227_v34  ;;  %13576 = vmatpush1.bf16.msra.mxu1 %v18229_v14 }
0x13f3   :  { %13514 = vmatprep.subr.bf16.mxu0 %v18235_v52  ;;  %13578 = vmatprep.subr.bf16.mxu1 %v18237_v55 }
0x13f6   :  { %13516 = vmatpush1.bf16.msra.mxu0 %v18247_v56  ;;  %13580 = vmatpush1.bf16.msra.mxu1 %v18249_v50 }
0x13f7   :  { %13518 = vmatprep.subr.bf16.mxu0 %v18255_v10  ;;  %13582 = vmatprep.subr.bf16.mxu1 %v18257_v37 }
0x13fa   :  { %13520 = vmatpush1.bf16.msra.mxu0 %v18267_v1  ;;  %13584 = vmatpush1.bf16.msra.mxu1 %v20233_v12 }
0x13fb   :  { %13522 = vmatprep.subr.bf16.mxu0 %v20234_v61  ;;  %13586 = vmatprep.subr.bf16.mxu1 %v20260_v36 }
0x13fe   :  { %13524 = vmatpush1.bf16.msra.mxu0 %v20352_v4  ;;  %13588 = vmatpush1.bf16.msra.mxu1 %v20353_v3 }
0x13ff   :  { %13526 = vmatprep.subr.bf16.mxu0 %v20354_v35  ;;  %13590 = vmatprep.subr.bf16.mxu1 %v20355_v49 }
0x1402   :  { %13528 = vmatpush1.bf16.msra.mxu0 %v20356_v42  ;;  %13592 = vmatpush1.bf16.msra.mxu1 %v20357_v48  ;;  %v20368_v48 = vld [vmem:[#allocation158_spill] sm:$0xff]  ;;  %v20372_v42 = vld [vmem:[#allocation140_spill] sm:$0xff] }
0x1403   :  { %13530 = vmatprep.subr.bf16.mxu0 %v20358_v40  ;;  %13594 = vmatprep.subr.bf16.mxu1 %v20359_v28  ;;  %v20369_v40 = vld [vmem:[#allocation159_spill] sm:$0xff] }
0x1404   :  { %v20370_v28 = vld [vmem:[#allocation135_spill] sm:$0xff] }
0x1406   :  { %13532 = vmatpush1.bf16.msra.mxu0 %v20360_v26  ;;  %13596 = vmatpush1.bf16.msra.mxu1 %v20361_v8  ;;  %v20371_v26 = vld [vmem:[#allocation136_spill] sm:$0xff] }
0x1407   :  { %13534 = vmatprep.subr.bf16.mxu0 %v20362_v29  ;;  %13598 = vmatprep.subr.bf16.mxu1 %v20363_v0 }
0x140a   :  { %13536 = vmatpush1.bf16.msra.mxu0 %v20364_v39  ;;  %13600 = vmatpush1.bf16.msra.mxu1 %v20365_v15 }
0x140b   :  { %13538 = vmatprep.subr.bf16.mxu0 %v20366_v27  ;;  %13602 = vmatprep.subr.bf16.mxu1 %v20367_v51 }
0x140e   :  { %13540 = vmatpush1.bf16.msra.mxu0 %v20368_v48  ;;  %13604 = vmatpush1.bf16.msra.mxu1 %v20369_v40 }
0x140f   :  { %13606 = vmatprep.subr.bf16.mxu0 %v20370_v28  ;;  %13670 = vmatprep.subr.bf16.mxu1 %v20371_v26 }
0x14a4   :  { %v6615_v8 = vpop.f32.mrb[40].mxu0  ;;  %v6686_v29 = vpop.f32.mrb[52].mxu1 }
0x14a5   :  { %v6616_v0 = vadd.f32 %v6615_v8, %v20372_v42  ;;  %v6617_v49 = vpop.f32.mrb[41].mxu0  ;;  %v6688_v39 = vpop.f32.mrb[53].mxu1  ;;  %v6687_v48 = vadd.f32 %v6686_v29, %v18456_v54 }
0x14a6   :  { %v6618_v15 = vadd.f32 %v6617_v49, %v18451_v59  ;;  %v6689_v40 = vadd.f32 %v6688_v39, %v18459_v53 }
0x14a7   :  { %v11683_v35 = vmul.f32 -1.442695, %v6616_v0  ;;  %v11685_v51 = vmul.f32 -1.442695, %v6687_v48 }
0x14a8   :  { %v11684_v27 = vmul.f32 -1.442695, %v6618_v15 }
0x14a9   :  { %15529 = vpow2.f32 %v11683_v35 }
0x14aa   :  { %15531 = vpow2.f32 %v11684_v27 }
0x14ab   :  { %15533 = vtanh.f32 %v6689_v40 }
0x14ac   :  { %15535 = vpow2.f32 %v11685_v51 }
0x14b3   :  { %v15530_v28 = vpop.eup %15529 }
0x14b4   :  { %v6700_v3 = vadd.f32 1.0, %v15530_v28  ;;  %v15532_v26 = vpop.eup %15531  ;;  %v20374_v28 = vld [vmem:[#allocation138_spill] sm:$0xff] }
0x14b5   :  { %v6701_v8 = vadd.f32 1.0, %v15532_v26  ;;  %v15534_v42 = vpop.eup %15533 }
0x14b6   :  { %15537 = vrcp.f32 %v6700_v3  ;;  %v15536_v4 = vpop.eup %15535 }
0x14b7   :  { %15539 = vrcp.f32 %v6701_v8  ;;  %v6702_v35 = vadd.f32 1.0, %v15536_v4 }
0x14b9   :  { %15541 = vrcp.f32 %v6702_v35  ;;  %v7066_v35 = vld [vmem:[%s20379_s28 + $0x20] sm:$0xff] }
0x14c0   :  { %v15538_v49 = vpop.eup %15537 }
0x14c1   :  { %v6711_v0 = vmul.f32 %v15538_v49, %v15534_v42  ;;  %v15540_v15 = vpop.eup %15539 }
0x14c2   :  { %v6710_v27 = vmul.f32 %v15540_v15, %v18772_v25  ;;  %v7062_v15 = vld [vmem:[%s20379_s28] sm:$0xff] }
0x14c3   :  { %v15542_v48 = vpop.eup %15541 }
0x14c4   :  { %v18849_v29 = vadd.f32 %v6711_v0, %v6710_v27  ;;  %v7064_v27 = vld [vmem:[%s20379_s28 + $0x10] sm:$0xff] }
0x14c6   :  { %15543 = vtanh.f32 %v18849_v29 }
0x14d0   :  { %v15544_v40 = vpop.eup %15543 }
0x14d1   :  { %v18852_v39 = vmul.f32 %v15544_v40, %v15542_v48  ;;  %v7068_v48 = vld [vmem:[%s20379_s28 + $0x30] sm:$0xff]  ;;  %v7071_v40 = vld [vmem:[%s20379_s28 + $0x48] sm:$0xff] }
0x14d3   :  { %20373 = vst [vmem:[#allocation132_spill] sm:$0xff] %v18852_v39  ;;  %v6716_v51 = vrot.slane %v18852_v39, 2 }
0x14d5   :  { %v6717_v3 = vrot.slane %v6716_v51, 6  ;;  %v7075_v51 = vld [vmem:[%s20379_s28 + $0x68] sm:$0xff] }
0x14d7   :  { %6783 = vmatprep.mubr.f32.mxu0 %v6717_v3  ;;  %6854 = vmatprep.mubr.f32.mxu1 %v6717_v3  ;;  %v7073_v3 = vld [vmem:[%s20379_s28 + $0x58] sm:$0xff] }
0x14d8   :  { %6784 = vmatmul.mubr.f32.vlgmr.msra.gmra.mrb[42].mxu0 %v20374_v28  ;;  %6855 = vmatmul.mubr.f32.vlgmr.msra.gmra.mrb[54].mxu1 %v20374_v28  ;;  %v7077_v28 = vld [vmem:[%s20379_s28 + $0x78] sm:$0xff] }
0x14d9   :  { %13608 = vmatpush1.bf16.msra.mxu0 %v18064_v63  ;;  %13672 = vmatpush1.bf16.msra.mxu1 %v18066_v9  ;;  %v20375_v63 = vld [vmem:[#allocation142_spill] sm:$0xff]  ;;  %v20378_v9 = vld [vmem:[#allocation145_spill] sm:$0xff] }
0x14da   :  { %13610 = vmatprep.subr.bf16.mxu0 %v18072_v16  ;;  %13674 = vmatprep.subr.bf16.mxu1 %v18074_v19  ;;  %v20382_v16 = vld [vmem:[#allocation148_spill] sm:$0xff]  ;;  %v20383_v19 = vld [vmem:[#allocation149_spill] sm:$0xff] }
0x14dd   :  { %13612 = vmatpush1.bf16.msra.mxu0 %v18087_v20  ;;  %13676 = vmatpush1.bf16.msra.mxu1 %v18089_v58  ;;  %v20384_v20 = vld [vmem:[#allocation150_spill] sm:$0xff]  ;;  %v20385_v58 = vld [vmem:[#allocation151_spill] sm:$0xff] }
0x14de   :  { %13614 = vmatprep.subr.bf16.mxu0 %v18095_v47  ;;  %13678 = vmatprep.subr.bf16.mxu1 %v18097_v13  ;;  %v20386_v47 = vld [vmem:[#allocation152_spill] sm:$0xff]  ;;  %v20387_v13 = vld [vmem:[#allocation153_spill] sm:$0xff] }
0x14e1   :  { %13616 = vmatpush1.bf16.msra.mxu0 %v18107_v32  ;;  %13680 = vmatpush1.bf16.msra.mxu1 %v18109_v41  ;;  %v20388_v32 = vld [vmem:[#allocation154_spill] sm:$0xff]  ;;  %v20389_v41 = vld [vmem:[#allocation155_spill] sm:$0xff] }
0x14e2   :  { %13618 = vmatprep.subr.bf16.mxu0 %v18115_v30  ;;  %13682 = vmatprep.subr.bf16.mxu1 %v18117_v18  ;;  %v20390_v30 = vld [vmem:[#allocation156_spill] sm:$0xff]  ;;  %v20391_v18 = vld [vmem:[#allocation157_spill] sm:$0xff] }
0x14e5   :  { %13620 = vmatpush1.bf16.msra.mxu0 %v18127_v6  ;;  %13684 = vmatpush1.bf16.msra.mxu1 %v18129_v2  ;;  %v20392_v6 = vld [vmem:[#allocation158_spill] sm:$0xff]  ;;  %v20393_v2 = vld [vmem:[#allocation159_spill] sm:$0xff] }
0x14e6   :  { %13622 = vmatprep.subr.bf16.mxu0 %v18135_v21  ;;  %13686 = vmatprep.subr.bf16.mxu1 %v18137_v11  ;;  %v7063_v21 = vld [vmem:[%s20379_s28 + $0x8] sm:$0xff] }
0x14e7   :  { %v7067_v11 = vld [vmem:[%s20379_s28 + $0x28] sm:$0xff] }
0x14e9   :  { %13624 = vmatpush1.bf16.msra.mxu0 %v18147_v24  ;;  %13688 = vmatpush1.bf16.msra.mxu1 %v18149_v17  ;;  %v7065_v24 = vld [vmem:[%s20379_s28 + $0x18] sm:$0xff]  ;;  %v18922_v17 = vpack.c.bf16 %v7067_v11, %v7063_v21  ;;  %v7078_v21 = vld [vmem:[%s20379_s28 + $0x80] sm:$0xff] }
0x14ea   :  { %13626 = vmatprep.subr.bf16.mxu0 %v18155_v57  ;;  %13690 = vmatprep.subr.bf16.mxu1 %v18157_v45  ;;  %v7069_v57 = vld [vmem:[%s20379_s28 + $0x38] sm:$0xff]  ;;  %v7082_v11 = vld [vmem:[%s20379_s28 + $0xa0] sm:$0xff] }
0x14eb   :  { %20394 = vst [vmem:[#allocation133_spill] sm:$0xff] %v18922_v17  ;;  %v18925_v45 = vpack.c.bf16 %v7069_v57, %v7065_v24 }
0x14ed   :  { %13628 = vmatpush1.bf16.msra.mxu0 %v18167_v43  ;;  %13692 = vmatpush1.bf16.msra.mxu1 %v18169_v44  ;;  %20395 = vst [vmem:[#allocation134_spill] sm:$0xff] %v18925_v45 }
0x14ee   :  { %13630 = vmatprep.subr.bf16.mxu0 %v18175_v60  ;;  %13694 = vmatprep.subr.bf16.mxu1 %v18177_v5  ;;  %v20396_v60 = vld [vmem:[#allocation140_spill] sm:$0xff] }
0x14f1   :  { %13632 = vmatpush1.bf16.msra.mxu0 %v18187_v33  ;;  %13696 = vmatpush1.bf16.msra.mxu1 %v18189_v23 }
0x14f2   :  { %13634 = vmatprep.subr.bf16.mxu0 %v18195_v22  ;;  %13698 = vmatprep.subr.bf16.mxu1 %v18197_v46 }
0x14f5   :  { %13636 = vmatpush1.bf16.msra.mxu0 %v18207_v31  ;;  %13700 = vmatpush1.bf16.msra.mxu1 %v18209_v38 }
0x14f6   :  { %13638 = vmatprep.subr.bf16.mxu0 %v18215_v62  ;;  %13702 = vmatprep.subr.bf16.mxu1 %v18217_v7 }
0x14f9   :  { %13640 = vmatpush1.bf16.msra.mxu0 %v18227_v34  ;;  %13704 = vmatpush1.bf16.msra.mxu1 %v18229_v14 }
0x14fa   :  { %13642 = vmatprep.subr.bf16.mxu0 %v18235_v52  ;;  %13706 = vmatprep.subr.bf16.mxu1 %v18237_v55  ;;  %v20376_v52 = vld [vmem:[#allocation143_spill] sm:$0xff]  ;;  %v20377_v55 = vld [vmem:[#allocation144_spill] sm:$0xff] }
0x14fd   :  { %13644 = vmatpush1.bf16.msra.mxu0 %v18247_v56  ;;  %13708 = vmatpush1.bf16.msra.mxu1 %v18249_v50 }
0x14fe   :  { %13646 = vmatprep.subr.bf16.mxu0 %v18255_v10  ;;  %13710 = vmatprep.subr.bf16.mxu1 %v18257_v37  ;;  %v20380_v10 = vld [vmem:[#allocation146_spill] sm:$0xff]  ;;  %v20381_v37 = vld [vmem:[#allocation147_spill] sm:$0xff] }
0x1501   :  { %13648 = vmatpush1.bf16.msra.mxu0 %v18267_v1  ;;  %13712 = vmatpush1.bf16.msra.mxu1 %v20233_v12 }
0x1502   :  { %13650 = vmatprep.subr.bf16.mxu0 %v20234_v61  ;;  %13714 = vmatprep.subr.bf16.mxu1 %v20260_v36 }
0x1505   :  { %13652 = vmatpush1.bf16.msra.mxu0 %v20375_v63  ;;  %13716 = vmatpush1.bf16.msra.mxu1 %v20376_v52  ;;  %v18948_v52 = vpack.c.bf16 %v7066_v35, %v7062_v15  ;;  %v7096_v15 = vld [vmem:[%s20379_s28 + $0x110] sm:$0xff] }
0x1506   :  { %13654 = vmatprep.subr.bf16.mxu0 %v20377_v55  ;;  %13718 = vmatprep.subr.bf16.mxu1 %v20378_v9  ;;  %v18950_v55 = vpack.c.bf16 %v7068_v48, %v7064_v27  ;;  %v7070_v9 = vld [vmem:[%s20379_s28 + $0x40] sm:$0xff]  ;;  %v7100_v35 = vld [vmem:[%s20379_s28 + $0x130] sm:$0xff]  ;;  %v7103_v27 = vld [vmem:[%s20379_s28 + $0x148] sm:$0xff] }
0x1507   :  { %v7107_v48 = vld [vmem:[%s20379_s28 + $0x168] sm:$0xff] }
0x1509   :  { %13656 = vmatpush1.bf16.msra.mxu0 %v20380_v10  ;;  %13720 = vmatpush1.bf16.msra.mxu1 %v20381_v37  ;;  %v7074_v10 = vld [vmem:[%s20379_s28 + $0x60] sm:$0xff]  ;;  %v20399_v37 = vld [vmem:[#allocation139_spill] sm:$0xff] }
0x150a   :  { %13658 = vmatprep.subr.bf16.mxu0 %v20382_v16  ;;  %13722 = vmatprep.subr.bf16.mxu1 %v20383_v19  ;;  %v6888_v16 = vrot.slane %v20399_v37, 7  ;;  %v18955_v19 = vpack.c.bf16 %v7075_v51, %v7071_v40  ;;  %v7105_v40 = vld [vmem:[%s20379_s28 + $0x158] sm:$0xff]  ;;  %v7104_v37 = vld [vmem:[%s20379_s28 + $0x150] sm:$0xff] }
0x150d   :  { %13660 = vmatpush1.bf16.msra.mxu0 %v20384_v20  ;;  %13724 = vmatpush1.bf16.msra.mxu1 %v20385_v58  ;;  %v18957_v20 = vpack.c.bf16 %v7077_v28, %v7073_v3  ;;  %v7072_v58 = vld [vmem:[%s20379_s28 + $0x50] sm:$0xff]  ;;  %v19030_v3 = vpack.c.bf16 %v7100_v35, %v7096_v15  ;;  %v7102_v28 = vld [vmem:[%s20379_s28 + $0x140] sm:$0xff]  ;;  %v7131_v15 = vld [vmem:[%s20379_s28 + $0x228] sm:$0xff] }
0x150e   :  { %13662 = vmatprep.subr.bf16.mxu0 %v20386_v47  ;;  %13726 = vmatprep.subr.bf16.mxu1 %v20387_v13  ;;  %v7076_v47 = vld [vmem:[%s20379_s28 + $0x70] sm:$0xff]  ;;  %v7079_v13 = vld [vmem:[%s20379_s28 + $0x88] sm:$0xff]  ;;  %v7129_v35 = vld [vmem:[%s20379_s28 + $0x218] sm:$0xff] }
0x1511   :  { %13664 = vmatpush1.bf16.msra.mxu0 %v20388_v32  ;;  %13728 = vmatpush1.bf16.msra.mxu1 %v20389_v41  ;;  %v7083_v32 = vld [vmem:[%s20379_s28 + $0xa8] sm:$0xff]  ;;  %v7081_v41 = vld [vmem:[%s20379_s28 + $0x98] sm:$0xff] }
0x1512   :  { %13666 = vmatprep.subr.bf16.mxu0 %v20390_v30  ;;  %13730 = vmatprep.subr.bf16.mxu1 %v20391_v18  ;;  %v7085_v30 = vld [vmem:[%s20379_s28 + $0xb8] sm:$0xff]  ;;  %v11692_v18 = vld [vmem:[%s20197_s23 + $0x2] sm:$0x1]  ;;  %v18976_v24 = vpack.c.bf16 %v7083_v32, %v7079_v13 }
0x1513   :  { %v18978_v57 = vpack.c.bf16 %v7085_v30, %v7081_v41  ;;  %v7113_v13 = vld [vmem:[%s20379_s28 + $0x198] sm:$0xff] }
0x1514   :  { %v7117_v32 = vld [vmem:[%s20379_s28 + $0x1b8] sm:$0xff] }
0x1515   :  { %13668 = vmatpush1.bf16.msra.mxu0 %v20392_v6  ;;  %13732 = vmatpush1.bf16.msra.mxu1 %v20393_v2  ;;  %v18968_v6 = vpack.c.bf16 %v7074_v10, %v7070_v9  ;;  %v18970_v2 = vpack.c.bf16 %v7076_v47, %v7072_v58  ;;  %v19036_v9 = vpack.c.bf16 %v7107_v48, %v7103_v27  ;;  %v7111_v58 = vld [vmem:[%s20379_s28 + $0x188] sm:$0xff]  ;;  %v7133_v27 = vld [vmem:[%s20379_s28 + $0x238] sm:$0xff] }
0x1516   :  { %13734 = vmatprep.subr.bf16.mxu0 %v18922_v17  ;;  %13798 = vmatprep.subr.bf16.mxu1 %v18925_v45  ;;  %v7115_v47 = vld [vmem:[%s20379_s28 + $0x1a8] sm:$0xff] }
0x15ab   :  { %v6785_v43 = vpop.f32.mrb[42].mxu0  ;;  %v6856_v44 = vpop.f32.mrb[54].mxu1 }
0x15ac   :  { %v6786_v5 = vadd.f32 %v6785_v43, %v20396_v60  ;;  %v6787_v33 = vpop.f32.mrb[43].mxu0  ;;  %v6858_v23 = vpop.f32.mrb[55].mxu1  ;;  %v6857_v38 = vadd.f32 %v6856_v44, %v18456_v54  ;;  %v7080_v43 = vld [vmem:[%s20379_s28 + $0x90] sm:$0xff] }
0x15ad   :  { %v6788_v22 = vadd.f32 %v6787_v33, %v18451_v59  ;;  %v6859_v62 = vadd.f32 %v6858_v23, %v18459_v53  ;;  %v7084_v44 = vld [vmem:[%s20379_s28 + $0xb0] sm:$0xff]  ;;  %v7091_v33 = vld [vmem:[%s20379_s28 + $0xe8] sm:$0xff]  ;;  %v7089_v23 = vld [vmem:[%s20379_s28 + $0xd8] sm:$0xff] }
0x15ae   :  { %v11686_v46 = vmul.f32 -1.442695, %v6786_v5  ;;  %v11688_v7 = vmul.f32 -1.442695, %v6857_v38  ;;  %v7087_v5 = vld [vmem:[%s20379_s28 + $0xc8] sm:$0xff]  ;;  %v7086_v38 = vld [vmem:[%s20379_s28 + $0xc0] sm:$0xff] }
0x15af   :  { %v11687_v31 = vmul.f32 -1.442695, %v6788_v22  ;;  %v7093_v22 = vld [vmem:[%s20379_s28 + $0xf8] sm:$0xff]  ;;  %v7160_v53 = vld [vmem:[%s20379_s28 + $0x310] sm:$0xff] }
0x15b0   :  { %15545 = vpow2.f32 %v11686_v46  ;;  %v18988_v46 = vpack.c.bf16 %v7082_v11, %v7078_v21  ;;  %v7114_v21 = vld [vmem:[%s20379_s28 + $0x1a0] sm:$0xff]  ;;  %v19056_v11 = vpack.c.bf16 %v7115_v47, %v7111_v58  ;;  %v7132_v58 = vld [vmem:[%s20379_s28 + $0x230] sm:$0xff]  ;;  %v7135_v47 = vld [vmem:[%s20379_s28 + $0x248] sm:$0xff] }
0x15b1   :  { %15547 = vpow2.f32 %v11687_v31  ;;  %v18990_v31 = vpack.c.bf16 %v7084_v44, %v7080_v43  ;;  %v19058_v43 = vpack.c.bf16 %v7117_v32, %v7113_v13  ;;  %v7112_v44 = vld [vmem:[%s20379_s28 + $0x190] sm:$0xff]  ;;  %v7139_v13 = vld [vmem:[%s20379_s28 + $0x268] sm:$0xff]  ;;  %v7137_v32 = vld [vmem:[%s20379_s28 + $0x258] sm:$0xff] }
0x15b2   :  { %15549 = vtanh.f32 %v6859_v62  ;;  %v7090_v62 = vld [vmem:[%s20379_s28 + $0xe0] sm:$0xff]  ;;  %v7164_v54 = vld [vmem:[%s20379_s28 + $0x330] sm:$0xff] }
0x15b3   :  { %15551 = vpow2.f32 %v11688_v7  ;;  %v18996_v7 = vpack.c.bf16 %v7091_v33, %v7087_v5  ;;  %v7116_v5 = vld [vmem:[%s20379_s28 + $0x1b0] sm:$0xff]  ;;  %v7119_v33 = vld [vmem:[%s20379_s28 + $0x1c8] sm:$0xff] }
0x15ba   :  { %v15546_v34 = vpop.eup %15545 }
0x15bb   :  { %v6870_v14 = vadd.f32 1.0, %v15546_v34  ;;  %v15548_v56 = vpop.eup %15547  ;;  %v18998_v34 = vpack.c.bf16 %v7093_v22, %v7089_v23  ;;  %v7123_v23 = vld [vmem:[%s20379_s28 + $0x1e8] sm:$0xff]  ;;  %v7121_v22 = vld [vmem:[%s20379_s28 + $0x1d8] sm:$0xff] }
0x15bc   :  { %v6871_v50 = vadd.f32 1.0, %v15548_v56  ;;  %v15550_v1 = vpop.eup %15549  ;;  %v7092_v56 = vld [vmem:[%s20379_s28 + $0xf0] sm:$0xff] }
0x15bd   :  { %15553 = vrcp.f32 %v6870_v14  ;;  %v15552_v12 = vpop.eup %15551  ;;  %v7088_v14 = vld [vmem:[%s20379_s28 + $0xd0] sm:$0xff] }
0x15be   :  { %15555 = vrcp.f32 %v6871_v50  ;;  %v6872_v4 = vadd.f32 1.0, %v15552_v12  ;;  %v7095_v50 = vld [vmem:[%s20379_s28 + $0x108] sm:$0xff]  ;;  %v7097_v12 = vld [vmem:[%s20379_s28 + $0x118] sm:$0xff] }
0x15c0   :  { %15557 = vrcp.f32 %v6872_v4  ;;  %v7094_v4 = vld [vmem:[%s20379_s28 + $0x100] sm:$0xff] }
0x15c7   :  { %v15554_v61 = vpop.eup %15553 }
0x15c8   :  { %v6881_v36 = vmul.f32 %v15554_v61, %v15550_v1  ;;  %v15556_v25 = vpop.eup %15555  ;;  %v7099_v1 = vld [vmem:[%s20379_s28 + $0x128] sm:$0xff]  ;;  %v7101_v61 = vld [vmem:[%s20379_s28 + $0x138] sm:$0xff] }
0x15c9   :  { %v6880_v42 = vmul.f32 %v15556_v25, %v18849_v29  ;;  %v19010_v25 = vpack.c.bf16 %v7092_v56, %v7088_v14  ;;  %v19070_v14 = vpack.c.bf16 %v7116_v5, %v7112_v44  ;;  %v7118_v56 = vld [vmem:[%s20379_s28 + $0x1c0] sm:$0xff] }
0x15ca   :  { %v15558_v8 = vpop.eup %15557  ;;  %v7134_v5 = vld [vmem:[%s20379_s28 + $0x240] sm:$0xff] }
0x15cb   :  { %v18934_v26 = vadd.f32 %v6881_v36, %v6880_v42  ;;  %v19008_v36 = vpack.c.bf16 %v7090_v62, %v7086_v38  ;;  %v7098_v42 = vld [vmem:[%s20379_s28 + $0x120] sm:$0xff]  ;;  %v7125_v38 = vld [vmem:[%s20379_s28 + $0x1f8] sm:$0xff] }
0x15cc   :  { %v19028_v51 = vpack.c.bf16 %v7098_v42, %v7094_v4  ;;  %v7124_v4 = vld [vmem:[%s20379_s28 + $0x1f0] sm:$0xff]  ;;  %v7127_v42 = vld [vmem:[%s20379_s28 + $0x208] sm:$0xff] }
0x15cd   :  { %20397 = vst [vmem:[#allocation135_spill] sm:$0xff] %v18934_v26  ;;  %15559 = vtanh.f32 %v18934_v26 }
0x15d7   :  { %v15560_v49 = vpop.eup %15559 }
0x15d8   :  { %v18937_v0 = vmul.f32 %v15560_v49, %v15558_v8  ;;  %v19016_v8 = vpack.c.bf16 %v7099_v1, %v7095_v50  ;;  %v19018_v49 = vpack.c.bf16 %v7101_v61, %v7097_v12  ;;  %v7122_v50 = vld [vmem:[%s20379_s28 + $0x1e0] sm:$0xff]  ;;  %v19076_v1 = vpack.c.bf16 %v7123_v23, %v7119_v33  ;;  %v7120_v61 = vld [vmem:[%s20379_s28 + $0x1d0] sm:$0xff] }
0x15d9   :  { %v19078_v12 = vpack.c.bf16 %v7125_v38, %v7121_v22  ;;  %v19088_v48 = vpack.c.bf16 %v7122_v50, %v7118_v56  ;;  %v7138_v33 = vld [vmem:[%s20379_s28 + $0x260] sm:$0xff]  ;;  %v19116_v23 = vpack.c.bf16 %v7139_v13, %v7135_v47  ;;  %v7136_v38 = vld [vmem:[%s20379_s28 + $0x250] sm:$0xff]  ;;  %v7143_v50 = vld [vmem:[%s20379_s28 + $0x288] sm:$0xff] }
0x15da   :  { %20398 = vst [vmem:[#allocation136_spill] sm:$0xff] %v18937_v0  ;;  %v6886_v29 = vrot.slane %v18937_v0, 1  ;;  %v7140_v56 = vld [vmem:[%s20379_s28 + $0x270] sm:$0xff]  ;;  %v7151_v13 = vld [vmem:[%s20379_s28 + $0x2c8] sm:$0xff] }
0x15db   :  { %v7148_v47 = vld [vmem:[%s20379_s28 + $0x2b0] sm:$0xff] }
0x15dc   :  { %v6889_v63 = vrot.slane %v6886_v29, 7  ;;  %v7109_v29 = vld [vmem:[%s20379_s28 + $0x178] sm:$0xff]  ;;  %v7156_v0 = vld [vmem:[%s20379_s28 + $0x2f0] sm:$0xff] }
0x15dd   :  { %v19038_v10 = vpack.c.bf16 %v7109_v29, %v7105_v40  ;;  %v19090_v40 = vpack.c.bf16 %v7124_v4, %v7120_v61  ;;  %v7126_v29 = vld [vmem:[%s20379_s28 + $0x200] sm:$0xff]  ;;  %v7147_v61 = vld [vmem:[%s20379_s28 + $0x2a8] sm:$0xff]  ;;  %v7145_v4 = vld [vmem:[%s20379_s28 + $0x298] sm:$0xff] }
0x15de   :  { %6956 = vmatprep.mubr.f32.mxu0 %v6889_v63  ;;  %7027 = vmatprep.mubr.f32.mxu1 %v6889_v63  ;;  %v7106_v63 = vld [vmem:[%s20379_s28 + $0x160] sm:$0xff] }
0x15df   :  { %6957 = vmatmul.mubr.f32.vlgmr.msra.gmra.mrb[44].mxu0 %v6888_v16  ;;  %7028 = vmatmul.mubr.f32.vlgmr.msra.gmra.mrb[56].mxu1 %v6888_v16  ;;  %v7108_v16 = vld [vmem:[%s20379_s28 + $0x170] sm:$0xff]  ;;  %v19048_v41 = vpack.c.bf16 %v7106_v63, %v7102_v28  ;;  %v7130_v28 = vld [vmem:[%s20379_s28 + $0x220] sm:$0xff]  ;;  %v19096_v63 = vpack.c.bf16 %v7131_v15, %v7127_v42  ;;  %v7149_v42 = vld [vmem:[%s20379_s28 + $0x2b8] sm:$0xff]  ;;  %v19128_v15 = vpack.c.bf16 %v7138_v33, %v7134_v5 }
0x15e0   :  { %13736 = vmatpush1.bf16.msra.mxu0 %v18948_v52  ;;  %13800 = vmatpush1.bf16.msra.mxu1 %v18950_v55  ;;  %v19050_v30 = vpack.c.bf16 %v7108_v16, %v7104_v37  ;;  %v19098_v37 = vpack.c.bf16 %v7133_v27, %v7129_v35  ;;  %v7128_v16 = vld [vmem:[%s20379_s28 + $0x210] sm:$0xff]  ;;  %v19130_v35 = vpack.c.bf16 %v7140_v56, %v7136_v38  ;;  %v7142_v27 = vld [vmem:[%s20379_s28 + $0x280] sm:$0xff]  ;;  %v7157_v5 = vld [vmem:[%s20379_s28 + $0x2f8] sm:$0xff] }
0x15e1   :  { %13738 = vmatprep.subr.bf16.mxu0 %v18955_v19  ;;  %13802 = vmatprep.subr.bf16.mxu1 %v18957_v20  ;;  %v19110_v44 = vpack.c.bf16 %v7132_v58, %v7128_v16  ;;  %v19138_v16 = vpack.c.bf16 %v7149_v42, %v7145_v4  ;;  %v7144_v58 = vld [vmem:[%s20379_s28 + $0x290] sm:$0xff]  ;;  %v7150_v56 = vld [vmem:[%s20379_s28 + $0x2c0] sm:$0xff] }
0x15e2   :  { %7280 = vmatprep.mubr.f32.mxu0 %v11692_v18  ;;  %7351 = vmatprep.mubr.f32.mxu1 %v11692_v18  ;;  %v7110_v18 = vld [vmem:[%s20379_s28 + $0x180] sm:$0xff]  ;;  %v19150_v38 = vpack.c.bf16 %v7148_v47, %v7144_v58  ;;  %v7152_v42 = vld [vmem:[%s20379_s28 + $0x2d0] sm:$0xff]  ;;  %v7161_v58 = vld [vmem:[%s20379_s28 + $0x318] sm:$0xff] }
0x15e3   :  { %v19068_v62 = vpack.c.bf16 %v7114_v21, %v7110_v18  ;;  %v7141_v18 = vld [vmem:[%s20379_s28 + $0x278] sm:$0xff]  ;;  %v19108_v21 = vpack.c.bf16 %v7130_v28, %v7126_v29  ;;  %v7146_v29 = vld [vmem:[%s20379_s28 + $0x2a0] sm:$0xff]  ;;  %v19136_v28 = vpack.c.bf16 %v7147_v61, %v7143_v50 }
0x15e4   :  { %13740 = vmatpush1.bf16.msra.mxu0 %v18968_v6  ;;  %13804 = vmatpush1.bf16.msra.mxu1 %v18970_v2  ;;  %v19118_v22 = vpack.c.bf16 %v7141_v18, %v7137_v32  ;;  %v7155_v32 = vld [vmem:[%s20379_s28 + $0x2e8] sm:$0xff]  ;;  %v7153_v18 = vld [vmem:[%s20379_s28 + $0x2d8] sm:$0xff]  ;;  %v19148_v33 = vpack.c.bf16 %v7146_v29, %v7142_v27  ;;  %v7154_v50 = vld [vmem:[%s20379_s28 + $0x2e0] sm:$0xff] }
0x15e5   :  { %13742 = vmatprep.subr.bf16.mxu0 %v18976_v24  ;;  %13806 = vmatprep.subr.bf16.mxu1 %v18978_v57  ;;  %v19156_v61 = vpack.c.bf16 %v7155_v32, %v7151_v13  ;;  %v19158_v4 = vpack.c.bf16 %v7157_v5, %v7153_v18  ;;  %v7159_v27 = vld [vmem:[%s20379_s28 + $0x308] sm:$0xff]  ;;  %v7165_v47 = vld [vmem:[%s20379_s28 + $0x338] sm:$0xff]  ;;  %v19168_v13 = vpack.c.bf16 %v7154_v50, %v7150_v56  ;;  %v7158_v18 = vld [vmem:[%s20379_s28 + $0x300] sm:$0xff] }
0x15e6   :  { %v7163_v29 = vld [vmem:[%s20379_s28 + $0x328] sm:$0xff]  ;;  %v19170_v32 = vpack.c.bf16 %v7156_v0, %v7152_v42  ;;  %v7162_v5 = vld [vmem:[%s20379_s28 + $0x320] sm:$0xff]  ;;  %v19178_v26 = vpack.c.bf16 %v7165_v47, %v7161_v58  ;;  %v7169_v50 = vld [vmem:[%s20379_s28 + $0x358] sm:$0xff] }
0x15e7   :  { %20400 = vst [vmem:[#allocation138_spill] sm:$0xff] %v19156_v61  ;;  %20401 = vst [vmem:[#allocation142_spill] sm:$0xff] %v19158_v4  ;;  %v19176_v39 = vpack.c.bf16 %v7163_v29, %v7159_v27  ;;  %v7167_v56 = vld [vmem:[%s20379_s28 + $0x348] sm:$0xff]  ;;  %v7173_v42 = vld [vmem:[%s20379_s28 + $0x378] sm:$0xff]  ;;  %v19188_v27 = vpack.c.bf16 %v7162_v5, %v7158_v18  ;;  %v19190_v29 = vpack.c.bf16 %v7164_v54, %v7160_v53 }
0x15e8   :  { %13744 = vmatpush1.bf16.msra.mxu0 %v18988_v46  ;;  %13808 = vmatpush1.bf16.msra.mxu1 %v18990_v31  ;;  %20402 = vst [vmem:[#allocation143_spill] sm:$0xff] %v19168_v13  ;;  %20403 = vst [vmem:[#allocation144_spill] sm:$0xff] %v19170_v32  ;;  %v7171_v0 = vld [vmem:[%s20379_s28 + $0x368] sm:$0xff]  ;;  %v7166_v58 = vld [vmem:[%s20379_s28 + $0x340] sm:$0xff]  ;;  %v19198_v60 = vpack.c.bf16 %v7173_v42, %v7169_v50 }
0x15e9   :  { %13746 = vmatprep.subr.bf16.mxu0 %v18996_v7  ;;  %13810 = vmatprep.subr.bf16.mxu1 %v18998_v34  ;;  %20404 = vst [vmem:[#allocation145_spill] sm:$0xff] %v19176_v39  ;;  %20405 = vst [vmem:[#allocation146_spill] sm:$0xff] %v19178_v26  ;;  %v7170_v47 = vld [vmem:[%s20379_s28 + $0x360] sm:$0xff]  ;;  %v19196_v59 = vpack.c.bf16 %v7171_v0, %v7167_v56  ;;  %v7175_v18 = vld [vmem:[%s20379_s28 + $0x388] sm:$0xff] }
0x15ea   :  { %20406 = vst [vmem:[#allocation147_spill] sm:$0xff] %v19188_v27  ;;  %20407 = vst [vmem:[#allocation148_spill] sm:$0xff] %v19190_v29  ;;  %v7179_v54 = vld [vmem:[%s20379_s28 + $0x3a8] sm:$0xff]  ;;  %v7177_v53 = vld [vmem:[%s20379_s28 + $0x398] sm:$0xff]  ;;  %v19208_v56 = vpack.c.bf16 %v7170_v47, %v7166_v58 }
0x15eb   :  { %20408 = vst [vmem:[#allocation149_spill] sm:$0xff] %v19196_v59  ;;  %20409 = vst [vmem:[#allocation150_spill] sm:$0xff] %v19198_v60  ;;  %v7181_v5 = vld [vmem:[%s20379_s28 + $0x3b8] sm:$0xff]  ;;  %v7174_v50 = vld [vmem:[%s20379_s28 + $0x380] sm:$0xff] }
0x15ec   :  { %13748 = vmatpush1.bf16.msra.mxu0 %v19008_v36  ;;  %13812 = vmatpush1.bf16.msra.mxu1 %v19010_v25  ;;  %20410 = vst [vmem:[#allocation151_spill] sm:$0xff] %v19208_v56  ;;  %v7178_v42 = vld [vmem:[%s20379_s28 + $0x3a0] sm:$0xff]  ;;  %v7183_v58 = vld [vmem:[%s20379_s28 + $0x3c8] sm:$0xff] }
0x15ed   :  { %13750 = vmatprep.subr.bf16.mxu0 %v19016_v8  ;;  %13814 = vmatprep.subr.bf16.mxu1 %v19018_v49  ;;  %v7187_v47 = vld [vmem:[%s20379_s28 + $0x3e8] sm:$0xff] }
0x15f0   :  { %13752 = vmatpush1.bf16.msra.mxu0 %v19028_v51  ;;  %13816 = vmatpush1.bf16.msra.mxu1 %v19030_v3 }
0x15f1   :  { %13754 = vmatprep.subr.bf16.mxu0 %v19036_v9  ;;  %13818 = vmatprep.subr.bf16.mxu1 %v19038_v10 }
0x15f4   :  { %13756 = vmatpush1.bf16.msra.mxu0 %v19048_v41  ;;  %13820 = vmatpush1.bf16.msra.mxu1 %v19050_v30 }
0x15f5   :  { %13758 = vmatprep.subr.bf16.mxu0 %v19056_v11  ;;  %13822 = vmatprep.subr.bf16.mxu1 %v19058_v43 }
0x15f8   :  { %13760 = vmatpush1.bf16.msra.mxu0 %v19068_v62  ;;  %13824 = vmatpush1.bf16.msra.mxu1 %v19070_v14 }
0x15f9   :  { %13762 = vmatprep.subr.bf16.mxu0 %v19076_v1  ;;  %13826 = vmatprep.subr.bf16.mxu1 %v19078_v12 }
0x15fc   :  { %13764 = vmatpush1.bf16.msra.mxu0 %v19088_v48  ;;  %13828 = vmatpush1.bf16.msra.mxu1 %v19090_v40 }
0x15fd   :  { %13766 = vmatprep.subr.bf16.mxu0 %v19096_v63  ;;  %13830 = vmatprep.subr.bf16.mxu1 %v19098_v37 }
0x1600   :  { %13768 = vmatpush1.bf16.msra.mxu0 %v19108_v21  ;;  %13832 = vmatpush1.bf16.msra.mxu1 %v19110_v44 }
0x1601   :  { %13770 = vmatprep.subr.bf16.mxu0 %v19116_v23  ;;  %13834 = vmatprep.subr.bf16.mxu1 %v19118_v22 }
0x1604   :  { %13772 = vmatpush1.bf16.msra.mxu0 %v19128_v15  ;;  %13836 = vmatpush1.bf16.msra.mxu1 %v19130_v35 }
0x1605   :  { %13774 = vmatprep.subr.bf16.mxu0 %v19136_v28  ;;  %13838 = vmatprep.subr.bf16.mxu1 %v19138_v16 }
0x1608   :  { %13776 = vmatpush1.bf16.msra.mxu0 %v19148_v33  ;;  %13840 = vmatpush1.bf16.msra.mxu1 %v19150_v38 }
0x1609   :  { %13778 = vmatprep.subr.bf16.mxu0 %v19156_v61  ;;  %13842 = vmatprep.subr.bf16.mxu1 %v19158_v4  ;;  %v7168_v4 = vld [vmem:[%s20379_s28 + $0x350] sm:$0xff] }
0x160a   :  { %v7188_v61 = vld [vmem:[%s20379_s28 + $0x3f0] sm:$0xff] }
0x160c   :  { %13780 = vmatpush1.bf16.msra.mxu0 %v19168_v13  ;;  %13844 = vmatpush1.bf16.msra.mxu1 %v19170_v32  ;;  %v7172_v13 = vld [vmem:[%s20379_s28 + $0x370] sm:$0xff] }
0x160d   :  { %13782 = vmatprep.subr.bf16.mxu0 %v19176_v39  ;;  %13846 = vmatprep.subr.bf16.mxu1 %v19178_v26  ;;  %v19210_v0 = vpack.c.bf16 %v7172_v13, %v7168_v4  ;;  %v19216_v26 = vpack.c.bf16 %v7179_v54, %v7175_v18  ;;  %v19218_v39 = vpack.c.bf16 %v7181_v5, %v7177_v53  ;;  %v7176_v32 = vld [vmem:[%s20379_s28 + $0x390] sm:$0xff]  ;;  %v7185_v4 = vld [vmem:[%s20379_s28 + $0x3d8] sm:$0xff]  ;;  %v7182_v18 = vld [vmem:[%s20379_s28 + $0x3c0] sm:$0xff] }
0x160e   :  { %v7189_v13 = vld [vmem:[%s20379_s28 + $0x3f8] sm:$0xff]  ;;  %v19235_v54 = vpack.c.bf16 %v7187_v47, %v7183_v58  ;;  %v7186_v5 = vld [vmem:[%s20379_s28 + $0x3e0] sm:$0xff] }
0x160f   :  { %20411 = vst [vmem:[#allocation152_spill] sm:$0xff] %v19210_v0  ;;  %20412 = vst [vmem:[#allocation153_spill] sm:$0xff] %v19216_v26  ;;  %v19237_v53 = vpack.c.bf16 %v7189_v13, %v7185_v4  ;;  %v20424_v58 = vld [vmem:[#allocation144_spill] sm:$0xff]  ;;  %v20425_v47 = vld [vmem:[#allocation145_spill] sm:$0xff] }
0x1610   :  { %13784 = vmatpush1.bf16.msra.mxu0 %v19188_v27  ;;  %13848 = vmatpush1.bf16.msra.mxu1 %v19190_v29  ;;  %20413 = vst [vmem:[#allocation154_spill] sm:$0xff] %v19218_v39  ;;  %v7180_v27 = vld [vmem:[%s20379_s28 + $0x3b0] sm:$0xff]  ;;  %20416 = vst [vmem:[#allocation157_spill] sm:$0xff] %v19235_v54  ;;  %v20426_v4 = vld [vmem:[#allocation146_spill] sm:$0xff] }
0x1611   :  { %13786 = vmatprep.subr.bf16.mxu0 %v19196_v59  ;;  %13850 = vmatprep.subr.bf16.mxu1 %v19198_v60  ;;  %v19228_v59 = vpack.c.bf16 %v7178_v42, %v7174_v50  ;;  %v19230_v60 = vpack.c.bf16 %v7180_v27, %v7176_v32  ;;  %20417 = vst [vmem:[#allocation158_spill] sm:$0xff] %v19237_v53  ;;  %v7184_v29 = vld [vmem:[%s20379_s28 + $0x3d0] sm:$0xff]  ;;  %v20420_v27 = vld [vmem:[#allocation129_spill] sm:$0xff] }
0x1612   :  { %v19244_v50 = vpack.c.bf16 %v7186_v5, %v7182_v18  ;;  %v19246_v32 = vpack.c.bf16 %v7188_v61, %v7184_v29  ;;  %v20421_v61 = vld [vmem:[#allocation138_spill] sm:$0xff]  ;;  %v20423_v42 = vld [vmem:[#allocation143_spill] sm:$0xff]  ;;  %v20428_v18 = vld [vmem:[#allocation148_spill] sm:$0xff] }
0x1613   :  { %20414 = vst [vmem:[#allocation155_spill] sm:$0xff] %v19228_v59  ;;  %20415 = vst [vmem:[#allocation156_spill] sm:$0xff] %v19230_v60  ;;  %v20422_v29 = vld [vmem:[#allocation142_spill] sm:$0xff]  ;;  %v20427_v13 = vld [vmem:[#allocation147_spill] sm:$0xff] }
0x1614   :  { %13788 = vmatpush1.bf16.msra.mxu0 %v19208_v56  ;;  %13852 = vmatpush1.bf16.msra.mxu1 %v19210_v0  ;;  %20418 = vst [vmem:[#allocation159_spill] sm:$0xff] %v19244_v50  ;;  %20419 = vst [vmem:[#allocation139_spill] sm:$0xff] %v19246_v32  ;;  %v20429_v5 = vld [vmem:[#allocation149_spill] sm:$0xff] }
0x1615   :  { %13790 = vmatprep.subr.bf16.mxu0 %v19216_v26  ;;  %13854 = vmatprep.subr.bf16.mxu1 %v19218_v39 }
0x1618   :  { %13792 = vmatpush1.bf16.msra.mxu0 %v19228_v59  ;;  %13856 = vmatpush1.bf16.msra.mxu1 %v19230_v60 }
0x1619   :  { %13794 = vmatprep.subr.bf16.mxu0 %v19235_v54  ;;  %13858 = vmatprep.subr.bf16.mxu1 %v19237_v53 }
0x161c   :  { %13796 = vmatpush1.bf16.msra.mxu0 %v19244_v50  ;;  %13860 = vmatpush1.bf16.msra.mxu1 %v19246_v32 }
0x161d   :  { %13862 = vmatprep.subr.bf16.mxu0 %v18922_v17  ;;  %13926 = vmatprep.subr.bf16.mxu1 %v18925_v45 }
0x161f   :  { %7281 = vmatmul.mubr.f32.vlgmr.msra.gmra.mrb[46].mxu0 %v20420_v27  ;;  %7352 = vmatmul.mubr.f32.vlgmr.msra.gmra.mrb[58].mxu1 %v20420_v27  ;;  %v20430_v27 = vld [vmem:[#allocation150_spill] sm:$0xff] }
0x1620   :  { %13864 = vmatpush1.bf16.msra.mxu0 %v18948_v52  ;;  %13928 = vmatpush1.bf16.msra.mxu1 %v18950_v55 }
0x1621   :  { %13866 = vmatprep.subr.bf16.mxu0 %v18955_v19  ;;  %13930 = vmatprep.subr.bf16.mxu1 %v18957_v20 }
0x1624   :  { %13868 = vmatpush1.bf16.msra.mxu0 %v18968_v6  ;;  %13932 = vmatpush1.bf16.msra.mxu1 %v18970_v2 }
0x1625   :  { %13870 = vmatprep.subr.bf16.mxu0 %v18976_v24  ;;  %13934 = vmatprep.subr.bf16.mxu1 %v18978_v57 }
0x1628   :  { %13872 = vmatpush1.bf16.msra.mxu0 %v18988_v46  ;;  %13936 = vmatpush1.bf16.msra.mxu1 %v18990_v31 }
0x1629   :  { %13874 = vmatprep.subr.bf16.mxu0 %v18996_v7  ;;  %13938 = vmatprep.subr.bf16.mxu1 %v18998_v34 }
0x162c   :  { %13876 = vmatpush1.bf16.msra.mxu0 %v19008_v36  ;;  %13940 = vmatpush1.bf16.msra.mxu1 %v19010_v25 }
0x162d   :  { %13878 = vmatprep.subr.bf16.mxu0 %v19016_v8  ;;  %13942 = vmatprep.subr.bf16.mxu1 %v19018_v49 }
0x1630   :  { %13880 = vmatpush1.bf16.msra.mxu0 %v19028_v51  ;;  %13944 = vmatpush1.bf16.msra.mxu1 %v19030_v3 }
0x1631   :  { %13882 = vmatprep.subr.bf16.mxu0 %v19036_v9  ;;  %13946 = vmatprep.subr.bf16.mxu1 %v19038_v10 }
0x1634   :  { %13884 = vmatpush1.bf16.msra.mxu0 %v19048_v41  ;;  %13948 = vmatpush1.bf16.msra.mxu1 %v19050_v30 }
0x1635   :  { %13886 = vmatprep.subr.bf16.mxu0 %v19056_v11  ;;  %13950 = vmatprep.subr.bf16.mxu1 %v19058_v43 }
0x1638   :  { %13888 = vmatpush1.bf16.msra.mxu0 %v19068_v62  ;;  %13952 = vmatpush1.bf16.msra.mxu1 %v19070_v14 }
0x1639   :  { %13890 = vmatprep.subr.bf16.mxu0 %v19076_v1  ;;  %13954 = vmatprep.subr.bf16.mxu1 %v19078_v12 }
0x163c   :  { %13892 = vmatpush1.bf16.msra.mxu0 %v19088_v48  ;;  %13956 = vmatpush1.bf16.msra.mxu1 %v19090_v40 }
0x163d   :  { %13894 = vmatprep.subr.bf16.mxu0 %v19096_v63  ;;  %13958 = vmatprep.subr.bf16.mxu1 %v19098_v37 }
0x1640   :  { %13896 = vmatpush1.bf16.msra.mxu0 %v19108_v21  ;;  %13960 = vmatpush1.bf16.msra.mxu1 %v19110_v44 }
0x1641   :  { %13898 = vmatprep.subr.bf16.mxu0 %v19116_v23  ;;  %13962 = vmatprep.subr.bf16.mxu1 %v19118_v22 }
0x1644   :  { %13900 = vmatpush1.bf16.msra.mxu0 %v19128_v15  ;;  %13964 = vmatpush1.bf16.msra.mxu1 %v19130_v35 }
0x1645   :  { %13902 = vmatprep.subr.bf16.mxu0 %v19136_v28  ;;  %13966 = vmatprep.subr.bf16.mxu1 %v19138_v16 }
0x1648   :  { %13904 = vmatpush1.bf16.msra.mxu0 %v19148_v33  ;;  %13968 = vmatpush1.bf16.msra.mxu1 %v19150_v38 }
0x1649   :  { %13906 = vmatprep.subr.bf16.mxu0 %v20421_v61  ;;  %13970 = vmatprep.subr.bf16.mxu1 %v20422_v29 }
0x164c   :  { %13908 = vmatpush1.bf16.msra.mxu0 %v20423_v42  ;;  %13972 = vmatpush1.bf16.msra.mxu1 %v20424_v58 }
0x164d   :  { %13910 = vmatprep.subr.bf16.mxu0 %v20425_v47  ;;  %13974 = vmatprep.subr.bf16.mxu1 %v20426_v4 }
0x1650   :  { %13912 = vmatpush1.bf16.msra.mxu0 %v20427_v13  ;;  %13976 = vmatpush1.bf16.msra.mxu1 %v20428_v18  ;;  %v20434_v13 = vld [vmem:[#allocation128_spill] sm:$0xff] }
0x1651   :  { %13914 = vmatprep.subr.bf16.mxu0 %v20429_v5  ;;  %13978 = vmatprep.subr.bf16.mxu1 %v20430_v27  ;;  %v20432_v5 = vld [vmem:[#allocation127_spill] sm:$0xff] }
0x1654   :  { %13916 = vmatpush1.bf16.msra.mxu0 %v19208_v56  ;;  %13980 = vmatpush1.bf16.msra.mxu1 %v19210_v0  ;;  %v20431_v56 = vld [vmem:[#allocation140_spill] sm:$0xff] }
0x1655   :  { %13918 = vmatprep.subr.bf16.mxu0 %v19216_v26  ;;  %13982 = vmatprep.subr.bf16.mxu1 %v19218_v39 }
0x1658   :  { %13920 = vmatpush1.bf16.msra.mxu0 %v19228_v59  ;;  %13984 = vmatpush1.bf16.msra.mxu1 %v19230_v60 }
0x1659   :  { %13922 = vmatprep.subr.bf16.mxu0 %v19235_v54  ;;  %13986 = vmatprep.subr.bf16.mxu1 %v19237_v53  ;;  %v20433_v53 = vld [vmem:[#allocation126_spill] sm:$0xff] }
0x165c   :  { %13924 = vmatpush1.bf16.msra.mxu0 %v19244_v50  ;;  %13988 = vmatpush1.bf16.msra.mxu1 %v19246_v32 }
0x165d   :  { %13990 = vmatprep.subr.bf16.mxu0 %v18922_v17  ;;  %14054 = vmatprep.subr.bf16.mxu1 %v18925_v45 }
0x16b2   :  { %v6958_v0 = vpop.f32.mrb[44].mxu0  ;;  %v7029_v26 = vpop.f32.mrb[56].mxu1 }
0x16b3   :  { %v6959_v39 = vadd.f32 %v6958_v0, %v20431_v56  ;;  %v6960_v27 = vpop.f32.mrb[45].mxu0  ;;  %v7031_v59 = vpop.f32.mrb[57].mxu1  ;;  %v7030_v50 = vadd.f32 %v7029_v26, %v20433_v53 }
0x16b4   :  { %v6961_v60 = vadd.f32 %v6960_v27, %v20432_v5  ;;  %v7032_v32 = vadd.f32 %v7031_v59, %v20434_v13 }
0x16b5   :  { %v11689_v18 = vmul.f32 -1.442695, %v6959_v39  ;;  %v11691_v4 = vmul.f32 -1.442695, %v7030_v50  ;;  %v20437_v50 = vld [vmem:[#allocation122_spill] sm:$0xff] }
0x16b6   :  { %v11690_v54 = vmul.f32 -1.442695, %v6961_v60 }
0x16b7   :  { %15561 = vpow2.f32 %v11689_v18 }
0x16b8   :  { %15563 = vpow2.f32 %v11690_v54  ;;  %v20435_v54 = vld [vmem:[#allocation135_spill] sm:$0xff] }
0x16b9   :  { %15565 = vtanh.f32 %v7032_v32 }
0x16ba   :  { %15567 = vpow2.f32 %v11691_v4 }
0x16c1   :  { %v15562_v17 = vpop.eup %15561 }
0x16c2   :  { %v7043_v47 = vadd.f32 1.0, %v15562_v17  ;;  %v15564_v45 = vpop.eup %15563 }
0x16c3   :  { %v7044_v56 = vadd.f32 1.0, %v15564_v45  ;;  %v15566_v0 = vpop.eup %15565  ;;  %v7190_v45 = vld [vmem:[#allocation22] sm:$0xf] }
0x16c4   :  { %15569 = vrcp.f32 %v7043_v47  ;;  %v15568_v58 = vpop.eup %15567  ;;  %v19329_v32 = vrot.slane %v7190_v45, %v20437_v50  ;;  %v20439_v47 = vld [vmem:[#allocation123_spill] sm:$0xff] }
0x16c5   :  { %15571 = vrcp.f32 %v7044_v56  ;;  %v7045_v18 = vadd.f32 1.0, %v15568_v58  ;;  %v19332_v4 = vrot.slane %v7190_v45, %v20439_v47 }
0x16c6   :  { %20438 = vst [vmem:[#allocation138_spill] sm:$0xff] %v19329_v32 }
0x16c7   :  { %15573 = vrcp.f32 %v7045_v18  ;;  %20440 = vst [vmem:[#allocation142_spill] sm:$0xff] %v19332_v4 }
0x16ce   :  { %v15570_v5 = vpop.eup %15569 }
0x16cf   :  { %v7054_v39 = vmul.f32 %v15570_v5, %v15566_v0  ;;  %v15572_v60 = vpop.eup %15571 }
0x16d0   :  { %v7053_v27 = vmul.f32 %v15572_v60, %v20435_v54  ;;  %v20441_v54 = vld [vmem:[#allocation125_spill] sm:$0xff] }
0x16d1   :  { %v15574_v59 = vpop.eup %15573 }
0x16d2   :  { %v7055_v26 = vadd.f32 %v7054_v39, %v7053_v27  ;;  %v19337_v27 = vrot.slane %v7190_v45, %v20441_v54  ;;  %v11693_v54 = vld [vmem:[%s16738_s27 + $0x2] sm:$0x1] }
0x16d4   :  { %15575 = vtanh.f32 %v7055_v26  ;;  %7061 = vst [vmem:[#allocation34 + $0x1] sm:$0x1] %v7055_v26  ;;  %v20442_v26 = vld [vmem:[#allocation124_spill] sm:$0xff] }
0x16de   :  { %v15576_v17 = vpop.eup %15575 }
0x16df   :  { %v19325_v53 = vmul.f32 %v15576_v17, %v15574_v59  ;;  %v19340_v59 = vrot.slane %v7190_v45, %v20442_v26 }
0x16e1   :  { %20436 = vst [vmem:[#allocation129_spill] sm:$0xff] %v19325_v53  ;;  %7059 = vst [vmem:[#allocation32 + $0x1] sm:$0x1] %v19325_v53 }
0x16f2   :  { %v7282_v58 = vpop.f32.mrb[46].mxu0  ;;  %v7353_v13 = vpop.f32.mrb[58].mxu1 }
0x16f3   :  { %v7283_v56 = vadd.f32 %v7282_v58, %v19329_v32  ;;  %v7284_v0 = vpop.f32.mrb[47].mxu0  ;;  %v7355_v5 = vpop.f32.mrb[59].mxu1  ;;  %v7354_v17 = vadd.f32 %v7353_v13, %v19337_v27 }
0x16f4   :  { %v7285_v39 = vadd.f32 %v7284_v0, %v19332_v4  ;;  %v7356_v47 = vadd.f32 %v7355_v5, %v19340_v59 }
0x16f5   :  { %v11694_v60 = vmul.f32 -1.442695, %v7283_v56  ;;  %v11696_v58 = vmul.f32 -1.442695, %v7354_v17  ;;  %v20448_v17 = vld [vmem:[#allocation148_spill] sm:$0xff] }
0x16f6   :  { %v11695_v18 = vmul.f32 -1.442695, %v7285_v39 }
0x16f7   :  { %15577 = vpow2.f32 %v11694_v60 }
0x16f8   :  { %15579 = vpow2.f32 %v11695_v18 }
0x16f9   :  { %15581 = vtanh.f32 %v7356_v47 }
0x16fa   :  { %15583 = vpow2.f32 %v11696_v58  ;;  %v20449_v58 = vld [vmem:[#allocation149_spill] sm:$0xff] }
0x1701   :  { %v15578_v50 = vpop.eup %15577 }
0x1702   :  { %v7367_v53 = vadd.f32 1.0, %v15578_v50  ;;  %v15580_v0 = vpop.eup %15579 }
0x1703   :  { %v7368_v56 = vadd.f32 1.0, %v15580_v0  ;;  %v15582_v39 = vpop.eup %15581  ;;  %v20450_v0 = vld [vmem:[#allocation150_spill] sm:$0xff] }
0x1704   :  { %15585 = vrcp.f32 %v7367_v53  ;;  %v15584_v60 = vpop.eup %15583  ;;  %v20443_v53 = vld [vmem:[#allocation137_spill] sm:$0xff] }
0x1705   :  { %15587 = vrcp.f32 %v7368_v56  ;;  %v7369_v26 = vadd.f32 1.0, %v15584_v60  ;;  %v20451_v56 = vld [vmem:[#allocation151_spill] sm:$0xff]  ;;  %v20453_v60 = vld [vmem:[#allocation153_spill] sm:$0xff] }
0x1707   :  { %15589 = vrcp.f32 %v7369_v26  ;;  %v20447_v26 = vld [vmem:[#allocation147_spill] sm:$0xff] }
0x170e   :  { %v15586_v18 = vpop.eup %15585 }
0x170f   :  { %v7378_v4 = vmul.f32 %v15586_v18, %v15582_v39  ;;  %v15588_v45 = vpop.eup %15587  ;;  %v20452_v39 = vld [vmem:[#allocation152_spill] sm:$0xff]  ;;  %v20454_v18 = vld [vmem:[#allocation154_spill] sm:$0xff] }
0x1710   :  { %v7377_v32 = vmul.f32 %v15588_v45, %v11693_v54  ;;  %v20446_v54 = vld [vmem:[#allocation146_spill] sm:$0xff]  ;;  %v20455_v45 = vld [vmem:[#allocation155_spill] sm:$0xff] }
0x1711   :  { %v15590_v50 = vpop.eup %15589 }
0x1712   :  { %v19345_v13 = vadd.f32 %v7378_v4, %v7377_v32  ;;  %v20444_v32 = vld [vmem:[#allocation144_spill] sm:$0xff]  ;;  %v20445_v4 = vld [vmem:[#allocation145_spill] sm:$0xff] }
0x1714   :  { %15591 = vtanh.f32 %v19345_v13 }
0x171e   :  { %v15592_v47 = vpop.eup %15591 }
0x171f   :  { %v7381_v5 = vmul.f32 %v15592_v47, %v15590_v50  ;;  %v20456_v50 = vld [vmem:[#allocation156_spill] sm:$0xff]  ;;  %v20457_v47 = vld [vmem:[#allocation157_spill] sm:$0xff] }
0x1721   :  { %7382 = vst [vmem:[#allocation2] sm:$0x1] %v7381_v5  ;;  %7447 = vmatprep.mubr.f32.mxu0 %v7381_v5  ;;  %7518 = vmatprep.mubr.f32.mxu1 %v7381_v5  ;;  %v20458_v5 = vld [vmem:[#allocation158_spill] sm:$0xff] }
0x1722   :  { %7448 = vmatmul.mubr.f32.vlgmr.msra.gmra.mrb[48].mxu0 %v20443_v53  ;;  %7519 = vmatmul.mubr.f32.vlgmr.msra.gmra.mrb[60].mxu1 %v20443_v53  ;;  %v20459_v53 = vld [vmem:[#allocation159_spill] sm:$0xff] }
0x1723   :  { %13992 = vmatpush1.bf16.msra.mxu0 %v18948_v52  ;;  %14056 = vmatpush1.bf16.msra.mxu1 %v18950_v55 }
0x1724   :  { %13994 = vmatprep.subr.bf16.mxu0 %v18955_v19  ;;  %14058 = vmatprep.subr.bf16.mxu1 %v18957_v20 }
0x1727   :  { %13996 = vmatpush1.bf16.msra.mxu0 %v18968_v6  ;;  %14060 = vmatpush1.bf16.msra.mxu1 %v18970_v2 }
0x1728   :  { %13998 = vmatprep.subr.bf16.mxu0 %v18976_v24  ;;  %14062 = vmatprep.subr.bf16.mxu1 %v18978_v57 }
0x172b   :  { %14000 = vmatpush1.bf16.msra.mxu0 %v18988_v46  ;;  %14064 = vmatpush1.bf16.msra.mxu1 %v18990_v31 }
0x172c   :  { %14002 = vmatprep.subr.bf16.mxu0 %v18996_v7  ;;  %14066 = vmatprep.subr.bf16.mxu1 %v18998_v34 }
0x172f   :  { %14004 = vmatpush1.bf16.msra.mxu0 %v19008_v36  ;;  %14068 = vmatpush1.bf16.msra.mxu1 %v19010_v25 }
0x1730   :  { %14006 = vmatprep.subr.bf16.mxu0 %v19016_v8  ;;  %14070 = vmatprep.subr.bf16.mxu1 %v19018_v49 }
0x1733   :  { %14008 = vmatpush1.bf16.msra.mxu0 %v19028_v51  ;;  %14072 = vmatpush1.bf16.msra.mxu1 %v19030_v3 }
0x1734   :  { %14010 = vmatprep.subr.bf16.mxu0 %v19036_v9  ;;  %14074 = vmatprep.subr.bf16.mxu1 %v19038_v10 }
0x1737   :  { %14012 = vmatpush1.bf16.msra.mxu0 %v19048_v41  ;;  %14076 = vmatpush1.bf16.msra.mxu1 %v19050_v30 }
0x1738   :  { %14014 = vmatprep.subr.bf16.mxu0 %v19056_v11  ;;  %14078 = vmatprep.subr.bf16.mxu1 %v19058_v43 }
0x173b   :  { %14016 = vmatpush1.bf16.msra.mxu0 %v19068_v62  ;;  %14080 = vmatpush1.bf16.msra.mxu1 %v19070_v14 }
0x173c   :  { %14018 = vmatprep.subr.bf16.mxu0 %v19076_v1  ;;  %14082 = vmatprep.subr.bf16.mxu1 %v19078_v12 }
0x173f   :  { %14020 = vmatpush1.bf16.msra.mxu0 %v19088_v48  ;;  %14084 = vmatpush1.bf16.msra.mxu1 %v19090_v40 }
0x1740   :  { %14022 = vmatprep.subr.bf16.mxu0 %v19096_v63  ;;  %14086 = vmatprep.subr.bf16.mxu1 %v19098_v37 }
0x1743   :  { %14024 = vmatpush1.bf16.msra.mxu0 %v19108_v21  ;;  %14088 = vmatpush1.bf16.msra.mxu1 %v19110_v44 }
0x1744   :  { %14026 = vmatprep.subr.bf16.mxu0 %v19116_v23  ;;  %14090 = vmatprep.subr.bf16.mxu1 %v19118_v22 }
0x1747   :  { %14028 = vmatpush1.bf16.msra.mxu0 %v19128_v15  ;;  %14092 = vmatpush1.bf16.msra.mxu1 %v19130_v35 }
0x1748   :  { %14030 = vmatprep.subr.bf16.mxu0 %v19136_v28  ;;  %14094 = vmatprep.subr.bf16.mxu1 %v19138_v16 }
0x174b   :  { %14032 = vmatpush1.bf16.msra.mxu0 %v19148_v33  ;;  %14096 = vmatpush1.bf16.msra.mxu1 %v19150_v38 }
0x174c   :  { %14034 = vmatprep.subr.bf16.mxu0 %v20421_v61  ;;  %14098 = vmatprep.subr.bf16.mxu1 %v20422_v29 }
0x174f   :  { %14036 = vmatpush1.bf16.msra.mxu0 %v20423_v42  ;;  %14100 = vmatpush1.bf16.msra.mxu1 %v20444_v32 }
0x1750   :  { %14038 = vmatprep.subr.bf16.mxu0 %v20445_v4  ;;  %14102 = vmatprep.subr.bf16.mxu1 %v20446_v54  ;;  %v20464_v54 = vld [vmem:[#allocation142_spill] sm:$0xff] }
0x1753   :  { %14040 = vmatpush1.bf16.msra.mxu0 %v20447_v26  ;;  %14104 = vmatpush1.bf16.msra.mxu1 %v20448_v17  ;;  %v20463_v17 = vld [vmem:[#allocation138_spill] sm:$0xff] }
0x1754   :  { %14042 = vmatprep.subr.bf16.mxu0 %v20449_v58  ;;  %14106 = vmatprep.subr.bf16.mxu1 %v20450_v0  ;;  %v20460_v58 = vld [vmem:[#allocation139_spill] sm:$0xff]  ;;  %v20461_v0 = vld [vmem:[#allocation133_spill] sm:$0xff] }
0x1757   :  { %14044 = vmatpush1.bf16.msra.mxu0 %v20451_v56  ;;  %14108 = vmatpush1.bf16.msra.mxu1 %v20452_v39  ;;  %v20462_v56 = vld [vmem:[#allocation134_spill] sm:$0xff] }
0x1758   :  { %14046 = vmatprep.subr.bf16.mxu0 %v20453_v60  ;;  %14110 = vmatprep.subr.bf16.mxu1 %v20454_v18 }
0x175b   :  { %14048 = vmatpush1.bf16.msra.mxu0 %v20455_v45  ;;  %14112 = vmatpush1.bf16.msra.mxu1 %v20456_v50 }
0x175c   :  { %14050 = vmatprep.subr.bf16.mxu0 %v20457_v47  ;;  %14114 = vmatprep.subr.bf16.mxu1 %v20458_v5 }
0x175f   :  { %14052 = vmatpush1.bf16.msra.mxu0 %v20459_v53  ;;  %14116 = vmatpush1.bf16.msra.mxu1 %v20460_v58 }
0x1760   :  { %14118 = vmatprep.subr.bf16.mxu0 %v20461_v0  ;;  %14182 = vmatprep.subr.bf16.mxu1 %v20462_v56 }
0x17f5   :  { %v7449_v39 = vpop.f32.mrb[48].mxu0  ;;  %v7520_v60 = vpop.f32.mrb[60].mxu1 }
0x17f6   :  { %v7450_v18 = vadd.f32 %v7449_v39, %v20463_v17  ;;  %v7451_v26 = vpop.f32.mrb[49].mxu0  ;;  %v7522_v45 = vpop.f32.mrb[61].mxu1  ;;  %v7521_v53 = vadd.f32 %v7520_v60, %v19337_v27 }
0x17f7   :  { %v7452_v50 = vadd.f32 %v7451_v26, %v20464_v54  ;;  %v7523_v58 = vadd.f32 %v7522_v45, %v19340_v59 }
0x17f8   :  { %v11697_v4 = vmul.f32 -1.442695, %v7450_v18  ;;  %v11699_v5 = vmul.f32 -1.442695, %v7521_v53  ;;  %v20471_v53 = vld [vmem:[#allocation148_spill] sm:$0xff] }
0x17f9   :  { %v11698_v47 = vmul.f32 -1.442695, %v7452_v50 }
0x17fa   :  { %15593 = vpow2.f32 %v11697_v4 }
0x17fb   :  { %15595 = vpow2.f32 %v11698_v47 }
0x17fc   :  { %15597 = vtanh.f32 %v7523_v58 }
0x17fd   :  { %15599 = vpow2.f32 %v11699_v5  ;;  %v20470_v5 = vld [vmem:[#allocation147_spill] sm:$0xff] }
0x1804   :  { %v15594_v0 = vpop.eup %15593 }
0x1805   :  { %v7534_v32 = vadd.f32 1.0, %v15594_v0  ;;  %v15596_v56 = vpop.eup %15595 }
0x1806   :  { %v7535_v39 = vadd.f32 1.0, %v15596_v56  ;;  %v15598_v17 = vpop.eup %15597  ;;  %v20469_v56 = vld [vmem:[#allocation146_spill] sm:$0xff] }
0x1807   :  { %15601 = vrcp.f32 %v7534_v32  ;;  %v15600_v42 = vpop.eup %15599  ;;  %v20465_v32 = vld [vmem:[#allocation130_spill] sm:$0xff] }
0x1808   :  { %15603 = vrcp.f32 %v7535_v39  ;;  %v7536_v4 = vadd.f32 1.0, %v15600_v42  ;;  %v20466_v42 = vld [vmem:[#allocation143_spill] sm:$0xff]  ;;  %v20472_v39 = vld [vmem:[#allocation149_spill] sm:$0xff] }
0x180a   :  { %15605 = vrcp.f32 %v7536_v4  ;;  %v20476_v4 = vld [vmem:[#allocation153_spill] sm:$0xff] }
0x1811   :  { %v15602_v26 = vpop.eup %15601 }
0x1812   :  { %v7545_v18 = vmul.f32 %v15602_v26, %v15598_v17  ;;  %v15604_v50 = vpop.eup %15603  ;;  %v20468_v17 = vld [vmem:[#allocation145_spill] sm:$0xff]  ;;  %v20473_v26 = vld [vmem:[#allocation150_spill] sm:$0xff] }
0x1813   :  { %v7544_v47 = vmul.f32 %v15604_v50, %v19345_v13  ;;  %v20467_v13 = vld [vmem:[#allocation144_spill] sm:$0xff] }
0x1814   :  { %v15606_v0 = vpop.eup %15605  ;;  %v20475_v50 = vld [vmem:[#allocation152_spill] sm:$0xff] }
0x1815   :  { %v19419_v60 = vadd.f32 %v7545_v18, %v7544_v47  ;;  %v20474_v18 = vld [vmem:[#allocation151_spill] sm:$0xff]  ;;  %v20477_v47 = vld [vmem:[#allocation154_spill] sm:$0xff] }
0x1817   :  { %15607 = vtanh.f32 %v19419_v60 }
0x1821   :  { %v15608_v58 = vpop.eup %15607 }
0x1822   :  { %v7548_v45 = vmul.f32 %v15608_v58, %v15606_v0  ;;  %v20478_v0 = vld [vmem:[#allocation155_spill] sm:$0xff]  ;;  %v20479_v58 = vld [vmem:[#allocation156_spill] sm:$0xff] }
0x1824   :  { %7549 = vst [vmem:[#allocation2 + $0x1] sm:$0x1] %v7548_v45  ;;  %7614 = vmatprep.mubr.f32.mxu0 %v7548_v45  ;;  %7685 = vmatprep.mubr.f32.mxu1 %v7548_v45  ;;  %v20480_v45 = vld [vmem:[#allocation157_spill] sm:$0xff] }
0x1825   :  { %7615 = vmatmul.mubr.f32.vlgmr.msra.gmra.mrb[50].mxu0 %v20465_v32  ;;  %7686 = vmatmul.mubr.f32.vlgmr.msra.gmra.mrb[62].mxu1 %v20465_v32  ;;  %v20481_v32 = vld [vmem:[#allocation158_spill] sm:$0xff] }
0x1826   :  { %14120 = vmatpush1.bf16.msra.mxu0 %v18948_v52  ;;  %14184 = vmatpush1.bf16.msra.mxu1 %v18950_v55 }
0x1827   :  { %14122 = vmatprep.subr.bf16.mxu0 %v18955_v19  ;;  %14186 = vmatprep.subr.bf16.mxu1 %v18957_v20 }
0x182a   :  { %14124 = vmatpush1.bf16.msra.mxu0 %v18968_v6  ;;  %14188 = vmatpush1.bf16.msra.mxu1 %v18970_v2 }
0x182b   :  { %14126 = vmatprep.subr.bf16.mxu0 %v18976_v24  ;;  %14190 = vmatprep.subr.bf16.mxu1 %v18978_v57 }
0x182e   :  { %14128 = vmatpush1.bf16.msra.mxu0 %v18988_v46  ;;  %14192 = vmatpush1.bf16.msra.mxu1 %v18990_v31 }
0x182f   :  { %14130 = vmatprep.subr.bf16.mxu0 %v18996_v7  ;;  %14194 = vmatprep.subr.bf16.mxu1 %v18998_v34 }
0x1832   :  { %14132 = vmatpush1.bf16.msra.mxu0 %v19008_v36  ;;  %14196 = vmatpush1.bf16.msra.mxu1 %v19010_v25 }
0x1833   :  { %14134 = vmatprep.subr.bf16.mxu0 %v19016_v8  ;;  %14198 = vmatprep.subr.bf16.mxu1 %v19018_v49 }
0x1836   :  { %14136 = vmatpush1.bf16.msra.mxu0 %v19028_v51  ;;  %14200 = vmatpush1.bf16.msra.mxu1 %v19030_v3 }
0x1837   :  { %14138 = vmatprep.subr.bf16.mxu0 %v19036_v9  ;;  %14202 = vmatprep.subr.bf16.mxu1 %v19038_v10 }
0x183a   :  { %14140 = vmatpush1.bf16.msra.mxu0 %v19048_v41  ;;  %14204 = vmatpush1.bf16.msra.mxu1 %v19050_v30 }
0x183b   :  { %14142 = vmatprep.subr.bf16.mxu0 %v19056_v11  ;;  %14206 = vmatprep.subr.bf16.mxu1 %v19058_v43 }
0x183e   :  { %14144 = vmatpush1.bf16.msra.mxu0 %v19068_v62  ;;  %14208 = vmatpush1.bf16.msra.mxu1 %v19070_v14 }
0x183f   :  { %14146 = vmatprep.subr.bf16.mxu0 %v19076_v1  ;;  %14210 = vmatprep.subr.bf16.mxu1 %v19078_v12 }
0x1842   :  { %14148 = vmatpush1.bf16.msra.mxu0 %v19088_v48  ;;  %14212 = vmatpush1.bf16.msra.mxu1 %v19090_v40 }
0x1843   :  { %14150 = vmatprep.subr.bf16.mxu0 %v19096_v63  ;;  %14214 = vmatprep.subr.bf16.mxu1 %v19098_v37 }
0x1846   :  { %14152 = vmatpush1.bf16.msra.mxu0 %v19108_v21  ;;  %14216 = vmatpush1.bf16.msra.mxu1 %v19110_v44 }
0x1847   :  { %14154 = vmatprep.subr.bf16.mxu0 %v19116_v23  ;;  %14218 = vmatprep.subr.bf16.mxu1 %v19118_v22 }
0x184a   :  { %14156 = vmatpush1.bf16.msra.mxu0 %v19128_v15  ;;  %14220 = vmatpush1.bf16.msra.mxu1 %v19130_v35 }
0x184b   :  { %14158 = vmatprep.subr.bf16.mxu0 %v19136_v28  ;;  %14222 = vmatprep.subr.bf16.mxu1 %v19138_v16 }
0x184e   :  { %14160 = vmatpush1.bf16.msra.mxu0 %v19148_v33  ;;  %14224 = vmatpush1.bf16.msra.mxu1 %v19150_v38 }
0x184f   :  { %14162 = vmatprep.subr.bf16.mxu0 %v20421_v61  ;;  %14226 = vmatprep.subr.bf16.mxu1 %v20422_v29 }
0x1852   :  { %14164 = vmatpush1.bf16.msra.mxu0 %v20466_v42  ;;  %14228 = vmatpush1.bf16.msra.mxu1 %v20467_v13 }
0x1853   :  { %14166 = vmatprep.subr.bf16.mxu0 %v20468_v17  ;;  %14230 = vmatprep.subr.bf16.mxu1 %v20469_v56 }
0x1856   :  { %14168 = vmatpush1.bf16.msra.mxu0 %v20470_v5  ;;  %14232 = vmatpush1.bf16.msra.mxu1 %v20471_v53  ;;  %v20482_v53 = vld [vmem:[#allocation159_spill] sm:$0xff]  ;;  %v20486_v5 = vld [vmem:[#allocation138_spill] sm:$0xff] }
0x1857   :  { %14170 = vmatprep.subr.bf16.mxu0 %v20472_v39  ;;  %14234 = vmatprep.subr.bf16.mxu1 %v20473_v26  ;;  %v20483_v39 = vld [vmem:[#allocation139_spill] sm:$0xff]  ;;  %v20484_v26 = vld [vmem:[#allocation133_spill] sm:$0xff] }
0x185a   :  { %14172 = vmatpush1.bf16.msra.mxu0 %v20474_v18  ;;  %14236 = vmatpush1.bf16.msra.mxu1 %v20475_v50  ;;  %v20485_v18 = vld [vmem:[#allocation134_spill] sm:$0xff] }
0x185b   :  { %14174 = vmatprep.subr.bf16.mxu0 %v20476_v4  ;;  %14238 = vmatprep.subr.bf16.mxu1 %v20477_v47 }
0x185e   :  { %14176 = vmatpush1.bf16.msra.mxu0 %v20478_v0  ;;  %14240 = vmatpush1.bf16.msra.mxu1 %v20479_v58 }
0x185f   :  { %14178 = vmatprep.subr.bf16.mxu0 %v20480_v45  ;;  %14242 = vmatprep.subr.bf16.mxu1 %v20481_v32 }
0x1862   :  { %14180 = vmatpush1.bf16.msra.mxu0 %v20482_v53  ;;  %14244 = vmatpush1.bf16.msra.mxu1 %v20483_v39 }
0x1863   :  { %14246 = vmatprep.subr.bf16.mxu0 %v20484_v26  ;;  %14310 = vmatprep.subr.bf16.mxu1 %v20485_v18 }
0x18f8   :  { %v7616_v50 = vpop.f32.mrb[50].mxu0  ;;  %v7687_v4 = vpop.f32.mrb[62].mxu1 }
0x18f9   :  { %v7617_v47 = vadd.f32 %v7616_v50, %v20486_v5  ;;  %v7618_v56 = vpop.f32.mrb[51].mxu0  ;;  %v7689_v0 = vpop.f32.mrb[63].mxu1  ;;  %v7688_v53 = vadd.f32 %v7687_v4, %v19337_v27 }
0x18fa   :  { %v7619_v58 = vadd.f32 %v7618_v56, %v20464_v54  ;;  %v7690_v39 = vadd.f32 %v7689_v0, %v19340_v59  ;;  %v20492_v0 = vld [vmem:[#allocation147_spill] sm:$0xff] }
0x18fb   :  { %v11700_v17 = vmul.f32 -1.442695, %v7617_v47  ;;  %v11702_v32 = vmul.f32 -1.442695, %v7688_v53 }
0x18fc   :  { %v11701_v45 = vmul.f32 -1.442695, %v7619_v58 }
0x18fd   :  { %15609 = vpow2.f32 %v11700_v17 }
0x18fe   :  { %15611 = vpow2.f32 %v11701_v45 }
0x18ff   :  { %15613 = vtanh.f32 %v7690_v39 }
0x1900   :  { %15615 = vpow2.f32 %v11702_v32  ;;  %v20493_v32 = vld [vmem:[#allocation148_spill] sm:$0xff] }
0x1907   :  { %v15610_v26 = vpop.eup %15609 }
0x1908   :  { %v7701_v13 = vadd.f32 1.0, %v15610_v26  ;;  %v15612_v18 = vpop.eup %15611 }
0x1909   :  { %v7702_v50 = vadd.f32 1.0, %v15612_v18  ;;  %v15614_v5 = vpop.eup %15613  ;;  %v20491_v18 = vld [vmem:[#allocation146_spill] sm:$0xff] }
0x190a   :  { %15617 = vrcp.f32 %v7701_v13  ;;  %v15616_v42 = vpop.eup %15615  ;;  %v20487_v13 = vld [vmem:[#allocation141_spill] sm:$0xff] }
0x190b   :  { %15619 = vrcp.f32 %v7702_v50  ;;  %v7703_v17 = vadd.f32 1.0, %v15616_v42  ;;  %v20489_v42 = vld [vmem:[#allocation144_spill] sm:$0xff]  ;;  %v20494_v50 = vld [vmem:[#allocation149_spill] sm:$0xff] }
0x190d   :  { %15621 = vrcp.f32 %v7703_v17  ;;  %v20498_v17 = vld [vmem:[#allocation153_spill] sm:$0xff] }
0x1914   :  { %v15618_v56 = vpop.eup %15617 }
0x1915   :  { %v7712_v47 = vmul.f32 %v15618_v56, %v15614_v5  ;;  %v15620_v58 = vpop.eup %15619  ;;  %v20490_v5 = vld [vmem:[#allocation145_spill] sm:$0xff]  ;;  %v20495_v56 = vld [vmem:[#allocation150_spill] sm:$0xff] }
0x1916   :  { %v7711_v45 = vmul.f32 %v15620_v58, %v19419_v60  ;;  %v20488_v60 = vld [vmem:[#allocation143_spill] sm:$0xff]  ;;  %v20497_v58 = vld [vmem:[#allocation152_spill] sm:$0xff] }
0x1917   :  { %v15622_v53 = vpop.eup %15621 }
0x1918   :  { %v19493_v4 = vadd.f32 %v7712_v47, %v7711_v45  ;;  %v20496_v47 = vld [vmem:[#allocation151_spill] sm:$0xff]  ;;  %v20499_v45 = vld [vmem:[#allocation154_spill] sm:$0xff] }
0x191a   :  { %15623 = vtanh.f32 %v19493_v4 }
0x1924   :  { %v15624_v39 = vpop.eup %15623 }
0x1925   :  { %v7715_v26 = vmul.f32 %v15624_v39, %v15622_v53  ;;  %v20500_v53 = vld [vmem:[#allocation155_spill] sm:$0xff]  ;;  %v20501_v39 = vld [vmem:[#allocation156_spill] sm:$0xff] }
0x1927   :  { %7716 = vst [vmem:[#allocation2 + $0x2] sm:$0x1] %v7715_v26  ;;  %7781 = vmatprep.mubr.f32.mxu0 %v7715_v26  ;;  %7852 = vmatprep.mubr.f32.mxu1 %v7715_v26  ;;  %v20502_v26 = vld [vmem:[#allocation157_spill] sm:$0xff] }
0x1928   :  { %7782 = vmatmul.mubr.f32.vlgmr.msra.gmra.mrb[52].mxu0 %v20487_v13  ;;  %7853 = vmatmul.mubr.f32.vlgmr.msra.gmra.mrb[64].mxu1 %v20487_v13  ;;  %v20503_v13 = vld [vmem:[#allocation158_spill] sm:$0xff] }
0x1929   :  { %14248 = vmatpush1.bf16.msra.mxu0 %v18948_v52  ;;  %14312 = vmatpush1.bf16.msra.mxu1 %v18950_v55 }
0x192a   :  { %14250 = vmatprep.subr.bf16.mxu0 %v18955_v19  ;;  %14314 = vmatprep.subr.bf16.mxu1 %v18957_v20 }
0x192d   :  { %14252 = vmatpush1.bf16.msra.mxu0 %v18968_v6  ;;  %14316 = vmatpush1.bf16.msra.mxu1 %v18970_v2 }
0x192e   :  { %14254 = vmatprep.subr.bf16.mxu0 %v18976_v24  ;;  %14318 = vmatprep.subr.bf16.mxu1 %v18978_v57 }
0x1931   :  { %14256 = vmatpush1.bf16.msra.mxu0 %v18988_v46  ;;  %14320 = vmatpush1.bf16.msra.mxu1 %v18990_v31 }
0x1932   :  { %14258 = vmatprep.subr.bf16.mxu0 %v18996_v7  ;;  %14322 = vmatprep.subr.bf16.mxu1 %v18998_v34 }
0x1935   :  { %14260 = vmatpush1.bf16.msra.mxu0 %v19008_v36  ;;  %14324 = vmatpush1.bf16.msra.mxu1 %v19010_v25 }
0x1936   :  { %14262 = vmatprep.subr.bf16.mxu0 %v19016_v8  ;;  %14326 = vmatprep.subr.bf16.mxu1 %v19018_v49 }
0x1939   :  { %14264 = vmatpush1.bf16.msra.mxu0 %v19028_v51  ;;  %14328 = vmatpush1.bf16.msra.mxu1 %v19030_v3 }
0x193a   :  { %14266 = vmatprep.subr.bf16.mxu0 %v19036_v9  ;;  %14330 = vmatprep.subr.bf16.mxu1 %v19038_v10 }
0x193d   :  { %14268 = vmatpush1.bf16.msra.mxu0 %v19048_v41  ;;  %14332 = vmatpush1.bf16.msra.mxu1 %v19050_v30 }
0x193e   :  { %14270 = vmatprep.subr.bf16.mxu0 %v19056_v11  ;;  %14334 = vmatprep.subr.bf16.mxu1 %v19058_v43 }
0x1941   :  { %14272 = vmatpush1.bf16.msra.mxu0 %v19068_v62  ;;  %14336 = vmatpush1.bf16.msra.mxu1 %v19070_v14 }
0x1942   :  { %14274 = vmatprep.subr.bf16.mxu0 %v19076_v1  ;;  %14338 = vmatprep.subr.bf16.mxu1 %v19078_v12 }
0x1945   :  { %14276 = vmatpush1.bf16.msra.mxu0 %v19088_v48  ;;  %14340 = vmatpush1.bf16.msra.mxu1 %v19090_v40 }
0x1946   :  { %14278 = vmatprep.subr.bf16.mxu0 %v19096_v63  ;;  %14342 = vmatprep.subr.bf16.mxu1 %v19098_v37 }
0x1949   :  { %14280 = vmatpush1.bf16.msra.mxu0 %v19108_v21  ;;  %14344 = vmatpush1.bf16.msra.mxu1 %v19110_v44 }
0x194a   :  { %14282 = vmatprep.subr.bf16.mxu0 %v19116_v23  ;;  %14346 = vmatprep.subr.bf16.mxu1 %v19118_v22 }
0x194d   :  { %14284 = vmatpush1.bf16.msra.mxu0 %v19128_v15  ;;  %14348 = vmatpush1.bf16.msra.mxu1 %v19130_v35 }
0x194e   :  { %14286 = vmatprep.subr.bf16.mxu0 %v19136_v28  ;;  %14350 = vmatprep.subr.bf16.mxu1 %v19138_v16 }
0x1951   :  { %14288 = vmatpush1.bf16.msra.mxu0 %v19148_v33  ;;  %14352 = vmatpush1.bf16.msra.mxu1 %v19150_v38 }
0x1952   :  { %14290 = vmatprep.subr.bf16.mxu0 %v20421_v61  ;;  %14354 = vmatprep.subr.bf16.mxu1 %v20422_v29 }
0x1955   :  { %14292 = vmatpush1.bf16.msra.mxu0 %v20488_v60  ;;  %14356 = vmatpush1.bf16.msra.mxu1 %v20489_v42 }
0x1956   :  { %14294 = vmatprep.subr.bf16.mxu0 %v20490_v5  ;;  %14358 = vmatprep.subr.bf16.mxu1 %v20491_v18 }
0x1959   :  { %14296 = vmatpush1.bf16.msra.mxu0 %v20492_v0  ;;  %14360 = vmatpush1.bf16.msra.mxu1 %v20493_v32  ;;  %v20504_v32 = vld [vmem:[#allocation159_spill] sm:$0xff]  ;;  %v20508_v0 = vld [vmem:[#allocation138_spill] sm:$0xff] }
0x195a   :  { %14298 = vmatprep.subr.bf16.mxu0 %v20494_v50  ;;  %14362 = vmatprep.subr.bf16.mxu1 %v20495_v56  ;;  %v20505_v50 = vld [vmem:[#allocation139_spill] sm:$0xff]  ;;  %v20506_v56 = vld [vmem:[#allocation133_spill] sm:$0xff] }
0x195d   :  { %14300 = vmatpush1.bf16.msra.mxu0 %v20496_v47  ;;  %14364 = vmatpush1.bf16.msra.mxu1 %v20497_v58  ;;  %v20507_v47 = vld [vmem:[#allocation134_spill] sm:$0xff] }
0x195e   :  { %14302 = vmatprep.subr.bf16.mxu0 %v20498_v17  ;;  %14366 = vmatprep.subr.bf16.mxu1 %v20499_v45 }
0x1961   :  { %14304 = vmatpush1.bf16.msra.mxu0 %v20500_v53  ;;  %14368 = vmatpush1.bf16.msra.mxu1 %v20501_v39 }
0x1962   :  { %14306 = vmatprep.subr.bf16.mxu0 %v20502_v26  ;;  %14370 = vmatprep.subr.bf16.mxu1 %v20503_v13 }
0x1965   :  { %14308 = vmatpush1.bf16.msra.mxu0 %v20504_v32  ;;  %14372 = vmatpush1.bf16.msra.mxu1 %v20505_v50 }
0x1966   :  { %14374 = vmatprep.subr.bf16.mxu0 %v20506_v56  ;;  %14438 = vmatprep.subr.bf16.mxu1 %v20507_v47 }
0x19fb   :  { %v7783_v58 = vpop.f32.mrb[52].mxu0  ;;  %v7854_v17 = vpop.f32.mrb[64].mxu1 }
0x19fc   :  { %v7784_v45 = vadd.f32 %v7783_v58, %v20508_v0  ;;  %v7785_v18 = vpop.f32.mrb[53].mxu0  ;;  %v7856_v53 = vpop.f32.mrb[65].mxu1  ;;  %v7855_v32 = vadd.f32 %v7854_v17, %v19337_v27 }
0x19fd   :  { %v7786_v39 = vadd.f32 %v7785_v18, %v20464_v54  ;;  %v7857_v50 = vadd.f32 %v7856_v53, %v19340_v59  ;;  %v20514_v53 = vld [vmem:[#allocation147_spill] sm:$0xff] }
0x19fe   :  { %v11703_v5 = vmul.f32 -1.442695, %v7784_v45  ;;  %v11705_v13 = vmul.f32 -1.442695, %v7855_v32 }
0x19ff   :  { %v11704_v26 = vmul.f32 -1.442695, %v7786_v39 }
0x1a00   :  { %15625 = vpow2.f32 %v11703_v5 }
0x1a01   :  { %15627 = vpow2.f32 %v11704_v26 }
0x1a02   :  { %15629 = vtanh.f32 %v7857_v50 }
0x1a03   :  { %15631 = vpow2.f32 %v11705_v13  ;;  %v20515_v13 = vld [vmem:[#allocation148_spill] sm:$0xff] }
0x1a0a   :  { %v15626_v56 = vpop.eup %15625 }
0x1a0b   :  { %v7868_v42 = vadd.f32 1.0, %v15626_v56  ;;  %v15628_v47 = vpop.eup %15627 }
0x1a0c   :  { %v7869_v58 = vadd.f32 1.0, %v15628_v47  ;;  %v15630_v0 = vpop.eup %15629  ;;  %v20513_v47 = vld [vmem:[#allocation146_spill] sm:$0xff] }
0x1a0d   :  { %15633 = vrcp.f32 %v7868_v42  ;;  %v15632_v60 = vpop.eup %15631  ;;  %v20509_v42 = vld [vmem:[#allocation131_spill] sm:$0xff] }
0x1a0e   :  { %15635 = vrcp.f32 %v7869_v58  ;;  %v7870_v5 = vadd.f32 1.0, %v15632_v60  ;;  %v20511_v60 = vld [vmem:[#allocation144_spill] sm:$0xff]  ;;  %v20516_v58 = vld [vmem:[#allocation149_spill] sm:$0xff] }
0x1a10   :  { %15637 = vrcp.f32 %v7870_v5  ;;  %v20520_v5 = vld [vmem:[#allocation153_spill] sm:$0xff] }
0x1a17   :  { %v15634_v18 = vpop.eup %15633 }
0x1a18   :  { %v7879_v45 = vmul.f32 %v15634_v18, %v15630_v0  ;;  %v15636_v39 = vpop.eup %15635  ;;  %v20512_v0 = vld [vmem:[#allocation145_spill] sm:$0xff]  ;;  %v20517_v18 = vld [vmem:[#allocation150_spill] sm:$0xff] }
0x1a19   :  { %v7878_v26 = vmul.f32 %v15636_v39, %v19493_v4  ;;  %v20510_v4 = vld [vmem:[#allocation143_spill] sm:$0xff]  ;;  %v20519_v39 = vld [vmem:[#allocation152_spill] sm:$0xff] }
0x1a1a   :  { %v15638_v32 = vpop.eup %15637 }
0x1a1b   :  { %v19567_v17 = vadd.f32 %v7879_v45, %v7878_v26  ;;  %v20518_v45 = vld [vmem:[#allocation151_spill] sm:$0xff]  ;;  %v20521_v26 = vld [vmem:[#allocation154_spill] sm:$0xff] }
0x1a1d   :  { %15639 = vtanh.f32 %v19567_v17 }
0x1a27   :  { %v15640_v50 = vpop.eup %15639 }
0x1a28   :  { %v7882_v56 = vmul.f32 %v15640_v50, %v15638_v32  ;;  %v20522_v32 = vld [vmem:[#allocation155_spill] sm:$0xff]  ;;  %v20523_v50 = vld [vmem:[#allocation156_spill] sm:$0xff] }
0x1a2a   :  { %7883 = vst [vmem:[#allocation2 + $0x3] sm:$0x1] %v7882_v56  ;;  %7948 = vmatprep.mubr.f32.mxu0 %v7882_v56  ;;  %8019 = vmatprep.mubr.f32.mxu1 %v7882_v56  ;;  %v20524_v56 = vld [vmem:[#allocation157_spill] sm:$0xff] }
0x1a2b   :  { %7949 = vmatmul.mubr.f32.vlgmr.msra.gmra.mrb[54].mxu0 %v20509_v42  ;;  %8020 = vmatmul.mubr.f32.vlgmr.msra.gmra.mrb[66].mxu1 %v20509_v42  ;;  %v20525_v42 = vld [vmem:[#allocation158_spill] sm:$0xff] }
0x1a2c   :  { %14376 = vmatpush1.bf16.msra.mxu0 %v18948_v52  ;;  %14440 = vmatpush1.bf16.msra.mxu1 %v18950_v55 }
0x1a2d   :  { %14378 = vmatprep.subr.bf16.mxu0 %v18955_v19  ;;  %14442 = vmatprep.subr.bf16.mxu1 %v18957_v20 }
0x1a30   :  { %14380 = vmatpush1.bf16.msra.mxu0 %v18968_v6  ;;  %14444 = vmatpush1.bf16.msra.mxu1 %v18970_v2 }
0x1a31   :  { %14382 = vmatprep.subr.bf16.mxu0 %v18976_v24  ;;  %14446 = vmatprep.subr.bf16.mxu1 %v18978_v57 }
0x1a34   :  { %14384 = vmatpush1.bf16.msra.mxu0 %v18988_v46  ;;  %14448 = vmatpush1.bf16.msra.mxu1 %v18990_v31 }
0x1a35   :  { %14386 = vmatprep.subr.bf16.mxu0 %v18996_v7  ;;  %14450 = vmatprep.subr.bf16.mxu1 %v18998_v34 }
0x1a38   :  { %14388 = vmatpush1.bf16.msra.mxu0 %v19008_v36  ;;  %14452 = vmatpush1.bf16.msra.mxu1 %v19010_v25 }
0x1a39   :  { %14390 = vmatprep.subr.bf16.mxu0 %v19016_v8  ;;  %14454 = vmatprep.subr.bf16.mxu1 %v19018_v49 }
0x1a3c   :  { %14392 = vmatpush1.bf16.msra.mxu0 %v19028_v51  ;;  %14456 = vmatpush1.bf16.msra.mxu1 %v19030_v3 }
0x1a3d   :  { %14394 = vmatprep.subr.bf16.mxu0 %v19036_v9  ;;  %14458 = vmatprep.subr.bf16.mxu1 %v19038_v10 }
0x1a40   :  { %14396 = vmatpush1.bf16.msra.mxu0 %v19048_v41  ;;  %14460 = vmatpush1.bf16.msra.mxu1 %v19050_v30 }
0x1a41   :  { %14398 = vmatprep.subr.bf16.mxu0 %v19056_v11  ;;  %14462 = vmatprep.subr.bf16.mxu1 %v19058_v43 }
0x1a44   :  { %14400 = vmatpush1.bf16.msra.mxu0 %v19068_v62  ;;  %14464 = vmatpush1.bf16.msra.mxu1 %v19070_v14 }
0x1a45   :  { %14402 = vmatprep.subr.bf16.mxu0 %v19076_v1  ;;  %14466 = vmatprep.subr.bf16.mxu1 %v19078_v12 }
0x1a48   :  { %14404 = vmatpush1.bf16.msra.mxu0 %v19088_v48  ;;  %14468 = vmatpush1.bf16.msra.mxu1 %v19090_v40 }
0x1a49   :  { %14406 = vmatprep.subr.bf16.mxu0 %v19096_v63  ;;  %14470 = vmatprep.subr.bf16.mxu1 %v19098_v37 }
0x1a4c   :  { %14408 = vmatpush1.bf16.msra.mxu0 %v19108_v21  ;;  %14472 = vmatpush1.bf16.msra.mxu1 %v19110_v44 }
0x1a4d   :  { %14410 = vmatprep.subr.bf16.mxu0 %v19116_v23  ;;  %14474 = vmatprep.subr.bf16.mxu1 %v19118_v22 }
0x1a50   :  { %14412 = vmatpush1.bf16.msra.mxu0 %v19128_v15  ;;  %14476 = vmatpush1.bf16.msra.mxu1 %v19130_v35 }
0x1a51   :  { %14414 = vmatprep.subr.bf16.mxu0 %v19136_v28  ;;  %14478 = vmatprep.subr.bf16.mxu1 %v19138_v16 }
0x1a54   :  { %14416 = vmatpush1.bf16.msra.mxu0 %v19148_v33  ;;  %14480 = vmatpush1.bf16.msra.mxu1 %v19150_v38 }
0x1a55   :  { %14418 = vmatprep.subr.bf16.mxu0 %v20421_v61  ;;  %14482 = vmatprep.subr.bf16.mxu1 %v20422_v29 }
0x1a58   :  { %14420 = vmatpush1.bf16.msra.mxu0 %v20510_v4  ;;  %14484 = vmatpush1.bf16.msra.mxu1 %v20511_v60 }
0x1a59   :  { %14422 = vmatprep.subr.bf16.mxu0 %v20512_v0  ;;  %14486 = vmatprep.subr.bf16.mxu1 %v20513_v47 }
0x1a5c   :  { %14424 = vmatpush1.bf16.msra.mxu0 %v20514_v53  ;;  %14488 = vmatpush1.bf16.msra.mxu1 %v20515_v13  ;;  %v20526_v13 = vld [vmem:[#allocation159_spill] sm:$0xff]  ;;  %v20530_v53 = vld [vmem:[#allocation138_spill] sm:$0xff] }
0x1a5d   :  { %14426 = vmatprep.subr.bf16.mxu0 %v20516_v58  ;;  %14490 = vmatprep.subr.bf16.mxu1 %v20517_v18  ;;  %v20527_v58 = vld [vmem:[#allocation139_spill] sm:$0xff]  ;;  %v20528_v18 = vld [vmem:[#allocation133_spill] sm:$0xff] }
0x1a60   :  { %14428 = vmatpush1.bf16.msra.mxu0 %v20518_v45  ;;  %14492 = vmatpush1.bf16.msra.mxu1 %v20519_v39  ;;  %v20529_v45 = vld [vmem:[#allocation134_spill] sm:$0xff] }
0x1a61   :  { %14430 = vmatprep.subr.bf16.mxu0 %v20520_v5  ;;  %14494 = vmatprep.subr.bf16.mxu1 %v20521_v26 }
0x1a64   :  { %14432 = vmatpush1.bf16.msra.mxu0 %v20522_v32  ;;  %14496 = vmatpush1.bf16.msra.mxu1 %v20523_v50 }
0x1a65   :  { %14434 = vmatprep.subr.bf16.mxu0 %v20524_v56  ;;  %14498 = vmatprep.subr.bf16.mxu1 %v20525_v42 }
0x1a68   :  { %14436 = vmatpush1.bf16.msra.mxu0 %v20526_v13  ;;  %14500 = vmatpush1.bf16.msra.mxu1 %v20527_v58 }
0x1a69   :  { %14502 = vmatprep.subr.bf16.mxu0 %v20528_v18  ;;  %14566 = vmatprep.subr.bf16.mxu1 %v20529_v45 }
0x1afe   :  { %v7950_v39 = vpop.f32.mrb[54].mxu0  ;;  %v8021_v5 = vpop.f32.mrb[66].mxu1 }
0x1aff   :  { %v7951_v26 = vadd.f32 %v7950_v39, %v20530_v53  ;;  %v7952_v47 = vpop.f32.mrb[55].mxu0  ;;  %v8023_v32 = vpop.f32.mrb[67].mxu1  ;;  %v8022_v13 = vadd.f32 %v8021_v5, %v19337_v27 }
0x1b00   :  { %v7953_v50 = vadd.f32 %v7952_v47, %v20464_v54  ;;  %v8024_v58 = vadd.f32 %v8023_v32, %v19340_v59  ;;  %v20536_v32 = vld [vmem:[#allocation147_spill] sm:$0xff] }
0x1b01   :  { %v11706_v0 = vmul.f32 -1.442695, %v7951_v26  ;;  %v11708_v42 = vmul.f32 -1.442695, %v8022_v13 }
0x1b02   :  { %v11707_v56 = vmul.f32 -1.442695, %v7953_v50 }
0x1b03   :  { %15641 = vpow2.f32 %v11706_v0 }
0x1b04   :  { %15643 = vpow2.f32 %v11707_v56 }
0x1b05   :  { %15645 = vtanh.f32 %v8024_v58 }
0x1b06   :  { %15647 = vpow2.f32 %v11708_v42  ;;  %v20537_v42 = vld [vmem:[#allocation148_spill] sm:$0xff] }
0x1b0d   :  { %v15642_v18 = vpop.eup %15641 }
0x1b0e   :  { %v8035_v60 = vadd.f32 1.0, %v15642_v18  ;;  %v15644_v45 = vpop.eup %15643 }
0x1b0f   :  { %v8036_v39 = vadd.f32 1.0, %v15644_v45  ;;  %v15646_v53 = vpop.eup %15645  ;;  %v20535_v45 = vld [vmem:[#allocation146_spill] sm:$0xff] }
0x1b10   :  { %15649 = vrcp.f32 %v8035_v60  ;;  %v15648_v4 = vpop.eup %15647  ;;  %v20531_v60 = vld [vmem:[#allocation132_spill] sm:$0xff] }
0x1b11   :  { %15651 = vrcp.f32 %v8036_v39  ;;  %v8037_v0 = vadd.f32 1.0, %v15648_v4  ;;  %v20533_v4 = vld [vmem:[#allocation144_spill] sm:$0xff]  ;;  %v20538_v39 = vld [vmem:[#allocation149_spill] sm:$0xff] }
0x1b13   :  { %15653 = vrcp.f32 %v8037_v0  ;;  %v20542_v0 = vld [vmem:[#allocation153_spill] sm:$0xff] }
0x1b1a   :  { %v15650_v47 = vpop.eup %15649 }
0x1b1b   :  { %v8046_v26 = vmul.f32 %v15650_v47, %v15646_v53  ;;  %v15652_v50 = vpop.eup %15651  ;;  %v20534_v53 = vld [vmem:[#allocation145_spill] sm:$0xff]  ;;  %v20539_v47 = vld [vmem:[#allocation150_spill] sm:$0xff] }
0x1b1c   :  { %v8045_v56 = vmul.f32 %v15652_v50, %v19567_v17  ;;  %v20532_v17 = vld [vmem:[#allocation143_spill] sm:$0xff]  ;;  %v20541_v50 = vld [vmem:[#allocation152_spill] sm:$0xff] }
0x1b1d   :  { %v15654_v13 = vpop.eup %15653 }
0x1b1e   :  { %v19641_v5 = vadd.f32 %v8046_v26, %v8045_v56  ;;  %v20540_v26 = vld [vmem:[#allocation151_spill] sm:$0xff]  ;;  %v20543_v56 = vld [vmem:[#allocation154_spill] sm:$0xff] }
0x1b20   :  { %15655 = vtanh.f32 %v19641_v5 }
0x1b2a   :  { %v15656_v58 = vpop.eup %15655 }
0x1b2b   :  { %v8049_v18 = vmul.f32 %v15656_v58, %v15654_v13  ;;  %v20544_v13 = vld [vmem:[#allocation155_spill] sm:$0xff]  ;;  %v20545_v58 = vld [vmem:[#allocation156_spill] sm:$0xff] }
0x1b2d   :  { %8050 = vst [vmem:[#allocation2 + $0x4] sm:$0x1] %v8049_v18  ;;  %8115 = vmatprep.mubr.f32.mxu0 %v8049_v18  ;;  %8186 = vmatprep.mubr.f32.mxu1 %v8049_v18  ;;  %v20546_v18 = vld [vmem:[#allocation157_spill] sm:$0xff] }
0x1b2e   :  { %8116 = vmatmul.mubr.f32.vlgmr.msra.gmra.mrb[56].mxu0 %v20531_v60  ;;  %8187 = vmatmul.mubr.f32.vlgmr.msra.gmra.mrb[68].mxu1 %v20531_v60  ;;  %v20547_v60 = vld [vmem:[#allocation158_spill] sm:$0xff] }
0x1b2f   :  { %14504 = vmatpush1.bf16.msra.mxu0 %v18948_v52  ;;  %14568 = vmatpush1.bf16.msra.mxu1 %v18950_v55 }
0x1b30   :  { %14506 = vmatprep.subr.bf16.mxu0 %v18955_v19  ;;  %14570 = vmatprep.subr.bf16.mxu1 %v18957_v20 }
0x1b33   :  { %14508 = vmatpush1.bf16.msra.mxu0 %v18968_v6  ;;  %14572 = vmatpush1.bf16.msra.mxu1 %v18970_v2 }
0x1b34   :  { %14510 = vmatprep.subr.bf16.mxu0 %v18976_v24  ;;  %14574 = vmatprep.subr.bf16.mxu1 %v18978_v57 }
0x1b37   :  { %14512 = vmatpush1.bf16.msra.mxu0 %v18988_v46  ;;  %14576 = vmatpush1.bf16.msra.mxu1 %v18990_v31 }
0x1b38   :  { %14514 = vmatprep.subr.bf16.mxu0 %v18996_v7  ;;  %14578 = vmatprep.subr.bf16.mxu1 %v18998_v34 }
0x1b3b   :  { %14516 = vmatpush1.bf16.msra.mxu0 %v19008_v36  ;;  %14580 = vmatpush1.bf16.msra.mxu1 %v19010_v25 }
0x1b3c   :  { %14518 = vmatprep.subr.bf16.mxu0 %v19016_v8  ;;  %14582 = vmatprep.subr.bf16.mxu1 %v19018_v49 }
0x1b3f   :  { %14520 = vmatpush1.bf16.msra.mxu0 %v19028_v51  ;;  %14584 = vmatpush1.bf16.msra.mxu1 %v19030_v3 }
0x1b40   :  { %14522 = vmatprep.subr.bf16.mxu0 %v19036_v9  ;;  %14586 = vmatprep.subr.bf16.mxu1 %v19038_v10 }
0x1b43   :  { %14524 = vmatpush1.bf16.msra.mxu0 %v19048_v41  ;;  %14588 = vmatpush1.bf16.msra.mxu1 %v19050_v30 }
0x1b44   :  { %14526 = vmatprep.subr.bf16.mxu0 %v19056_v11  ;;  %14590 = vmatprep.subr.bf16.mxu1 %v19058_v43 }
0x1b47   :  { %14528 = vmatpush1.bf16.msra.mxu0 %v19068_v62  ;;  %14592 = vmatpush1.bf16.msra.mxu1 %v19070_v14 }
0x1b48   :  { %14530 = vmatprep.subr.bf16.mxu0 %v19076_v1  ;;  %14594 = vmatprep.subr.bf16.mxu1 %v19078_v12 }
0x1b4b   :  { %14532 = vmatpush1.bf16.msra.mxu0 %v19088_v48  ;;  %14596 = vmatpush1.bf16.msra.mxu1 %v19090_v40 }
0x1b4c   :  { %14534 = vmatprep.subr.bf16.mxu0 %v19096_v63  ;;  %14598 = vmatprep.subr.bf16.mxu1 %v19098_v37 }
0x1b4f   :  { %14536 = vmatpush1.bf16.msra.mxu0 %v19108_v21  ;;  %14600 = vmatpush1.bf16.msra.mxu1 %v19110_v44 }
0x1b50   :  { %14538 = vmatprep.subr.bf16.mxu0 %v19116_v23  ;;  %14602 = vmatprep.subr.bf16.mxu1 %v19118_v22 }
0x1b53   :  { %14540 = vmatpush1.bf16.msra.mxu0 %v19128_v15  ;;  %14604 = vmatpush1.bf16.msra.mxu1 %v19130_v35 }
0x1b54   :  { %14542 = vmatprep.subr.bf16.mxu0 %v19136_v28  ;;  %14606 = vmatprep.subr.bf16.mxu1 %v19138_v16 }
0x1b57   :  { %14544 = vmatpush1.bf16.msra.mxu0 %v19148_v33  ;;  %14608 = vmatpush1.bf16.msra.mxu1 %v19150_v38 }
0x1b58   :  { %14546 = vmatprep.subr.bf16.mxu0 %v20421_v61  ;;  %14610 = vmatprep.subr.bf16.mxu1 %v20422_v29 }
0x1b5b   :  { %14548 = vmatpush1.bf16.msra.mxu0 %v20532_v17  ;;  %14612 = vmatpush1.bf16.msra.mxu1 %v20533_v4 }
0x1b5c   :  { %14550 = vmatprep.subr.bf16.mxu0 %v20534_v53  ;;  %14614 = vmatprep.subr.bf16.mxu1 %v20535_v45 }
0x1b5f   :  { %14552 = vmatpush1.bf16.msra.mxu0 %v20536_v32  ;;  %14616 = vmatpush1.bf16.msra.mxu1 %v20537_v42  ;;  %v20548_v42 = vld [vmem:[#allocation159_spill] sm:$0xff]  ;;  %v20552_v32 = vld [vmem:[#allocation138_spill] sm:$0xff] }
0x1b60   :  { %14554 = vmatprep.subr.bf16.mxu0 %v20538_v39  ;;  %14618 = vmatprep.subr.bf16.mxu1 %v20539_v47  ;;  %v20549_v39 = vld [vmem:[#allocation139_spill] sm:$0xff]  ;;  %v20550_v47 = vld [vmem:[#allocation133_spill] sm:$0xff] }
0x1b63   :  { %14556 = vmatpush1.bf16.msra.mxu0 %v20540_v26  ;;  %14620 = vmatpush1.bf16.msra.mxu1 %v20541_v50  ;;  %v20551_v26 = vld [vmem:[#allocation134_spill] sm:$0xff] }
0x1b64   :  { %14558 = vmatprep.subr.bf16.mxu0 %v20542_v0  ;;  %14622 = vmatprep.subr.bf16.mxu1 %v20543_v56 }
0x1b67   :  { %14560 = vmatpush1.bf16.msra.mxu0 %v20544_v13  ;;  %14624 = vmatpush1.bf16.msra.mxu1 %v20545_v58 }
0x1b68   :  { %14562 = vmatprep.subr.bf16.mxu0 %v20546_v18  ;;  %14626 = vmatprep.subr.bf16.mxu1 %v20547_v60 }
0x1b6b   :  { %14564 = vmatpush1.bf16.msra.mxu0 %v20548_v42  ;;  %14628 = vmatpush1.bf16.msra.mxu1 %v20549_v39 }
0x1b6c   :  { %14630 = vmatprep.subr.bf16.mxu0 %v20550_v47  ;;  %14694 = vmatprep.subr.bf16.mxu1 %v20551_v26 }
0x1c01   :  { %v8117_v50 = vpop.f32.mrb[56].mxu0  ;;  %v8188_v0 = vpop.f32.mrb[68].mxu1 }
0x1c02   :  { %v8118_v56 = vadd.f32 %v8117_v50, %v20552_v32  ;;  %v8119_v45 = vpop.f32.mrb[57].mxu0  ;;  %v8190_v13 = vpop.f32.mrb[69].mxu1  ;;  %v8189_v42 = vadd.f32 %v8188_v0, %v19337_v27 }
0x1c03   :  { %v8120_v58 = vadd.f32 %v8119_v45, %v20464_v54  ;;  %v8191_v39 = vadd.f32 %v8190_v13, %v19340_v59 }
0x1c04   :  { %v11709_v53 = vmul.f32 -1.442695, %v8118_v56  ;;  %v11711_v60 = vmul.f32 -1.442695, %v8189_v42 }
0x1c05   :  { %v11710_v18 = vmul.f32 -1.442695, %v8120_v58 }
0x1c06   :  { %15657 = vpow2.f32 %v11709_v53 }
0x1c07   :  { %15659 = vpow2.f32 %v11710_v18 }
0x1c08   :  { %15661 = vtanh.f32 %v8191_v39 }
0x1c09   :  { %15663 = vpow2.f32 %v11711_v60 }
0x1c10   :  { %v15658_v47 = vpop.eup %15657 }
0x1c11   :  { %v8202_v4 = vadd.f32 1.0, %v15658_v47  ;;  %v15660_v26 = vpop.eup %15659 }
0x1c12   :  { %v8203_v50 = vadd.f32 1.0, %v15660_v26  ;;  %v15662_v32 = vpop.eup %15661 }
0x1c13   :  { %15665 = vrcp.f32 %v8202_v4  ;;  %v15664_v17 = vpop.eup %15663  ;;  %v20553_v4 = vld [vmem:[#allocation136_spill] sm:$0xff] }
0x1c14   :  { %15667 = vrcp.f32 %v8203_v50  ;;  %v8204_v53 = vadd.f32 1.0, %v15664_v17  ;;  %v20573_v17 = vld [vmem:[#allocation129_spill] sm:$0xff] }
0x1c16   :  { %15669 = vrcp.f32 %v8204_v53 }
0x1c1d   :  { %v15666_v45 = vpop.eup %15665 }
0x1c1e   :  { %v8213_v56 = vmul.f32 %v15666_v45, %v15662_v32  ;;  %v15668_v58 = vpop.eup %15667 }
0x1c1f   :  { %v8212_v18 = vmul.f32 %v15668_v58, %v19641_v5 }
0x1c20   :  { %v15670_v42 = vpop.eup %15669 }
0x1c21   :  { %v19715_v0 = vadd.f32 %v8213_v56, %v8212_v18 }
0x1c23   :  { %15671 = vtanh.f32 %v19715_v0 }
0x1c2d   :  { %v15672_v39 = vpop.eup %15671 }
0x1c2e   :  { %v8216_v13 = vmul.f32 %v15672_v39, %v15670_v42 }
0x1c30   :  { %8217 = vst [vmem:[#allocation2 + $0x5] sm:$0x1] %v8216_v13  ;;  %8282 = vmatprep.mubr.f32.mxu0 %v8216_v13  ;;  %8353 = vmatprep.mubr.f32.mxu1 %v8216_v13 }
0x1c31   :  { %8283 = vmatmul.mubr.f32.vlgmr.msra.gmra.mrb[58].mxu0 %v20553_v4  ;;  %8354 = vmatmul.mubr.f32.vlgmr.msra.gmra.mrb[70].mxu1 %v20553_v4 }
0x1c32   :  { %14632 = vmatpush1.bf16.msra.mxu0 %v18948_v52  ;;  %14696 = vmatpush1.bf16.msra.mxu1 %v18950_v55  ;;  %v20554_v52 = vld [vmem:[#allocation143_spill] sm:$0xff]  ;;  %v20555_v55 = vld [vmem:[#allocation144_spill] sm:$0xff] }
0x1c33   :  { %14634 = vmatprep.subr.bf16.mxu0 %v18955_v19  ;;  %14698 = vmatprep.subr.bf16.mxu1 %v18957_v20  ;;  %v20556_v19 = vld [vmem:[#allocation145_spill] sm:$0xff]  ;;  %v20557_v20 = vld [vmem:[#allocation146_spill] sm:$0xff] }
0x1c36   :  { %14636 = vmatpush1.bf16.msra.mxu0 %v18968_v6  ;;  %14700 = vmatpush1.bf16.msra.mxu1 %v18970_v2  ;;  %v20558_v6 = vld [vmem:[#allocation147_spill] sm:$0xff]  ;;  %v20559_v2 = vld [vmem:[#allocation148_spill] sm:$0xff] }
0x1c37   :  { %14638 = vmatprep.subr.bf16.mxu0 %v18976_v24  ;;  %14702 = vmatprep.subr.bf16.mxu1 %v18978_v57  ;;  %v20560_v24 = vld [vmem:[#allocation149_spill] sm:$0xff]  ;;  %v20561_v57 = vld [vmem:[#allocation150_spill] sm:$0xff] }
0x1c3a   :  { %14640 = vmatpush1.bf16.msra.mxu0 %v18988_v46  ;;  %14704 = vmatpush1.bf16.msra.mxu1 %v18990_v31  ;;  %v20562_v46 = vld [vmem:[#allocation151_spill] sm:$0xff]  ;;  %v20563_v31 = vld [vmem:[#allocation152_spill] sm:$0xff] }
0x1c3b   :  { %14642 = vmatprep.subr.bf16.mxu0 %v18996_v7  ;;  %14706 = vmatprep.subr.bf16.mxu1 %v18998_v34  ;;  %v20564_v7 = vld [vmem:[#allocation153_spill] sm:$0xff]  ;;  %v20565_v34 = vld [vmem:[#allocation154_spill] sm:$0xff] }
0x1c3e   :  { %14644 = vmatpush1.bf16.msra.mxu0 %v19008_v36  ;;  %14708 = vmatpush1.bf16.msra.mxu1 %v19010_v25  ;;  %v20566_v36 = vld [vmem:[#allocation155_spill] sm:$0xff]  ;;  %v20567_v25 = vld [vmem:[#allocation156_spill] sm:$0xff] }
0x1c3f   :  { %14646 = vmatprep.subr.bf16.mxu0 %v19016_v8  ;;  %14710 = vmatprep.subr.bf16.mxu1 %v19018_v49  ;;  %v20568_v8 = vld [vmem:[#allocation157_spill] sm:$0xff]  ;;  %v20569_v49 = vld [vmem:[#allocation158_spill] sm:$0xff] }
0x1c42   :  { %14648 = vmatpush1.bf16.msra.mxu0 %v19028_v51  ;;  %14712 = vmatpush1.bf16.msra.mxu1 %v19030_v3  ;;  %v20570_v51 = vld [vmem:[#allocation159_spill] sm:$0xff] }
0x1c43   :  { %14650 = vmatprep.subr.bf16.mxu0 %v19036_v9  ;;  %14714 = vmatprep.subr.bf16.mxu1 %v19038_v10  ;;  %v20571_v3 = vld [vmem:[#allocation139_spill] sm:$0xff] }
0x1c46   :  { %14652 = vmatpush1.bf16.msra.mxu0 %v19048_v41  ;;  %14716 = vmatpush1.bf16.msra.mxu1 %v19050_v30  ;;  %v20572_v41 = vld [vmem:[#allocation138_spill] sm:$0xff] }
0x1c47   :  { %14654 = vmatprep.subr.bf16.mxu0 %v19056_v11  ;;  %14718 = vmatprep.subr.bf16.mxu1 %v19058_v43 }
0x1c4a   :  { %14656 = vmatpush1.bf16.msra.mxu0 %v19068_v62  ;;  %14720 = vmatpush1.bf16.msra.mxu1 %v19070_v14 }
0x1c4b   :  { %14658 = vmatprep.subr.bf16.mxu0 %v19076_v1  ;;  %14722 = vmatprep.subr.bf16.mxu1 %v19078_v12 }
0x1c4e   :  { %14660 = vmatpush1.bf16.msra.mxu0 %v19088_v48  ;;  %14724 = vmatpush1.bf16.msra.mxu1 %v19090_v40 }
0x1c4f   :  { %14662 = vmatprep.subr.bf16.mxu0 %v19096_v63  ;;  %14726 = vmatprep.subr.bf16.mxu1 %v19098_v37 }
0x1c52   :  { %14664 = vmatpush1.bf16.msra.mxu0 %v19108_v21  ;;  %14728 = vmatpush1.bf16.msra.mxu1 %v19110_v44 }
0x1c53   :  { %14666 = vmatprep.subr.bf16.mxu0 %v19116_v23  ;;  %14730 = vmatprep.subr.bf16.mxu1 %v19118_v22 }
0x1c56   :  { %14668 = vmatpush1.bf16.msra.mxu0 %v19128_v15  ;;  %14732 = vmatpush1.bf16.msra.mxu1 %v19130_v35 }
0x1c57   :  { %14670 = vmatprep.subr.bf16.mxu0 %v19136_v28  ;;  %14734 = vmatprep.subr.bf16.mxu1 %v19138_v16 }
0x1c5a   :  { %14672 = vmatpush1.bf16.msra.mxu0 %v19148_v33  ;;  %14736 = vmatpush1.bf16.msra.mxu1 %v19150_v38 }
0x1c5b   :  { %14674 = vmatprep.subr.bf16.mxu0 %v20421_v61  ;;  %14738 = vmatprep.subr.bf16.mxu1 %v20422_v29 }
0x1c5e   :  { %14676 = vmatpush1.bf16.msra.mxu0 %v20554_v52  ;;  %14740 = vmatpush1.bf16.msra.mxu1 %v20555_v55 }
0x1c5f   :  { %14678 = vmatprep.subr.bf16.mxu0 %v20556_v19  ;;  %14742 = vmatprep.subr.bf16.mxu1 %v20557_v20 }
0x1c62   :  { %14680 = vmatpush1.bf16.msra.mxu0 %v20558_v6  ;;  %14744 = vmatpush1.bf16.msra.mxu1 %v20559_v2 }
0x1c63   :  { %14682 = vmatprep.subr.bf16.mxu0 %v20560_v24  ;;  %14746 = vmatprep.subr.bf16.mxu1 %v20561_v57 }
0x1c66   :  { %14684 = vmatpush1.bf16.msra.mxu0 %v20562_v46  ;;  %14748 = vmatpush1.bf16.msra.mxu1 %v20563_v31 }
0x1c67   :  { %14686 = vmatprep.subr.bf16.mxu0 %v20564_v7  ;;  %14750 = vmatprep.subr.bf16.mxu1 %v20565_v34 }
0x1c6a   :  { %14688 = vmatpush1.bf16.msra.mxu0 %v20566_v36  ;;  %14752 = vmatpush1.bf16.msra.mxu1 %v20567_v25 }
0x1c6b   :  { %14690 = vmatprep.subr.bf16.mxu0 %v20568_v8  ;;  %14754 = vmatprep.subr.bf16.mxu1 %v20569_v49 }
0x1c6e   :  { %14692 = vmatpush1.bf16.msra.mxu0 %v20570_v51  ;;  %14756 = vmatpush1.bf16.msra.mxu1 %v20571_v3 }
0x1d04   :  { %v8284_v9 = vpop.f32.mrb[58].mxu0  ;;  %v8355_v10 = vpop.f32.mrb[70].mxu1 }
0x1d05   :  { %v8285_v30 = vadd.f32 %v8284_v9, %v20572_v41  ;;  %v8286_v11 = vpop.f32.mrb[59].mxu0  ;;  %v8357_v43 = vpop.f32.mrb[71].mxu1  ;;  %v8356_v12 = vadd.f32 %v8355_v10, %v19337_v27 }
0x1d06   :  { %v8287_v62 = vadd.f32 %v8286_v11, %v20464_v54  ;;  %v8358_v48 = vadd.f32 %v8357_v43, %v19340_v59 }
0x1d07   :  { %v11712_v14 = vmul.f32 -1.442695, %v8285_v30  ;;  %v11714_v40 = vmul.f32 -1.442695, %v8356_v12 }
0x1d08   :  { %v11713_v1 = vmul.f32 -1.442695, %v8287_v62 }
0x1d09   :  { %15673 = vpow2.f32 %v11712_v14 }
0x1d0a   :  { %15675 = vpow2.f32 %v11713_v1 }
0x1d0b   :  { %15677 = vtanh.f32 %v8358_v48 }
0x1d0c   :  { %15679 = vpow2.f32 %v11714_v40 }
0x1d13   :  { %v15674_v63 = vpop.eup %15673 }
0x1d14   :  { %v8369_v37 = vadd.f32 1.0, %v15674_v63  ;;  %v15676_v21 = vpop.eup %15675 }
0x1d15   :  { %v8370_v44 = vadd.f32 1.0, %v15676_v21  ;;  %v15678_v23 = vpop.eup %15677 }
0x1d16   :  { %15681 = vrcp.f32 %v8369_v37  ;;  %v15680_v22 = vpop.eup %15679 }
0x1d17   :  { %15683 = vrcp.f32 %v8370_v44  ;;  %v8371_v16 = vadd.f32 1.0, %v15680_v22 }
0x1d19   :  { %15685 = vrcp.f32 %v8371_v16 }
0x1d20   :  { %v15682_v15 = vpop.eup %15681 }
0x1d21   :  { %v8380_v35 = vmul.f32 %v15682_v15, %v15678_v23  ;;  %v15684_v28 = vpop.eup %15683 }
0x1d22   :  { %v8379_v33 = vmul.f32 %v15684_v28, %v19715_v0 }
0x1d23   :  { %v15686_v61 = vpop.eup %15685 }
0x1d24   :  { %v8381_v38 = vadd.f32 %v8380_v35, %v8379_v33 }
0x1d26   :  { %15687 = vtanh.f32 %v8381_v38 }
0x1d30   :  { %v15688_v29 = vpop.eup %15687 }
0x1d31   :  { %v8383_v5 = vmul.f32 %v15688_v29, %v15686_v61 }
0x1d33   :  { %8384 = vst [vmem:[#allocation2 + $0x6] sm:$0x1] %v8383_v5  ;;  %8449 = vmatprep.mubr.f32.mxu0 %v8383_v5  ;;  %8520 = vmatprep.mubr.f32.mxu1 %v8383_v5 }
0x1d34   :  { %8450 = vmatmul.mubr.f32.vlgmr.msra.gmra.mrb[60].mxu0 %v20573_v17  ;;  %8521 = vmatmul.mubr.f32.vlgmr.msra.gmra.mrb[72].mxu1 %v20573_v17 }
0x1e07   :  { %v8451_v32 = vpop.f32.mrb[60].mxu0  ;;  %v8522_v60 = vpop.f32.mrb[72].mxu1 }
0x1e08   :  { %v8452_v47 = vadd.f32 %v8451_v32, %v20572_v41  ;;  %v8453_v26 = vpop.f32.mrb[61].mxu0  ;;  %v8524_v50 = vpop.f32.mrb[73].mxu1  ;;  %v8523_v53 = vadd.f32 %v8522_v60, %v19337_v27 }
0x1e09   :  { %v8454_v45 = vadd.f32 %v8453_v26, %v20464_v54  ;;  %v8525_v18 = vadd.f32 %v8524_v50, %v19340_v59 }
0x1e0a   :  { %v11715_v56 = vmul.f32 -1.442695, %v8452_v47  ;;  %v11717_v0 = vmul.f32 -1.442695, %v8523_v53 }
0x1e0b   :  { %v11716_v58 = vmul.f32 -1.442695, %v8454_v45 }
0x1e0c   :  { %15689 = vpow2.f32 %v11715_v56 }
0x1e0d   :  { %15691 = vpow2.f32 %v11716_v58 }
0x1e0e   :  { %15693 = vtanh.f32 %v8525_v18 }
0x1e0f   :  { %15695 = vpow2.f32 %v11717_v0 }
0x1e16   :  { %v15690_v42 = vpop.eup %15689 }
0x1e17   :  { %v8536_v39 = vadd.f32 1.0, %v15690_v42  ;;  %v15692_v13 = vpop.eup %15691 }
0x1e18   :  { %v8537_v4 = vadd.f32 1.0, %v15692_v13  ;;  %v15694_v52 = vpop.eup %15693 }
0x1e19   :  { %15697 = vrcp.f32 %v8536_v39  ;;  %v15696_v55 = vpop.eup %15695 }
0x1e1a   :  { %15699 = vrcp.f32 %v8537_v4  ;;  %v8538_v6 = vadd.f32 1.0, %v15696_v55 }
0x1e1c   :  { %15701 = vrcp.f32 %v8538_v6 }
0x1e23   :  { %v15698_v54 = vpop.eup %15697 }
0x1e24   :  { %v8547_v19 = vmul.f32 %v15698_v54, %v15694_v52  ;;  %v15700_v20 = vpop.eup %15699 }
0x1e25   :  { %v8546_v2 = vmul.f32 %v15700_v20, %v8381_v38 }
0x1e26   :  { %v15702_v27 = vpop.eup %15701 }
0x1e27   :  { %v8548_v24 = vadd.f32 %v8547_v19, %v8546_v2 }
0x1e29   :  { %15703 = vtanh.f32 %v8548_v24  ;;  %8555 = vst [vmem:[#allocation34 + $0x2] sm:$0x1] %v8548_v24 }
0x1e33   :  { %v15704_v59 = vpop.eup %15703 }
0x1e34   :  { %v8550_v57 = vmul.f32 %v15704_v59, %v15702_v27 }
0x1e36   :  { %8551 = vst [vmem:[#allocation2 + $0x7] sm:$0x1] %v8550_v57  ;;  %8553 = vst [vmem:[#allocation32 + $0x2] sm:$0x1] %v8550_v57 }
0x1e37   :  { %16514 = dma.done.wait [#allocation7], 2048 }
0x1e38   :  { %16515 = vsyncadd [#allocation7], 4294965248 }
0x1e39   :  { %16516 = dma.done.wait [#allocation7 + $0x1], 6400 }
0x1e3a   :  { %16517 = vsyncadd [#allocation7 + $0x1], 4294960896 }
0x1e3b   :  { %16518 = dma.done.wait [#allocation7 + $0x2], 28224 }
0x1e3c   :  { %16519 = vsyncadd [#allocation7 + $0x2], 4294939072 }
0x1e3d   :  { %16520 = dma.done.wait [#allocation7 + $0x3], 6400 }
0x1e3e   :  { %16521 = vsyncadd [#allocation7 + $0x3], 4294960896  ;;  %v20574_v46 = vmov 0   ;;  %v8575_v31 = vld [vmem:[#allocation3 + $0x8] sm:$0xff]  ;;  %v8574_v7 = vld [vmem:[#allocation3] sm:$0xff]  ;;  %s20632_s27 = sld [smem:[#allocation69_spill]] }
0x1e3f   :  { %8634 = vmatprep.mubr.bf16.mxu0 %v20574_v46  ;;  %v8577_v34 = vld [vmem:[#allocation3 + $0x18] sm:$0xff]  ;;  %8602 = vmatprep.subr.bf16.mxu0 %v8575_v31  ;;  %v8576_v36 = vld [vmem:[#allocation3 + $0x10] sm:$0xff]  ;;  %v8579_v25 = vld [vmem:[#allocation3 + $0x28] sm:$0xff]  ;;  %s16580_s13 = smov [#allocation32]  }
0x1e40   :  { %8603 = vmatpush1.bf16.msra.mxu0 %v8574_v7  ;;  %v15705_v8 = vld [vmem:[#allocation4 + $0x4] ss:$16 sps:$4 sm:$0xff]   ;;  %v8581_v51 = vld [vmem:[#allocation3 + $0x38] sm:$0xff]  ;;  %v15710_v3 = vld [vmem:[#allocation4] ss:$16 sps:$4 sm:$0xff]   ;;  %s11181_s4 = sshll.u32 %s16580_s13, 4  ;;  %s11182_s4 = int_to_ptr.vmem [resolvable:$true] %s11181_s4 }
0x1e41   :  { %8604 = vmatprep.subr.bf16.mxu0 %v8577_v34  ;;  %v8578_v49 = vld [vmem:[#allocation3 + $0x20] sm:$0xff]  ;;  %8984 = vmatprep.subr.bf16.mxu1 %v15705_v8  ;;  %v8580_v10 = vld [vmem:[#allocation3 + $0x30] sm:$0xff]  ;;  %v8583_v11 = vld [vmem:[#allocation3 + $0x48] sm:$0xff]  ;;  %s16432_s2 = scalar_lea.vmem %s11182_s4, 48  ;;  %s16436_s7 = scalar_lea.vmem %s11182_s4, 64 }
0x1e42   :  { %v15711_v9 = vld [vmem:[#allocation4 + $0x24] ss:$16 sps:$4 sm:$0xff]   ;;  %8985 = vmatpush1.bf16.msra.mxu1 %v15710_v3  ;;  %v15716_v41 = vld [vmem:[#allocation4 + $0x20] ss:$16 sps:$4 sm:$0xff]   ;;  %v8585_v1 = vld [vmem:[#allocation3 + $0x58] sm:$0xff]  ;;  %p16433_p8 = scmp.ne.s32.totalorder %s11182_s4, %s16432_s2  ;;  %p16437_p9 = scmp.lt.s32.totalorder %s11182_s4, %s11182_s4 }
0x1e43   :  { %8986 = vmatprep.subr.bf16.mxu1 %v15711_v9  ;;  %v15717_v30 = vld [vmem:[#allocation4 + $0x44] ss:$16 sps:$4 sm:$0xff]   ;;  %v15722_v43 = vld [vmem:[#allocation4 + $0x40] ss:$16 sps:$4 sm:$0xff]   ;;  %v8587_v63 = vld [vmem:[#allocation3 + $0x68] sm:$0xff]  ;;  %p16438_p10 = scmp.lt.s32.totalorder %s16436_s7, %s16432_s2 }
0x1e44   :  { %8605 = vmatpush1.bf16.msra.mxu0 %v8576_v36  ;;  %v8582_v62 = vld [vmem:[#allocation3 + $0x40] sm:$0xff]  ;;  %v8584_v12 = vld [vmem:[#allocation3 + $0x50] sm:$0xff]  ;;  %v8589_v23 = vld [vmem:[#allocation3 + $0x78] sm:$0xff] }
0x1e45   :  { %8606 = vmatprep.subr.bf16.mxu0 %v8579_v25  ;;  %v15723_v14 = vld [vmem:[#allocation4 + $0x64] ss:$16 sps:$4 sm:$0xff]   ;;  %v15728_v48 = vld [vmem:[#allocation4 + $0x60] ss:$16 sps:$4 sm:$0xff]   ;;  %v8572_v15 = vld [vmem:[#allocation2] sm:$0xff]  ;;  %p16439_p11 = por %p16438_p10, %p16437_p9 }
0x1e46   :  { %8987 = vmatpush1.bf16.msra.mxu1 %v15716_v41  ;;  %v15729_v40 = vld [vmem:[#allocation4 + $0x84] ss:$16 sps:$4 sm:$0xff]   ;;  %v15734_v37 = vld [vmem:[#allocation4 + $0x80] ss:$16 sps:$4 sm:$0xff]   ;;  %v15709_v35 = vld [vmem:[#allocation4 + $0xc] ss:$16 sps:$4 sm:$0xff]   ;;  %v8573_v33 = vpack.c.bf16 %v8572_v15, %v8572_v15 }
0x1e47   :  { %8988 = vmatprep.subr.bf16.mxu1 %v15717_v30  ;;  %v8586_v21 = vld [vmem:[#allocation3 + $0x60] sm:$0xff]  ;;  %v8588_v22 = vld [vmem:[#allocation3 + $0x70] sm:$0xff]  ;;  %v15707_v38 = vld [vmem:[#allocation4 + $0x8] ss:$16 sps:$4 sm:$0xff]   ;;  %p16440_p12 = pnand %p16439_p11, %p16433_p8 }
0x1e48   :  { %8607 = vmatpush1.bf16.msra.mxu0 %v8578_v49  ;;  %v15735_v44 = vld [vmem:[#allocation4 + $0xa4] ss:$16 sps:$4 sm:$0xff]   ;;  %v15740_v28 = vld [vmem:[#allocation4 + $0xa0] ss:$16 sps:$4 sm:$0xff]   ;;  %v15715_v29 = vld [vmem:[#allocation4 + $0x2c] ss:$16 sps:$4 sm:$0xff]  }
0x1e49   :  { %8608 = vmatprep.subr.bf16.mxu0 %v8581_v51  ;;  %v15741_v16 = vld [vmem:[#allocation4 + $0xc4] ss:$16 sps:$4 sm:$0xff]   ;;  %v15746_v61 = vld [vmem:[#allocation4 + $0xc0] ss:$16 sps:$4 sm:$0xff]   ;;  %v15713_v17 = vld [vmem:[#allocation4 + $0x28] ss:$16 sps:$4 sm:$0xff]  }
0x1e4a   :  { %8989 = vmatpush1.bf16.msra.mxu1 %v15722_v43  ;;  %v15747_v5 = vld [vmem:[#allocation4 + $0xe4] ss:$16 sps:$4 sm:$0xff]   ;;  %v15721_v32 = vld [vmem:[#allocation4 + $0x4c] ss:$16 sps:$4 sm:$0xff]   ;;  %v15752_v60 = vld [vmem:[#allocation4 + $0xe0] ss:$16 sps:$4 sm:$0xff]  }
0x1e4b   :  { %8990 = vmatprep.subr.bf16.mxu1 %v15723_v14  ;;  %v15753_v47 = vld [vmem:[#allocation4 + $0x104] ss:$16 sps:$4 sm:$0xff]   ;;  %v15719_v26 = vld [vmem:[#allocation4 + $0x48] ss:$16 sps:$4 sm:$0xff]   ;;  %v15758_v50 = vld [vmem:[#allocation4 + $0x100] ss:$16 sps:$4 sm:$0xff]  }
0x1e4c   :  { %8609 = vmatpush1.bf16.msra.mxu0 %v8580_v10  ;;  %v15727_v45 = vld [vmem:[#allocation4 + $0x6c] ss:$16 sps:$4 sm:$0xff]   ;;  %v15759_v56 = vld [vmem:[#allocation4 + $0x124] ss:$16 sps:$4 sm:$0xff]   ;;  %v15725_v58 = vld [vmem:[#allocation4 + $0x68] ss:$16 sps:$4 sm:$0xff]  }
0x1e4d   :  { %8610 = vmatprep.subr.bf16.mxu0 %v8583_v11  ;;  %v15764_v53 = vld [vmem:[#allocation4 + $0x120] ss:$16 sps:$4 sm:$0xff]   ;;  %v15733_v18 = vld [vmem:[#allocation4 + $0x8c] ss:$16 sps:$4 sm:$0xff]   ;;  %v15765_v0 = vld [vmem:[#allocation4 + $0x144] ss:$16 sps:$4 sm:$0xff]  }
0x1e4e   :  { %8991 = vmatpush1.bf16.msra.mxu1 %v15728_v48  ;;  %v15731_v42 = vld [vmem:[#allocation4 + $0x88] ss:$16 sps:$4 sm:$0xff]   ;;  %v15770_v39 = vld [vmem:[#allocation4 + $0x140] ss:$16 sps:$4 sm:$0xff]   ;;  %v15739_v13 = vld [vmem:[#allocation4 + $0xac] ss:$16 sps:$4 sm:$0xff]  }
0x1e4f   :  { %8992 = vmatprep.subr.bf16.mxu1 %v15729_v40  ;;  %v15737_v4 = vld [vmem:[#allocation4 + $0xa8] ss:$16 sps:$4 sm:$0xff]   ;;  %v15745_v52 = vld [vmem:[#allocation4 + $0xcc] ss:$16 sps:$4 sm:$0xff]   ;;  %v15771_v57 = vld [vmem:[#allocation4 + $0x164] ss:$16 sps:$4 sm:$0xff]  }
0x1e50   :  { %8611 = vmatpush1.bf16.msra.mxu0 %v8582_v62  ;;  %v15743_v55 = vld [vmem:[#allocation4 + $0xc8] ss:$16 sps:$4 sm:$0xff]   ;;  %v15751_v54 = vld [vmem:[#allocation4 + $0xec] ss:$16 sps:$4 sm:$0xff]   ;;  %v15776_v7 = vld [vmem:[#allocation4 + $0x160] ss:$16 sps:$4 sm:$0xff]  }
0x1e51   :  { %8612 = vmatprep.subr.bf16.mxu0 %v8585_v1  ;;  %v15749_v19 = vld [vmem:[#allocation4 + $0xe8] ss:$16 sps:$4 sm:$0xff]   ;;  %v15757_v20 = vld [vmem:[#allocation4 + $0x10c] ss:$16 sps:$4 sm:$0xff]   ;;  %v8695_v34 = vld [vmem:[#allocation4 + $0x180] sm:$0xff] }
0x1e52   :  { %8993 = vmatpush1.bf16.msra.mxu1 %v15734_v37  ;;  %v15755_v6 = vld [vmem:[#allocation4 + $0x108] ss:$16 sps:$4 sm:$0xff]   ;;  %v15763_v2 = vld [vmem:[#allocation4 + $0x12c] ss:$16 sps:$4 sm:$0xff]   ;;  %v11767_v25 = vcombine.high %v8695_v34, %v8695_v34  ;;  %v11766_v49 = vcombine.low %v8695_v34, %v8695_v34  ;;  %v15783_v10 = vld [vmem:[#allocation5 + $0x4] ss:$28 sps:$4 sm:$0xff]  }
0x1e53   :  { %8994 = vmatprep.subr.bf16.mxu1 %v15735_v44  ;;  %v15761_v24 = vld [vmem:[#allocation4 + $0x128] ss:$16 sps:$4 sm:$0xff]   ;;  %v15769_v27 = vld [vmem:[#allocation4 + $0x14c] ss:$16 sps:$4 sm:$0xff]   ;;  %v8590_v30 = vld [vmem:[#allocation23] sm:$0x3] }
0x1e54   :  { %8613 = vmatpush1.bf16.msra.mxu0 %v8584_v12  ;;  %v15767_v59 = vld [vmem:[#allocation4 + $0x148] ss:$16 sps:$4 sm:$0xff]   ;;  %v15775_v46 = vld [vmem:[#allocation4 + $0x16c] ss:$16 sps:$4 sm:$0xff]   ;;  %v8973_v3 = vsel %vm3672_vm5, %v11766_v49, 0  ;;  %v20575_v11 = vld [vmem:[#allocation122_spill] sm:$0xff] }
0x1e55   :  { %8614 = vmatprep.subr.bf16.mxu0 %v8587_v63  ;;  %v15773_v31 = vld [vmem:[#allocation4 + $0x168] ss:$16 sps:$4 sm:$0xff]   ;;  %v8595_v43 = vrot.slane %v8590_v30, %v20575_v11  ;;  %v15852_v49 = vld [vmem:[#allocation5 + $0x274] ss:$28 sps:$4 sm:$0xff]  }
0x1e56   :  { %8995 = vmatpush1.bf16.msra.mxu1 %v15740_v28  ;;  %v8696_v36 = vld [vmem:[#allocation4 + $0x188] sm:$0xff]  ;;  %v15786_v41 = vld [vmem:[#allocation5 + $0xc] ss:$28 sps:$4 sm:$0xff]  }
0x1e57   :  { %8996 = vmatprep.subr.bf16.mxu1 %v15741_v16  ;;  %v11769_v8 = vcombine.high %v8696_v36, %v8696_v36  ;;  %v11768_v51 = vcombine.low %v8696_v36, %v8696_v36  ;;  %v20576_v62 = vld [vmem:[#allocation123_spill] sm:$0xff]  ;;  %v15784_v15 = vld [vmem:[#allocation5 + $0x8] ss:$28 sps:$4 sm:$0xff]   ;;  %v15841_v36 = vld [vmem:[#allocation5 + $0x230] ss:$28 sps:$4 sm:$0xff]  }
0x1e58   :  { %8615 = vmatpush1.bf16.msra.mxu0 %v8586_v21  ;;  %v8599_v14 = vrot.slane %v8590_v30, %v20576_v62  ;;  %v15789_v28 = vld [vmem:[#allocation5 + $0x3c] ss:$28 sps:$4 sm:$0xff]   ;;  %v15792_v16 = vld [vmem:[#allocation5 + $0x44] ss:$28 sps:$4 sm:$0xff]  }
0x1e59   :  { %8616 = vmatprep.subr.bf16.mxu0 %v8589_v23  ;;  %v8979_v9 = vsel %vm3672_vm5, %v11768_v51, 0  ;;  %v15846_v34 = vld [vmem:[#allocation5 + $0x23c] ss:$28 sps:$4 sm:$0xff]   ;;  %v15847_v51 = vld [vmem:[#allocation5 + $0x268] ss:$28 sps:$4 sm:$0xff]  }
0x1e5a   :  { %8997 = vmatpush1.bf16.msra.mxu1 %v15746_v61  ;;  %v15795_v61 = vld [vmem:[#allocation5 + $0x74] ss:$28 sps:$4 sm:$0xff]   ;;  %v15856_v30 = vld [vmem:[#allocation5 + $0x2a8] ss:$28 sps:$4 sm:$0xff]  }
0x1e5b   :  { %8998 = vmatprep.subr.bf16.mxu1 %v15747_v5  ;;  %v15793_v5 = vld [vmem:[#allocation5 + $0x70] ss:$28 sps:$4 sm:$0xff]  }
0x1e5c   :  { %8617 = vmatpush1.bf16.msra.mxu0 %v8588_v22  ;;  %v15781_v22 = vld [vmem:[#allocation5] ss:$28 sps:$4 sm:$0xff]  }
0x1e5d   :  { %9025 = vmatprep.subr.bf16.mxu0 %v15709_v35 }
0x1e5e   :  { %8999 = vmatpush1.bf16.msra.mxu1 %v15752_v60  ;;  %v15804_v60 = vld [vmem:[#allocation5 + $0xb4] ss:$28 sps:$4 sm:$0xff]  }
0x1e5f   :  { %8635 = vmatmul.mubr.bf16.vlgmr.msra.gmra.mrb[64].mxu0 %v8573_v33  ;;  %9000 = vmatprep.subr.bf16.mxu1 %v15753_v47  ;;  %v15787_v33 = vld [vmem:[#allocation5 + $0x38] ss:$28 sps:$4 sm:$0xff]   ;;  %v15799_v47 = vld [vmem:[#allocation5 + $0xa8] ss:$28 sps:$4 sm:$0xff]  }
0x1e60   :  { %9026 = vmatpush1.bf16.msra.mxu0 %v15707_v38  ;;  %v15790_v38 = vld [vmem:[#allocation5 + $0x40] ss:$28 sps:$4 sm:$0xff]  }
0x1e61   :  { %9027 = vmatprep.subr.bf16.mxu0 %v15715_v29  ;;  %v15798_v29 = vld [vmem:[#allocation5 + $0x7c] ss:$28 sps:$4 sm:$0xff]  }
0x1e62   :  { %9001 = vmatpush1.bf16.msra.mxu1 %v15758_v50  ;;  %v15807_v50 = vld [vmem:[#allocation5 + $0xe4] ss:$28 sps:$4 sm:$0xff]  }
0x1e63   :  { %9002 = vmatprep.subr.bf16.mxu1 %v15759_v56  ;;  %v15805_v56 = vld [vmem:[#allocation5 + $0xe0] ss:$28 sps:$4 sm:$0xff]  }
0x1e64   :  { %9028 = vmatpush1.bf16.msra.mxu0 %v15713_v17  ;;  %v15796_v17 = vld [vmem:[#allocation5 + $0x78] ss:$28 sps:$4 sm:$0xff]  }
0x1e65   :  { %9029 = vmatprep.subr.bf16.mxu0 %v15721_v32  ;;  %v15801_v32 = vld [vmem:[#allocation5 + $0xac] ss:$28 sps:$4 sm:$0xff]  }
0x1e66   :  { %9003 = vmatpush1.bf16.msra.mxu1 %v15764_v53  ;;  %v15813_v53 = vld [vmem:[#allocation5 + $0x11c] ss:$28 sps:$4 sm:$0xff]  }
0x1e67   :  { %9004 = vmatprep.subr.bf16.mxu1 %v15765_v0  ;;  %v15811_v0 = vld [vmem:[#allocation5 + $0x118] ss:$28 sps:$4 sm:$0xff]  }
0x1e68   :  { %9030 = vmatpush1.bf16.msra.mxu0 %v15719_v26  ;;  %v15802_v26 = vld [vmem:[#allocation5 + $0xb0] ss:$28 sps:$4 sm:$0xff]  }
0x1e69   :  { %9031 = vmatprep.subr.bf16.mxu0 %v15727_v45  ;;  %v15810_v45 = vld [vmem:[#allocation5 + $0xec] ss:$28 sps:$4 sm:$0xff]  }
0x1e6a   :  { %9005 = vmatpush1.bf16.msra.mxu1 %v15770_v39  ;;  %v15819_v39 = vld [vmem:[#allocation5 + $0x154] ss:$28 sps:$4 sm:$0xff]  }
0x1e6b   :  { %9006 = vmatprep.subr.bf16.mxu1 %v15771_v57  ;;  %v15840_v57 = vld [vmem:[#allocation5 + $0x204] ss:$28 sps:$4 sm:$0xff]  }
0x1e6c   :  { %9032 = vmatpush1.bf16.msra.mxu0 %v15725_v58  ;;  %v15808_v58 = vld [vmem:[#allocation5 + $0xe8] ss:$28 sps:$4 sm:$0xff]  }
0x1e6d   :  { %9033 = vmatprep.subr.bf16.mxu0 %v15733_v18  ;;  %v15816_v18 = vld [vmem:[#allocation5 + $0x124] ss:$28 sps:$4 sm:$0xff]  }
0x1e6e   :  { %9007 = vmatpush1.bf16.msra.mxu1 %v15776_v7  ;;  %v15843_v7 = vld [vmem:[#allocation5 + $0x234] ss:$28 sps:$4 sm:$0xff]  }
0x1e6f   :  { %11770 = vmatprep.subr.msk.bf16.mxu1 %vm3672_vm5, %v11767_v25  ;;  %v15844_v25 = vld [vmem:[#allocation5 + $0x238] ss:$28 sps:$4 sm:$0xff]  }
0x1e70   :  { %9034 = vmatpush1.bf16.msra.mxu0 %v15731_v42  ;;  %v15814_v42 = vld [vmem:[#allocation5 + $0x120] ss:$28 sps:$4 sm:$0xff]  }
0x1e71   :  { %9035 = vmatprep.subr.bf16.mxu0 %v15739_v13  ;;  %v15822_v13 = vld [vmem:[#allocation5 + $0x15c] ss:$28 sps:$4 sm:$0xff]  }
0x1e72   :  { %9009 = vmatpush1.bf16.msra.mxu1 %v8973_v3  ;;  %v15850_v3 = vld [vmem:[#allocation5 + $0x270] ss:$28 sps:$4 sm:$0xff]  }
0x1e73   :  { %10521 = vmatprep.subr.bf16.mxu1 %v15783_v10  ;;  %v15858_v10 = vld [vmem:[#allocation5 + $0x2ac] ss:$28 sps:$4 sm:$0xff]  }
0x1e74   :  { %9036 = vmatpush1.bf16.msra.mxu0 %v15737_v4  ;;  %v15817_v4 = vld [vmem:[#allocation5 + $0x150] ss:$28 sps:$4 sm:$0xff]  }
0x1e75   :  { %9037 = vmatprep.subr.bf16.mxu0 %v15745_v52  ;;  %v15820_v52 = vld [vmem:[#allocation5 + $0x158] ss:$28 sps:$4 sm:$0xff]  }
0x1e78   :  { %9038 = vmatpush1.bf16.msra.mxu0 %v15743_v55  ;;  %v15825_v55 = vld [vmem:[#allocation5 + $0x18c] ss:$28 sps:$4 sm:$0xff]  }
0x1e79   :  { %9039 = vmatprep.subr.bf16.mxu0 %v15751_v54  ;;  %v15828_v54 = vld [vmem:[#allocation5 + $0x194] ss:$28 sps:$4 sm:$0xff]  }
0x1e7c   :  { %9040 = vmatpush1.bf16.msra.mxu0 %v15749_v19  ;;  %v15823_v19 = vld [vmem:[#allocation5 + $0x188] ss:$28 sps:$4 sm:$0xff]  }
0x1e7d   :  { %9041 = vmatprep.subr.bf16.mxu0 %v15757_v20  ;;  %v15826_v20 = vld [vmem:[#allocation5 + $0x190] ss:$28 sps:$4 sm:$0xff]  }
0x1e80   :  { %9042 = vmatpush1.bf16.msra.mxu0 %v15755_v6  ;;  %v15831_v6 = vld [vmem:[#allocation5 + $0x1c4] ss:$28 sps:$4 sm:$0xff]  }
0x1e81   :  { %9043 = vmatprep.subr.bf16.mxu0 %v15763_v2  ;;  %v15834_v2 = vld [vmem:[#allocation5 + $0x1cc] ss:$28 sps:$4 sm:$0xff]  }
0x1e84   :  { %9044 = vmatpush1.bf16.msra.mxu0 %v15761_v24  ;;  %v15829_v24 = vld [vmem:[#allocation5 + $0x1c0] ss:$28 sps:$4 sm:$0xff]  }
0x1e85   :  { %9045 = vmatprep.subr.bf16.mxu0 %v15769_v27  ;;  %v15832_v27 = vld [vmem:[#allocation5 + $0x1c8] ss:$28 sps:$4 sm:$0xff]  }
0x1e88   :  { %9046 = vmatpush1.bf16.msra.mxu0 %v15767_v59  ;;  %v15837_v59 = vld [vmem:[#allocation5 + $0x1fc] ss:$28 sps:$4 sm:$0xff]  }
0x1e89   :  { %9047 = vmatprep.subr.bf16.mxu0 %v15775_v46  ;;  %v15835_v46 = vld [vmem:[#allocation5 + $0x1f8] ss:$28 sps:$4 sm:$0xff]  }
0x1e8c   :  { %9048 = vmatpush1.bf16.msra.mxu0 %v15773_v31  ;;  %v15838_v31 = vld [vmem:[#allocation5 + $0x200] ss:$28 sps:$4 sm:$0xff]  }
0x1e8d   :  { %11772 = vmatprep.subr.msk.bf16.mxu0 %vm3672_vm5, %v11769_v8  ;;  %v15849_v8 = vld [vmem:[#allocation5 + $0x26c] ss:$28 sps:$4 sm:$0xff]  }
0x1e90   :  { %9050 = vmatpush1.bf16.msra.mxu0 %v8979_v9  ;;  %v15855_v9 = vld [vmem:[#allocation5 + $0x2a4] ss:$28 sps:$4 sm:$0xff]  }
0x1e91   :  { %10603 = vmatprep.subr.bf16.mxu0 %v15786_v41  ;;  %v15853_v41 = vld [vmem:[#allocation5 + $0x2a0] ss:$28 sps:$4 sm:$0xff]  }
0x1f32   :  { %v8636_v1 = vpop.f32.mrb[64].mxu0 }
0x1f33   :  { %v8637_v12 = vadd.f32 %v8636_v1, %v8595_v43  ;;  %v8638_v48 = vpop.f32.mrb[65].mxu0  ;;  %v15861_v43 = vld [vmem:[#allocation5 + $0x2dc] ss:$28 sps:$4 sm:$0xff]  }
0x1f34   :  { %v8639_v40 = vadd.f32 %v8638_v48, %v8599_v14  ;;  %v8640_v63 = vpop.f32.mrb[66].mxu0  ;;  %v15864_v14 = vld [vmem:[#allocation5 + $0x2e4] ss:$28 sps:$4 sm:$0xff]   ;;  %v15859_v1 = vld [vmem:[#allocation5 + $0x2d8] ss:$28 sps:$4 sm:$0xff]  }
0x1f35   :  { %v8643_v37 = vmax.f32 %v8637_v12, 0.0  ;;  %v8641_v21 = vpop.f32.mrb[67].mxu0  ;;  %v15862_v12 = vld [vmem:[#allocation5 + $0x2e0] ss:$28 sps:$4 sm:$0xff]   ;;  %v15867_v48 = vld [vmem:[#allocation5 + $0x314] ss:$28 sps:$4 sm:$0xff]  }
0x1f36   :  { %v8644_v44 = vmax.f32 %v8639_v40, 0.0  ;;  %v15870_v40 = vld [vmem:[#allocation5 + $0x31c] ss:$28 sps:$4 sm:$0xff]   ;;  %v15865_v63 = vld [vmem:[#allocation5 + $0x310] ss:$28 sps:$4 sm:$0xff]  }
0x1f37   :  { %v8645_v35 = vpack.c.bf16 %v8643_v37, %v8643_v37  ;;  %v15868_v37 = vld [vmem:[#allocation5 + $0x318] ss:$28 sps:$4 sm:$0xff]   ;;  %v15873_v21 = vld [vmem:[#allocation5 + $0x34c] ss:$28 sps:$4 sm:$0xff]  }
0x1f38   :  { %v8646_v23 = vpack.c.bf16 %v8644_v44, %v8644_v44  ;;  %v15876_v44 = vld [vmem:[#allocation5 + $0x354] ss:$28 sps:$4 sm:$0xff]  }
0x1f3a   :  { %11771 = vmatprep.mubr.msk.bf16.mxu1 %vm3668_vm6, %v8646_v23  ;;  %11773 = vmatprep.mubr.msk.bf16.mxu0 %vm3668_vm6, %v8646_v23  ;;  %v15871_v23 = vld [vmem:[#allocation5 + $0x348] ss:$28 sps:$4 sm:$0xff]  }
0x1f3b   :  { %9017 = vmatmul.mubr.bf16.vlgmr.msra.gmra.mrb[76].mxu1 %v8645_v35  ;;  %9058 = vmatmul.mubr.bf16.vlgmr.msra.gmra.mrb[68].mxu0 %v8645_v35  ;;  %v15882_v35 = vld [vmem:[#allocation5 + $0x38c] ss:$28 sps:$4 sm:$0xff]  }
0x1f3c   :  { %10522 = vmatpush1.bf16.msra.mxu1 %v15781_v22  ;;  %10604 = vmatpush1.bf16.msra.mxu0 %v15784_v15  ;;  %v15874_v22 = vld [vmem:[#allocation5 + $0x350] ss:$28 sps:$4 sm:$0xff]   ;;  %v15879_v15 = vld [vmem:[#allocation5 + $0x384] ss:$28 sps:$4 sm:$0xff]  }
0x1f3d   :  { %10523 = vmatprep.subr.bf16.mxu1 %v15789_v28  ;;  %10605 = vmatprep.subr.bf16.mxu0 %v15792_v16  ;;  %v19802_v28 = vld [vmem:[#allocation25] sm:$0xf] }
0x1f3e   :  { %v8702_v16 = vrot.slane %v19802_v28, %v20575_v11 }
0x1f40   :  { %10524 = vmatpush1.bf16.msra.mxu1 %v15787_v33  ;;  %10606 = vmatpush1.bf16.msra.mxu0 %v15790_v38  ;;  %v8706_v33 = vrot.slane %v19802_v28, %v20576_v62  ;;  %v20577_v38 = vld [vmem:[#allocation124_spill] sm:$0xff] }
0x1f41   :  { %10525 = vmatprep.subr.bf16.mxu1 %v15795_v61  ;;  %10607 = vmatprep.subr.bf16.mxu0 %v15798_v29  ;;  %v8714_v61 = vrot.slane %v19802_v28, %v20577_v38 }
0x1f44   :  { %10526 = vmatpush1.bf16.msra.mxu1 %v15793_v5  ;;  %10608 = vmatpush1.bf16.msra.mxu0 %v15796_v17 }
0x1f45   :  { %10527 = vmatprep.subr.bf16.mxu1 %v15801_v32  ;;  %10609 = vmatprep.subr.bf16.mxu0 %v15804_v60 }
0x1f48   :  { %10528 = vmatpush1.bf16.msra.mxu1 %v15799_v47  ;;  %10610 = vmatpush1.bf16.msra.mxu0 %v15802_v26 }
0x1f49   :  { %10529 = vmatprep.subr.bf16.mxu1 %v15807_v50  ;;  %10611 = vmatprep.subr.bf16.mxu0 %v15810_v45 }
0x1f4c   :  { %10530 = vmatpush1.bf16.msra.mxu1 %v15805_v56  ;;  %10612 = vmatpush1.bf16.msra.mxu0 %v15808_v58 }
0x1f4d   :  { %10531 = vmatprep.subr.bf16.mxu1 %v15813_v53  ;;  %10613 = vmatprep.subr.bf16.mxu0 %v15816_v18 }
0x1f50   :  { %10532 = vmatpush1.bf16.msra.mxu1 %v15811_v0  ;;  %10614 = vmatpush1.bf16.msra.mxu0 %v15814_v42 }
0x1f51   :  { %10533 = vmatprep.subr.bf16.mxu1 %v15819_v39  ;;  %10615 = vmatprep.subr.bf16.mxu0 %v15822_v13  ;;  %v15877_v39 = vld [vmem:[#allocation5 + $0x380] ss:$28 sps:$4 sm:$0xff]   ;;  %v15880_v13 = vld [vmem:[#allocation5 + $0x388] ss:$28 sps:$4 sm:$0xff]  }
0x1f54   :  { %10534 = vmatpush1.bf16.msra.mxu1 %v15817_v4  ;;  %10616 = vmatpush1.bf16.msra.mxu0 %v15820_v52  ;;  %v15885_v52 = vld [vmem:[#allocation5 + $0x3bc] ss:$28 sps:$4 sm:$0xff]  }
0x1f55   :  { %10535 = vmatprep.subr.bf16.mxu1 %v15825_v55  ;;  %10617 = vmatprep.subr.bf16.mxu0 %v15828_v54  ;;  %v15888_v55 = vld [vmem:[#allocation5 + $0x3c4] ss:$28 sps:$4 sm:$0xff]  }
0x1f58   :  { %10536 = vmatpush1.bf16.msra.mxu1 %v15823_v19  ;;  %10618 = vmatpush1.bf16.msra.mxu0 %v15826_v20  ;;  %v15883_v19 = vld [vmem:[#allocation5 + $0x3b8] ss:$28 sps:$4 sm:$0xff]   ;;  %v15886_v20 = vld [vmem:[#allocation5 + $0x3c0] ss:$28 sps:$4 sm:$0xff]  }
0x1f59   :  { %10537 = vmatprep.subr.bf16.mxu1 %v15831_v6  ;;  %10619 = vmatprep.subr.bf16.mxu0 %v15834_v2  ;;  %v15891_v6 = vld [vmem:[#allocation5 + $0x3f4] ss:$28 sps:$4 sm:$0xff]   ;;  %v15894_v2 = vld [vmem:[#allocation5 + $0x3fc] ss:$28 sps:$4 sm:$0xff]  }
0x1f5c   :  { %10538 = vmatpush1.bf16.msra.mxu1 %v15829_v24  ;;  %10620 = vmatpush1.bf16.msra.mxu0 %v15832_v27  ;;  %v15889_v24 = vld [vmem:[#allocation5 + $0x3f0] ss:$28 sps:$4 sm:$0xff]   ;;  %v15892_v27 = vld [vmem:[#allocation5 + $0x3f8] ss:$28 sps:$4 sm:$0xff]  }
0x1f5d   :  { %10539 = vmatprep.subr.bf16.mxu1 %v15837_v59  ;;  %10621 = vmatprep.subr.bf16.mxu0 %v15840_v57  ;;  %v15897_v59 = vld [vmem:[#allocation5 + $0x42c] ss:$28 sps:$4 sm:$0xff]   ;;  %v15900_v57 = vld [vmem:[#allocation5 + $0x434] ss:$28 sps:$4 sm:$0xff]  }
0x1f60   :  { %10540 = vmatpush1.bf16.msra.mxu1 %v15835_v46  ;;  %10622 = vmatpush1.bf16.msra.mxu0 %v15838_v31  ;;  %v15895_v46 = vld [vmem:[#allocation5 + $0x428] ss:$28 sps:$4 sm:$0xff]   ;;  %v15898_v31 = vld [vmem:[#allocation5 + $0x430] ss:$28 sps:$4 sm:$0xff]  }
0x1f61   :  { %10541 = vmatprep.subr.bf16.mxu1 %v15843_v7  ;;  %10623 = vmatprep.subr.bf16.mxu0 %v15846_v34  ;;  %v15903_v7 = vld [vmem:[#allocation5 + $0x464] ss:$28 sps:$4 sm:$0xff]   ;;  %v15906_v34 = vld [vmem:[#allocation5 + $0x46c] ss:$28 sps:$4 sm:$0xff]  }
0x1f64   :  { %10542 = vmatpush1.bf16.msra.mxu1 %v15841_v36  ;;  %10624 = vmatpush1.bf16.msra.mxu0 %v15844_v25  ;;  %v15901_v36 = vld [vmem:[#allocation5 + $0x460] ss:$28 sps:$4 sm:$0xff]   ;;  %v15904_v25 = vld [vmem:[#allocation5 + $0x468] ss:$28 sps:$4 sm:$0xff]  }
0x1f65   :  { %10543 = vmatprep.subr.bf16.mxu1 %v15849_v8  ;;  %10625 = vmatprep.subr.bf16.mxu0 %v15852_v49  ;;  %v15909_v8 = vld [vmem:[#allocation5 + $0x49c] ss:$28 sps:$4 sm:$0xff]   ;;  %v15912_v49 = vld [vmem:[#allocation5 + $0x4a4] ss:$28 sps:$4 sm:$0xff]  }
0x1f68   :  { %10544 = vmatpush1.bf16.msra.mxu1 %v15847_v51  ;;  %10626 = vmatpush1.bf16.msra.mxu0 %v15850_v3  ;;  %v15907_v51 = vld [vmem:[#allocation5 + $0x498] ss:$28 sps:$4 sm:$0xff]   ;;  %v15910_v3 = vld [vmem:[#allocation5 + $0x4a0] ss:$28 sps:$4 sm:$0xff]  }
0x1f69   :  { %10545 = vmatprep.subr.bf16.mxu1 %v15855_v9  ;;  %10627 = vmatprep.subr.bf16.mxu0 %v15858_v10  ;;  %v15915_v9 = vld [vmem:[#allocation5 + $0x4d4] ss:$28 sps:$4 sm:$0xff]   ;;  %v15918_v10 = vld [vmem:[#allocation5 + $0x4dc] ss:$28 sps:$4 sm:$0xff]  }
0x1f6c   :  { %10546 = vmatpush1.bf16.msra.mxu1 %v15853_v41  ;;  %10628 = vmatpush1.bf16.msra.mxu0 %v15856_v30  ;;  %v15913_v41 = vld [vmem:[#allocation5 + $0x4d0] ss:$28 sps:$4 sm:$0xff]   ;;  %v15916_v30 = vld [vmem:[#allocation5 + $0x4d8] ss:$28 sps:$4 sm:$0xff]  }
0x1f6d   :  { %10547 = vmatprep.subr.bf16.mxu1 %v15861_v43  ;;  %10629 = vmatprep.subr.bf16.mxu0 %v15864_v14  ;;  %v15921_v43 = vld [vmem:[#allocation5 + $0x50c] ss:$28 sps:$4 sm:$0xff]   ;;  %v15924_v14 = vld [vmem:[#allocation5 + $0x514] ss:$28 sps:$4 sm:$0xff]  }
0x1f70   :  { %10548 = vmatpush1.bf16.msra.mxu1 %v15859_v1  ;;  %10630 = vmatpush1.bf16.msra.mxu0 %v15862_v12  ;;  %v15919_v1 = vld [vmem:[#allocation5 + $0x508] ss:$28 sps:$4 sm:$0xff]   ;;  %v15922_v12 = vld [vmem:[#allocation5 + $0x510] ss:$28 sps:$4 sm:$0xff]  }
0x1f71   :  { %10549 = vmatprep.subr.bf16.mxu1 %v15867_v48  ;;  %10631 = vmatprep.subr.bf16.mxu0 %v15870_v40  ;;  %v15927_v48 = vld [vmem:[#allocation5 + $0x544] ss:$28 sps:$4 sm:$0xff]   ;;  %v15930_v40 = vld [vmem:[#allocation5 + $0x54c] ss:$28 sps:$4 sm:$0xff]  }
0x1f74   :  { %10550 = vmatpush1.bf16.msra.mxu1 %v15865_v63  ;;  %10632 = vmatpush1.bf16.msra.mxu0 %v15868_v37  ;;  %v15925_v63 = vld [vmem:[#allocation5 + $0x540] ss:$28 sps:$4 sm:$0xff]   ;;  %v15928_v37 = vld [vmem:[#allocation5 + $0x548] ss:$28 sps:$4 sm:$0xff]  }
0x1f75   :  { %10551 = vmatprep.subr.bf16.mxu1 %v15873_v21  ;;  %10633 = vmatprep.subr.bf16.mxu0 %v15876_v44  ;;  %v15933_v21 = vld [vmem:[#allocation5 + $0x57c] ss:$28 sps:$4 sm:$0xff]   ;;  %v15936_v44 = vld [vmem:[#allocation5 + $0x584] ss:$28 sps:$4 sm:$0xff]  }
0x1f78   :  { %10552 = vmatpush1.bf16.msra.mxu1 %v15871_v23  ;;  %10634 = vmatpush1.bf16.msra.mxu0 %v15874_v22  ;;  %v15931_v23 = vld [vmem:[#allocation5 + $0x578] ss:$28 sps:$4 sm:$0xff]   ;;  %v15934_v22 = vld [vmem:[#allocation5 + $0x580] ss:$28 sps:$4 sm:$0xff]  }
0x1f79   :  { %10562 = vmatprep.subr.bf16.mxu1 %v15879_v15  ;;  %10644 = vmatprep.subr.bf16.mxu0 %v15882_v35  ;;  %v15939_v15 = vld [vmem:[#allocation5 + $0x5b4] ss:$28 sps:$4 sm:$0xff]   ;;  %v15942_v35 = vld [vmem:[#allocation5 + $0x5bc] ss:$28 sps:$4 sm:$0xff]  }
0x200e   :  { %v9018_v29 = vpop.f32.mrb[76].mxu1  ;;  %v19810_v5 = vpop.f32.mrb[68].mxu0 }
0x200f   :  { %v9019_v17 = vadd.f32 %v9018_v29, %v8702_v16  ;;  %v9020_v32 = vpop.f32.mrb[77].mxu1  ;;  %v9061_v60 = vpop.f32.mrb[69].mxu0  ;;  %v15937_v16 = vld [vmem:[#allocation5 + $0x5b0] ss:$28 sps:$4 sm:$0xff]  }
0x2010   :  { %v9021_v47 = vadd.f32 %v9020_v32, %v8706_v33  ;;  %v9062_v26 = vadd.f32 %v9061_v60, %v8714_v61  ;;  %v9022_v50 = vpop.f32.mrb[78].mxu1  ;;  %v9063_v45 = vpop.f32.mrb[70].mxu0  ;;  %v15940_v33 = vld [vmem:[#allocation5 + $0x5b8] ss:$28 sps:$4 sm:$0xff]   ;;  %v15945_v61 = vld [vmem:[#allocation5 + $0x5ec] ss:$28 sps:$4 sm:$0xff]  }
0x2011   :  { %v9066_v56 = vmax.f32 %v9019_v17, 0.0  ;;  %v9023_v58 = vpop.f32.mrb[79].mxu1  ;;  %v9064_v53 = vpop.f32.mrb[71].mxu0  ;;  %v15948_v29 = vld [vmem:[#allocation5 + $0x5f4] ss:$28 sps:$4 sm:$0xff]  }
0x2012   :  { %v9067_v18 = vmax.f32 %v9021_v47, 0.0  ;;  %v9069_v0 = vmax.f32 %v9062_v26, 0.0  ;;  %v15943_v17 = vld [vmem:[#allocation5 + $0x5e8] ss:$28 sps:$4 sm:$0xff]   ;;  %v15946_v32 = vld [vmem:[#allocation5 + $0x5f0] ss:$28 sps:$4 sm:$0xff]  }
0x2013   :  { %v19814_v4 = vpack.c.bf16 %v9066_v56, %v9066_v56  ;;  %v15951_v60 = vld [vmem:[#allocation5 + $0x624] ss:$28 sps:$4 sm:$0xff]   ;;  %v15954_v47 = vld [vmem:[#allocation5 + $0x62c] ss:$28 sps:$4 sm:$0xff]   ;;  %v15957_v45 = vld [vmem:[#allocation5 + $0x65c] ss:$28 sps:$4 sm:$0xff]  }
0x2014   :  { %v19812_v42 = vpack.c.bf16 %v9067_v18, %v9067_v18  ;;  %v19818_v54 = vpack.c.bf16 %v9069_v0, %v9069_v0  ;;  %v15949_v26 = vld [vmem:[#allocation5 + $0x620] ss:$28 sps:$4 sm:$0xff]   ;;  %v15952_v50 = vld [vmem:[#allocation5 + $0x628] ss:$28 sps:$4 sm:$0xff]   ;;  %v15955_v58 = vld [vmem:[#allocation5 + $0x658] ss:$28 sps:$4 sm:$0xff]  }
0x2015   :  { %v15960_v56 = vld [vmem:[#allocation5 + $0x664] ss:$28 sps:$4 sm:$0xff]   ;;  %v20578_v18 = vld [vmem:[#allocation125_spill] sm:$0xff] }
0x2016   :  { %10553 = vmatprep.mubr.bf16.mxu1 %v19812_v42  ;;  %10635 = vmatprep.mubr.bf16.mxu0 %v19812_v42  ;;  %v15958_v53 = vld [vmem:[#allocation5 + $0x660] ss:$28 sps:$4 sm:$0xff]   ;;  %v8710_v0 = vrot.slane %v19802_v28, %v20578_v18 }
0x2017   :  { %10554 = vmatmul.mubr.bf16.vlgmr.msra.gmra.mrb[80].mxu1 %v19814_v4  ;;  %10636 = vmatmul.mubr.bf16.vlgmr.msra.gmra.mrb[72].mxu0 %v19814_v4 }
0x2018   :  { %10563 = vmatpush1.bf16.msra.mxu1 %v15877_v39  ;;  %10645 = vmatpush1.bf16.msra.mxu0 %v15880_v13  ;;  %v15963_v39 = vld [vmem:[#allocation5 + $0x694] ss:$28 sps:$4 sm:$0xff]   ;;  %v15966_v13 = vld [vmem:[#allocation5 + $0x69c] ss:$28 sps:$4 sm:$0xff]  }
0x2019   :  { %11999 = vmatprep.mubr.msk.bf16.mxu1 %vm3464_vm3, %v19818_v54  ;;  %12001 = vmatprep.mubr.msk.bf16.mxu0 %vm3464_vm3, %v19818_v54 }
0x201a   :  { %10564 = vmatprep.subr.bf16.mxu1 %v15885_v52  ;;  %10646 = vmatprep.subr.bf16.mxu0 %v15888_v55  ;;  %v9322_v52 = vld [vmem:[#allocation5 + $0x6c8] sm:$0x33]  ;;  %v9323_v55 = vld [vmem:[#allocation5 + $0x6d0] sm:$0x33] }
0x201c   :  { %10565 = vmatpush1.bf16.msra.mxu1 %v15883_v19  ;;  %10647 = vmatpush1.bf16.msra.mxu0 %v15886_v20  ;;  %v15961_v19 = vld [vmem:[#allocation5 + $0x690] ss:$28 sps:$4 sm:$0xff]   ;;  %v15964_v20 = vld [vmem:[#allocation5 + $0x698] ss:$28 sps:$4 sm:$0xff]  }
0x201d   :  { %10566 = vmatprep.subr.bf16.mxu1 %v15891_v6  ;;  %10648 = vmatprep.subr.bf16.mxu0 %v15894_v2  ;;  %v11992_v6 = vcombine.high %v9322_v52, %v9322_v52  ;;  %v11991_v2 = vcombine.low %v9322_v52, %v9322_v52  ;;  %v16029_v52 = vld [vmem:[#allocation5 + $0x600] ss:$28 sps:$4 sm:$0xff]  }
0x201f   :  { %v10501_v28 = vsel %vm3468_vm4, %v11991_v2, 0  ;;  %v16031_v2 = vld [vmem:[#allocation5 + $0x2b0] ss:$28 sps:$4 sm:$0xff]  }
0x2020   :  { %10567 = vmatpush1.bf16.msra.mxu1 %v15889_v24  ;;  %10649 = vmatpush1.bf16.msra.mxu0 %v15892_v27  ;;  %v9060_v24 = vadd.f32 %v19810_v5, %v8710_v0  ;;  %v11994_v27 = vcombine.high %v9323_v55, %v9323_v55  ;;  %v15971_v5 = vld [vmem:[#allocation5 + $0x10] ss:$28 sps:$4 sm:$0xff]   ;;  %v16021_v0 = vld [vmem:[#allocation5 + $0x240] ss:$28 sps:$4 sm:$0xff]  }
0x2021   :  { %10568 = vmatprep.subr.bf16.mxu1 %v15897_v59  ;;  %10650 = vmatprep.subr.bf16.mxu0 %v15900_v57  ;;  %v11993_v59 = vcombine.low %v9323_v55, %v9323_v55  ;;  %v16026_v55 = vld [vmem:[#allocation5 + $0x278] ss:$28 sps:$4 sm:$0xff]  }
0x2022   :  { %v9068_v57 = vmax.f32 %v9060_v24, 0.0  ;;  %v16035_v24 = vld [vmem:[#allocation5 + $0x478] ss:$28 sps:$4 sm:$0xff]  }
0x2024   :  { %10569 = vmatpush1.bf16.msra.mxu1 %v15895_v46  ;;  %10651 = vmatpush1.bf16.msra.mxu0 %v15898_v31  ;;  %v10507_v46 = vsel %vm3468_vm4, %v11993_v59, 0  ;;  %v15973_v31 = vld [vmem:[#allocation5 + $0x14] ss:$28 sps:$4 sm:$0xff]  }
0x2025   :  { %10570 = vmatprep.subr.bf16.mxu1 %v15903_v7  ;;  %10652 = vmatprep.subr.bf16.mxu0 %v15906_v34  ;;  %v15974_v7 = vld [vmem:[#allocation5 + $0x1d8] ss:$28 sps:$4 sm:$0xff]   ;;  %v19833_v34 = vpack.c.bf16 %v9068_v57, %v9068_v57  ;;  %v16039_v59 = vld [vmem:[#allocation5 + $0x670] ss:$28 sps:$4 sm:$0xff]  }
0x2026   :  { %v16040_v57 = vld [vmem:[#allocation5 + $0x4b0] ss:$28 sps:$4 sm:$0xff]  }
0x2028   :  { %10571 = vmatpush1.bf16.msra.mxu1 %v15901_v36  ;;  %10653 = vmatpush1.bf16.msra.mxu0 %v15904_v25  ;;  %v15975_v36 = vld [vmem:[#allocation5 + $0x18] ss:$28 sps:$4 sm:$0xff]   ;;  %v15978_v25 = vld [vmem:[#allocation5 + $0x4c] ss:$28 sps:$4 sm:$0xff]  }
0x2029   :  { %10572 = vmatprep.subr.bf16.mxu1 %v15909_v8  ;;  %10654 = vmatprep.subr.bf16.mxu0 %v15912_v49  ;;  %v15979_v8 = vld [vmem:[#allocation5 + $0x210] ss:$28 sps:$4 sm:$0xff]   ;;  %v15976_v49 = vld [vmem:[#allocation5 + $0x48] ss:$28 sps:$4 sm:$0xff]  }
0x202c   :  { %10573 = vmatpush1.bf16.msra.mxu1 %v15907_v51  ;;  %10655 = vmatpush1.bf16.msra.mxu0 %v15910_v3  ;;  %v15980_v51 = vld [vmem:[#allocation5 + $0x50] ss:$28 sps:$4 sm:$0xff]   ;;  %v15983_v3 = vld [vmem:[#allocation5 + $0x84] ss:$28 sps:$4 sm:$0xff]  }
0x202d   :  { %10574 = vmatprep.subr.bf16.mxu1 %v15915_v9  ;;  %10656 = vmatprep.subr.bf16.mxu0 %v15918_v10  ;;  %v15984_v9 = vld [vmem:[#allocation5 + $0x248] ss:$28 sps:$4 sm:$0xff]   ;;  %v15981_v10 = vld [vmem:[#allocation5 + $0x80] ss:$28 sps:$4 sm:$0xff]  }
0x2030   :  { %10575 = vmatpush1.bf16.msra.mxu1 %v15913_v41  ;;  %10657 = vmatpush1.bf16.msra.mxu0 %v15916_v30  ;;  %v15985_v41 = vld [vmem:[#allocation5 + $0x88] ss:$28 sps:$4 sm:$0xff]   ;;  %v15988_v30 = vld [vmem:[#allocation5 + $0xbc] ss:$28 sps:$4 sm:$0xff]  }
0x2031   :  { %10576 = vmatprep.subr.bf16.mxu1 %v15921_v43  ;;  %10658 = vmatprep.subr.bf16.mxu0 %v15924_v14  ;;  %v15989_v43 = vld [vmem:[#allocation5 + $0x280] ss:$28 sps:$4 sm:$0xff]   ;;  %v15986_v14 = vld [vmem:[#allocation5 + $0xb8] ss:$28 sps:$4 sm:$0xff]  }
0x2034   :  { %10577 = vmatpush1.bf16.msra.mxu1 %v15919_v1  ;;  %10659 = vmatpush1.bf16.msra.mxu0 %v15922_v12  ;;  %v15990_v1 = vld [vmem:[#allocation5 + $0xc0] ss:$28 sps:$4 sm:$0xff]   ;;  %v15993_v12 = vld [vmem:[#allocation5 + $0xf4] ss:$28 sps:$4 sm:$0xff]  }
0x2035   :  { %10578 = vmatprep.subr.bf16.mxu1 %v15927_v48  ;;  %10660 = vmatprep.subr.bf16.mxu0 %v15930_v40  ;;  %v15991_v48 = vld [vmem:[#allocation5 + $0xf0] ss:$28 sps:$4 sm:$0xff]   ;;  %v15995_v40 = vld [vmem:[#allocation5 + $0xf8] ss:$28 sps:$4 sm:$0xff]  }
0x2038   :  { %10579 = vmatpush1.bf16.msra.mxu1 %v15925_v63  ;;  %10661 = vmatpush1.bf16.msra.mxu0 %v15928_v37  ;;  %v15998_v63 = vld [vmem:[#allocation5 + $0x12c] ss:$28 sps:$4 sm:$0xff]  }
0x2039   :  { %10580 = vmatprep.subr.bf16.mxu1 %v15933_v21  ;;  %10662 = vmatprep.subr.bf16.mxu0 %v15936_v44  ;;  %v15999_v37 = vld [vmem:[#allocation5 + $0x2f0] ss:$28 sps:$4 sm:$0xff]   ;;  %v15996_v21 = vld [vmem:[#allocation5 + $0x128] ss:$28 sps:$4 sm:$0xff]  }
0x203a   :  { %v16000_v44 = vld [vmem:[#allocation5 + $0x130] ss:$28 sps:$4 sm:$0xff]  }
0x203c   :  { %10581 = vmatpush1.bf16.msra.mxu1 %v15931_v23  ;;  %10663 = vmatpush1.bf16.msra.mxu0 %v15934_v22  ;;  %v16003_v23 = vld [vmem:[#allocation5 + $0x164] ss:$28 sps:$4 sm:$0xff]  }
0x203d   :  { %10582 = vmatprep.subr.bf16.mxu1 %v15939_v15  ;;  %10664 = vmatprep.subr.bf16.mxu0 %v15942_v35  ;;  %v16004_v22 = vld [vmem:[#allocation5 + $0x328] ss:$28 sps:$4 sm:$0xff]   ;;  %v16001_v15 = vld [vmem:[#allocation5 + $0x160] ss:$28 sps:$4 sm:$0xff]  }
0x203e   :  { %v16005_v35 = vld [vmem:[#allocation5 + $0x168] ss:$28 sps:$4 sm:$0xff]  }
0x2040   :  { %10583 = vmatpush1.bf16.msra.mxu1 %v15937_v16  ;;  %10665 = vmatpush1.bf16.msra.mxu0 %v15940_v33  ;;  %v16008_v16 = vld [vmem:[#allocation5 + $0x19c] ss:$28 sps:$4 sm:$0xff]  }
0x2041   :  { %10584 = vmatprep.subr.bf16.mxu1 %v15945_v61  ;;  %10666 = vmatprep.subr.bf16.mxu0 %v15948_v29  ;;  %v16009_v33 = vld [vmem:[#allocation5 + $0x360] ss:$28 sps:$4 sm:$0xff]   ;;  %v16006_v61 = vld [vmem:[#allocation5 + $0x198] ss:$28 sps:$4 sm:$0xff]  }
0x2042   :  { %v16010_v29 = vld [vmem:[#allocation5 + $0x1a0] ss:$28 sps:$4 sm:$0xff]  }
0x2044   :  { %10585 = vmatpush1.bf16.msra.mxu1 %v15943_v17  ;;  %10667 = vmatpush1.bf16.msra.mxu0 %v15946_v32  ;;  %v16013_v17 = vld [vmem:[#allocation5 + $0x1d4] ss:$28 sps:$4 sm:$0xff]  }
0x2045   :  { %10586 = vmatprep.subr.bf16.mxu1 %v15951_v60  ;;  %10668 = vmatprep.subr.bf16.mxu0 %v15954_v47  ;;  %v16014_v32 = vld [vmem:[#allocation5 + $0x558] ss:$28 sps:$4 sm:$0xff]   ;;  %v16011_v60 = vld [vmem:[#allocation5 + $0x1d0] ss:$28 sps:$4 sm:$0xff]  }
0x2046   :  { %v16015_v47 = vld [vmem:[#allocation5 + $0x398] ss:$28 sps:$4 sm:$0xff]  }
0x2048   :  { %10587 = vmatpush1.bf16.msra.mxu1 %v15949_v26  ;;  %10669 = vmatpush1.bf16.msra.mxu0 %v15952_v50  ;;  %v16018_v26 = vld [vmem:[#allocation5 + $0x20c] ss:$28 sps:$4 sm:$0xff]  }
0x2049   :  { %10588 = vmatprep.subr.bf16.mxu1 %v15957_v45  ;;  %10670 = vmatprep.subr.bf16.mxu0 %v15960_v56  ;;  %v16019_v50 = vld [vmem:[#allocation5 + $0x590] ss:$28 sps:$4 sm:$0xff]   ;;  %v16016_v45 = vld [vmem:[#allocation5 + $0x208] ss:$28 sps:$4 sm:$0xff]  }
0x204a   :  { %v16020_v56 = vld [vmem:[#allocation5 + $0x3d0] ss:$28 sps:$4 sm:$0xff]  }
0x204c   :  { %10589 = vmatpush1.bf16.msra.mxu1 %v15955_v58  ;;  %10671 = vmatpush1.bf16.msra.mxu0 %v15958_v53  ;;  %v16023_v58 = vld [vmem:[#allocation5 + $0x244] ss:$28 sps:$4 sm:$0xff]  }
0x204d   :  { %10590 = vmatprep.subr.bf16.mxu1 %v15963_v39  ;;  %10672 = vmatprep.subr.bf16.mxu0 %v15966_v13  ;;  %v16024_v53 = vld [vmem:[#allocation5 + $0x5c8] ss:$28 sps:$4 sm:$0xff]   ;;  %v16028_v13 = vld [vmem:[#allocation5 + $0x27c] ss:$28 sps:$4 sm:$0xff]  }
0x204e   :  { %v16025_v39 = vld [vmem:[#allocation5 + $0x408] ss:$28 sps:$4 sm:$0xff]  }
0x2050   :  { %10591 = vmatpush1.bf16.msra.mxu1 %v15961_v19  ;;  %10673 = vmatpush1.bf16.msra.mxu0 %v15964_v20  ;;  %v16030_v19 = vld [vmem:[#allocation5 + $0x440] ss:$28 sps:$4 sm:$0xff]   ;;  %v16033_v20 = vld [vmem:[#allocation5 + $0x2b4] ss:$28 sps:$4 sm:$0xff]  }
0x2051   :  { %11998 = vmatprep.subr.msk.bf16.mxu1 %vm3468_vm4, %v11992_v6  ;;  %12000 = vmatprep.subr.msk.bf16.mxu0 %vm3468_vm4, %v11994_v27  ;;  %v16034_v6 = vld [vmem:[#allocation5 + $0x638] ss:$28 sps:$4 sm:$0xff]   ;;  %v16038_v27 = vld [vmem:[#allocation5 + $0x2ec] ss:$28 sps:$4 sm:$0xff]  }
0x2054   :  { %10593 = vmatpush1.bf16.msra.mxu1 %v10501_v28  ;;  %10675 = vmatpush1.bf16.msra.mxu0 %v10507_v46  ;;  %v16036_v28 = vld [vmem:[#allocation5 + $0x2e8] ss:$28 sps:$4 sm:$0xff]  }
0x2055   :  { %10685 = vmatprep.subr.bf16.mxu1 %v15973_v31  ;;  %12027 = vmatprep.subr.bf16.mxu0 %v15974_v7  ;;  %v16043_v46 = vld [vmem:[#allocation5 + $0x324] ss:$28 sps:$4 sm:$0xff]  }
0x2056   :  { %v16044_v31 = vld [vmem:[#allocation5 + $0x6a8] ss:$28 sps:$4 sm:$0xff]   ;;  %v16041_v7 = vld [vmem:[#allocation5 + $0x320] ss:$28 sps:$4 sm:$0xff]  }
0x2057   :  { %10595 = vmatmul.mubr.bf16.vlgmr.msra.gmra.mrb[80].mxu1 %v19833_v34  ;;  %10677 = vmatmul.mubr.bf16.vlgmr.msra.gmra.mrb[72].mxu0 %v19833_v34 }
0x2058   :  { %10686 = vmatpush1.bf16.msra.mxu1 %v15971_v5  ;;  %10717 = vmatprep.mubr.bf16.mxu1 %v19812_v42  ;;  %v16045_v5 = vld [vmem:[#allocation5 + $0x4e8] ss:$28 sps:$4 sm:$0xff]  }
0x2059   :  { %12028 = vmatpush3.bf16.msra.mxu0 %v15975_v36  ;;  %10799 = vmatprep.mubr.bf16.mxu0 %v19812_v42  ;;  %v15994_v42 = vld [vmem:[#allocation5 + $0x2b8] ss:$28 sps:$4 sm:$0xff]  }
0x205a   :  { %10687 = vmatprep.subr.bf16.mxu1 %v15978_v25  ;;  %12029 = vmatprep.subr.bf16.mxu0 %v15979_v8  ;;  %v16048_v36 = vld [vmem:[#allocation5 + $0x35c] ss:$28 sps:$4 sm:$0xff]   ;;  %v16049_v25 = vld [vmem:[#allocation5 + $0x6e0] ss:$0 sps:$4 sm:$0x33]  }
0x205b   :  { %v16046_v8 = vld [vmem:[#allocation5 + $0x358] ss:$28 sps:$4 sm:$0xff]  }
0x205c   :  { %10688 = vmatpush1.bf16.msra.mxu1 %v15976_v49  ;;  %v16050_v49 = vld [vmem:[#allocation5 + $0x520] ss:$28 sps:$4 sm:$0xff]  }
0x205d   :  { %12030 = vmatpush3.bf16.msra.mxu0 %v15980_v51  ;;  %10689 = vmatprep.subr.bf16.mxu1 %v15983_v3  ;;  %v16053_v51 = vld [vmem:[#allocation5 + $0x394] ss:$28 sps:$4 sm:$0xff]  }
0x205e   :  { %12031 = vmatprep.subr.bf16.mxu0 %v15984_v9  ;;  %v16051_v3 = vld [vmem:[#allocation5 + $0x390] ss:$28 sps:$4 sm:$0xff]  }
0x205f   :  { %v16056_v9 = vld [vmem:[#allocation5 + $0x3cc] ss:$28 sps:$4 sm:$0xff]  }
0x2060   :  { %10690 = vmatpush1.bf16.msra.mxu1 %v15981_v10  ;;  %v20579_v10 = vld [vmem:[#allocation79_spill] sm:$0xff] }
0x2061   :  { %12032 = vmatpush3.bf16.msra.mxu0 %v15985_v41  ;;  %10691 = vmatprep.subr.bf16.mxu1 %v15988_v30  ;;  %v16054_v41 = vld [vmem:[#allocation5 + $0x3c8] ss:$28 sps:$4 sm:$0xff]  }
0x2062   :  { %12033 = vmatprep.subr.bf16.mxu0 %v15989_v43  ;;  %v16059_v30 = vld [vmem:[#allocation5 + $0x404] ss:$28 sps:$4 sm:$0xff]   ;;  %v20580_v43 = vld [vmem:[#allocation71_spill] sm:$0xff] }
0x2064   :  { %10692 = vmatpush1.bf16.msra.mxu1 %v15986_v14  ;;  %v20581_v14 = vld [vmem:[#allocation80_spill] sm:$0xff] }
0x2065   :  { %12034 = vmatpush3.bf16.msra.mxu0 %v15990_v1  ;;  %10693 = vmatprep.subr.bf16.mxu1 %v15993_v12  ;;  %v16057_v1 = vld [vmem:[#allocation5 + $0x400] ss:$28 sps:$4 sm:$0xff]  }
0x2066   :  { %12035 = vmatprep.subr.bf16.mxu0 %v15994_v42  ;;  %v16062_v12 = vld [vmem:[#allocation5 + $0x43c] ss:$28 sps:$4 sm:$0xff]   ;;  %v20582_v42 = vld [vmem:[#allocation72_spill] sm:$0xff] }
0x2068   :  { %10694 = vmatpush1.bf16.msra.mxu1 %v15991_v48  ;;  %v16060_v48 = vld [vmem:[#allocation5 + $0x438] ss:$28 sps:$4 sm:$0xff]  }
0x2069   :  { %12036 = vmatpush3.bf16.msra.mxu0 %v15995_v40  ;;  %10695 = vmatprep.subr.bf16.mxu1 %v15998_v63  ;;  %v16065_v40 = vld [vmem:[#allocation5 + $0x474] ss:$28 sps:$4 sm:$0xff]   ;;  %v20584_v63 = vld [vmem:[#allocation73_spill] sm:$0xff] }
0x206a   :  { %12037 = vmatprep.subr.bf16.mxu0 %v15999_v37  ;;  %v16063_v37 = vld [vmem:[#allocation5 + $0x470] ss:$28 sps:$4 sm:$0xff]  }
0x206c   :  { %10696 = vmatpush1.bf16.msra.mxu1 %v15996_v21  ;;  %v16068_v21 = vld [vmem:[#allocation5 + $0x4ac] ss:$28 sps:$4 sm:$0xff]  }
0x206d   :  { %12038 = vmatpush3.bf16.msra.mxu0 %v16000_v44  ;;  %10697 = vmatprep.subr.bf16.mxu1 %v16003_v23  ;;  %v20586_v44 = vld [vmem:[#allocation74_spill] sm:$0xff]  ;;  %v20587_v23 = vld [vmem:[#allocation83_spill] sm:$0xff] }
0x206e   :  { %12039 = vmatprep.subr.bf16.mxu0 %v16004_v22  ;;  %v16066_v22 = vld [vmem:[#allocation5 + $0x4a8] ss:$28 sps:$4 sm:$0xff]  }
0x2070   :  { %10698 = vmatpush1.bf16.msra.mxu1 %v16001_v15  ;;  %v16071_v15 = vld [vmem:[#allocation5 + $0x4e4] ss:$28 sps:$4 sm:$0xff]  }
0x2071   :  { %12040 = vmatpush3.bf16.msra.mxu0 %v16005_v35  ;;  %10699 = vmatprep.subr.bf16.mxu1 %v16008_v16  ;;  %v20588_v35 = vld [vmem:[#allocation75_spill] sm:$0xff]  ;;  %v20589_v16 = vld [vmem:[#allocation84_spill] sm:$0xff] }
0x2072   :  { %12041 = vmatprep.subr.bf16.mxu0 %v16009_v33  ;;  %v16069_v33 = vld [vmem:[#allocation5 + $0x4e0] ss:$28 sps:$4 sm:$0xff]  }
0x2074   :  { %10700 = vmatpush1.bf16.msra.mxu1 %v16006_v61  ;;  %v16074_v61 = vld [vmem:[#allocation5 + $0x51c] ss:$28 sps:$4 sm:$0xff]  }
0x2075   :  { %12042 = vmatpush3.bf16.msra.mxu0 %v16010_v29  ;;  %10701 = vmatprep.subr.bf16.mxu1 %v16013_v17  ;;  %v20590_v29 = vld [vmem:[#allocation76_spill] sm:$0xff]  ;;  %v20591_v17 = vld [vmem:[#allocation85_spill] sm:$0xff] }
0x2076   :  { %12049 = vmatprep.subr.bf16.mxu0 %v16014_v32  ;;  %v16072_v32 = vld [vmem:[#allocation5 + $0x518] ss:$28 sps:$4 sm:$0xff]  }
0x2078   :  { %10800 = vmatmul.mubr.bf16.vlgmr.msra.gmra.mrb[76].mxu0 %v19814_v4  ;;  %10702 = vmatpush1.bf16.msra.mxu1 %v16011_v60  ;;  %v16077_v60 = vld [vmem:[#allocation5 + $0x554] ss:$28 sps:$4 sm:$0xff]  }
0x2079   :  { %12050 = vmatpush3.bf16.msra.mxu0 %v16015_v47  ;;  %12004 = vmatprep.mubr.msk.bf16.mxu0 %vm3464_vm3, %v19818_v54  ;;  %v20592_v47 = vld [vmem:[#allocation77_spill] sm:$0xff] }
0x207a   :  { %10703 = vmatprep.subr.bf16.mxu1 %v16018_v26  ;;  %12051 = vmatprep.subr.bf16.mxu0 %v16019_v50  ;;  %v20593_v26 = vld [vmem:[#allocation86_spill] sm:$0xff] }
0x207b   :  { %v16075_v50 = vld [vmem:[#allocation5 + $0x550] ss:$28 sps:$4 sm:$0xff]  }
0x207c   :  { %10704 = vmatpush1.bf16.msra.mxu1 %v16016_v45  ;;  %v16080_v45 = vld [vmem:[#allocation5 + $0x58c] ss:$28 sps:$4 sm:$0xff]  }
0x207d   :  { %12052 = vmatpush3.bf16.msra.mxu0 %v16020_v56  ;;  %10705 = vmatprep.subr.bf16.mxu1 %v16023_v58  ;;  %v20594_v56 = vld [vmem:[#allocation78_spill] sm:$0xff]  ;;  %v20595_v58 = vld [vmem:[#allocation95_spill] sm:$0xff] }
0x207e   :  { %12053 = vmatprep.subr.bf16.mxu0 %v16024_v53  ;;  %v16078_v53 = vld [vmem:[#allocation5 + $0x588] ss:$28 sps:$4 sm:$0xff]  }
0x2080   :  { %10706 = vmatpush1.bf16.msra.mxu1 %v16021_v0  ;;  %v16083_v0 = vld [vmem:[#allocation5 + $0x5c4] ss:$28 sps:$4 sm:$0xff]  }
0x2081   :  { %12054 = vmatpush3.bf16.msra.mxu0 %v16025_v39  ;;  %10707 = vmatprep.subr.bf16.mxu1 %v16028_v13  ;;  %v16081_v39 = vld [vmem:[#allocation5 + $0x5c0] ss:$28 sps:$4 sm:$0xff]  }
0x2082   :  { %12055 = vmatprep.subr.bf16.mxu0 %v16029_v52  ;;  %v16086_v13 = vld [vmem:[#allocation5 + $0x5fc] ss:$28 sps:$4 sm:$0xff]  }
0x2083   :  { %v16084_v52 = vld [vmem:[#allocation5 + $0x5f8] ss:$28 sps:$4 sm:$0xff]  }
0x2084   :  { %10708 = vmatpush1.bf16.msra.mxu1 %v16026_v55  ;;  %v16089_v55 = vld [vmem:[#allocation5 + $0x634] ss:$28 sps:$4 sm:$0xff]  }
0x2085   :  { %12056 = vmatpush3.bf16.msra.mxu0 %v16030_v19  ;;  %10709 = vmatprep.subr.bf16.mxu1 %v16033_v20  ;;  %v16087_v19 = vld [vmem:[#allocation5 + $0x630] ss:$28 sps:$4 sm:$0xff]  }
0x2086   :  { %12057 = vmatprep.subr.bf16.mxu0 %v16034_v6  ;;  %v16092_v20 = vld [vmem:[#allocation5 + $0x66c] ss:$28 sps:$4 sm:$0xff]  }
0x2087   :  { %v16090_v6 = vld [vmem:[#allocation5 + $0x668] ss:$28 sps:$4 sm:$0xff]  }
0x2088   :  { %10710 = vmatpush1.bf16.msra.mxu1 %v16031_v2  ;;  %v16095_v2 = vld [vmem:[#allocation5 + $0x6a4] ss:$28 sps:$4 sm:$0xff]  }
0x2089   :  { %12058 = vmatpush3.bf16.msra.mxu0 %v16035_v24  ;;  %10711 = vmatprep.subr.bf16.mxu1 %v16038_v27  ;;  %v9324_v24 = vld [vmem:[#allocation5 + $0x6d8] sm:$0x33] }
0x208a   :  { %12059 = vmatprep.subr.bf16.mxu0 %v16039_v59  ;;  %v16093_v27 = vld [vmem:[#allocation5 + $0x6a0] ss:$28 sps:$4 sm:$0xff]   ;;  %v11996_v59 = vcombine.high %v9324_v24, %v9324_v24 }
0x208c   :  { %10712 = vmatpush1.bf16.msra.mxu1 %v16036_v28  ;;  %v11995_v28 = vcombine.low %v9324_v24, %v9324_v24 }
0x208d   :  { %12060 = vmatpush3.bf16.msra.mxu0 %v16040_v57  ;;  %10713 = vmatprep.subr.bf16.mxu1 %v16043_v46  ;;  %v20596_v46 = vld [vmem:[#allocation111_spill] sm:$0xff] }
0x208e   :  { %12061 = vmatprep.subr.bf16.mxu0 %v16044_v31  ;;  %v10513_v57 = vsel %vm3468_vm4, %v11995_v28, 0  ;;  %v20597_v31 = vld [vmem:[#allocation103_spill] sm:$0xff] }
0x208f   :  { %v20628_v28 = vld [vmem:[#allocation119_spill] sm:$0xff] }
0x2090   :  { %10714 = vmatpush1.bf16.msra.mxu1 %v16041_v7  ;;  %v20598_v7 = vld [vmem:[#allocation112_spill] sm:$0xff] }
0x2091   :  { %12062 = vmatpush3.bf16.msra.mxu0 %v16045_v5  ;;  %10715 = vmatprep.subr.bf16.mxu1 %v16048_v36  ;;  %v20599_v5 = vld [vmem:[#allocation104_spill] sm:$0xff]  ;;  %v20600_v36 = vld [vmem:[#allocation113_spill] sm:$0xff] }
0x2092   :  { %14809 = vmatprep.subr.msk.bf16.mxu0 %vm3468_vm4, %v16049_v25  ;;  %v20601_v25 = vld [vmem:[#allocation105_spill] sm:$0xff] }
0x2094   :  { %10716 = vmatpush1.bf16.msra.mxu1 %v16046_v8  ;;  %v20602_v8 = vld [vmem:[#allocation114_spill] sm:$0xff] }
0x2095   :  { %12064 = vmatpush3.bf16.msra.mxu0 %v16050_v49  ;;  %10726 = vmatprep.subr.bf16.mxu1 %v16053_v51  ;;  %v20603_v49 = vld [vmem:[#allocation106_spill] sm:$0xff]  ;;  %v20604_v51 = vld [vmem:[#allocation115_spill] sm:$0xff] }
0x2096   :  { %12071 = vmatprep.subr.bf16.mxu0 %v20579_v10  ;;  %v20608_v10 = vld [vmem:[#allocation117_spill] sm:$0xff] }
0x2097   :  { %10718 = vmatmul.mubr.bf16.vlgmr.msra.gmra.mrb[84].mxu1 %v19814_v4  ;;  %v20583_v4 = vld [vmem:[#allocation81_spill] sm:$0xff] }
0x2098   :  { %10840 = vmatmul.mubr.bf16.vlgmr.msra.gmra.mrb[80].mxu0 %v19833_v34  ;;  %10727 = vmatpush1.bf16.msra.mxu1 %v16051_v3  ;;  %v20605_v3 = vld [vmem:[#allocation107_spill] sm:$0xff] }
0x2099   :  { %12003 = vmatprep.mubr.msk.bf16.mxu1 %vm3464_vm3, %v19818_v54  ;;  %10728 = vmatprep.subr.bf16.mxu1 %v16056_v9  ;;  %v20585_v54 = vld [vmem:[#allocation82_spill] sm:$0xff]  ;;  %v20606_v9 = vld [vmem:[#allocation116_spill] sm:$0xff] }
0x209a   :  { %12072 = vmatpush3.bf16.msra.mxu0 %v20580_v43  ;;  %v20611_v43 = vld [vmem:[#allocation110_spill] sm:$0xff] }
0x209b   :  { %12073 = vmatprep.subr.bf16.mxu0 %v20581_v14  ;;  %v19883_v14 = vld [vmem:[#allocation26] sm:$0x7f] }
0x209c   :  { %10729 = vmatpush1.bf16.msra.mxu1 %v16054_v41  ;;  %v20609_v41 = vld [vmem:[#allocation109_spill] sm:$0xff] }
0x209d   :  { %10730 = vmatprep.subr.bf16.mxu1 %v16059_v30  ;;  %v20610_v30 = vld [vmem:[#allocation118_spill] sm:$0xff] }
0x209e   :  { %12074 = vmatpush3.bf16.msra.mxu0 %v20582_v42  ;;  %v9343_v42 = vrot.slane %v19883_v14, %v20577_v38  ;;  %v20612_v38 = vld [vmem:[#allocation87_spill] sm:$0xff] }
0x209f   :  { %12075 = vmatprep.subr.bf16.mxu0 %v20583_v4 }
0x20a0   :  { %10731 = vmatpush1.bf16.msra.mxu1 %v16057_v1  ;;  %v9331_v1 = vrot.slane %v19883_v14, %v20575_v11 }
0x20a1   :  { %10732 = vmatprep.subr.bf16.mxu1 %v16062_v12  ;;  %v9335_v12 = vrot.slane %v19883_v14, %v20576_v62 }
0x20a2   :  { %12076 = vmatpush3.bf16.msra.mxu0 %v20584_v63 }
0x20a3   :  { %12077 = vmatprep.subr.bf16.mxu0 %v20585_v54 }
0x20a4   :  { %10733 = vmatpush1.bf16.msra.mxu1 %v16060_v48 }
0x20a5   :  { %10734 = vmatprep.subr.bf16.mxu1 %v16065_v40 }
0x20a6   :  { %12078 = vmatpush3.bf16.msra.mxu0 %v20586_v44 }
0x20a7   :  { %12079 = vmatprep.subr.bf16.mxu0 %v20587_v23 }
0x20a8   :  { %10735 = vmatpush1.bf16.msra.mxu1 %v16063_v37 }
0x20a9   :  { %10736 = vmatprep.subr.bf16.mxu1 %v16068_v21 }
0x20aa   :  { %12080 = vmatpush3.bf16.msra.mxu0 %v20588_v35 }
0x20ab   :  { %12081 = vmatprep.subr.bf16.mxu0 %v20589_v16 }
0x20ac   :  { %10737 = vmatpush1.bf16.msra.mxu1 %v16066_v22 }
0x20ad   :  { %10738 = vmatprep.subr.bf16.mxu1 %v16071_v15 }
0x20ae   :  { %12082 = vmatpush3.bf16.msra.mxu0 %v20590_v29  ;;  %v20613_v29 = vld [vmem:[#allocation96_spill] sm:$0xff] }
0x20af   :  { %12083 = vmatprep.subr.bf16.mxu0 %v20591_v17  ;;  %v20614_v17 = vld [vmem:[#allocation88_spill] sm:$0xff] }
0x20b0   :  { %10739 = vmatpush1.bf16.msra.mxu1 %v16069_v33 }
0x20b1   :  { %10740 = vmatprep.subr.bf16.mxu1 %v16074_v61 }
0x20b2   :  { %12084 = vmatpush3.bf16.msra.mxu0 %v20592_v47  ;;  %v20617_v47 = vld [vmem:[#allocation98_spill] sm:$0xff] }
0x20b3   :  { %12085 = vmatprep.subr.bf16.mxu0 %v20593_v26  ;;  %v20618_v26 = vld [vmem:[#allocation90_spill] sm:$0xff] }
0x20b4   :  { %10741 = vmatpush1.bf16.msra.mxu1 %v16072_v32  ;;  %v20615_v32 = vld [vmem:[#allocation97_spill] sm:$0xff] }
0x20b5   :  { %10742 = vmatprep.subr.bf16.mxu1 %v16077_v60  ;;  %v20616_v60 = vld [vmem:[#allocation89_spill] sm:$0xff] }
0x20b6   :  { %12086 = vmatpush3.bf16.msra.mxu0 %v20594_v56  ;;  %v9339_v56 = vrot.slane %v19883_v14, %v20578_v18 }
0x20b7   :  { %12093 = vmatprep.subr.bf16.mxu0 %v20595_v58  ;;  %v20621_v58 = vld [vmem:[#allocation100_spill] sm:$0xff] }
0x20b8   :  { %10743 = vmatpush1.bf16.msra.mxu1 %v16075_v50  ;;  %v20619_v50 = vld [vmem:[#allocation99_spill] sm:$0xff] }
0x20b9   :  { %10744 = vmatprep.subr.bf16.mxu1 %v16080_v45  ;;  %v20620_v45 = vld [vmem:[#allocation91_spill] sm:$0xff] }
0x20bc   :  { %10745 = vmatpush1.bf16.msra.mxu1 %v16078_v53  ;;  %v20622_v53 = vld [vmem:[#allocation92_spill] sm:$0xff] }
0x20bd   :  { %10746 = vmatprep.subr.bf16.mxu1 %v16083_v0 }
0x20c0   :  { %10747 = vmatpush1.bf16.msra.mxu1 %v16081_v39  ;;  %v20623_v39 = vld [vmem:[#allocation101_spill] sm:$0xff] }
0x20c1   :  { %10748 = vmatprep.subr.bf16.mxu1 %v16086_v13 }
0x20c4   :  { %10749 = vmatpush1.bf16.msra.mxu1 %v16084_v52 }
0x20c5   :  { %10750 = vmatprep.subr.bf16.mxu1 %v16089_v55  ;;  %v20624_v55 = vld [vmem:[#allocation93_spill] sm:$0xff] }
0x20c8   :  { %10751 = vmatpush1.bf16.msra.mxu1 %v16087_v19 }
0x20c9   :  { %10752 = vmatprep.subr.bf16.mxu1 %v16092_v20 }
0x20cc   :  { %10753 = vmatpush1.bf16.msra.mxu1 %v16090_v6 }
0x20cd   :  { %10754 = vmatprep.subr.bf16.mxu1 %v16095_v2  ;;  %v20625_v2 = vld [vmem:[#allocation102_spill] sm:$0xff] }
0x20d0   :  { %10755 = vmatpush1.bf16.msra.mxu1 %v16093_v27  ;;  %v20626_v27 = vld [vmem:[#allocation94_spill] sm:$0xff] }
0x20d1   :  { %12002 = vmatprep.subr.msk.bf16.mxu1 %vm3468_vm4, %v11996_v59  ;;  %v20627_v59 = vmov 0.0  }
0x20d4   :  { %10757 = vmatpush1.bf16.msra.mxu1 %v10513_v57  ;;  %v20629_v57 = vld [vmem:[#allocation120_spill] sm:$0xff] }
0x20d5   :  { %12115 = vmatprep.subr.bf16.mxu1 %v20596_v46  ;;  %v20630_v46 = vld [vmem:[#allocation121_spill] sm:$0xff] }
0x20d7   :  { %10759 = vmatmul.mubr.bf16.vlgmr.msra.gmra.mrb[84].mxu1 %v19833_v34  ;;  %v20607_v34 = vld [vmem:[#allocation108_spill] sm:$0xff] }
0x20d8   :  { %12116 = vmatpush3.bf16.msra.mxu1 %v20597_v31  ;;  %v20631_v31 = vsub.s32 6, %v20630_v46 }
0x20d9   :  { %12117 = vmatprep.subr.bf16.mxu1 %v20598_v7 }
0x20da   :  { %v9355_v7 = vrot.slane %v19883_v14, %v20631_v31 }
0x20dc   :  { %12118 = vmatpush3.bf16.msra.mxu1 %v20599_v5 }
0x20dd   :  { %12119 = vmatprep.subr.bf16.mxu1 %v20600_v36 }
0x20e0   :  { %12120 = vmatpush3.bf16.msra.mxu1 %v20601_v25 }
0x20e1   :  { %12121 = vmatprep.subr.bf16.mxu1 %v20602_v8 }
0x20e4   :  { %12122 = vmatpush3.bf16.msra.mxu1 %v20603_v49 }
0x20e5   :  { %12123 = vmatprep.subr.bf16.mxu1 %v20604_v51 }
0x20e8   :  { %12124 = vmatpush3.bf16.msra.mxu1 %v20605_v3 }
0x20e9   :  { %12125 = vmatprep.subr.bf16.mxu1 %v20606_v9 }
0x20ec   :  { %12126 = vmatpush3.bf16.msra.mxu1 %v20607_v34 }
0x20ed   :  { %12127 = vmatprep.subr.bf16.mxu1 %v20608_v10  ;;  %v20633_v10 = vsub.s32 4, %v20630_v46 }
0x20f0   :  { %12128 = vmatpush3.bf16.msra.mxu1 %v20609_v41  ;;  %v9347_v41 = vrot.slane %v19883_v14, %v20633_v10 }
0x20f1   :  { %12129 = vmatprep.subr.bf16.mxu1 %v20610_v30  ;;  %v20634_v30 = vsub.s32 5, %v20630_v46 }
0x20f4   :  { %12130 = vmatpush3.bf16.msra.mxu1 %v20611_v43  ;;  %v9351_v43 = vrot.slane %v19883_v14, %v20634_v30 }
0x212a   :  { %v10596_v4 = vpop.f32.mrb[80].mxu1  ;;  %v10678_v48 = vpop.f32.mrb[72].mxu0 }
0x212b   :  { %v14763_v40 = vadd.f32 %v10596_v4, %v9331_v1  ;;  %v10598_v63 = vpop.f32.mrb[81].mxu1  ;;  %v10680_v54 = vpop.f32.mrb[73].mxu0  ;;  %v14765_v0 = vadd.f32 %v10678_v48, %v9339_v56 }
0x212c   :  { %v14764_v37 = vadd.f32 %v10598_v63, %v9335_v12  ;;  %v14766_v21 = vadd.f32 %v10680_v54, %v9343_v42  ;;  %v10600_v44 = vpop.f32.mrb[82].mxu1  ;;  %v10682_v23 = vpop.f32.mrb[74].mxu0 }
0x212d   :  { %v10847_v22 = vmax.f32 %v14763_v40, 0.0  ;;  %v10601_v15 = vpop.f32.mrb[83].mxu1  ;;  %v10683_v35 = vpop.f32.mrb[75].mxu0  ;;  %v10849_v19 = vmax.f32 %v14765_v0, 0.0  ;;  %v16098_v44 = vld [vmem:[%s20632_s27] sm:$0xff]   ;;  %v16099_v23 = vld [vmem:[%s20632_s27 + $0x8] sm:$0xff]  }
0x212e   :  { %v10848_v16 = vmax.f32 %v14764_v37, 0.0  ;;  %v10850_v11 = vmax.f32 %v14766_v21, 0.0 }
0x212f   :  { %v10854_v61 = vpack.c.bf16 %v10847_v22, %v10847_v22  ;;  %v10856_v18 = vpack.c.bf16 %v10849_v19, %v10849_v19 }
0x2130   :  { %v10855_v33 = vpack.c.bf16 %v10848_v16, %v10848_v16  ;;  %v10857_v62 = vpack.c.bf16 %v10850_v11, %v10850_v11  ;;  %v16100_v16 = vld [vmem:[%s20632_s27 + $0x10] sm:$0xff]  }
0x2132   :  { %10953 = vmatprep.mubr.bf16.mxu0 %v10855_v33  ;;  %v16101_v33 = vld [vmem:[%s20632_s27 + $0x18] sm:$0xff]  }
0x2133   :  { %10954 = vmatmul.mubr.bf16.vlgmr.msra.gmra.mrb[84].mxu0 %v10854_v61  ;;  %v12005_v61 = vld [vmem:[#allocation28] ss:$0 sm:$0xff] }
0x2134   :  { %12094 = vmatpush3.bf16.msra.mxu0 %v20612_v38  ;;  %10993 = vmatprep.mubr.bf16.mxu0 %v10857_v62 }
0x2135   :  { %12095 = vmatprep.subr.bf16.mxu0 %v20613_v29 }
0x2138   :  { %12096 = vmatpush3.bf16.msra.mxu0 %v20614_v17 }
0x2139   :  { %12097 = vmatprep.subr.bf16.mxu0 %v20615_v32 }
0x213c   :  { %12098 = vmatpush3.bf16.msra.mxu0 %v20616_v60 }
0x213d   :  { %12099 = vmatprep.subr.bf16.mxu0 %v20617_v47 }
0x2140   :  { %12100 = vmatpush3.bf16.msra.mxu0 %v20618_v26 }
0x2141   :  { %12101 = vmatprep.subr.bf16.mxu0 %v20619_v50 }
0x2144   :  { %12102 = vmatpush3.bf16.msra.mxu0 %v20620_v45 }
0x2145   :  { %12103 = vmatprep.subr.bf16.mxu0 %v20621_v58 }
0x2148   :  { %12104 = vmatpush3.bf16.msra.mxu0 %v20622_v53 }
0x2149   :  { %12105 = vmatprep.subr.bf16.mxu0 %v20623_v39 }
0x214b   :  { %v12043_v13 = vpop.f32.mrb[76].mxu0 }
0x214c   :  { %v12044_v52 = vpop.f32.mrb[77].mxu0  ;;  %12106 = vmatpush3.bf16.msra.mxu0 %v20624_v55 }
0x214d   :  { %v12045_v20 = vadd.f32 %v12044_v52, %v12043_v13  ;;  %v12046_v6 = vpop.f32.mrb[78].mxu0  ;;  %12107 = vmatprep.subr.bf16.mxu0 %v20625_v2 }
0x214e   :  { %v12047_v24 = vpop.f32.mrb[79].mxu0 }
0x214f   :  { %v10802_v25 = vadd.f32 %v12045_v20, %v9355_v7 }
0x2150   :  { %12108 = vmatpush3.bf16.msra.mxu0 %v20626_v27 }
0x2151   :  { %12169 = vmatprep.subr.bf16.mxu0 %v20627_v59 }
0x2153   :  { %10994 = vmatmul.mubr.bf16.vlgmr.msra.gmra.mrb[88].mxu0 %v10856_v18 }
0x2154   :  { %12170 = vmatpush3.bf16.msra.mxu0 %v20628_v28  ;;  %12173 = vmatprep.mubr.msk.bf16.mxu0 %vm16579_vm1, %v20627_v59 }
0x2155   :  { %12171 = vmatprep.subr.bf16.mxu0 %v20627_v59 }
0x2158   :  { %12172 = vmatpush3.bf16.msra.mxu0 %v20629_v57 }
0x2159   :  { %12177 = vmatprep.subr.bf16.mxu0 %v20627_v59 }
0x216b   :  { %v12065_v5 = vpop.f32.mrb[80].mxu0 }
0x216c   :  { %v12066_v36 = vpop.f32.mrb[81].mxu0 }
0x216d   :  { %v12067_v8 = vadd.f32 %v12066_v36, %v12065_v5  ;;  %v12068_v49 = vpop.f32.mrb[82].mxu0 }
0x216e   :  { %v12069_v51 = vpop.f32.mrb[83].mxu0 }
0x216f   :  { %v10842_v3 = vadd.f32 %v12067_v8, %v10802_v25 }
0x2171   :  { %v10853_v9 = vmax.f32 %v10842_v3, 0.0 }
0x2173   :  { %v10860_v34 = vpack.c.bf16 %v10853_v9, %v10853_v9 }
0x2175   :  { %12174 = vmatmul.mubr.msk.bf16.vlgmr.msra.gmra.mrb[92].mxu0 %vm2734_vm2, %v10860_v34 }
0x2176   :  { %12185 = vmatprep.mubr.msk.bf16.mxu0 %vm16579_vm1, %v20627_v59  ;;  %12178 = vmatpush3.bf16.msra.mxu0 %v16098_v44 }
0x2177   :  { %12179 = vmatprep.subr.bf16.mxu0 %v20627_v59 }
0x217a   :  { %12180 = vmatpush3.bf16.msra.mxu0 %v16099_v23 }
0x217b   :  { %12181 = vmatprep.subr.bf16.mxu0 %v20627_v59 }
0x217e   :  { %12182 = vmatpush3.bf16.msra.mxu0 %v16100_v16 }
0x217f   :  { %12183 = vmatprep.subr.bf16.mxu0 %v20627_v59 }
0x2182   :  { %12184 = vmatpush3.bf16.msra.mxu0 %v16101_v33 }
0x21aa   :  { %v10760_v1 = vpop.f32.mrb[84].mxu1 }
0x21ab   :  { %v14767_v12 = vadd.f32 %v10760_v1, %v9347_v41  ;;  %v10762_v42 = vpop.f32.mrb[85].mxu1 }
0x21ac   :  { %v14768_v4 = vadd.f32 %v10762_v42, %v9351_v43  ;;  %v10764_v48 = vpop.f32.mrb[86].mxu1 }
0x21ad   :  { %v10851_v40 = vmax.f32 %v14767_v12, 0.0  ;;  %v10765_v63 = vpop.f32.mrb[87].mxu1 }
0x21ae   :  { %v10852_v54 = vmax.f32 %v14768_v4, 0.0 }
0x21af   :  { %v10858_v21 = vpack.c.bf16 %v10851_v40, %v10851_v40 }
0x21b0   :  { %v10859_v37 = vpack.c.bf16 %v10852_v54, %v10852_v54 }
0x21b2   :  { %11033 = vmatprep.mubr.bf16.mxu1 %v10859_v37 }
0x21b3   :  { %11034 = vmatmul.mubr.bf16.vlgmr.msra.gmra.mrb[88].mxu1 %v10858_v21 }
0x2206   :  { %v12087_v14 = vpop.f32.mrb[84].mxu0 }
0x2207   :  { %v12088_v22 = vpop.f32.mrb[85].mxu0 }
0x2208   :  { %v12089_v15 = vadd.f32 %v12088_v22, %v12087_v14  ;;  %v12090_v35 = vpop.f32.mrb[86].mxu0 }
0x2209   :  { %v12091_v11 = vpop.f32.mrb[87].mxu0 }
0x220a   :  { %v10956_v29 = vadd.f32 %v12089_v15, %v12005_v61 }
0x2226   :  { %v12109_v62 = vpop.f32.mrb[88].mxu0 }
0x2227   :  { %v12110_v38 = vpop.f32.mrb[89].mxu0 }
0x2228   :  { %v12111_v17 = vadd.f32 %v12110_v38, %v12109_v62  ;;  %v12112_v32 = vpop.f32.mrb[90].mxu0 }
0x2229   :  { %v12113_v60 = vpop.f32.mrb[91].mxu0 }
0x222a   :  { %v10996_v47 = vadd.f32 %v12111_v17, %v10956_v29 }
0x2248   :  { %v11075_v26 = vpop.f32.mrb[92].mxu0 }
0x2249   :  { %v12175_v50 = vpop.f32.mrb[93].mxu0 }
0x224a   :  { %v11078_v45 = vpop.f32.mrb[94].mxu0 }
0x224b   :  { %v12176_v56 = vpop.f32.mrb[95].mxu0 }
0x2286   :  { %v12131_v58 = vpop.f32.mrb[88].mxu1 }
0x2287   :  { %v12132_v53 = vpop.f32.mrb[89].mxu1 }
0x2288   :  { %v12133_v0 = vadd.f32 %v12132_v53, %v12131_v58  ;;  %v12134_v39 = vpop.f32.mrb[90].mxu1 }
0x2289   :  { %v12135_v13 = vpop.f32.mrb[91].mxu1 }
0x228a   :  { %v11036_v52 = vadd.f32 %v12133_v0, %v10996_v47 }
0x228c   :  { %v11076_v55 = vadd.f32 %v11075_v26, %v11036_v52 }
0x228e   :  { %v11081_v19 = vpack.c.bf16 %v11076_v55, %v11076_v55 }
0x2290   :  { %12186 = vmatmul.mubr.msk.bf16.vlgmr.msra.gmra.mrb[96].mxu0 %vm1331_vm0, %v11081_v19 }
0x2291   :  { %16443 = shalt.err (!%p16440_p12)
}
0x2292   :  { %s16444_s25 = scalar_lea.hbm %s16748_s12, 48 }
0x2293   :  { %p16445_p13 = scmp.ne.s32.totalorder %s16748_s12, %s16444_s25  ;;  %p16448_p0 = scmp.lt.u32.totalorder %s16444_s25, %s16748_s12 }
0x2295   :  { %p16450_p1 = pnand %p16448_p0, %p16445_p13 }
0x2297   :  { %16453 = shalt.err (!%p16450_p1)
}
0x2298   :  { %s16581_s0 = smov 16   ;;  %s16582_s10 = smov 1  }
0x2299   :  { %11187 = dma.vmem_to_hbm [thread:$0]  %s11182_s4, 48, %s16748_s12, [#allocation33], %s16581_s0, %s16581_s0, %s16582_s10  }
0x229a   :  { %s16583_s30 = smov [#allocation34]  }
0x229b   :  { %s11193_s11 = sshll.u32 %s16583_s30, 4  ;;  %s11194_s11 = int_to_ptr.vmem [resolvable:$true] %s11193_s11 }
0x229c   :  { %s16454_s17 = scalar_lea.vmem %s11194_s11, 48  ;;  %s16458_s21 = scalar_lea.vmem %s11194_s11, 64 }
0x229d   :  { %p16455_p2 = scmp.ne.s32.totalorder %s11194_s11, %s16454_s17  ;;  %p16459_p3 = scmp.lt.s32.totalorder %s11194_s11, %s11194_s11 }
0x229e   :  { %p16460_p4 = scmp.lt.s32.totalorder %s16458_s21, %s16454_s17 }
0x22a0   :  { %p16461_p5 = por %p16460_p4, %p16459_p3 }
0x22a2   :  { %p16462_p6 = pnand %p16461_p5, %p16455_p2 }
0x22a4   :  { %16465 = shalt.err (!%p16462_p6)
}
0x22a5   :  { %s16466_s15 = scalar_lea.hbm %s16753_s14, 48 }
0x22a6   :  { %p16467_p7 = scmp.ne.s32.totalorder %s16753_s14, %s16466_s15  ;;  %p16470_p8 = scmp.lt.u32.totalorder %s16466_s15, %s16753_s14 }
0x22a8   :  { %p16472_p9 = pnand %p16470_p8, %p16467_p7 }
0x22aa   :  { %16475 = shalt.err (!%p16472_p9)
}
0x22ab   :  { %11199 = dma.vmem_to_hbm [thread:$0]  %s11194_s11, 48, %s16753_s14, [#allocation33], %s16581_s0, %s16581_s0, %s16582_s10   ;;  %v12007_v20 = vld [vmem:[#allocation29] ss:$0 sm:$0xff]  ;;  %vm11164_vm10 = vcmask 80896  }
0x22ac   :  { %s16584_s12 = smov [#allocation31]  }
0x22ad   :  { %s11172_s9 = sshll.u32 %s16584_s12, 4  ;;  %s11173_s9 = int_to_ptr.vmem [resolvable:$true] %s11172_s9 }
0x22ae   :  { %s16476_s16 = scalar_lea.vmem %s11173_s9, 128  ;;  %p16481_p11 = scmp.lt.s32.totalorder %s11173_s9, %s11173_s9 }
0x22af   :  { %p16477_p10 = scmp.ne.s32.totalorder %s11173_s9, %s16476_s16  ;;  %p16482_p12 = scmp.lt.s32.totalorder %s16476_s16, %s16476_s16 }
0x22b1   :  { %p16483_p13 = por %p16482_p12, %p16481_p11 }
0x22b3   :  { %p16484_p0 = pnand %p16483_p13, %p16477_p10 }
0x2363   :  { %v11158_v6 = vpop.f32.mrb[96].mxu0 }
0x2364   :  { %v11159_v2 = vadd.f32 %v12007_v20, %v11158_v6  ;;  %v12187_v24 = vpop.f32.mrb[97].mxu0 }
0x2365   :  { %v11161_v27 = vpop.f32.mrb[98].mxu0 }
0x2366   :  { %v12188_v18 = vpop.f32.mrb[99].mxu0  ;;  %11165 = vst.msk [vmem:[#allocation31] sm:$0xff] %vm11164_vm10, %v11159_v2 }
0x2367   :  { %16487 = shalt.err (!%p16484_p0)
}
0x2368   :  { %s16488_s14 = scalar_lea.hbm %s16743_s5, 128 }
0x2369   :  { %p16489_p1 = scmp.ne.s32.totalorder %s16743_s5, %s16488_s14  ;;  %p16492_p2 = scmp.lt.u32.totalorder %s16488_s14, %s16743_s5 }
0x236b   :  { %p16494_p3 = pnand %p16492_p2, %p16489_p1 }
0x236d   :  { %16497 = shalt.err (!%p16494_p3)
}
0x236e   :  { %11175 = dma.vmem_to_hbm [thread:$0]  %s11173_s9, 128, %s16743_s5, [#allocation10]  }
0x236f   :  { %16522 = dma.done.wait [#allocation10], 128  }
0x2370   :  { %16523 = vsyncadd [#allocation10], 4294967168 }
0x2371   :  { %16524 = dma.done.wait [#allocation33], 96  }
0x2372   :  { %16525 = vsyncadd [#allocation33], 4294967200 }
0x2373   :  { %11209 = vsyncpa [#allocation9], 1 }
0x2374   :  { %11210 = vsyncpa [#allocation12], 1 }
0x2375   :  { %11211 = vsyncpa [#allocation15], 1 }
0x2376   :  { %11212 = vsyncpa [#allocation18], 1 }
0x2377   :  { %11213 = vsyncpa [#allocation21], 1 }
0x2378   :  { %11214 = vsyncpa [#allocation24], 1 }
0x2379   :  { %11215 = vsyncpa [#allocation27], 1 }
0x237a   :  { %11216 = vsyncpa [#allocation30], 1 }
0x237b   :  { %11217 = vsyncpa [#allocation10], 1 }
0x237c   :  { %11218 = vsyncpa [#allocation33], 1 }
0x237d   :  { %11219 = vsyncmov [#allocation7] }
0x2380   :  { %s11220_s8 = vpop.sfrf %11219 }
0x2381   :  { %p12013_p4 = scmp.ne.s32.totalorder %s11220_s8, 0 }
0x2383   :  { %11224 = shalt.err (%p12013_p4)  }
0x2384   :  { %11226 = vsyncmov [#allocation7 + $0x1] }
0x2387   :  { %s11227_s5 = vpop.sfrf %11226 }
0x2388   :  { %p12014_p5 = scmp.ne.s32.totalorder %s11227_s5, 0 }
0x238a   :  { %11231 = shalt.err (%p12014_p5)  }
0x238b   :  { %11233 = vsyncmov [#allocation7 + $0x2] }
0x238e   :  { %s11234_s20 = vpop.sfrf %11233 }
0x238f   :  { %p12015_p6 = scmp.ne.s32.totalorder %s11234_s20, 0 }
0x2391   :  { %11238 = shalt.err (%p12015_p6)  }
0x2392   :  { %11240 = vsyncmov [#allocation7 + $0x3] }
0x2395   :  { %s11241_s18 = vpop.sfrf %11240 }
0x2396   :  { %p12016_p7 = scmp.ne.s32.totalorder %s11241_s18, 0 }
0x2398   :  { %11245 = shalt.err (%p12016_p7)  }

</bundles_post_ra>
